<compile_context>
chip_gen: v6e
topology: v6e:2x2x1
jax: 0.10.0
libtpu: 0.0.40
codegen_flags: <defaults>
</compile_context>

<pallas_src>
import math
import functools

import jax
import jax.numpy as jnp
from jax.experimental import pallas as pl
from jax.experimental.pallas import tpu as pltpu  # noqa: F401  (TPU backend)

# ----------------------------- config ---------------------------------------
EMBED = 32            # embedding_size
HEADS = 4             # num_heads
HEAD_DIM = EMBED // HEADS
ENC_LAYERS = 2        # num_encoder_layers
DEC_LAYERS = 2        # num_decoder_layers
DENSE = 64            # dense_dim (dim_feedforward)
DENSE_PAD = 128       # FFN hidden dim, lane-padded (zeros are exact)
SRC_VOCAB = 16
TRG_VOCAB = 18
SRC_PAD = 0           # src_pad_index
MAX_LEN = 16
NEG_INF = -1e30       # additive mask value (exp underflows to 0, same as -inf)
VOCAB_PAD = 128       # fc_out lane-padded width (sliced back to 18 on host)
LN_EPS = 1e-5
ATTN_SCALE = 1.0 / math.sqrt(HEAD_DIM)


# ------------------------ in-kernel building blocks --------------------------

def _ln(x, g, b):
    """LayerNorm over the last axis (biased variance, matches torch)."""
    mu = jnp.mean(x, axis=-1, keepdims=True)
    var = jnp.mean((x - mu) ** 2, axis=-1, keepdims=True)
    return (x - mu) * jax.lax.rsqrt(var + LN_EPS) * g + b


def _split_heads(x, n, l):
    """[n*l, E] -> [HEADS*n, l, HEAD_DIM]; head-major batch (b = h*n + batch)."""
    return jnp.concatenate(
        [x[:, h * HEAD_DIM:(h + 1) * HEAD_DIM].reshape(n, l, HEAD_DIM)
         for h in range(HEADS)],
        axis=0)


def _mha(q, k, v, wo, n, lq, lk, add_mask=None):
    """Multi-head attention with all heads batched into one einsum pair.

    q: [n*lq, E]   k, v: [n*lk, E]   wo: [E, E] ([in, out] layout)
    add_mask: optional pre-broadcast additive mask [HEADS*n, lq, lk]
    ATTN_SCALE is already folded into the Q projection weights by the caller.
    Returns concat(heads) @ wo as [n*lq, E] (output bias added by caller).
    """
    qh = _split_heads(q, n, lq)                      # [H*n, lq, D]
    kh = _split_heads(k, n, lk)                      # [H*n, lk, D]
    vh = _split_heads(v, n, lk)                      # [H*n, lk, D]
    s = jnp.einsum('bqd,bkd->bqk', qh, kh, preferred_element_type=jnp.float32)
    if add_mask is not None:
        s = s + add_mask
    m = jnp.max(s, axis=-1, keepdims=True)
    p = jnp.exp(s - m)
    p = p * pl.reciprocal(jnp.sum(p, axis=-1, keepdims=True), approx=True)
    o = jnp.einsum('bqk,bkd->bqd', p, vh, preferred_element_type=jnp.float32)
    # concat(heads) @ Wo  ==  sum_h  o_h @ Wo[h*D:(h+1)*D, :]
    acc = None
    for h in range(HEADS):
        oh = o[h * n:(h + 1) * n].reshape(n * lq, HEAD_DIM)
        part = jnp.dot(oh, wo[h * HEAD_DIM:(h + 1) * HEAD_DIM, :],
                       preferred_element_type=jnp.float32)
        acc = part if acc is None else acc + part
    return acc


# ------------------------------ fused kernel ---------------------------------

def _transformer_kernel(x_ref, y_ref, pad_ref,
                        e_qkv_w, e_qkv_b, e_ow, e_ob,
                        e_l1w, e_l1b, e_l2w, e_l2b,
                        e_n1g, e_n1b, e_n2g, e_n2b, e_fng, e_fnb,
                        d_sqkv_w, d_sqkv_b, d_sow, d_sob,
                        d_cqkv_w, d_cqkv_b, d_cow, d_cob,
                        d_l1w, d_l1b, d_l2w, d_l2b,
                        d_n1g, d_n1b, d_n2g, d_n2b, d_n3g, d_n3b,
                        d_fng, d_fnb, fc_w, fc_b,
                        out_ref, *, n_batch, src_len, trg_len):
    """Whole transformer forward, fully resident in VMEM (single launch)."""
    E = EMBED
    nH = HEADS * n_batch

    # ---- hoisted additive masks: built ONCE, reused by every layer ----------
    pad_rep = pad_ref[...]                                     # [H*N, Ls] (0/NEG_INF)
    enc_mask = jnp.broadcast_to(pad_rep[:, None, :], (nH, src_len, src_len))
    row = jax.lax.broadcasted_iota(jnp.int32, (trg_len, trg_len), 0)
    col = jax.lax.broadcasted_iota(jnp.int32, (trg_len, trg_len), 1)
    causal2d = jnp.where(row >= col, 0.0, NEG_INF).astype(jnp.float32)
    dec_mask = jnp.broadcast_to(causal2d[None, :, :], (nH, trg_len, trg_len))

    # ------------------------------- encoder ---------------------------------
    x = x_ref[...]                                             # [N*Ls, E]
    for l in range(ENC_LAYERS):
        qkv = jnp.dot(x, e_qkv_w[l],
                      preferred_element_type=jnp.float32) + e_qkv_b[l]
        q, k, v = qkv[:, :E], qkv[:, E:2 * E], qkv[:, 2 * E:]
        a = _mha(q, k, v, e_ow[l], n_batch, src_len, src_len, enc_mask) + e_ob[l]
        x = _ln(x + a, e_n1g[l], e_n1b[l])                     # fused residual+LN
        h = jnp.maximum(jnp.dot(x, e_l1w[l],
                                preferred_element_type=jnp.float32) + e_l1b[l], 0.0)
        f = jnp.dot(h, e_l2w[l], preferred_element_type=jnp.float32) + e_l2b[l]
        x = _ln(x + f, e_n2g[l], e_n2b[l])
    mem = _ln(x, e_fng[...], e_fnb[...])                       # stays in VMEM

    # ------------------------------- decoder ---------------------------------
    y = y_ref[...]                                             # [N*Lt, E]
    for l in range(DEC_LAYERS):
        # causal self-attention
        qkv = jnp.dot(y, d_sqkv_w[l],
                      preferred_element_type=jnp.float32) + d_sqkv_b[l]
        q, k, v = qkv[:, :E], qkv[:, E:2 * E], qkv[:, 2 * E:]
        a = _mha(q, k, v, d_sow[l], n_batch, trg_len, trg_len, dec_mask) + d_sob[l]
        y = _ln(y + a, d_n1g[l], d_n1b[l])
        # cross-attention over encoder memory (memory mask is None -> no mask)
        wqkv = d_cqkv_w[l]
        bqkv = d_cqkv_b[l]
        q = jnp.dot(y, wqkv[:, :E],
                    preferred_element_type=jnp.float32) + bqkv[:, :E]
        kv = jnp.dot(mem, wqkv[:, E:],
                     preferred_element_type=jnp.float32) + bqkv[:, E:]
        k, v = kv[:, :E], kv[:, E:]
        c = _mha(q, k, v, d_cow[l], n_batch, trg_len, src_len, None) + d_cob[l]
        y = _ln(y + c, d_n2g[l], d_n2b[l])
        # feed-forward (hidden dim lane-padded to 128, zeros are exact)
        h = jnp.maximum(jnp.dot(y, d_l1w[l],
                                preferred_element_type=jnp.float32) + d_l1b[l], 0.0)
        f = jnp.dot(h, d_l2w[l], preferred_element_type=jnp.float32) + d_l2b[l]
        y = _ln(y + f, d_n3g[l], d_n3b[l])
    y = _ln(y, d_fng[...], d_fnb[...])
    # output projection to (lane-padded) target vocabulary -> lane-dense store
    out_ref[...] = jnp.dot(y, fc_w[...],
                           preferred_element_type=jnp.float32) + fc_b[...]


# ------------------------------ kernel wrapper --------------------------------

def transformer_forward(kp, src, trg):
    """src/trg: [L, N] int32 token ids (PyTorch seq-first convention).
    Returns logits [Lt, N, TRG_VOCAB] float32 (same as the PyTorch module)."""
    Ls, N = src.shape
    Lt, _ = trg.shape

    # batch-first embeddings (gather is glue, stays in plain JAX)
    src_bt = src.T                                            # [N, Ls]
    trg_bt = trg.T                                            # [N, Lt]
    x = (kp['src_word_emb'][src_bt] +
         kp['src_pos_emb'][:Ls][None]).reshape(N * Ls, EMBED)
    y = (kp['trg_word_emb'][trg_bt] +
         kp['trg_pos_emb'][:Lt][None]).reshape(N * Lt, EMBED)

    # additive pad vector, pre-tiled per head (head-major, matches _split_heads)
    pad_add = jnp.where(src_bt == SRC_PAD, NEG_INF, 0.0).astype(jnp.float32)
    pad_rep = jnp.tile(pad_add, (HEADS, 1))                   # [H*N, Ls]

    kernel = functools.partial(_transformer_kernel,
                               n_batch=N, src_len=Ls, trg_len=Lt)
    logits = pl.pallas_call(
        kernel,
        out_shape=jax.ShapeDtypeStruct((N * Lt, VOCAB_PAD), jnp.float32),
    )(x, y, pad_rep,
      kp['enc_qkv_w'], kp['enc_qkv_b'], kp['enc_out_w'], kp['enc_out_b'],
      kp['enc_l1_w'], kp['enc_l1_b'], kp['enc_l2_w'], kp['enc_l2_b'],
      kp['enc_n1_g'], kp['enc_n1_b'], kp['enc_n2_g'], kp['enc_n2_b'],
      kp['enc_fn_g'], kp['enc_fn_b'],
      kp['dec_sqkv_w'], kp['dec_sqkv_b'], kp['dec_sout_w'], kp['dec_sout_b'],
      kp['dec_cqkv_w'], kp['dec_cqkv_b'], kp['dec_cout_w'], kp['dec_cout_b'],
      kp['dec_l1_w'], kp['dec_l1_b'], kp['dec_l2_w'], kp['dec_l2_b'],
      kp['dec_n1_g'], kp['dec_n1_b'], kp['dec_n2_g'], kp['dec_n2_b'],
      kp['dec_n3_g'], kp['dec_n3_b'],
      kp['dec_fn_g'], kp['dec_fn_b'], kp['fc_w'], kp['fc_b'])
    logits = logits.reshape(N, Lt, VOCAB_PAD)[:, :, :TRG_VOCAB]
    return logits.transpose(1, 0, 2)                          # [Lt, N, V]


# ------------------------- deterministic init -------------------------------

def init_params(key):
    """PyTorch-layout parameters (Linear weights are [out, in])."""
    keys = iter(jax.random.split(key, 256))

    def w(shape, scale=0.05):
        return (scale * jax.random.normal(next(keys), shape)).astype(jnp.float32)

    def attn_params():
        return dict(in_w=w((3 * EMBED, EMBED)),
                    in_b=jnp.zeros((3 * EMBED,), jnp.float32),
                    out_w=w((EMBED, EMBED)),
                    out_b=jnp.zeros((EMBED,), jnp.float32))

    def layer_params(decoder=False):
        p = dict(self_attn=attn_params(),
                 lin1_w=w((DENSE, EMBED)), lin1_b=jnp.zeros((DENSE,), jnp.float32),
                 lin2_w=w((EMBED, DENSE)), lin2_b=jnp.zeros((EMBED,), jnp.float32),
                 norm1_g=jnp.ones((EMBED,), jnp.float32), norm1_b=jnp.zeros((EMBED,), jnp.float32),
                 norm2_g=jnp.ones((EMBED,), jnp.float32), norm2_b=jnp.zeros((EMBED,), jnp.float32))
        if decoder:
            p['cross_attn'] = attn_params()
            p['norm3_g'] = jnp.ones((EMBED,), jnp.float32)
            p['norm3_b'] = jnp.zeros((EMBED,), jnp.float32)
        return p

    return dict(
        src_word_emb=w((SRC_VOCAB, EMBED), 0.1),
        src_pos_emb=w((MAX_LEN, EMBED), 0.1),
        trg_word_emb=w((TRG_VOCAB, EMBED), 0.1),
        trg_pos_emb=w((MAX_LEN, EMBED), 0.1),
        enc_layers=[layer_params() for _ in range(ENC_LAYERS)],
        dec_layers=[layer_params(True) for _ in range(DEC_LAYERS)],
        enc_norm_g=jnp.ones((EMBED,), jnp.float32),
        enc_norm_b=jnp.zeros((EMBED,), jnp.float32),
        dec_norm_g=jnp.ones((EMBED,), jnp.float32),
        dec_norm_b=jnp.zeros((EMBED,), jnp.float32),
        fc_w=w((TRG_VOCAB, EMBED)),
        fc_b=jnp.zeros((TRG_VOCAB,), jnp.float32),
    )


def prepare_kernel_params(p):
    """One-time (outside jit) conversion to kernel layout:
    weights pre-transposed to [in, out] and layer-stacked; ATTN_SCALE folded
    into the Q columns/bias of the QKV projections; FFN hidden dim zero-padded
    64 -> 128; fc_out lane-padded 18 -> 128; biases/norm params as [L, 1, F]."""
    scale_q = jnp.concatenate([jnp.full((EMBED,), ATTN_SCALE, jnp.float32),
                               jnp.ones((2 * EMBED,), jnp.float32)])

    def qkv_w(attn):   # torch [3E, E] -> [E, 3E], Q columns pre-scaled
        return attn['in_w'].T * scale_q[None, :]

    def qkv_b(attn):
        return (attn['in_b'] * scale_q)[None, :]

    def out_w(attn):
        return attn['out_w'].T

    def out_b(attn):
        return attn['out_b'][None, :]

    def l1_w(lp):
        return jnp.pad(lp['lin1_w'].T, ((0, 0), (0, DENSE_PAD - DENSE)))

    def l1_b(lp):
        return jnp.pad(lp['lin1_b'], (0, DENSE_PAD - DENSE))[None, :]

    def l2_w(lp):
        return jnp.pad(lp['lin2_w'].T, ((0, DENSE_PAD - DENSE), (0, 0)))

    def l2_b(lp):
        return lp['lin2_b'][None, :]

    def stack(layers, fn):
        return jnp.stack([fn(lp) for lp in layers])

    enc, dec = p['enc_layers'], p['dec_layers']
    return dict(
        src_word_emb=p['src_word_emb'], src_pos_emb=p['src_pos_emb'],
        trg_word_emb=p['trg_word_emb'], trg_pos_emb=p['trg_pos_emb'],
        # encoder stack
        enc_qkv_w=stack(enc, lambda l: qkv_w(l['self_attn'])),
        enc_qkv_b=stack(enc, lambda l: qkv_b(l['self_attn'])),
        enc_out_w=stack(enc, lambda l: out_w(l['self_attn'])),
        enc_out_b=stack(enc, lambda l: out_b(l['self_attn'])),
        enc_l1_w=stack(enc, l1_w), enc_l1_b=stack(enc, l1_b),
        enc_l2_w=stack(enc, l2_w), enc_l2_b=stack(enc, l2_b),
        enc_n1_g=stack(enc, lambda l: l['norm1_g'][None, :]),
        enc_n1_b=stack(enc, lambda l: l['norm1_b'][None, :]),
        enc_n2_g=stack(enc, lambda l: l['norm2_g'][None, :]),
        enc_n2_b=stack(enc, lambda l: l['norm2_b'][None, :]),
        enc_fn_g=p['enc_norm_g'][None, :], enc_fn_b=p['enc_norm_b'][None, :],
        # decoder stack
        dec_sqkv_w=stack(dec, lambda l: qkv_w(l['self_attn'])),
        dec_sqkv_b=stack(dec, lambda l: qkv_b(l['self_attn'])),
        dec_sout_w=stack(dec, lambda l: out_w(l['self_attn'])),
        dec_sout_b=stack(dec, lambda l: out_b(l['self_attn'])),
        dec_cqkv_w=stack(dec, lambda l: qkv_w(l['cross_attn'])),
        dec_cqkv_b=stack(dec, lambda l: qkv_b(l['cross_attn'])),
        dec_cout_w=stack(dec, lambda l: out_w(l['cross_attn'])),
        dec_cout_b=stack(dec, lambda l: out_b(l['cross_attn'])),
        dec_l1_w=stack(dec, l1_w), dec_l1_b=stack(dec, l1_b),
        dec_l2_w=stack(dec, l2_w), dec_l2_b=stack(dec, l2_b),
        dec_n1_g=stack(dec, lambda l: l['norm1_g'][None, :]),
        dec_n1_b=stack(dec, lambda l: l['norm1_b'][None, :]),
        dec_n2_g=stack(dec, lambda l: l['norm2_g'][None, :]),
        dec_n2_b=stack(dec, lambda l: l['norm2_b'][None, :]),
        dec_n3_g=stack(dec, lambda l: l['norm3_g'][None, :]),
        dec_n3_b=stack(dec, lambda l: l['norm3_b'][None, :]),
        dec_fn_g=p['dec_norm_g'][None, :], dec_fn_b=p['dec_norm_b'][None, :],
        # output projection, lane-padded 18 -> 128 (sliced back on the host)
        fc_w=jnp.pad(p['fc_w'].T, ((0, 0), (0, VOCAB_PAD - TRG_VOCAB))),
        fc_b=jnp.pad(p['fc_b'], (0, VOCAB_PAD - TRG_VOCAB))[None, :],
    )


# ---------------------- plain-JAX reference (for checking) -------------------

def reference_forward(params, src, trg):
    """Plain-JAX mirror of torch.nn.Transformer (post-norm, ReLU, eval mode)."""
    E, H, D = EMBED, HEADS, HEAD_DIM
    Ls, N = src.shape
    Lt, _ = trg.shape

    def ln(x, g, b):
        mu = x.mean(-1, keepdims=True)
        var = ((x - mu) ** 2).mean(-1, keepdims=True)
        return (x - mu) / jnp.sqrt(var + LN_EPS) * g + b

    def mha(p, q_in, kv_in, add_mask):
        Lq, Lk = q_in.shape[0], kv_in.shape[0]
        wq, wk, wv = p['in_w'][:E], p['in_w'][E:2 * E], p['in_w'][2 * E:]
        bq, bk, bv = p['in_b'][:E], p['in_b'][E:2 * E], p['in_b'][2 * E:]
        q = (q_in @ wq.T + bq).reshape(Lq, N * H, D).transpose(1, 0, 2)
        k = (kv_in @ wk.T + bk).reshape(Lk, N * H, D).transpose(1, 0, 2)
        v = (kv_in @ wv.T + bv).reshape(Lk, N * H, D).transpose(1, 0, 2)
        s = jnp.einsum('bqd,bkd->bqk', q, k) * ATTN_SCALE + add_mask
        a = jax.nn.softmax(s, axis=-1)
        o = jnp.einsum('bqk,bkd->bqd', a, v).transpose(1, 0, 2).reshape(Lq, N, E)
        return o @ p['out_w'].T + p['out_b']

    embed_src = params['src_word_emb'][src] + params['src_pos_emb'][:Ls][:, None, :]
    embed_trg = params['trg_word_emb'][trg] + params['trg_pos_emb'][:Lt][:, None, :]

    pad = (src.T == SRC_PAD)
    enc_mask = jnp.broadcast_to(jnp.where(pad[:, None, None, :], NEG_INF, 0.0),
                                (N, H, Ls, Ls)).reshape(N * H, Ls, Ls)
    causal = jnp.where(jnp.arange(Lt)[:, None] >= jnp.arange(Lt)[None, :], 0.0, NEG_INF)
    dec_mask = jnp.broadcast_to(causal[None], (N * H, Lt, Lt))
    cross_mask = jnp.zeros((N * H, Lt, Ls), jnp.float32)

    x = embed_src
    for lp in params['enc_layers']:
        x = ln(x + mha(lp['self_attn'], x, x, enc_mask), lp['norm1_g'], lp['norm1_b'])
        h = jnp.maximum(x @ lp['lin1_w'].T + lp['lin1_b'], 0.0)
        x = ln(x + h @ lp['lin2_w'].T + lp['lin2_b'], lp['norm2_g'], lp['norm2_b'])
    mem = ln(x, params['enc_norm_g'], params['enc_norm_b'])

    y = embed_trg
    for lp in params['dec_layers']:
        y = ln(y + mha(lp['self_attn'], y, y, dec_mask), lp['norm1_g'], lp['norm1_b'])
        y = ln(y + mha(lp['cross_attn'], y, mem, cross_mask), lp['norm2_g'], lp['norm2_b'])
        h = jnp.maximum(y @ lp['lin1_w'].T + lp['lin1_b'], 0.0)
        y = ln(y + h @ lp['lin2_w'].T + lp['lin2_b'], lp['norm3_g'], lp['norm3_b'])
    y = ln(y, params['dec_norm_g'], params['dec_norm_b'])
    return y @ params['fc_w'].T + params['fc_b']


# ------------------------------- main ----------------------------------------

if __name__ == "__main__":
    key = jax.random.PRNGKey(0)
    pkey, skey, tkey = jax.random.split(key, 3)
    params = init_params(pkey)
    kparams = prepare_kernel_params(params)   # one-time layout prep, outside jit

    SRC_SEQ, TRG_SEQ, BATCH = 8, 8, 2
    src = jax.random.randint(skey, (SRC_SEQ, BATCH), 1, SRC_VOCAB, dtype=jnp.int32)
    src = src.at[-2:, 1].set(SRC_PAD)   # pad tail of 2nd sequence -> exercises src mask
    trg = jax.random.randint(tkey, (TRG_SEQ, BATCH), 0, TRG_VOCAB, dtype=jnp.int32)

    fwd = jax.jit(transformer_forward)
    out = fwd(kparams, src, trg)
    jax.block_until_ready(out)

    assert out.shape == (TRG_SEQ, BATCH, TRG_VOCAB), out.shape
    assert out.dtype == jnp.float32
    assert bool(jnp.all(jnp.isfinite(out)))

    # cross-check against a plain-JAX reference of the same module
    ref = jax.jit(reference_forward)(params, src, trg)
    max_err = float(jnp.max(jnp.abs(out - ref)))
    assert max_err < 2e-2, f"mismatch vs plain-JAX reference: max_err={max_err}"

    print("KERNEL_OK")
</pallas_src>

<mosaic_0001>
module attributes {stable_mosaic.version = 11 : i64} {
  func.func @_transformer_kernel(%arg0: memref<16x32xf32, #tpu.memory_space<vmem>>, %arg1: memref<16x32xf32, #tpu.memory_space<vmem>>, %arg2: memref<8x8xf32, #tpu.memory_space<vmem>>, %arg3: memref<2x32x96xf32, #tpu.memory_space<vmem>>, %arg4: memref<2x1x96xf32, #tpu.memory_space<vmem>>, %arg5: memref<2x32x32xf32, #tpu.memory_space<vmem>>, %arg6: memref<2x1x32xf32, #tpu.memory_space<vmem>>, %arg7: memref<2x32x128xf32, #tpu.memory_space<vmem>>, %arg8: memref<2x1x128xf32, #tpu.memory_space<vmem>>, %arg9: memref<2x128x32xf32, #tpu.memory_space<vmem>>, %arg10: memref<2x1x32xf32, #tpu.memory_space<vmem>>, %arg11: memref<2x1x32xf32, #tpu.memory_space<vmem>>, %arg12: memref<2x1x32xf32, #tpu.memory_space<vmem>>, %arg13: memref<2x1x32xf32, #tpu.memory_space<vmem>>, %arg14: memref<2x1x32xf32, #tpu.memory_space<vmem>>, %arg15: memref<1x32xf32, #tpu.memory_space<vmem>>, %arg16: memref<1x32xf32, #tpu.memory_space<vmem>>, %arg17: memref<2x32x96xf32, #tpu.memory_space<vmem>>, %arg18: memref<2x1x96xf32, #tpu.memory_space<vmem>>, %arg19: memref<2x32x32xf32, #tpu.memory_space<vmem>>, %arg20: memref<2x1x32xf32, #tpu.memory_space<vmem>>, %arg21: memref<2x32x96xf32, #tpu.memory_space<vmem>>, %arg22: memref<2x1x96xf32, #tpu.memory_space<vmem>>, %arg23: memref<2x32x32xf32, #tpu.memory_space<vmem>>, %arg24: memref<2x1x32xf32, #tpu.memory_space<vmem>>, %arg25: memref<2x32x128xf32, #tpu.memory_space<vmem>>, %arg26: memref<2x1x128xf32, #tpu.memory_space<vmem>>, %arg27: memref<2x128x32xf32, #tpu.memory_space<vmem>>, %arg28: memref<2x1x32xf32, #tpu.memory_space<vmem>>, %arg29: memref<2x1x32xf32, #tpu.memory_space<vmem>>, %arg30: memref<2x1x32xf32, #tpu.memory_space<vmem>>, %arg31: memref<2x1x32xf32, #tpu.memory_space<vmem>>, %arg32: memref<2x1x32xf32, #tpu.memory_space<vmem>>, %arg33: memref<2x1x32xf32, #tpu.memory_space<vmem>>, %arg34: memref<2x1x32xf32, #tpu.memory_space<vmem>>, %arg35: memref<1x32xf32, #tpu.memory_space<vmem>>, %arg36: memref<1x32xf32, #tpu.memory_space<vmem>>, %arg37: memref<32x128xf32, #tpu.memory_space<vmem>>, %arg38: memref<1x128xf32, #tpu.memory_space<vmem>>, %arg39: memref<16x128xf32, #tpu.memory_space<vmem>>) attributes {dimension_semantics = [], scalar_prefetch = 0 : i64, scratch_operands = 0 : i64, tpu.core_type = #tpu.core_type<tc>} {
    %c0 = arith.constant 0 : index
    %c0_0 = arith.constant 0 : index
    %0 = vector.load %arg2[%c0, %c0_0] : memref<8x8xf32, #tpu.memory_space<vmem>>, vector<8x8xf32>
    %1 = vector.shape_cast %0 : vector<8x8xf32> to vector<8x1x8xf32>
    %2 = vector.shape_cast %1 : vector<8x1x8xf32> to vector<8x1x8xf32>
    %3 = vector.broadcast %2 : vector<8x1x8xf32> to vector<8x8x8xf32>
    %4 = tpu.iota {dimensions = array<i32: 0>} : vector<8x8xi32>
    %5 = tpu.iota {dimensions = array<i32: 1>} : vector<8x8xi32>
    %6 = arith.cmpi sge, %4, %5 : vector<8x8xi32>
    %cst = arith.constant 0.000000e+00 : f32
    %cst_1 = arith.constant -1.000000e+30 : f32
    %7 = vector.broadcast %cst : f32 to vector<8x8xf32>
    %8 = vector.broadcast %cst_1 : f32 to vector<8x8xf32>
    %9 = arith.select %6, %7, %8 : vector<8x8xi1>, vector<8x8xf32>
    %10 = vector.shape_cast %9 : vector<8x8xf32> to vector<1x8x8xf32>
    %11 = vector.shape_cast %10 : vector<1x8x8xf32> to vector<1x8x8xf32>
    %12 = vector.broadcast %11 : vector<1x8x8xf32> to vector<8x8x8xf32>
    %c0_2 = arith.constant 0 : index
    %c0_3 = arith.constant 0 : index
    %13 = vector.load %arg0[%c0_2, %c0_3] : memref<16x32xf32, #tpu.memory_space<vmem>>, vector<16x32xf32>
    %c0_4 = arith.constant 0 : index
    %c0_5 = arith.constant 0 : index
    %c0_6 = arith.constant 0 : index
    %14 = vector.load %arg3[%c0_4, %c0_5, %c0_6] : memref<2x32x96xf32, #tpu.memory_space<vmem>>, vector<1x32x96xf32>
    %15 = vector.shape_cast %14 : vector<1x32x96xf32> to vector<32x96xf32>
    %cst_7 = arith.constant dense<0.000000e+00> : vector<16x96xf32>
    %16 = tpu.matmul %13, %15, %cst_7 {dimension_numbers = #tpu.dot_dimension_numbers<[1], [0], [0], [1], [0, 0, 1, 1], [], []>} : vector<16x32xf32>, vector<32x96xf32>, vector<16x96xf32> -> vector<16x96xf32>
    %c0_8 = arith.constant 0 : index
    %c0_9 = arith.constant 0 : index
    %c0_10 = arith.constant 0 : index
    %17 = vector.load %arg4[%c0_8, %c0_9, %c0_10] : memref<2x1x96xf32, #tpu.memory_space<vmem>>, vector<1x1x96xf32>
    %18 = vector.shape_cast %17 : vector<1x1x96xf32> to vector<1x96xf32>
    %19 = vector.broadcast %18 : vector<1x96xf32> to vector<16x96xf32>
    %20 = arith.addf %16, %19 : vector<16x96xf32>
    %21 = vector.extract_strided_slice %20 {offsets = [0, 0], sizes = [16, 32], strides = [1, 1]} : vector<16x96xf32> to vector<16x32xf32>
    %22 = vector.extract_strided_slice %20 {offsets = [0, 32], sizes = [16, 32], strides = [1, 1]} : vector<16x96xf32> to vector<16x32xf32>
    %23 = vector.extract_strided_slice %20 {offsets = [0, 64], sizes = [16, 32], strides = [1, 1]} : vector<16x96xf32> to vector<16x32xf32>
    %c0_11 = arith.constant 0 : index
    %c0_12 = arith.constant 0 : index
    %c0_13 = arith.constant 0 : index
    %24 = vector.load %arg5[%c0_11, %c0_12, %c0_13] : memref<2x32x32xf32, #tpu.memory_space<vmem>>, vector<1x32x32xf32>
    %25 = vector.shape_cast %24 : vector<1x32x32xf32> to vector<32x32xf32>
    %26 = vector.extract_strided_slice %21 {offsets = [0, 0], sizes = [16, 8], strides = [1, 1]} : vector<16x32xf32> to vector<16x8xf32>
    %27 = vector.shape_cast %26 : vector<16x8xf32> to vector<2x8x8xf32>
    %28 = vector.extract_strided_slice %21 {offsets = [0, 8], sizes = [16, 8], strides = [1, 1]} : vector<16x32xf32> to vector<16x8xf32>
    %29 = vector.shape_cast %28 : vector<16x8xf32> to vector<2x8x8xf32>
    %30 = vector.extract_strided_slice %21 {offsets = [0, 16], sizes = [16, 8], strides = [1, 1]} : vector<16x32xf32> to vector<16x8xf32>
    %31 = vector.shape_cast %30 : vector<16x8xf32> to vector<2x8x8xf32>
    %32 = vector.extract_strided_slice %21 {offsets = [0, 24], sizes = [16, 8], strides = [1, 1]} : vector<16x32xf32> to vector<16x8xf32>
    %33 = vector.shape_cast %32 : vector<16x8xf32> to vector<2x8x8xf32>
    %34 = tpu.concatenate %27, %29, %31, %33 in 0 : vector<2x8x8xf32>, vector<2x8x8xf32>, vector<2x8x8xf32>, vector<2x8x8xf32> -> vector<8x8x8xf32>
    %35 = vector.extract_strided_slice %22 {offsets = [0, 0], sizes = [16, 8], strides = [1, 1]} : vector<16x32xf32> to vector<16x8xf32>
    %36 = vector.shape_cast %35 : vector<16x8xf32> to vector<2x8x8xf32>
    %37 = vector.extract_strided_slice %22 {offsets = [0, 8], sizes = [16, 8], strides = [1, 1]} : vector<16x32xf32> to vector<16x8xf32>
    %38 = vector.shape_cast %37 : vector<16x8xf32> to vector<2x8x8xf32>
    %39 = vector.extract_strided_slice %22 {offsets = [0, 16], sizes = [16, 8], strides = [1, 1]} : vector<16x32xf32> to vector<16x8xf32>
    %40 = vector.shape_cast %39 : vector<16x8xf32> to vector<2x8x8xf32>
    %41 = vector.extract_strided_slice %22 {offsets = [0, 24], sizes = [16, 8], strides = [1, 1]} : vector<16x32xf32> to vector<16x8xf32>
    %42 = vector.shape_cast %41 : vector<16x8xf32> to vector<2x8x8xf32>
    %43 = tpu.concatenate %36, %38, %40, %42 in 0 : vector<2x8x8xf32>, vector<2x8x8xf32>, vector<2x8x8xf32>, vector<2x8x8xf32> -> vector<8x8x8xf32>
    %44 = vector.extract_strided_slice %23 {offsets = [0, 0], sizes = [16, 8], strides = [1, 1]} : vector<16x32xf32> to vector<16x8xf32>
    %45 = vector.shape_cast %44 : vector<16x8xf32> to vector<2x8x8xf32>
    %46 = vector.extract_strided_slice %23 {offsets = [0, 8], sizes = [16, 8], strides = [1, 1]} : vector<16x32xf32> to vector<16x8xf32>
    %47 = vector.shape_cast %46 : vector<16x8xf32> to vector<2x8x8xf32>
    %48 = vector.extract_strided_slice %23 {offsets = [0, 16], sizes = [16, 8], strides = [1, 1]} : vector<16x32xf32> to vector<16x8xf32>
    %49 = vector.shape_cast %48 : vector<16x8xf32> to vector<2x8x8xf32>
    %50 = vector.extract_strided_slice %23 {offsets = [0, 24], sizes = [16, 8], strides = [1, 1]} : vector<16x32xf32> to vector<16x8xf32>
    %51 = vector.shape_cast %50 : vector<16x8xf32> to vector<2x8x8xf32>
    %52 = tpu.concatenate %45, %47, %49, %51 in 0 : vector<2x8x8xf32>, vector<2x8x8xf32>, vector<2x8x8xf32>, vector<2x8x8xf32> -> vector<8x8x8xf32>
    "tpu.trace_start"() <{level = 10 : i32, message = "bqd,bkd->bqk"}> : () -> ()
    %cst_14 = arith.constant dense<0.000000e+00> : vector<8x8x8xf32>
    %53 = tpu.matmul %34, %43, %cst_14 {dimension_numbers = #tpu.dot_dimension_numbers<[2], [2], [1], [1], [0, 0, 0, 1, 1, 1], [0], [0]>} : vector<8x8x8xf32>, vector<8x8x8xf32>, vector<8x8x8xf32> -> vector<8x8x8xf32>
    "tpu.trace_stop"() : () -> ()
    %54 = arith.addf %53, %3 : vector<8x8x8xf32>
    %cst_15 = arith.constant dense<0xFF800000> : vector<8x8xf32>
    %55 = vector.multi_reduction <maximumf>, %54, %cst_15 [2] : vector<8x8x8xf32> to vector<8x8xf32>
    %56 = vector.shape_cast %55 : vector<8x8xf32> to vector<8x8x1xf32>
    %57 = vector.broadcast %56 : vector<8x8x1xf32> to vector<8x8x8xf32>
    %58 = arith.subf %54, %57 : vector<8x8x8xf32>
    %59 = math.exp %58 : vector<8x8x8xf32>
    %cst_16 = arith.constant dense<0.000000e+00> : vector<8x8xf32>
    %60 = vector.multi_reduction <add>, %59, %cst_16 [2] : vector<8x8x8xf32> to vector<8x8xf32>
    %61 = vector.shape_cast %60 : vector<8x8xf32> to vector<8x8x1xf32>
    %62 = tpu.reciprocal %61 {approx = true} : vector<8x8x1xf32> -> vector<8x8x1xf32>
    %63 = vector.broadcast %62 : vector<8x8x1xf32> to vector<8x8x8xf32>
    %64 = arith.mulf %59, %63 : vector<8x8x8xf32>
    "tpu.trace_start"() <{level = 10 : i32, message = "bqk,bkd->bqd"}> : () -> ()
    %cst_17 = arith.constant dense<0.000000e+00> : vector<8x8x8xf32>
    %65 = tpu.matmul %64, %52, %cst_17 {dimension_numbers = #tpu.dot_dimension_numbers<[2], [1], [1], [2], [0, 0, 0, 1, 1, 2], [0], [0]>} : vector<8x8x8xf32>, vector<8x8x8xf32>, vector<8x8x8xf32> -> vector<8x8x8xf32>
    "tpu.trace_stop"() : () -> ()
    %66 = vector.extract_strided_slice %65 {offsets = [0, 0, 0], sizes = [2, 8, 8], strides = [1, 1, 1]} : vector<8x8x8xf32> to vector<2x8x8xf32>
    %67 = vector.shape_cast %66 : vector<2x8x8xf32> to vector<16x8xf32>
    %68 = vector.extract_strided_slice %25 {offsets = [0, 0], sizes = [8, 32], strides = [1, 1]} : vector<32x32xf32> to vector<8x32xf32>
    %cst_18 = arith.constant dense<0.000000e+00> : vector<16x32xf32>
    %69 = tpu.matmul %67, %68, %cst_18 {dimension_numbers = #tpu.dot_dimension_numbers<[1], [0], [0], [1], [0, 0, 1, 1], [], []>} : vector<16x8xf32>, vector<8x32xf32>, vector<16x32xf32> -> vector<16x32xf32>
    %70 = vector.extract_strided_slice %65 {offsets = [2, 0, 0], sizes = [2, 8, 8], strides = [1, 1, 1]} : vector<8x8x8xf32> to vector<2x8x8xf32>
    %71 = vector.shape_cast %70 : vector<2x8x8xf32> to vector<16x8xf32>
    %72 = vector.extract_strided_slice %25 {offsets = [8, 0], sizes = [8, 32], strides = [1, 1]} : vector<32x32xf32> to vector<8x32xf32>
    %cst_19 = arith.constant dense<0.000000e+00> : vector<16x32xf32>
    %73 = tpu.matmul %71, %72, %cst_19 {dimension_numbers = #tpu.dot_dimension_numbers<[1], [0], [0], [1], [0, 0, 1, 1], [], []>} : vector<16x8xf32>, vector<8x32xf32>, vector<16x32xf32> -> vector<16x32xf32>
    %74 = arith.addf %69, %73 : vector<16x32xf32>
    %75 = vector.extract_strided_slice %65 {offsets = [4, 0, 0], sizes = [2, 8, 8], strides = [1, 1, 1]} : vector<8x8x8xf32> to vector<2x8x8xf32>
    %76 = vector.shape_cast %75 : vector<2x8x8xf32> to vector<16x8xf32>
    %77 = vector.extract_strided_slice %25 {offsets = [16, 0], sizes = [8, 32], strides = [1, 1]} : vector<32x32xf32> to vector<8x32xf32>
    %cst_20 = arith.constant dense<0.000000e+00> : vector<16x32xf32>
    %78 = tpu.matmul %76, %77, %cst_20 {dimension_numbers = #tpu.dot_dimension_numbers<[1], [0], [0], [1], [0, 0, 1, 1], [], []>} : vector<16x8xf32>, vector<8x32xf32>, vector<16x32xf32> -> vector<16x32xf32>
    %79 = arith.addf %74, %78 : vector<16x32xf32>
    %80 = vector.extract_strided_slice %65 {offsets = [6, 0, 0], sizes = [2, 8, 8], strides = [1, 1, 1]} : vector<8x8x8xf32> to vector<2x8x8xf32>
    %81 = vector.shape_cast %80 : vector<2x8x8xf32> to vector<16x8xf32>
    %82 = vector.extract_strided_slice %25 {offsets = [24, 0], sizes = [8, 32], strides = [1, 1]} : vector<32x32xf32> to vector<8x32xf32>
    %cst_21 = arith.constant dense<0.000000e+00> : vector<16x32xf32>
    %83 = tpu.matmul %81, %82, %cst_21 {dimension_numbers = #tpu.dot_dimension_numbers<[1], [0], [0], [1], [0, 0, 1, 1], [], []>} : vector<16x8xf32>, vector<8x32xf32>, vector<16x32xf32> -> vector<16x32xf32>
    %84 = arith.addf %79, %83 : vector<16x32xf32>
    %c0_22 = arith.constant 0 : index
    %c0_23 = arith.constant 0 : index
    %c0_24 = arith.constant 0 : index
    %85 = vector.load %arg6[%c0_22, %c0_23, %c0_24] : memref<2x1x32xf32, #tpu.memory_space<vmem>>, vector<1x1x32xf32>
    %86 = vector.shape_cast %85 : vector<1x1x32xf32> to vector<1x32xf32>
    %87 = vector.broadcast %86 : vector<1x32xf32> to vector<16x32xf32>
    %88 = arith.addf %84, %87 : vector<16x32xf32>
    %89 = arith.addf %13, %88 : vector<16x32xf32>
    %c0_25 = arith.constant 0 : index
    %c0_26 = arith.constant 0 : index
    %c0_27 = arith.constant 0 : index
    %90 = vector.load %arg11[%c0_25, %c0_26, %c0_27] : memref<2x1x32xf32, #tpu.memory_space<vmem>>, vector<1x1x32xf32>
    %91 = vector.shape_cast %90 : vector<1x1x32xf32> to vector<1x32xf32>
    %c0_28 = arith.constant 0 : index
    %c0_29 = arith.constant 0 : index
    %c0_30 = arith.constant 0 : index
    %92 = vector.load %arg12[%c0_28, %c0_29, %c0_30] : memref<2x1x32xf32, #tpu.memory_space<vmem>>, vector<1x1x32xf32>
    %93 = vector.shape_cast %92 : vector<1x1x32xf32> to vector<1x32xf32>
    %cst_31 = arith.constant dense<0.000000e+00> : vector<16xf32>
    %94 = vector.multi_reduction <add>, %89, %cst_31 [1] : vector<16x32xf32> to vector<16xf32>
    %95 = vector.shape_cast %94 : vector<16xf32> to vector<16x1xf32>
    %cst_32 = arith.constant 3.200000e+01 : f32
    %96 = vector.broadcast %cst_32 : f32 to vector<16x1xf32>
    %97 = arith.divf %95, %96 : vector<16x1xf32>
    %98 = vector.broadcast %97 : vector<16x1xf32> to vector<16x32xf32>
    %99 = arith.subf %89, %98 : vector<16x32xf32>
    %100 = arith.mulf %99, %99 : vector<16x32xf32>
    %cst_33 = arith.constant dense<0.000000e+00> : vector<16xf32>
    %101 = vector.multi_reduction <add>, %100, %cst_33 [1] : vector<16x32xf32> to vector<16xf32>
    %102 = vector.shape_cast %101 : vector<16xf32> to vector<16x1xf32>
    %cst_34 = arith.constant 3.200000e+01 : f32
    %103 = vector.broadcast %cst_34 : f32 to vector<16x1xf32>
    %104 = arith.divf %102, %103 : vector<16x1xf32>
    %105 = vector.broadcast %97 : vector<16x1xf32> to vector<16x32xf32>
    %106 = arith.subf %89, %105 : vector<16x32xf32>
    %cst_35 = arith.constant 9.99999974E-6 : f32
    %107 = vector.broadcast %cst_35 : f32 to vector<16x1xf32>
    %108 = arith.addf %104, %107 : vector<16x1xf32>
    %109 = math.rsqrt %108 : vector<16x1xf32>
    %110 = vector.broadcast %109 : vector<16x1xf32> to vector<16x32xf32>
    %111 = arith.mulf %106, %110 : vector<16x32xf32>
    %112 = vector.broadcast %91 : vector<1x32xf32> to vector<16x32xf32>
    %113 = arith.mulf %111, %112 : vector<16x32xf32>
    %114 = vector.broadcast %93 : vector<1x32xf32> to vector<16x32xf32>
    %115 = arith.addf %113, %114 : vector<16x32xf32>
    %c0_36 = arith.constant 0 : index
    %c0_37 = arith.constant 0 : index
    %c0_38 = arith.constant 0 : index
    %116 = vector.load %arg7[%c0_36, %c0_37, %c0_38] : memref<2x32x128xf32, #tpu.memory_space<vmem>>, vector<1x32x128xf32>
    %117 = vector.shape_cast %116 : vector<1x32x128xf32> to vector<32x128xf32>
    %cst_39 = arith.constant dense<0.000000e+00> : vector<16x128xf32>
    %118 = tpu.matmul %115, %117, %cst_39 {dimension_numbers = #tpu.dot_dimension_numbers<[1], [0], [0], [1], [0, 0, 1, 1], [], []>} : vector<16x32xf32>, vector<32x128xf32>, vector<16x128xf32> -> vector<16x128xf32>
    %c0_40 = arith.constant 0 : index
    %c0_41 = arith.constant 0 : index
    %c0_42 = arith.constant 0 : index
    %119 = vector.load %arg8[%c0_40, %c0_41, %c0_42] : memref<2x1x128xf32, #tpu.memory_space<vmem>>, vector<1x1x128xf32>
    %120 = vector.shape_cast %119 : vector<1x1x128xf32> to vector<1x128xf32>
    %121 = vector.broadcast %120 : vector<1x128xf32> to vector<16x128xf32>
    %122 = arith.addf %118, %121 : vector<16x128xf32>
    %cst_43 = arith.constant 0.000000e+00 : f32
    %123 = vector.broadcast %cst_43 : f32 to vector<16x128xf32>
    %124 = arith.maximumf %122, %123 : vector<16x128xf32>
    %c0_44 = arith.constant 0 : index
    %c0_45 = arith.constant 0 : index
    %c0_46 = arith.constant 0 : index
    %125 = vector.load %arg9[%c0_44, %c0_45, %c0_46] : memref<2x128x32xf32, #tpu.memory_space<vmem>>, vector<1x128x32xf32>
    %126 = vector.shape_cast %125 : vector<1x128x32xf32> to vector<128x32xf32>
    %cst_47 = arith.constant dense<0.000000e+00> : vector<16x32xf32>
    %127 = tpu.matmul %124, %126, %cst_47 {dimension_numbers = #tpu.dot_dimension_numbers<[1], [0], [0], [1], [0, 0, 1, 1], [], []>} : vector<16x128xf32>, vector<128x32xf32>, vector<16x32xf32> -> vector<16x32xf32>
    %c0_48 = arith.constant 0 : index
    %c0_49 = arith.constant 0 : index
    %c0_50 = arith.constant 0 : index
    %128 = vector.load %arg10[%c0_48, %c0_49, %c0_50] : memref<2x1x32xf32, #tpu.memory_space<vmem>>, vector<1x1x32xf32>
    %129 = vector.shape_cast %128 : vector<1x1x32xf32> to vector<1x32xf32>
    %130 = vector.broadcast %129 : vector<1x32xf32> to vector<16x32xf32>
    %131 = arith.addf %127, %130 : vector<16x32xf32>
    %132 = arith.addf %115, %131 : vector<16x32xf32>
    %c0_51 = arith.constant 0 : index
    %c0_52 = arith.constant 0 : index
    %c0_53 = arith.constant 0 : index
    %133 = vector.load %arg13[%c0_51, %c0_52, %c0_53] : memref<2x1x32xf32, #tpu.memory_space<vmem>>, vector<1x1x32xf32>
    %134 = vector.shape_cast %133 : vector<1x1x32xf32> to vector<1x32xf32>
    %c0_54 = arith.constant 0 : index
    %c0_55 = arith.constant 0 : index
    %c0_56 = arith.constant 0 : index
    %135 = vector.load %arg14[%c0_54, %c0_55, %c0_56] : memref<2x1x32xf32, #tpu.memory_space<vmem>>, vector<1x1x32xf32>
    %136 = vector.shape_cast %135 : vector<1x1x32xf32> to vector<1x32xf32>
    %cst_57 = arith.constant dense<0.000000e+00> : vector<16xf32>
    %137 = vector.multi_reduction <add>, %132, %cst_57 [1] : vector<16x32xf32> to vector<16xf32>
    %138 = vector.shape_cast %137 : vector<16xf32> to vector<16x1xf32>
    %cst_58 = arith.constant 3.200000e+01 : f32
    %139 = vector.broadcast %cst_58 : f32 to vector<16x1xf32>
    %140 = arith.divf %138, %139 : vector<16x1xf32>
    %141 = vector.broadcast %140 : vector<16x1xf32> to vector<16x32xf32>
    %142 = arith.subf %132, %141 : vector<16x32xf32>
    %143 = arith.mulf %142, %142 : vector<16x32xf32>
    %cst_59 = arith.constant dense<0.000000e+00> : vector<16xf32>
    %144 = vector.multi_reduction <add>, %143, %cst_59 [1] : vector<16x32xf32> to vector<16xf32>
    %145 = vector.shape_cast %144 : vector<16xf32> to vector<16x1xf32>
    %cst_60 = arith.constant 3.200000e+01 : f32
    %146 = vector.broadcast %cst_60 : f32 to vector<16x1xf32>
    %147 = arith.divf %145, %146 : vector<16x1xf32>
    %148 = vector.broadcast %140 : vector<16x1xf32> to vector<16x32xf32>
    %149 = arith.subf %132, %148 : vector<16x32xf32>
    %cst_61 = arith.constant 9.99999974E-6 : f32
    %150 = vector.broadcast %cst_61 : f32 to vector<16x1xf32>
    %151 = arith.addf %147, %150 : vector<16x1xf32>
    %152 = math.rsqrt %151 : vector<16x1xf32>
    %153 = vector.broadcast %152 : vector<16x1xf32> to vector<16x32xf32>
    %154 = arith.mulf %149, %153 : vector<16x32xf32>
    %155 = vector.broadcast %134 : vector<1x32xf32> to vector<16x32xf32>
    %156 = arith.mulf %154, %155 : vector<16x32xf32>
    %157 = vector.broadcast %136 : vector<1x32xf32> to vector<16x32xf32>
    %158 = arith.addf %156, %157 : vector<16x32xf32>
    %c1 = arith.constant 1 : index
    %c0_62 = arith.constant 0 : index
    %c0_63 = arith.constant 0 : index
    %159 = vector.load %arg3[%c1, %c0_62, %c0_63] : memref<2x32x96xf32, #tpu.memory_space<vmem>>, vector<1x32x96xf32>
    %160 = vector.shape_cast %159 : vector<1x32x96xf32> to vector<32x96xf32>
    %cst_64 = arith.constant dense<0.000000e+00> : vector<16x96xf32>
    %161 = tpu.matmul %158, %160, %cst_64 {dimension_numbers = #tpu.dot_dimension_numbers<[1], [0], [0], [1], [0, 0, 1, 1], [], []>} : vector<16x32xf32>, vector<32x96xf32>, vector<16x96xf32> -> vector<16x96xf32>
    %c1_65 = arith.constant 1 : index
    %c0_66 = arith.constant 0 : index
    %c0_67 = arith.constant 0 : index
    %162 = vector.load %arg4[%c1_65, %c0_66, %c0_67] : memref<2x1x96xf32, #tpu.memory_space<vmem>>, vector<1x1x96xf32>
    %163 = vector.shape_cast %162 : vector<1x1x96xf32> to vector<1x96xf32>
    %164 = vector.broadcast %163 : vector<1x96xf32> to vector<16x96xf32>
    %165 = arith.addf %161, %164 : vector<16x96xf32>
    %166 = vector.extract_strided_slice %165 {offsets = [0, 0], sizes = [16, 32], strides = [1, 1]} : vector<16x96xf32> to vector<16x32xf32>
    %167 = vector.extract_strided_slice %165 {offsets = [0, 32], sizes = [16, 32], strides = [1, 1]} : vector<16x96xf32> to vector<16x32xf32>
    %168 = vector.extract_strided_slice %165 {offsets = [0, 64], sizes = [16, 32], strides = [1, 1]} : vector<16x96xf32> to vector<16x32xf32>
    %c1_68 = arith.constant 1 : index
    %c0_69 = arith.constant 0 : index
    %c0_70 = arith.constant 0 : index
    %169 = vector.load %arg5[%c1_68, %c0_69, %c0_70] : memref<2x32x32xf32, #tpu.memory_space<vmem>>, vector<1x32x32xf32>
    %170 = vector.shape_cast %169 : vector<1x32x32xf32> to vector<32x32xf32>
    %171 = vector.extract_strided_slice %166 {offsets = [0, 0], sizes = [16, 8], strides = [1, 1]} : vector<16x32xf32> to vector<16x8xf32>
    %172 = vector.shape_cast %171 : vector<16x8xf32> to vector<2x8x8xf32>
    %173 = vector.extract_strided_slice %166 {offsets = [0, 8], sizes = [16, 8], strides = [1, 1]} : vector<16x32xf32> to vector<16x8xf32>
    %174 = vector.shape_cast %173 : vector<16x8xf32> to vector<2x8x8xf32>
    %175 = vector.extract_strided_slice %166 {offsets = [0, 16], sizes = [16, 8], strides = [1, 1]} : vector<16x32xf32> to vector<16x8xf32>
    %176 = vector.shape_cast %175 : vector<16x8xf32> to vector<2x8x8xf32>
    %177 = vector.extract_strided_slice %166 {offsets = [0, 24], sizes = [16, 8], strides = [1, 1]} : vector<16x32xf32> to vector<16x8xf32>
    %178 = vector.shape_cast %177 : vector<16x8xf32> to vector<2x8x8xf32>
    %179 = tpu.concatenate %172, %174, %176, %178 in 0 : vector<2x8x8xf32>, vector<2x8x8xf32>, vector<2x8x8xf32>, vector<2x8x8xf32> -> vector<8x8x8xf32>
    %180 = vector.extract_strided_slice %167 {offsets = [0, 0], sizes = [16, 8], strides = [1, 1]} : vector<16x32xf32> to vector<16x8xf32>
    %181 = vector.shape_cast %180 : vector<16x8xf32> to vector<2x8x8xf32>
    %182 = vector.extract_strided_slice %167 {offsets = [0, 8], sizes = [16, 8], strides = [1, 1]} : vector<16x32xf32> to vector<16x8xf32>
    %183 = vector.shape_cast %182 : vector<16x8xf32> to vector<2x8x8xf32>
    %184 = vector.extract_strided_slice %167 {offsets = [0, 16], sizes = [16, 8], strides = [1, 1]} : vector<16x32xf32> to vector<16x8xf32>
    %185 = vector.shape_cast %184 : vector<16x8xf32> to vector<2x8x8xf32>
    %186 = vector.extract_strided_slice %167 {offsets = [0, 24], sizes = [16, 8], strides = [1, 1]} : vector<16x32xf32> to vector<16x8xf32>
    %187 = vector.shape_cast %186 : vector<16x8xf32> to vector<2x8x8xf32>
    %188 = tpu.concatenate %181, %183, %185, %187 in 0 : vector<2x8x8xf32>, vector<2x8x8xf32>, vector<2x8x8xf32>, vector<2x8x8xf32> -> vector<8x8x8xf32>
    %189 = vector.extract_strided_slice %168 {offsets = [0, 0], sizes = [16, 8], strides = [1, 1]} : vector<16x32xf32> to vector<16x8xf32>
    %190 = vector.shape_cast %189 : vector<16x8xf32> to vector<2x8x8xf32>
    %191 = vector.extract_strided_slice %168 {offsets = [0, 8], sizes = [16, 8], strides = [1, 1]} : vector<16x32xf32> to vector<16x8xf32>
    %192 = vector.shape_cast %191 : vector<16x8xf32> to vector<2x8x8xf32>
    %193 = vector.extract_strided_slice %168 {offsets = [0, 16], sizes = [16, 8], strides = [1, 1]} : vector<16x32xf32> to vector<16x8xf32>
    %194 = vector.shape_cast %193 : vector<16x8xf32> to vector<2x8x8xf32>
    %195 = vector.extract_strided_slice %168 {offsets = [0, 24], sizes = [16, 8], strides = [1, 1]} : vector<16x32xf32> to vector<16x8xf32>
    %196 = vector.shape_cast %195 : vector<16x8xf32> to vector<2x8x8xf32>
    %197 = tpu.concatenate %190, %192, %194, %196 in 0 : vector<2x8x8xf32>, vector<2x8x8xf32>, vector<2x8x8xf32>, vector<2x8x8xf32> -> vector<8x8x8xf32>
    "tpu.trace_start"() <{level = 10 : i32, message = "bqd,bkd->bqk"}> : () -> ()
    %cst_71 = arith.constant dense<0.000000e+00> : vector<8x8x8xf32>
    %198 = tpu.matmul %179, %188, %cst_71 {dimension_numbers = #tpu.dot_dimension_numbers<[2], [2], [1], [1], [0, 0, 0, 1, 1, 1], [0], [0]>} : vector<8x8x8xf32>, vector<8x8x8xf32>, vector<8x8x8xf32> -> vector<8x8x8xf32>
    "tpu.trace_stop"() : () -> ()
    %199 = arith.addf %198, %3 : vector<8x8x8xf32>
    %cst_72 = arith.constant dense<0xFF800000> : vector<8x8xf32>
    %200 = vector.multi_reduction <maximumf>, %199, %cst_72 [2] : vector<8x8x8xf32> to vector<8x8xf32>
    %201 = vector.shape_cast %200 : vector<8x8xf32> to vector<8x8x1xf32>
    %202 = vector.broadcast %201 : vector<8x8x1xf32> to vector<8x8x8xf32>
    %203 = arith.subf %199, %202 : vector<8x8x8xf32>
    %204 = math.exp %203 : vector<8x8x8xf32>
    %cst_73 = arith.constant dense<0.000000e+00> : vector<8x8xf32>
    %205 = vector.multi_reduction <add>, %204, %cst_73 [2] : vector<8x8x8xf32> to vector<8x8xf32>
    %206 = vector.shape_cast %205 : vector<8x8xf32> to vector<8x8x1xf32>
    %207 = tpu.reciprocal %206 {approx = true} : vector<8x8x1xf32> -> vector<8x8x1xf32>
    %208 = vector.broadcast %207 : vector<8x8x1xf32> to vector<8x8x8xf32>
    %209 = arith.mulf %204, %208 : vector<8x8x8xf32>
    "tpu.trace_start"() <{level = 10 : i32, message = "bqk,bkd->bqd"}> : () -> ()
    %cst_74 = arith.constant dense<0.000000e+00> : vector<8x8x8xf32>
    %210 = tpu.matmul %209, %197, %cst_74 {dimension_numbers = #tpu.dot_dimension_numbers<[2], [1], [1], [2], [0, 0, 0, 1, 1, 2], [0], [0]>} : vector<8x8x8xf32>, vector<8x8x8xf32>, vector<8x8x8xf32> -> vector<8x8x8xf32>
    "tpu.trace_stop"() : () -> ()
    %211 = vector.extract_strided_slice %210 {offsets = [0, 0, 0], sizes = [2, 8, 8], strides = [1, 1, 1]} : vector<8x8x8xf32> to vector<2x8x8xf32>
    %212 = vector.shape_cast %211 : vector<2x8x8xf32> to vector<16x8xf32>
    %213 = vector.extract_strided_slice %170 {offsets = [0, 0], sizes = [8, 32], strides = [1, 1]} : vector<32x32xf32> to vector<8x32xf32>
    %cst_75 = arith.constant dense<0.000000e+00> : vector<16x32xf32>
    %214 = tpu.matmul %212, %213, %cst_75 {dimension_numbers = #tpu.dot_dimension_numbers<[1], [0], [0], [1], [0, 0, 1, 1], [], []>} : vector<16x8xf32>, vector<8x32xf32>, vector<16x32xf32> -> vector<16x32xf32>
    %215 = vector.extract_strided_slice %210 {offsets = [2, 0, 0], sizes = [2, 8, 8], strides = [1, 1, 1]} : vector<8x8x8xf32> to vector<2x8x8xf32>
    %216 = vector.shape_cast %215 : vector<2x8x8xf32> to vector<16x8xf32>
    %217 = vector.extract_strided_slice %170 {offsets = [8, 0], sizes = [8, 32], strides = [1, 1]} : vector<32x32xf32> to vector<8x32xf32>
    %cst_76 = arith.constant dense<0.000000e+00> : vector<16x32xf32>
    %218 = tpu.matmul %216, %217, %cst_76 {dimension_numbers = #tpu.dot_dimension_numbers<[1], [0], [0], [1], [0, 0, 1, 1], [], []>} : vector<16x8xf32>, vector<8x32xf32>, vector<16x32xf32> -> vector<16x32xf32>
    %219 = arith.addf %214, %218 : vector<16x32xf32>
    %220 = vector.extract_strided_slice %210 {offsets = [4, 0, 0], sizes = [2, 8, 8], strides = [1, 1, 1]} : vector<8x8x8xf32> to vector<2x8x8xf32>
    %221 = vector.shape_cast %220 : vector<2x8x8xf32> to vector<16x8xf32>
    %222 = vector.extract_strided_slice %170 {offsets = [16, 0], sizes = [8, 32], strides = [1, 1]} : vector<32x32xf32> to vector<8x32xf32>
    %cst_77 = arith.constant dense<0.000000e+00> : vector<16x32xf32>
    %223 = tpu.matmul %221, %222, %cst_77 {dimension_numbers = #tpu.dot_dimension_numbers<[1], [0], [0], [1], [0, 0, 1, 1], [], []>} : vector<16x8xf32>, vector<8x32xf32>, vector<16x32xf32> -> vector<16x32xf32>
    %224 = arith.addf %219, %223 : vector<16x32xf32>
    %225 = vector.extract_strided_slice %210 {offsets = [6, 0, 0], sizes = [2, 8, 8], strides = [1, 1, 1]} : vector<8x8x8xf32> to vector<2x8x8xf32>
    %226 = vector.shape_cast %225 : vector<2x8x8xf32> to vector<16x8xf32>
    %227 = vector.extract_strided_slice %170 {offsets = [24, 0], sizes = [8, 32], strides = [1, 1]} : vector<32x32xf32> to vector<8x32xf32>
    %cst_78 = arith.constant dense<0.000000e+00> : vector<16x32xf32>
    %228 = tpu.matmul %226, %227, %cst_78 {dimension_numbers = #tpu.dot_dimension_numbers<[1], [0], [0], [1], [0, 0, 1, 1], [], []>} : vector<16x8xf32>, vector<8x32xf32>, vector<16x32xf32> -> vector<16x32xf32>
    %229 = arith.addf %224, %228 : vector<16x32xf32>
    %c1_79 = arith.constant 1 : index
    %c0_80 = arith.constant 0 : index
    %c0_81 = arith.constant 0 : index
    %230 = vector.load %arg6[%c1_79, %c0_80, %c0_81] : memref<2x1x32xf32, #tpu.memory_space<vmem>>, vector<1x1x32xf32>
    %231 = vector.shape_cast %230 : vector<1x1x32xf32> to vector<1x32xf32>
    %232 = vector.broadcast %231 : vector<1x32xf32> to vector<16x32xf32>
    %233 = arith.addf %229, %232 : vector<16x32xf32>
    %234 = arith.addf %158, %233 : vector<16x32xf32>
    %c1_82 = arith.constant 1 : index
    %c0_83 = arith.constant 0 : index
    %c0_84 = arith.constant 0 : index
    %235 = vector.load %arg11[%c1_82, %c0_83, %c0_84] : memref<2x1x32xf32, #tpu.memory_space<vmem>>, vector<1x1x32xf32>
    %236 = vector.shape_cast %235 : vector<1x1x32xf32> to vector<1x32xf32>
    %c1_85 = arith.constant 1 : index
    %c0_86 = arith.constant 0 : index
    %c0_87 = arith.constant 0 : index
    %237 = vector.load %arg12[%c1_85, %c0_86, %c0_87] : memref<2x1x32xf32, #tpu.memory_space<vmem>>, vector<1x1x32xf32>
    %238 = vector.shape_cast %237 : vector<1x1x32xf32> to vector<1x32xf32>
    %cst_88 = arith.constant dense<0.000000e+00> : vector<16xf32>
    %239 = vector.multi_reduction <add>, %234, %cst_88 [1] : vector<16x32xf32> to vector<16xf32>
    %240 = vector.shape_cast %239 : vector<16xf32> to vector<16x1xf32>
    %cst_89 = arith.constant 3.200000e+01 : f32
    %241 = vector.broadcast %cst_89 : f32 to vector<16x1xf32>
    %242 = arith.divf %240, %241 : vector<16x1xf32>
    %243 = vector.broadcast %242 : vector<16x1xf32> to vector<16x32xf32>
    %244 = arith.subf %234, %243 : vector<16x32xf32>
    %245 = arith.mulf %244, %244 : vector<16x32xf32>
    %cst_90 = arith.constant dense<0.000000e+00> : vector<16xf32>
    %246 = vector.multi_reduction <add>, %245, %cst_90 [1] : vector<16x32xf32> to vector<16xf32>
    %247 = vector.shape_cast %246 : vector<16xf32> to vector<16x1xf32>
    %cst_91 = arith.constant 3.200000e+01 : f32
    %248 = vector.broadcast %cst_91 : f32 to vector<16x1xf32>
    %249 = arith.divf %247, %248 : vector<16x1xf32>
    %250 = vector.broadcast %242 : vector<16x1xf32> to vector<16x32xf32>
    %251 = arith.subf %234, %250 : vector<16x32xf32>
    %cst_92 = arith.constant 9.99999974E-6 : f32
    %252 = vector.broadcast %cst_92 : f32 to vector<16x1xf32>
    %253 = arith.addf %249, %252 : vector<16x1xf32>
    %254 = math.rsqrt %253 : vector<16x1xf32>
    %255 = vector.broadcast %254 : vector<16x1xf32> to vector<16x32xf32>
    %256 = arith.mulf %251, %255 : vector<16x32xf32>
    %257 = vector.broadcast %236 : vector<1x32xf32> to vector<16x32xf32>
    %258 = arith.mulf %256, %257 : vector<16x32xf32>
    %259 = vector.broadcast %238 : vector<1x32xf32> to vector<16x32xf32>
    %260 = arith.addf %258, %259 : vector<16x32xf32>
    %c1_93 = arith.constant 1 : index
    %c0_94 = arith.constant 0 : index
    %c0_95 = arith.constant 0 : index
    %261 = vector.load %arg7[%c1_93, %c0_94, %c0_95] : memref<2x32x128xf32, #tpu.memory_space<vmem>>, vector<1x32x128xf32>
    %262 = vector.shape_cast %261 : vector<1x32x128xf32> to vector<32x128xf32>
    %cst_96 = arith.constant dense<0.000000e+00> : vector<16x128xf32>
    %263 = tpu.matmul %260, %262, %cst_96 {dimension_numbers = #tpu.dot_dimension_numbers<[1], [0], [0], [1], [0, 0, 1, 1], [], []>} : vector<16x32xf32>, vector<32x128xf32>, vector<16x128xf32> -> vector<16x128xf32>
    %c1_97 = arith.constant 1 : index
    %c0_98 = arith.constant 0 : index
    %c0_99 = arith.constant 0 : index
    %264 = vector.load %arg8[%c1_97, %c0_98, %c0_99] : memref<2x1x128xf32, #tpu.memory_space<vmem>>, vector<1x1x128xf32>
    %265 = vector.shape_cast %264 : vector<1x1x128xf32> to vector<1x128xf32>
    %266 = vector.broadcast %265 : vector<1x128xf32> to vector<16x128xf32>
    %267 = arith.addf %263, %266 : vector<16x128xf32>
    %cst_100 = arith.constant 0.000000e+00 : f32
    %268 = vector.broadcast %cst_100 : f32 to vector<16x128xf32>
    %269 = arith.maximumf %267, %268 : vector<16x128xf32>
    %c1_101 = arith.constant 1 : index
    %c0_102 = arith.constant 0 : index
    %c0_103 = arith.constant 0 : index
    %270 = vector.load %arg9[%c1_101, %c0_102, %c0_103] : memref<2x128x32xf32, #tpu.memory_space<vmem>>, vector<1x128x32xf32>
    %271 = vector.shape_cast %270 : vector<1x128x32xf32> to vector<128x32xf32>
    %cst_104 = arith.constant dense<0.000000e+00> : vector<16x32xf32>
    %272 = tpu.matmul %269, %271, %cst_104 {dimension_numbers = #tpu.dot_dimension_numbers<[1], [0], [0], [1], [0, 0, 1, 1], [], []>} : vector<16x128xf32>, vector<128x32xf32>, vector<16x32xf32> -> vector<16x32xf32>
    %c1_105 = arith.constant 1 : index
    %c0_106 = arith.constant 0 : index
    %c0_107 = arith.constant 0 : index
    %273 = vector.load %arg10[%c1_105, %c0_106, %c0_107] : memref<2x1x32xf32, #tpu.memory_space<vmem>>, vector<1x1x32xf32>
    %274 = vector.shape_cast %273 : vector<1x1x32xf32> to vector<1x32xf32>
    %275 = vector.broadcast %274 : vector<1x32xf32> to vector<16x32xf32>
    %276 = arith.addf %272, %275 : vector<16x32xf32>
    %277 = arith.addf %260, %276 : vector<16x32xf32>
    %c1_108 = arith.constant 1 : index
    %c0_109 = arith.constant 0 : index
    %c0_110 = arith.constant 0 : index
    %278 = vector.load %arg13[%c1_108, %c0_109, %c0_110] : memref<2x1x32xf32, #tpu.memory_space<vmem>>, vector<1x1x32xf32>
    %279 = vector.shape_cast %278 : vector<1x1x32xf32> to vector<1x32xf32>
    %c1_111 = arith.constant 1 : index
    %c0_112 = arith.constant 0 : index
    %c0_113 = arith.constant 0 : index
    %280 = vector.load %arg14[%c1_111, %c0_112, %c0_113] : memref<2x1x32xf32, #tpu.memory_space<vmem>>, vector<1x1x32xf32>
    %281 = vector.shape_cast %280 : vector<1x1x32xf32> to vector<1x32xf32>
    %cst_114 = arith.constant dense<0.000000e+00> : vector<16xf32>
    %282 = vector.multi_reduction <add>, %277, %cst_114 [1] : vector<16x32xf32> to vector<16xf32>
    %283 = vector.shape_cast %282 : vector<16xf32> to vector<16x1xf32>
    %cst_115 = arith.constant 3.200000e+01 : f32
    %284 = vector.broadcast %cst_115 : f32 to vector<16x1xf32>
    %285 = arith.divf %283, %284 : vector<16x1xf32>
    %286 = vector.broadcast %285 : vector<16x1xf32> to vector<16x32xf32>
    %287 = arith.subf %277, %286 : vector<16x32xf32>
    %288 = arith.mulf %287, %287 : vector<16x32xf32>
    %cst_116 = arith.constant dense<0.000000e+00> : vector<16xf32>
    %289 = vector.multi_reduction <add>, %288, %cst_116 [1] : vector<16x32xf32> to vector<16xf32>
    %290 = vector.shape_cast %289 : vector<16xf32> to vector<16x1xf32>
    %cst_117 = arith.constant 3.200000e+01 : f32
    %291 = vector.broadcast %cst_117 : f32 to vector<16x1xf32>
    %292 = arith.divf %290, %291 : vector<16x1xf32>
    %293 = vector.broadcast %285 : vector<16x1xf32> to vector<16x32xf32>
    %294 = arith.subf %277, %293 : vector<16x32xf32>
    %cst_118 = arith.constant 9.99999974E-6 : f32
    %295 = vector.broadcast %cst_118 : f32 to vector<16x1xf32>
    %296 = arith.addf %292, %295 : vector<16x1xf32>
    %297 = math.rsqrt %296 : vector<16x1xf32>
    %298 = vector.broadcast %297 : vector<16x1xf32> to vector<16x32xf32>
    %299 = arith.mulf %294, %298 : vector<16x32xf32>
    %300 = vector.broadcast %279 : vector<1x32xf32> to vector<16x32xf32>
    %301 = arith.mulf %299, %300 : vector<16x32xf32>
    %302 = vector.broadcast %281 : vector<1x32xf32> to vector<16x32xf32>
    %303 = arith.addf %301, %302 : vector<16x32xf32>
    %c0_119 = arith.constant 0 : index
    %c0_120 = arith.constant 0 : index
    %304 = vector.load %arg15[%c0_119, %c0_120] : memref<1x32xf32, #tpu.memory_space<vmem>>, vector<1x32xf32>
    %c0_121 = arith.constant 0 : index
    %c0_122 = arith.constant 0 : index
    %305 = vector.load %arg16[%c0_121, %c0_122] : memref<1x32xf32, #tpu.memory_space<vmem>>, vector<1x32xf32>
    %cst_123 = arith.constant dense<0.000000e+00> : vector<16xf32>
    %306 = vector.multi_reduction <add>, %303, %cst_123 [1] : vector<16x32xf32> to vector<16xf32>
    %307 = vector.shape_cast %306 : vector<16xf32> to vector<16x1xf32>
    %cst_124 = arith.constant 3.200000e+01 : f32
    %308 = vector.broadcast %cst_124 : f32 to vector<16x1xf32>
    %309 = arith.divf %307, %308 : vector<16x1xf32>
    %310 = vector.broadcast %309 : vector<16x1xf32> to vector<16x32xf32>
    %311 = arith.subf %303, %310 : vector<16x32xf32>
    %312 = arith.mulf %311, %311 : vector<16x32xf32>
    %cst_125 = arith.constant dense<0.000000e+00> : vector<16xf32>
    %313 = vector.multi_reduction <add>, %312, %cst_125 [1] : vector<16x32xf32> to vector<16xf32>
    %314 = vector.shape_cast %313 : vector<16xf32> to vector<16x1xf32>
    %cst_126 = arith.constant 3.200000e+01 : f32
    %315 = vector.broadcast %cst_126 : f32 to vector<16x1xf32>
    %316 = arith.divf %314, %315 : vector<16x1xf32>
    %317 = vector.broadcast %309 : vector<16x1xf32> to vector<16x32xf32>
    %318 = arith.subf %303, %317 : vector<16x32xf32>
    %cst_127 = arith.constant 9.99999974E-6 : f32
    %319 = vector.broadcast %cst_127 : f32 to vector<16x1xf32>
    %320 = arith.addf %316, %319 : vector<16x1xf32>
    %321 = math.rsqrt %320 : vector<16x1xf32>
    %322 = vector.broadcast %321 : vector<16x1xf32> to vector<16x32xf32>
    %323 = arith.mulf %318, %322 : vector<16x32xf32>
    %324 = vector.broadcast %304 : vector<1x32xf32> to vector<16x32xf32>
    %325 = arith.mulf %323, %324 : vector<16x32xf32>
    %326 = vector.broadcast %305 : vector<1x32xf32> to vector<16x32xf32>
    %327 = arith.addf %325, %326 : vector<16x32xf32>
    %c0_128 = arith.constant 0 : index
    %c0_129 = arith.constant 0 : index
    %328 = vector.load %arg1[%c0_128, %c0_129] : memref<16x32xf32, #tpu.memory_space<vmem>>, vector<16x32xf32>
    %c0_130 = arith.constant 0 : index
    %c0_131 = arith.constant 0 : index
    %c0_132 = arith.constant 0 : index
    %329 = vector.load %arg17[%c0_130, %c0_131, %c0_132] : memref<2x32x96xf32, #tpu.memory_space<vmem>>, vector<1x32x96xf32>
    %330 = vector.shape_cast %329 : vector<1x32x96xf32> to vector<32x96xf32>
    %cst_133 = arith.constant dense<0.000000e+00> : vector<16x96xf32>
    %331 = tpu.matmul %328, %330, %cst_133 {dimension_numbers = #tpu.dot_dimension_numbers<[1], [0], [0], [1], [0, 0, 1, 1], [], []>} : vector<16x32xf32>, vector<32x96xf32>, vector<16x96xf32> -> vector<16x96xf32>
    %c0_134 = arith.constant 0 : index
    %c0_135 = arith.constant 0 : index
    %c0_136 = arith.constant 0 : index
    %332 = vector.load %arg18[%c0_134, %c0_135, %c0_136] : memref<2x1x96xf32, #tpu.memory_space<vmem>>, vector<1x1x96xf32>
    %333 = vector.shape_cast %332 : vector<1x1x96xf32> to vector<1x96xf32>
    %334 = vector.broadcast %333 : vector<1x96xf32> to vector<16x96xf32>
    %335 = arith.addf %331, %334 : vector<16x96xf32>
    %336 = vector.extract_strided_slice %335 {offsets = [0, 0], sizes = [16, 32], strides = [1, 1]} : vector<16x96xf32> to vector<16x32xf32>
    %337 = vector.extract_strided_slice %335 {offsets = [0, 32], sizes = [16, 32], strides = [1, 1]} : vector<16x96xf32> to vector<16x32xf32>
    %338 = vector.extract_strided_slice %335 {offsets = [0, 64], sizes = [16, 32], strides = [1, 1]} : vector<16x96xf32> to vector<16x32xf32>
    %c0_137 = arith.constant 0 : index
    %c0_138 = arith.constant 0 : index
    %c0_139 = arith.constant 0 : index
    %339 = vector.load %arg19[%c0_137, %c0_138, %c0_139] : memref<2x32x32xf32, #tpu.memory_space<vmem>>, vector<1x32x32xf32>
    %340 = vector.shape_cast %339 : vector<1x32x32xf32> to vector<32x32xf32>
    %341 = vector.extract_strided_slice %336 {offsets = [0, 0], sizes = [16, 8], strides = [1, 1]} : vector<16x32xf32> to vector<16x8xf32>
    %342 = vector.shape_cast %341 : vector<16x8xf32> to vector<2x8x8xf32>
    %343 = vector.extract_strided_slice %336 {offsets = [0, 8], sizes = [16, 8], strides = [1, 1]} : vector<16x32xf32> to vector<16x8xf32>
    %344 = vector.shape_cast %343 : vector<16x8xf32> to vector<2x8x8xf32>
    %345 = vector.extract_strided_slice %336 {offsets = [0, 16], sizes = [16, 8], strides = [1, 1]} : vector<16x32xf32> to vector<16x8xf32>
    %346 = vector.shape_cast %345 : vector<16x8xf32> to vector<2x8x8xf32>
    %347 = vector.extract_strided_slice %336 {offsets = [0, 24], sizes = [16, 8], strides = [1, 1]} : vector<16x32xf32> to vector<16x8xf32>
    %348 = vector.shape_cast %347 : vector<16x8xf32> to vector<2x8x8xf32>
    %349 = tpu.concatenate %342, %344, %346, %348 in 0 : vector<2x8x8xf32>, vector<2x8x8xf32>, vector<2x8x8xf32>, vector<2x8x8xf32> -> vector<8x8x8xf32>
    %350 = vector.extract_strided_slice %337 {offsets = [0, 0], sizes = [16, 8], strides = [1, 1]} : vector<16x32xf32> to vector<16x8xf32>
    %351 = vector.shape_cast %350 : vector<16x8xf32> to vector<2x8x8xf32>
    %352 = vector.extract_strided_slice %337 {offsets = [0, 8], sizes = [16, 8], strides = [1, 1]} : vector<16x32xf32> to vector<16x8xf32>
    %353 = vector.shape_cast %352 : vector<16x8xf32> to vector<2x8x8xf32>
    %354 = vector.extract_strided_slice %337 {offsets = [0, 16], sizes = [16, 8], strides = [1, 1]} : vector<16x32xf32> to vector<16x8xf32>
    %355 = vector.shape_cast %354 : vector<16x8xf32> to vector<2x8x8xf32>
    %356 = vector.extract_strided_slice %337 {offsets = [0, 24], sizes = [16, 8], strides = [1, 1]} : vector<16x32xf32> to vector<16x8xf32>
    %357 = vector.shape_cast %356 : vector<16x8xf32> to vector<2x8x8xf32>
    %358 = tpu.concatenate %351, %353, %355, %357 in 0 : vector<2x8x8xf32>, vector<2x8x8xf32>, vector<2x8x8xf32>, vector<2x8x8xf32> -> vector<8x8x8xf32>
    %359 = vector.extract_strided_slice %338 {offsets = [0, 0], sizes = [16, 8], strides = [1, 1]} : vector<16x32xf32> to vector<16x8xf32>
    %360 = vector.shape_cast %359 : vector<16x8xf32> to vector<2x8x8xf32>
    %361 = vector.extract_strided_slice %338 {offsets = [0, 8], sizes = [16, 8], strides = [1, 1]} : vector<16x32xf32> to vector<16x8xf32>
    %362 = vector.shape_cast %361 : vector<16x8xf32> to vector<2x8x8xf32>
    %363 = vector.extract_strided_slice %338 {offsets = [0, 16], sizes = [16, 8], strides = [1, 1]} : vector<16x32xf32> to vector<16x8xf32>
    %364 = vector.shape_cast %363 : vector<16x8xf32> to vector<2x8x8xf32>
    %365 = vector.extract_strided_slice %338 {offsets = [0, 24], sizes = [16, 8], strides = [1, 1]} : vector<16x32xf32> to vector<16x8xf32>
    %366 = vector.shape_cast %365 : vector<16x8xf32> to vector<2x8x8xf32>
    %367 = tpu.concatenate %360, %362, %364, %366 in 0 : vector<2x8x8xf32>, vector<2x8x8xf32>, vector<2x8x8xf32>, vector<2x8x8xf32> -> vector<8x8x8xf32>
    "tpu.trace_start"() <{level = 10 : i32, message = "bqd,bkd->bqk"}> : () -> ()
    %cst_140 = arith.constant dense<0.000000e+00> : vector<8x8x8xf32>
    %368 = tpu.matmul %349, %358, %cst_140 {dimension_numbers = #tpu.dot_dimension_numbers<[2], [2], [1], [1], [0, 0, 0, 1, 1, 1], [0], [0]>} : vector<8x8x8xf32>, vector<8x8x8xf32>, vector<8x8x8xf32> -> vector<8x8x8xf32>
    "tpu.trace_stop"() : () -> ()
    %369 = arith.addf %368, %12 : vector<8x8x8xf32>
    %cst_141 = arith.constant dense<0xFF800000> : vector<8x8xf32>
    %370 = vector.multi_reduction <maximumf>, %369, %cst_141 [2] : vector<8x8x8xf32> to vector<8x8xf32>
    %371 = vector.shape_cast %370 : vector<8x8xf32> to vector<8x8x1xf32>
    %372 = vector.broadcast %371 : vector<8x8x1xf32> to vector<8x8x8xf32>
    %373 = arith.subf %369, %372 : vector<8x8x8xf32>
    %374 = math.exp %373 : vector<8x8x8xf32>
    %cst_142 = arith.constant dense<0.000000e+00> : vector<8x8xf32>
    %375 = vector.multi_reduction <add>, %374, %cst_142 [2] : vector<8x8x8xf32> to vector<8x8xf32>
    %376 = vector.shape_cast %375 : vector<8x8xf32> to vector<8x8x1xf32>
    %377 = tpu.reciprocal %376 {approx = true} : vector<8x8x1xf32> -> vector<8x8x1xf32>
    %378 = vector.broadcast %377 : vector<8x8x1xf32> to vector<8x8x8xf32>
    %379 = arith.mulf %374, %378 : vector<8x8x8xf32>
    "tpu.trace_start"() <{level = 10 : i32, message = "bqk,bkd->bqd"}> : () -> ()
    %cst_143 = arith.constant dense<0.000000e+00> : vector<8x8x8xf32>
    %380 = tpu.matmul %379, %367, %cst_143 {dimension_numbers = #tpu.dot_dimension_numbers<[2], [1], [1], [2], [0, 0, 0, 1, 1, 2], [0], [0]>} : vector<8x8x8xf32>, vector<8x8x8xf32>, vector<8x8x8xf32> -> vector<8x8x8xf32>
    "tpu.trace_stop"() : () -> ()
    %381 = vector.extract_strided_slice %380 {offsets = [0, 0, 0], sizes = [2, 8, 8], strides = [1, 1, 1]} : vector<8x8x8xf32> to vector<2x8x8xf32>
    %382 = vector.shape_cast %381 : vector<2x8x8xf32> to vector<16x8xf32>
    %383 = vector.extract_strided_slice %340 {offsets = [0, 0], sizes = [8, 32], strides = [1, 1]} : vector<32x32xf32> to vector<8x32xf32>
    %cst_144 = arith.constant dense<0.000000e+00> : vector<16x32xf32>
    %384 = tpu.matmul %382, %383, %cst_144 {dimension_numbers = #tpu.dot_dimension_numbers<[1], [0], [0], [1], [0, 0, 1, 1], [], []>} : vector<16x8xf32>, vector<8x32xf32>, vector<16x32xf32> -> vector<16x32xf32>
    %385 = vector.extract_strided_slice %380 {offsets = [2, 0, 0], sizes = [2, 8, 8], strides = [1, 1, 1]} : vector<8x8x8xf32> to vector<2x8x8xf32>
    %386 = vector.shape_cast %385 : vector<2x8x8xf32> to vector<16x8xf32>
    %387 = vector.extract_strided_slice %340 {offsets = [8, 0], sizes = [8, 32], strides = [1, 1]} : vector<32x32xf32> to vector<8x32xf32>
    %cst_145 = arith.constant dense<0.000000e+00> : vector<16x32xf32>
    %388 = tpu.matmul %386, %387, %cst_145 {dimension_numbers = #tpu.dot_dimension_numbers<[1], [0], [0], [1], [0, 0, 1, 1], [], []>} : vector<16x8xf32>, vector<8x32xf32>, vector<16x32xf32> -> vector<16x32xf32>
    %389 = arith.addf %384, %388 : vector<16x32xf32>
    %390 = vector.extract_strided_slice %380 {offsets = [4, 0, 0], sizes = [2, 8, 8], strides = [1, 1, 1]} : vector<8x8x8xf32> to vector<2x8x8xf32>
    %391 = vector.shape_cast %390 : vector<2x8x8xf32> to vector<16x8xf32>
    %392 = vector.extract_strided_slice %340 {offsets = [16, 0], sizes = [8, 32], strides = [1, 1]} : vector<32x32xf32> to vector<8x32xf32>
    %cst_146 = arith.constant dense<0.000000e+00> : vector<16x32xf32>
    %393 = tpu.matmul %391, %392, %cst_146 {dimension_numbers = #tpu.dot_dimension_numbers<[1], [0], [0], [1], [0, 0, 1, 1], [], []>} : vector<16x8xf32>, vector<8x32xf32>, vector<16x32xf32> -> vector<16x32xf32>
    %394 = arith.addf %389, %393 : vector<16x32xf32>
    %395 = vector.extract_strided_slice %380 {offsets = [6, 0, 0], sizes = [2, 8, 8], strides = [1, 1, 1]} : vector<8x8x8xf32> to vector<2x8x8xf32>
    %396 = vector.shape_cast %395 : vector<2x8x8xf32> to vector<16x8xf32>
    %397 = vector.extract_strided_slice %340 {offsets = [24, 0], sizes = [8, 32], strides = [1, 1]} : vector<32x32xf32> to vector<8x32xf32>
    %cst_147 = arith.constant dense<0.000000e+00> : vector<16x32xf32>
    %398 = tpu.matmul %396, %397, %cst_147 {dimension_numbers = #tpu.dot_dimension_numbers<[1], [0], [0], [1], [0, 0, 1, 1], [], []>} : vector<16x8xf32>, vector<8x32xf32>, vector<16x32xf32> -> vector<16x32xf32>
    %399 = arith.addf %394, %398 : vector<16x32xf32>
    %c0_148 = arith.constant 0 : index
    %c0_149 = arith.constant 0 : index
    %c0_150 = arith.constant 0 : index
    %400 = vector.load %arg20[%c0_148, %c0_149, %c0_150] : memref<2x1x32xf32, #tpu.memory_space<vmem>>, vector<1x1x32xf32>
    %401 = vector.shape_cast %400 : vector<1x1x32xf32> to vector<1x32xf32>
    %402 = vector.broadcast %401 : vector<1x32xf32> to vector<16x32xf32>
    %403 = arith.addf %399, %402 : vector<16x32xf32>
    %404 = arith.addf %328, %403 : vector<16x32xf32>
    %c0_151 = arith.constant 0 : index
    %c0_152 = arith.constant 0 : index
    %c0_153 = arith.constant 0 : index
    %405 = vector.load %arg29[%c0_151, %c0_152, %c0_153] : memref<2x1x32xf32, #tpu.memory_space<vmem>>, vector<1x1x32xf32>
    %406 = vector.shape_cast %405 : vector<1x1x32xf32> to vector<1x32xf32>
    %c0_154 = arith.constant 0 : index
    %c0_155 = arith.constant 0 : index
    %c0_156 = arith.constant 0 : index
    %407 = vector.load %arg30[%c0_154, %c0_155, %c0_156] : memref<2x1x32xf32, #tpu.memory_space<vmem>>, vector<1x1x32xf32>
    %408 = vector.shape_cast %407 : vector<1x1x32xf32> to vector<1x32xf32>
    %cst_157 = arith.constant dense<0.000000e+00> : vector<16xf32>
    %409 = vector.multi_reduction <add>, %404, %cst_157 [1] : vector<16x32xf32> to vector<16xf32>
    %410 = vector.shape_cast %409 : vector<16xf32> to vector<16x1xf32>
    %cst_158 = arith.constant 3.200000e+01 : f32
    %411 = vector.broadcast %cst_158 : f32 to vector<16x1xf32>
    %412 = arith.divf %410, %411 : vector<16x1xf32>
    %413 = vector.broadcast %412 : vector<16x1xf32> to vector<16x32xf32>
    %414 = arith.subf %404, %413 : vector<16x32xf32>
    %415 = arith.mulf %414, %414 : vector<16x32xf32>
    %cst_159 = arith.constant dense<0.000000e+00> : vector<16xf32>
    %416 = vector.multi_reduction <add>, %415, %cst_159 [1] : vector<16x32xf32> to vector<16xf32>
    %417 = vector.shape_cast %416 : vector<16xf32> to vector<16x1xf32>
    %cst_160 = arith.constant 3.200000e+01 : f32
    %418 = vector.broadcast %cst_160 : f32 to vector<16x1xf32>
    %419 = arith.divf %417, %418 : vector<16x1xf32>
    %420 = vector.broadcast %412 : vector<16x1xf32> to vector<16x32xf32>
    %421 = arith.subf %404, %420 : vector<16x32xf32>
    %cst_161 = arith.constant 9.99999974E-6 : f32
    %422 = vector.broadcast %cst_161 : f32 to vector<16x1xf32>
    %423 = arith.addf %419, %422 : vector<16x1xf32>
    %424 = math.rsqrt %423 : vector<16x1xf32>
    %425 = vector.broadcast %424 : vector<16x1xf32> to vector<16x32xf32>
    %426 = arith.mulf %421, %425 : vector<16x32xf32>
    %427 = vector.broadcast %406 : vector<1x32xf32> to vector<16x32xf32>
    %428 = arith.mulf %426, %427 : vector<16x32xf32>
    %429 = vector.broadcast %408 : vector<1x32xf32> to vector<16x32xf32>
    %430 = arith.addf %428, %429 : vector<16x32xf32>
    %c0_162 = arith.constant 0 : index
    %c0_163 = arith.constant 0 : index
    %c0_164 = arith.constant 0 : index
    %431 = vector.load %arg21[%c0_162, %c0_163, %c0_164] : memref<2x32x96xf32, #tpu.memory_space<vmem>>, vector<1x32x96xf32>
    %432 = vector.shape_cast %431 : vector<1x32x96xf32> to vector<32x96xf32>
    %c0_165 = arith.constant 0 : index
    %c0_166 = arith.constant 0 : index
    %c0_167 = arith.constant 0 : index
    %433 = vector.load %arg22[%c0_165, %c0_166, %c0_167] : memref<2x1x96xf32, #tpu.memory_space<vmem>>, vector<1x1x96xf32>
    %434 = vector.shape_cast %433 : vector<1x1x96xf32> to vector<1x96xf32>
    %435 = vector.extract_strided_slice %432 {offsets = [0, 0], sizes = [32, 32], strides = [1, 1]} : vector<32x96xf32> to vector<32x32xf32>
    %cst_168 = arith.constant dense<0.000000e+00> : vector<16x32xf32>
    %436 = tpu.matmul %430, %435, %cst_168 {dimension_numbers = #tpu.dot_dimension_numbers<[1], [0], [0], [1], [0, 0, 1, 1], [], []>} : vector<16x32xf32>, vector<32x32xf32>, vector<16x32xf32> -> vector<16x32xf32>
    %437 = vector.extract_strided_slice %434 {offsets = [0, 0], sizes = [1, 32], strides = [1, 1]} : vector<1x96xf32> to vector<1x32xf32>
    %438 = vector.broadcast %437 : vector<1x32xf32> to vector<16x32xf32>
    %439 = arith.addf %436, %438 : vector<16x32xf32>
    %440 = vector.extract_strided_slice %432 {offsets = [0, 32], sizes = [32, 64], strides = [1, 1]} : vector<32x96xf32> to vector<32x64xf32>
    %cst_169 = arith.constant dense<0.000000e+00> : vector<16x64xf32>
    %441 = tpu.matmul %327, %440, %cst_169 {dimension_numbers = #tpu.dot_dimension_numbers<[1], [0], [0], [1], [0, 0, 1, 1], [], []>} : vector<16x32xf32>, vector<32x64xf32>, vector<16x64xf32> -> vector<16x64xf32>
    %442 = vector.extract_strided_slice %434 {offsets = [0, 32], sizes = [1, 64], strides = [1, 1]} : vector<1x96xf32> to vector<1x64xf32>
    %443 = vector.broadcast %442 : vector<1x64xf32> to vector<16x64xf32>
    %444 = arith.addf %441, %443 : vector<16x64xf32>
    %445 = vector.extract_strided_slice %444 {offsets = [0, 0], sizes = [16, 32], strides = [1, 1]} : vector<16x64xf32> to vector<16x32xf32>
    %446 = vector.extract_strided_slice %444 {offsets = [0, 32], sizes = [16, 32], strides = [1, 1]} : vector<16x64xf32> to vector<16x32xf32>
    %c0_170 = arith.constant 0 : index
    %c0_171 = arith.constant 0 : index
    %c0_172 = arith.constant 0 : index
    %447 = vector.load %arg23[%c0_170, %c0_171, %c0_172] : memref<2x32x32xf32, #tpu.memory_space<vmem>>, vector<1x32x32xf32>
    %448 = vector.shape_cast %447 : vector<1x32x32xf32> to vector<32x32xf32>
    %449 = vector.extract_strided_slice %439 {offsets = [0, 0], sizes = [16, 8], strides = [1, 1]} : vector<16x32xf32> to vector<16x8xf32>
    %450 = vector.shape_cast %449 : vector<16x8xf32> to vector<2x8x8xf32>
    %451 = vector.extract_strided_slice %439 {offsets = [0, 8], sizes = [16, 8], strides = [1, 1]} : vector<16x32xf32> to vector<16x8xf32>
    %452 = vector.shape_cast %451 : vector<16x8xf32> to vector<2x8x8xf32>
    %453 = vector.extract_strided_slice %439 {offsets = [0, 16], sizes = [16, 8], strides = [1, 1]} : vector<16x32xf32> to vector<16x8xf32>
    %454 = vector.shape_cast %453 : vector<16x8xf32> to vector<2x8x8xf32>
    %455 = vector.extract_strided_slice %439 {offsets = [0, 24], sizes = [16, 8], strides = [1, 1]} : vector<16x32xf32> to vector<16x8xf32>
    %456 = vector.shape_cast %455 : vector<16x8xf32> to vector<2x8x8xf32>
    %457 = tpu.concatenate %450, %452, %454, %456 in 0 : vector<2x8x8xf32>, vector<2x8x8xf32>, vector<2x8x8xf32>, vector<2x8x8xf32> -> vector<8x8x8xf32>
    %458 = vector.extract_strided_slice %445 {offsets = [0, 0], sizes = [16, 8], strides = [1, 1]} : vector<16x32xf32> to vector<16x8xf32>
    %459 = vector.shape_cast %458 : vector<16x8xf32> to vector<2x8x8xf32>
    %460 = vector.extract_strided_slice %445 {offsets = [0, 8], sizes = [16, 8], strides = [1, 1]} : vector<16x32xf32> to vector<16x8xf32>
    %461 = vector.shape_cast %460 : vector<16x8xf32> to vector<2x8x8xf32>
    %462 = vector.extract_strided_slice %445 {offsets = [0, 16], sizes = [16, 8], strides = [1, 1]} : vector<16x32xf32> to vector<16x8xf32>
    %463 = vector.shape_cast %462 : vector<16x8xf32> to vector<2x8x8xf32>
    %464 = vector.extract_strided_slice %445 {offsets = [0, 24], sizes = [16, 8], strides = [1, 1]} : vector<16x32xf32> to vector<16x8xf32>
    %465 = vector.shape_cast %464 : vector<16x8xf32> to vector<2x8x8xf32>
    %466 = tpu.concatenate %459, %461, %463, %465 in 0 : vector<2x8x8xf32>, vector<2x8x8xf32>, vector<2x8x8xf32>, vector<2x8x8xf32> -> vector<8x8x8xf32>
    %467 = vector.extract_strided_slice %446 {offsets = [0, 0], sizes = [16, 8], strides = [1, 1]} : vector<16x32xf32> to vector<16x8xf32>
    %468 = vector.shape_cast %467 : vector<16x8xf32> to vector<2x8x8xf32>
    %469 = vector.extract_strided_slice %446 {offsets = [0, 8], sizes = [16, 8], strides = [1, 1]} : vector<16x32xf32> to vector<16x8xf32>
    %470 = vector.shape_cast %469 : vector<16x8xf32> to vector<2x8x8xf32>
    %471 = vector.extract_strided_slice %446 {offsets = [0, 16], sizes = [16, 8], strides = [1, 1]} : vector<16x32xf32> to vector<16x8xf32>
    %472 = vector.shape_cast %471 : vector<16x8xf32> to vector<2x8x8xf32>
    %473 = vector.extract_strided_slice %446 {offsets = [0, 24], sizes = [16, 8], strides = [1, 1]} : vector<16x32xf32> to vector<16x8xf32>
    %474 = vector.shape_cast %473 : vector<16x8xf32> to vector<2x8x8xf32>
    %475 = tpu.concatenate %468, %470, %472, %474 in 0 : vector<2x8x8xf32>, vector<2x8x8xf32>, vector<2x8x8xf32>, vector<2x8x8xf32> -> vector<8x8x8xf32>
    "tpu.trace_start"() <{level = 10 : i32, message = "bqd,bkd->bqk"}> : () -> ()
    %cst_173 = arith.constant dense<0.000000e+00> : vector<8x8x8xf32>
    %476 = tpu.matmul %457, %466, %cst_173 {dimension_numbers = #tpu.dot_dimension_numbers<[2], [2], [1], [1], [0, 0, 0, 1, 1, 1], [0], [0]>} : vector<8x8x8xf32>, vector<8x8x8xf32>, vector<8x8x8xf32> -> vector<8x8x8xf32>
    "tpu.trace_stop"() : () -> ()
    %cst_174 = arith.constant dense<0xFF800000> : vector<8x8xf32>
    %477 = vector.multi_reduction <maximumf>, %476, %cst_174 [2] : vector<8x8x8xf32> to vector<8x8xf32>
    %478 = vector.shape_cast %477 : vector<8x8xf32> to vector<8x8x1xf32>
    %479 = vector.broadcast %478 : vector<8x8x1xf32> to vector<8x8x8xf32>
    %480 = arith.subf %476, %479 : vector<8x8x8xf32>
    %481 = math.exp %480 : vector<8x8x8xf32>
    %cst_175 = arith.constant dense<0.000000e+00> : vector<8x8xf32>
    %482 = vector.multi_reduction <add>, %481, %cst_175 [2] : vector<8x8x8xf32> to vector<8x8xf32>
    %483 = vector.shape_cast %482 : vector<8x8xf32> to vector<8x8x1xf32>
    %484 = tpu.reciprocal %483 {approx = true} : vector<8x8x1xf32> -> vector<8x8x1xf32>
    %485 = vector.broadcast %484 : vector<8x8x1xf32> to vector<8x8x8xf32>
    %486 = arith.mulf %481, %485 : vector<8x8x8xf32>
    "tpu.trace_start"() <{level = 10 : i32, message = "bqk,bkd->bqd"}> : () -> ()
    %cst_176 = arith.constant dense<0.000000e+00> : vector<8x8x8xf32>
    %487 = tpu.matmul %486, %475, %cst_176 {dimension_numbers = #tpu.dot_dimension_numbers<[2], [1], [1], [2], [0, 0, 0, 1, 1, 2], [0], [0]>} : vector<8x8x8xf32>, vector<8x8x8xf32>, vector<8x8x8xf32> -> vector<8x8x8xf32>
    "tpu.trace_stop"() : () -> ()
    %488 = vector.extract_strided_slice %487 {offsets = [0, 0, 0], sizes = [2, 8, 8], strides = [1, 1, 1]} : vector<8x8x8xf32> to vector<2x8x8xf32>
    %489 = vector.shape_cast %488 : vector<2x8x8xf32> to vector<16x8xf32>
    %490 = vector.extract_strided_slice %448 {offsets = [0, 0], sizes = [8, 32], strides = [1, 1]} : vector<32x32xf32> to vector<8x32xf32>
    %cst_177 = arith.constant dense<0.000000e+00> : vector<16x32xf32>
    %491 = tpu.matmul %489, %490, %cst_177 {dimension_numbers = #tpu.dot_dimension_numbers<[1], [0], [0], [1], [0, 0, 1, 1], [], []>} : vector<16x8xf32>, vector<8x32xf32>, vector<16x32xf32> -> vector<16x32xf32>
    %492 = vector.extract_strided_slice %487 {offsets = [2, 0, 0], sizes = [2, 8, 8], strides = [1, 1, 1]} : vector<8x8x8xf32> to vector<2x8x8xf32>
    %493 = vector.shape_cast %492 : vector<2x8x8xf32> to vector<16x8xf32>
    %494 = vector.extract_strided_slice %448 {offsets = [8, 0], sizes = [8, 32], strides = [1, 1]} : vector<32x32xf32> to vector<8x32xf32>
    %cst_178 = arith.constant dense<0.000000e+00> : vector<16x32xf32>
    %495 = tpu.matmul %493, %494, %cst_178 {dimension_numbers = #tpu.dot_dimension_numbers<[1], [0], [0], [1], [0, 0, 1, 1], [], []>} : vector<16x8xf32>, vector<8x32xf32>, vector<16x32xf32> -> vector<16x32xf32>
    %496 = arith.addf %491, %495 : vector<16x32xf32>
    %497 = vector.extract_strided_slice %487 {offsets = [4, 0, 0], sizes = [2, 8, 8], strides = [1, 1, 1]} : vector<8x8x8xf32> to vector<2x8x8xf32>
    %498 = vector.shape_cast %497 : vector<2x8x8xf32> to vector<16x8xf32>
    %499 = vector.extract_strided_slice %448 {offsets = [16, 0], sizes = [8, 32], strides = [1, 1]} : vector<32x32xf32> to vector<8x32xf32>
    %cst_179 = arith.constant dense<0.000000e+00> : vector<16x32xf32>
    %500 = tpu.matmul %498, %499, %cst_179 {dimension_numbers = #tpu.dot_dimension_numbers<[1], [0], [0], [1], [0, 0, 1, 1], [], []>} : vector<16x8xf32>, vector<8x32xf32>, vector<16x32xf32> -> vector<16x32xf32>
    %501 = arith.addf %496, %500 : vector<16x32xf32>
    %502 = vector.extract_strided_slice %487 {offsets = [6, 0, 0], sizes = [2, 8, 8], strides = [1, 1, 1]} : vector<8x8x8xf32> to vector<2x8x8xf32>
    %503 = vector.shape_cast %502 : vector<2x8x8xf32> to vector<16x8xf32>
    %504 = vector.extract_strided_slice %448 {offsets = [24, 0], sizes = [8, 32], strides = [1, 1]} : vector<32x32xf32> to vector<8x32xf32>
    %cst_180 = arith.constant dense<0.000000e+00> : vector<16x32xf32>
    %505 = tpu.matmul %503, %504, %cst_180 {dimension_numbers = #tpu.dot_dimension_numbers<[1], [0], [0], [1], [0, 0, 1, 1], [], []>} : vector<16x8xf32>, vector<8x32xf32>, vector<16x32xf32> -> vector<16x32xf32>
    %506 = arith.addf %501, %505 : vector<16x32xf32>
    %c0_181 = arith.constant 0 : index
    %c0_182 = arith.constant 0 : index
    %c0_183 = arith.constant 0 : index
    %507 = vector.load %arg24[%c0_181, %c0_182, %c0_183] : memref<2x1x32xf32, #tpu.memory_space<vmem>>, vector<1x1x32xf32>
    %508 = vector.shape_cast %507 : vector<1x1x32xf32> to vector<1x32xf32>
    %509 = vector.broadcast %508 : vector<1x32xf32> to vector<16x32xf32>
    %510 = arith.addf %506, %509 : vector<16x32xf32>
    %511 = arith.addf %430, %510 : vector<16x32xf32>
    %c0_184 = arith.constant 0 : index
    %c0_185 = arith.constant 0 : index
    %c0_186 = arith.constant 0 : index
    %512 = vector.load %arg31[%c0_184, %c0_185, %c0_186] : memref<2x1x32xf32, #tpu.memory_space<vmem>>, vector<1x1x32xf32>
    %513 = vector.shape_cast %512 : vector<1x1x32xf32> to vector<1x32xf32>
    %c0_187 = arith.constant 0 : index
    %c0_188 = arith.constant 0 : index
    %c0_189 = arith.constant 0 : index
    %514 = vector.load %arg32[%c0_187, %c0_188, %c0_189] : memref<2x1x32xf32, #tpu.memory_space<vmem>>, vector<1x1x32xf32>
    %515 = vector.shape_cast %514 : vector<1x1x32xf32> to vector<1x32xf32>
    %cst_190 = arith.constant dense<0.000000e+00> : vector<16xf32>
    %516 = vector.multi_reduction <add>, %511, %cst_190 [1] : vector<16x32xf32> to vector<16xf32>
    %517 = vector.shape_cast %516 : vector<16xf32> to vector<16x1xf32>
    %cst_191 = arith.constant 3.200000e+01 : f32
    %518 = vector.broadcast %cst_191 : f32 to vector<16x1xf32>
    %519 = arith.divf %517, %518 : vector<16x1xf32>
    %520 = vector.broadcast %519 : vector<16x1xf32> to vector<16x32xf32>
    %521 = arith.subf %511, %520 : vector<16x32xf32>
    %522 = arith.mulf %521, %521 : vector<16x32xf32>
    %cst_192 = arith.constant dense<0.000000e+00> : vector<16xf32>
    %523 = vector.multi_reduction <add>, %522, %cst_192 [1] : vector<16x32xf32> to vector<16xf32>
    %524 = vector.shape_cast %523 : vector<16xf32> to vector<16x1xf32>
    %cst_193 = arith.constant 3.200000e+01 : f32
    %525 = vector.broadcast %cst_193 : f32 to vector<16x1xf32>
    %526 = arith.divf %524, %525 : vector<16x1xf32>
    %527 = vector.broadcast %519 : vector<16x1xf32> to vector<16x32xf32>
    %528 = arith.subf %511, %527 : vector<16x32xf32>
    %cst_194 = arith.constant 9.99999974E-6 : f32
    %529 = vector.broadcast %cst_194 : f32 to vector<16x1xf32>
    %530 = arith.addf %526, %529 : vector<16x1xf32>
    %531 = math.rsqrt %530 : vector<16x1xf32>
    %532 = vector.broadcast %531 : vector<16x1xf32> to vector<16x32xf32>
    %533 = arith.mulf %528, %532 : vector<16x32xf32>
    %534 = vector.broadcast %513 : vector<1x32xf32> to vector<16x32xf32>
    %535 = arith.mulf %533, %534 : vector<16x32xf32>
    %536 = vector.broadcast %515 : vector<1x32xf32> to vector<16x32xf32>
    %537 = arith.addf %535, %536 : vector<16x32xf32>
    %c0_195 = arith.constant 0 : index
    %c0_196 = arith.constant 0 : index
    %c0_197 = arith.constant 0 : index
    %538 = vector.load %arg25[%c0_195, %c0_196, %c0_197] : memref<2x32x128xf32, #tpu.memory_space<vmem>>, vector<1x32x128xf32>
    %539 = vector.shape_cast %538 : vector<1x32x128xf32> to vector<32x128xf32>
    %cst_198 = arith.constant dense<0.000000e+00> : vector<16x128xf32>
    %540 = tpu.matmul %537, %539, %cst_198 {dimension_numbers = #tpu.dot_dimension_numbers<[1], [0], [0], [1], [0, 0, 1, 1], [], []>} : vector<16x32xf32>, vector<32x128xf32>, vector<16x128xf32> -> vector<16x128xf32>
    %c0_199 = arith.constant 0 : index
    %c0_200 = arith.constant 0 : index
    %c0_201 = arith.constant 0 : index
    %541 = vector.load %arg26[%c0_199, %c0_200, %c0_201] : memref<2x1x128xf32, #tpu.memory_space<vmem>>, vector<1x1x128xf32>
    %542 = vector.shape_cast %541 : vector<1x1x128xf32> to vector<1x128xf32>
    %543 = vector.broadcast %542 : vector<1x128xf32> to vector<16x128xf32>
    %544 = arith.addf %540, %543 : vector<16x128xf32>
    %cst_202 = arith.constant 0.000000e+00 : f32
    %545 = vector.broadcast %cst_202 : f32 to vector<16x128xf32>
    %546 = arith.maximumf %544, %545 : vector<16x128xf32>
    %c0_203 = arith.constant 0 : index
    %c0_204 = arith.constant 0 : index
    %c0_205 = arith.constant 0 : index
    %547 = vector.load %arg27[%c0_203, %c0_204, %c0_205] : memref<2x128x32xf32, #tpu.memory_space<vmem>>, vector<1x128x32xf32>
    %548 = vector.shape_cast %547 : vector<1x128x32xf32> to vector<128x32xf32>
    %cst_206 = arith.constant dense<0.000000e+00> : vector<16x32xf32>
    %549 = tpu.matmul %546, %548, %cst_206 {dimension_numbers = #tpu.dot_dimension_numbers<[1], [0], [0], [1], [0, 0, 1, 1], [], []>} : vector<16x128xf32>, vector<128x32xf32>, vector<16x32xf32> -> vector<16x32xf32>
    %c0_207 = arith.constant 0 : index
    %c0_208 = arith.constant 0 : index
    %c0_209 = arith.constant 0 : index
    %550 = vector.load %arg28[%c0_207, %c0_208, %c0_209] : memref<2x1x32xf32, #tpu.memory_space<vmem>>, vector<1x1x32xf32>
    %551 = vector.shape_cast %550 : vector<1x1x32xf32> to vector<1x32xf32>
    %552 = vector.broadcast %551 : vector<1x32xf32> to vector<16x32xf32>
    %553 = arith.addf %549, %552 : vector<16x32xf32>
    %554 = arith.addf %537, %553 : vector<16x32xf32>
    %c0_210 = arith.constant 0 : index
    %c0_211 = arith.constant 0 : index
    %c0_212 = arith.constant 0 : index
    %555 = vector.load %arg33[%c0_210, %c0_211, %c0_212] : memref<2x1x32xf32, #tpu.memory_space<vmem>>, vector<1x1x32xf32>
    %556 = vector.shape_cast %555 : vector<1x1x32xf32> to vector<1x32xf32>
    %c0_213 = arith.constant 0 : index
    %c0_214 = arith.constant 0 : index
    %c0_215 = arith.constant 0 : index
    %557 = vector.load %arg34[%c0_213, %c0_214, %c0_215] : memref<2x1x32xf32, #tpu.memory_space<vmem>>, vector<1x1x32xf32>
    %558 = vector.shape_cast %557 : vector<1x1x32xf32> to vector<1x32xf32>
    %cst_216 = arith.constant dense<0.000000e+00> : vector<16xf32>
    %559 = vector.multi_reduction <add>, %554, %cst_216 [1] : vector<16x32xf32> to vector<16xf32>
    %560 = vector.shape_cast %559 : vector<16xf32> to vector<16x1xf32>
    %cst_217 = arith.constant 3.200000e+01 : f32
    %561 = vector.broadcast %cst_217 : f32 to vector<16x1xf32>
    %562 = arith.divf %560, %561 : vector<16x1xf32>
    %563 = vector.broadcast %562 : vector<16x1xf32> to vector<16x32xf32>
    %564 = arith.subf %554, %563 : vector<16x32xf32>
    %565 = arith.mulf %564, %564 : vector<16x32xf32>
    %cst_218 = arith.constant dense<0.000000e+00> : vector<16xf32>
    %566 = vector.multi_reduction <add>, %565, %cst_218 [1] : vector<16x32xf32> to vector<16xf32>
    %567 = vector.shape_cast %566 : vector<16xf32> to vector<16x1xf32>
    %cst_219 = arith.constant 3.200000e+01 : f32
    %568 = vector.broadcast %cst_219 : f32 to vector<16x1xf32>
    %569 = arith.divf %567, %568 : vector<16x1xf32>
    %570 = vector.broadcast %562 : vector<16x1xf32> to vector<16x32xf32>
    %571 = arith.subf %554, %570 : vector<16x32xf32>
    %cst_220 = arith.constant 9.99999974E-6 : f32
    %572 = vector.broadcast %cst_220 : f32 to vector<16x1xf32>
    %573 = arith.addf %569, %572 : vector<16x1xf32>
    %574 = math.rsqrt %573 : vector<16x1xf32>
    %575 = vector.broadcast %574 : vector<16x1xf32> to vector<16x32xf32>
    %576 = arith.mulf %571, %575 : vector<16x32xf32>
    %577 = vector.broadcast %556 : vector<1x32xf32> to vector<16x32xf32>
    %578 = arith.mulf %576, %577 : vector<16x32xf32>
    %579 = vector.broadcast %558 : vector<1x32xf32> to vector<16x32xf32>
    %580 = arith.addf %578, %579 : vector<16x32xf32>
    %c1_221 = arith.constant 1 : index
    %c0_222 = arith.constant 0 : index
    %c0_223 = arith.constant 0 : index
    %581 = vector.load %arg17[%c1_221, %c0_222, %c0_223] : memref<2x32x96xf32, #tpu.memory_space<vmem>>, vector<1x32x96xf32>
    %582 = vector.shape_cast %581 : vector<1x32x96xf32> to vector<32x96xf32>
    %cst_224 = arith.constant dense<0.000000e+00> : vector<16x96xf32>
    %583 = tpu.matmul %580, %582, %cst_224 {dimension_numbers = #tpu.dot_dimension_numbers<[1], [0], [0], [1], [0, 0, 1, 1], [], []>} : vector<16x32xf32>, vector<32x96xf32>, vector<16x96xf32> -> vector<16x96xf32>
    %c1_225 = arith.constant 1 : index
    %c0_226 = arith.constant 0 : index
    %c0_227 = arith.constant 0 : index
    %584 = vector.load %arg18[%c1_225, %c0_226, %c0_227] : memref<2x1x96xf32, #tpu.memory_space<vmem>>, vector<1x1x96xf32>
    %585 = vector.shape_cast %584 : vector<1x1x96xf32> to vector<1x96xf32>
    %586 = vector.broadcast %585 : vector<1x96xf32> to vector<16x96xf32>
    %587 = arith.addf %583, %586 : vector<16x96xf32>
    %588 = vector.extract_strided_slice %587 {offsets = [0, 0], sizes = [16, 32], strides = [1, 1]} : vector<16x96xf32> to vector<16x32xf32>
    %589 = vector.extract_strided_slice %587 {offsets = [0, 32], sizes = [16, 32], strides = [1, 1]} : vector<16x96xf32> to vector<16x32xf32>
    %590 = vector.extract_strided_slice %587 {offsets = [0, 64], sizes = [16, 32], strides = [1, 1]} : vector<16x96xf32> to vector<16x32xf32>
    %c1_228 = arith.constant 1 : index
    %c0_229 = arith.constant 0 : index
    %c0_230 = arith.constant 0 : index
    %591 = vector.load %arg19[%c1_228, %c0_229, %c0_230] : memref<2x32x32xf32, #tpu.memory_space<vmem>>, vector<1x32x32xf32>
    %592 = vector.shape_cast %591 : vector<1x32x32xf32> to vector<32x32xf32>
    %593 = vector.extract_strided_slice %588 {offsets = [0, 0], sizes = [16, 8], strides = [1, 1]} : vector<16x32xf32> to vector<16x8xf32>
    %594 = vector.shape_cast %593 : vector<16x8xf32> to vector<2x8x8xf32>
    %595 = vector.extract_strided_slice %588 {offsets = [0, 8], sizes = [16, 8], strides = [1, 1]} : vector<16x32xf32> to vector<16x8xf32>
    %596 = vector.shape_cast %595 : vector<16x8xf32> to vector<2x8x8xf32>
    %597 = vector.extract_strided_slice %588 {offsets = [0, 16], sizes = [16, 8], strides = [1, 1]} : vector<16x32xf32> to vector<16x8xf32>
    %598 = vector.shape_cast %597 : vector<16x8xf32> to vector<2x8x8xf32>
    %599 = vector.extract_strided_slice %588 {offsets = [0, 24], sizes = [16, 8], strides = [1, 1]} : vector<16x32xf32> to vector<16x8xf32>
    %600 = vector.shape_cast %599 : vector<16x8xf32> to vector<2x8x8xf32>
    %601 = tpu.concatenate %594, %596, %598, %600 in 0 : vector<2x8x8xf32>, vector<2x8x8xf32>, vector<2x8x8xf32>, vector<2x8x8xf32> -> vector<8x8x8xf32>
    %602 = vector.extract_strided_slice %589 {offsets = [0, 0], sizes = [16, 8], strides = [1, 1]} : vector<16x32xf32> to vector<16x8xf32>
    %603 = vector.shape_cast %602 : vector<16x8xf32> to vector<2x8x8xf32>
    %604 = vector.extract_strided_slice %589 {offsets = [0, 8], sizes = [16, 8], strides = [1, 1]} : vector<16x32xf32> to vector<16x8xf32>
    %605 = vector.shape_cast %604 : vector<16x8xf32> to vector<2x8x8xf32>
    %606 = vector.extract_strided_slice %589 {offsets = [0, 16], sizes = [16, 8], strides = [1, 1]} : vector<16x32xf32> to vector<16x8xf32>
    %607 = vector.shape_cast %606 : vector<16x8xf32> to vector<2x8x8xf32>
    %608 = vector.extract_strided_slice %589 {offsets = [0, 24], sizes = [16, 8], strides = [1, 1]} : vector<16x32xf32> to vector<16x8xf32>
    %609 = vector.shape_cast %608 : vector<16x8xf32> to vector<2x8x8xf32>
    %610 = tpu.concatenate %603, %605, %607, %609 in 0 : vector<2x8x8xf32>, vector<2x8x8xf32>, vector<2x8x8xf32>, vector<2x8x8xf32> -> vector<8x8x8xf32>
    %611 = vector.extract_strided_slice %590 {offsets = [0, 0], sizes = [16, 8], strides = [1, 1]} : vector<16x32xf32> to vector<16x8xf32>
    %612 = vector.shape_cast %611 : vector<16x8xf32> to vector<2x8x8xf32>
    %613 = vector.extract_strided_slice %590 {offsets = [0, 8], sizes = [16, 8], strides = [1, 1]} : vector<16x32xf32> to vector<16x8xf32>
    %614 = vector.shape_cast %613 : vector<16x8xf32> to vector<2x8x8xf32>
    %615 = vector.extract_strided_slice %590 {offsets = [0, 16], sizes = [16, 8], strides = [1, 1]} : vector<16x32xf32> to vector<16x8xf32>
    %616 = vector.shape_cast %615 : vector<16x8xf32> to vector<2x8x8xf32>
    %617 = vector.extract_strided_slice %590 {offsets = [0, 24], sizes = [16, 8], strides = [1, 1]} : vector<16x32xf32> to vector<16x8xf32>
    %618 = vector.shape_cast %617 : vector<16x8xf32> to vector<2x8x8xf32>
    %619 = tpu.concatenate %612, %614, %616, %618 in 0 : vector<2x8x8xf32>, vector<2x8x8xf32>, vector<2x8x8xf32>, vector<2x8x8xf32> -> vector<8x8x8xf32>
    "tpu.trace_start"() <{level = 10 : i32, message = "bqd,bkd->bqk"}> : () -> ()
    %cst_231 = arith.constant dense<0.000000e+00> : vector<8x8x8xf32>
    %620 = tpu.matmul %601, %610, %cst_231 {dimension_numbers = #tpu.dot_dimension_numbers<[2], [2], [1], [1], [0, 0, 0, 1, 1, 1], [0], [0]>} : vector<8x8x8xf32>, vector<8x8x8xf32>, vector<8x8x8xf32> -> vector<8x8x8xf32>
    "tpu.trace_stop"() : () -> ()
    %621 = arith.addf %620, %12 : vector<8x8x8xf32>
    %cst_232 = arith.constant dense<0xFF800000> : vector<8x8xf32>
    %622 = vector.multi_reduction <maximumf>, %621, %cst_232 [2] : vector<8x8x8xf32> to vector<8x8xf32>
    %623 = vector.shape_cast %622 : vector<8x8xf32> to vector<8x8x1xf32>
    %624 = vector.broadcast %623 : vector<8x8x1xf32> to vector<8x8x8xf32>
    %625 = arith.subf %621, %624 : vector<8x8x8xf32>
    %626 = math.exp %625 : vector<8x8x8xf32>
    %cst_233 = arith.constant dense<0.000000e+00> : vector<8x8xf32>
    %627 = vector.multi_reduction <add>, %626, %cst_233 [2] : vector<8x8x8xf32> to vector<8x8xf32>
    %628 = vector.shape_cast %627 : vector<8x8xf32> to vector<8x8x1xf32>
    %629 = tpu.reciprocal %628 {approx = true} : vector<8x8x1xf32> -> vector<8x8x1xf32>
    %630 = vector.broadcast %629 : vector<8x8x1xf32> to vector<8x8x8xf32>
    %631 = arith.mulf %626, %630 : vector<8x8x8xf32>
    "tpu.trace_start"() <{level = 10 : i32, message = "bqk,bkd->bqd"}> : () -> ()
    %cst_234 = arith.constant dense<0.000000e+00> : vector<8x8x8xf32>
    %632 = tpu.matmul %631, %619, %cst_234 {dimension_numbers = #tpu.dot_dimension_numbers<[2], [1], [1], [2], [0, 0, 0, 1, 1, 2], [0], [0]>} : vector<8x8x8xf32>, vector<8x8x8xf32>, vector<8x8x8xf32> -> vector<8x8x8xf32>
    "tpu.trace_stop"() : () -> ()
    %633 = vector.extract_strided_slice %632 {offsets = [0, 0, 0], sizes = [2, 8, 8], strides = [1, 1, 1]} : vector<8x8x8xf32> to vector<2x8x8xf32>
    %634 = vector.shape_cast %633 : vector<2x8x8xf32> to vector<16x8xf32>
    %635 = vector.extract_strided_slice %592 {offsets = [0, 0], sizes = [8, 32], strides = [1, 1]} : vector<32x32xf32> to vector<8x32xf32>
    %cst_235 = arith.constant dense<0.000000e+00> : vector<16x32xf32>
    %636 = tpu.matmul %634, %635, %cst_235 {dimension_numbers = #tpu.dot_dimension_numbers<[1], [0], [0], [1], [0, 0, 1, 1], [], []>} : vector<16x8xf32>, vector<8x32xf32>, vector<16x32xf32> -> vector<16x32xf32>
    %637 = vector.extract_strided_slice %632 {offsets = [2, 0, 0], sizes = [2, 8, 8], strides = [1, 1, 1]} : vector<8x8x8xf32> to vector<2x8x8xf32>
    %638 = vector.shape_cast %637 : vector<2x8x8xf32> to vector<16x8xf32>
    %639 = vector.extract_strided_slice %592 {offsets = [8, 0], sizes = [8, 32], strides = [1, 1]} : vector<32x32xf32> to vector<8x32xf32>
    %cst_236 = arith.constant dense<0.000000e+00> : vector<16x32xf32>
    %640 = tpu.matmul %638, %639, %cst_236 {dimension_numbers = #tpu.dot_dimension_numbers<[1], [0], [0], [1], [0, 0, 1, 1], [], []>} : vector<16x8xf32>, vector<8x32xf32>, vector<16x32xf32> -> vector<16x32xf32>
    %641 = arith.addf %636, %640 : vector<16x32xf32>
    %642 = vector.extract_strided_slice %632 {offsets = [4, 0, 0], sizes = [2, 8, 8], strides = [1, 1, 1]} : vector<8x8x8xf32> to vector<2x8x8xf32>
    %643 = vector.shape_cast %642 : vector<2x8x8xf32> to vector<16x8xf32>
    %644 = vector.extract_strided_slice %592 {offsets = [16, 0], sizes = [8, 32], strides = [1, 1]} : vector<32x32xf32> to vector<8x32xf32>
    %cst_237 = arith.constant dense<0.000000e+00> : vector<16x32xf32>
    %645 = tpu.matmul %643, %644, %cst_237 {dimension_numbers = #tpu.dot_dimension_numbers<[1], [0], [0], [1], [0, 0, 1, 1], [], []>} : vector<16x8xf32>, vector<8x32xf32>, vector<16x32xf32> -> vector<16x32xf32>
    %646 = arith.addf %641, %645 : vector<16x32xf32>
    %647 = vector.extract_strided_slice %632 {offsets = [6, 0, 0], sizes = [2, 8, 8], strides = [1, 1, 1]} : vector<8x8x8xf32> to vector<2x8x8xf32>
    %648 = vector.shape_cast %647 : vector<2x8x8xf32> to vector<16x8xf32>
    %649 = vector.extract_strided_slice %592 {offsets = [24, 0], sizes = [8, 32], strides = [1, 1]} : vector<32x32xf32> to vector<8x32xf32>
    %cst_238 = arith.constant dense<0.000000e+00> : vector<16x32xf32>
    %650 = tpu.matmul %648, %649, %cst_238 {dimension_numbers = #tpu.dot_dimension_numbers<[1], [0], [0], [1], [0, 0, 1, 1], [], []>} : vector<16x8xf32>, vector<8x32xf32>, vector<16x32xf32> -> vector<16x32xf32>
    %651 = arith.addf %646, %650 : vector<16x32xf32>
    %c1_239 = arith.constant 1 : index
    %c0_240 = arith.constant 0 : index
    %c0_241 = arith.constant 0 : index
    %652 = vector.load %arg20[%c1_239, %c0_240, %c0_241] : memref<2x1x32xf32, #tpu.memory_space<vmem>>, vector<1x1x32xf32>
    %653 = vector.shape_cast %652 : vector<1x1x32xf32> to vector<1x32xf32>
    %654 = vector.broadcast %653 : vector<1x32xf32> to vector<16x32xf32>
    %655 = arith.addf %651, %654 : vector<16x32xf32>
    %656 = arith.addf %580, %655 : vector<16x32xf32>
    %c1_242 = arith.constant 1 : index
    %c0_243 = arith.constant 0 : index
    %c0_244 = arith.constant 0 : index
    %657 = vector.load %arg29[%c1_242, %c0_243, %c0_244] : memref<2x1x32xf32, #tpu.memory_space<vmem>>, vector<1x1x32xf32>
    %658 = vector.shape_cast %657 : vector<1x1x32xf32> to vector<1x32xf32>
    %c1_245 = arith.constant 1 : index
    %c0_246 = arith.constant 0 : index
    %c0_247 = arith.constant 0 : index
    %659 = vector.load %arg30[%c1_245, %c0_246, %c0_247] : memref<2x1x32xf32, #tpu.memory_space<vmem>>, vector<1x1x32xf32>
    %660 = vector.shape_cast %659 : vector<1x1x32xf32> to vector<1x32xf32>
    %cst_248 = arith.constant dense<0.000000e+00> : vector<16xf32>
    %661 = vector.multi_reduction <add>, %656, %cst_248 [1] : vector<16x32xf32> to vector<16xf32>
    %662 = vector.shape_cast %661 : vector<16xf32> to vector<16x1xf32>
    %cst_249 = arith.constant 3.200000e+01 : f32
    %663 = vector.broadcast %cst_249 : f32 to vector<16x1xf32>
    %664 = arith.divf %662, %663 : vector<16x1xf32>
    %665 = vector.broadcast %664 : vector<16x1xf32> to vector<16x32xf32>
    %666 = arith.subf %656, %665 : vector<16x32xf32>
    %667 = arith.mulf %666, %666 : vector<16x32xf32>
    %cst_250 = arith.constant dense<0.000000e+00> : vector<16xf32>
    %668 = vector.multi_reduction <add>, %667, %cst_250 [1] : vector<16x32xf32> to vector<16xf32>
    %669 = vector.shape_cast %668 : vector<16xf32> to vector<16x1xf32>
    %cst_251 = arith.constant 3.200000e+01 : f32
    %670 = vector.broadcast %cst_251 : f32 to vector<16x1xf32>
    %671 = arith.divf %669, %670 : vector<16x1xf32>
    %672 = vector.broadcast %664 : vector<16x1xf32> to vector<16x32xf32>
    %673 = arith.subf %656, %672 : vector<16x32xf32>
    %cst_252 = arith.constant 9.99999974E-6 : f32
    %674 = vector.broadcast %cst_252 : f32 to vector<16x1xf32>
    %675 = arith.addf %671, %674 : vector<16x1xf32>
    %676 = math.rsqrt %675 : vector<16x1xf32>
    %677 = vector.broadcast %676 : vector<16x1xf32> to vector<16x32xf32>
    %678 = arith.mulf %673, %677 : vector<16x32xf32>
    %679 = vector.broadcast %658 : vector<1x32xf32> to vector<16x32xf32>
    %680 = arith.mulf %678, %679 : vector<16x32xf32>
    %681 = vector.broadcast %660 : vector<1x32xf32> to vector<16x32xf32>
    %682 = arith.addf %680, %681 : vector<16x32xf32>
    %c1_253 = arith.constant 1 : index
    %c0_254 = arith.constant 0 : index
    %c0_255 = arith.constant 0 : index
    %683 = vector.load %arg21[%c1_253, %c0_254, %c0_255] : memref<2x32x96xf32, #tpu.memory_space<vmem>>, vector<1x32x96xf32>
    %684 = vector.shape_cast %683 : vector<1x32x96xf32> to vector<32x96xf32>
    %c1_256 = arith.constant 1 : index
    %c0_257 = arith.constant 0 : index
    %c0_258 = arith.constant 0 : index
    %685 = vector.load %arg22[%c1_256, %c0_257, %c0_258] : memref<2x1x96xf32, #tpu.memory_space<vmem>>, vector<1x1x96xf32>
    %686 = vector.shape_cast %685 : vector<1x1x96xf32> to vector<1x96xf32>
    %687 = vector.extract_strided_slice %684 {offsets = [0, 0], sizes = [32, 32], strides = [1, 1]} : vector<32x96xf32> to vector<32x32xf32>
    %cst_259 = arith.constant dense<0.000000e+00> : vector<16x32xf32>
    %688 = tpu.matmul %682, %687, %cst_259 {dimension_numbers = #tpu.dot_dimension_numbers<[1], [0], [0], [1], [0, 0, 1, 1], [], []>} : vector<16x32xf32>, vector<32x32xf32>, vector<16x32xf32> -> vector<16x32xf32>
    %689 = vector.extract_strided_slice %686 {offsets = [0, 0], sizes = [1, 32], strides = [1, 1]} : vector<1x96xf32> to vector<1x32xf32>
    %690 = vector.broadcast %689 : vector<1x32xf32> to vector<16x32xf32>
    %691 = arith.addf %688, %690 : vector<16x32xf32>
    %692 = vector.extract_strided_slice %684 {offsets = [0, 32], sizes = [32, 64], strides = [1, 1]} : vector<32x96xf32> to vector<32x64xf32>
    %cst_260 = arith.constant dense<0.000000e+00> : vector<16x64xf32>
    %693 = tpu.matmul %327, %692, %cst_260 {dimension_numbers = #tpu.dot_dimension_numbers<[1], [0], [0], [1], [0, 0, 1, 1], [], []>} : vector<16x32xf32>, vector<32x64xf32>, vector<16x64xf32> -> vector<16x64xf32>
    %694 = vector.extract_strided_slice %686 {offsets = [0, 32], sizes = [1, 64], strides = [1, 1]} : vector<1x96xf32> to vector<1x64xf32>
    %695 = vector.broadcast %694 : vector<1x64xf32> to vector<16x64xf32>
    %696 = arith.addf %693, %695 : vector<16x64xf32>
    %697 = vector.extract_strided_slice %696 {offsets = [0, 0], sizes = [16, 32], strides = [1, 1]} : vector<16x64xf32> to vector<16x32xf32>
    %698 = vector.extract_strided_slice %696 {offsets = [0, 32], sizes = [16, 32], strides = [1, 1]} : vector<16x64xf32> to vector<16x32xf32>
    %c1_261 = arith.constant 1 : index
    %c0_262 = arith.constant 0 : index
    %c0_263 = arith.constant 0 : index
    %699 = vector.load %arg23[%c1_261, %c0_262, %c0_263] : memref<2x32x32xf32, #tpu.memory_space<vmem>>, vector<1x32x32xf32>
    %700 = vector.shape_cast %699 : vector<1x32x32xf32> to vector<32x32xf32>
    %701 = vector.extract_strided_slice %691 {offsets = [0, 0], sizes = [16, 8], strides = [1, 1]} : vector<16x32xf32> to vector<16x8xf32>
    %702 = vector.shape_cast %701 : vector<16x8xf32> to vector<2x8x8xf32>
    %703 = vector.extract_strided_slice %691 {offsets = [0, 8], sizes = [16, 8], strides = [1, 1]} : vector<16x32xf32> to vector<16x8xf32>
    %704 = vector.shape_cast %703 : vector<16x8xf32> to vector<2x8x8xf32>
    %705 = vector.extract_strided_slice %691 {offsets = [0, 16], sizes = [16, 8], strides = [1, 1]} : vector<16x32xf32> to vector<16x8xf32>
    %706 = vector.shape_cast %705 : vector<16x8xf32> to vector<2x8x8xf32>
    %707 = vector.extract_strided_slice %691 {offsets = [0, 24], sizes = [16, 8], strides = [1, 1]} : vector<16x32xf32> to vector<16x8xf32>
    %708 = vector.shape_cast %707 : vector<16x8xf32> to vector<2x8x8xf32>
    %709 = tpu.concatenate %702, %704, %706, %708 in 0 : vector<2x8x8xf32>, vector<2x8x8xf32>, vector<2x8x8xf32>, vector<2x8x8xf32> -> vector<8x8x8xf32>
    %710 = vector.extract_strided_slice %697 {offsets = [0, 0], sizes = [16, 8], strides = [1, 1]} : vector<16x32xf32> to vector<16x8xf32>
    %711 = vector.shape_cast %710 : vector<16x8xf32> to vector<2x8x8xf32>
    %712 = vector.extract_strided_slice %697 {offsets = [0, 8], sizes = [16, 8], strides = [1, 1]} : vector<16x32xf32> to vector<16x8xf32>
    %713 = vector.shape_cast %712 : vector<16x8xf32> to vector<2x8x8xf32>
    %714 = vector.extract_strided_slice %697 {offsets = [0, 16], sizes = [16, 8], strides = [1, 1]} : vector<16x32xf32> to vector<16x8xf32>
    %715 = vector.shape_cast %714 : vector<16x8xf32> to vector<2x8x8xf32>
    %716 = vector.extract_strided_slice %697 {offsets = [0, 24], sizes = [16, 8], strides = [1, 1]} : vector<16x32xf32> to vector<16x8xf32>
    %717 = vector.shape_cast %716 : vector<16x8xf32> to vector<2x8x8xf32>
    %718 = tpu.concatenate %711, %713, %715, %717 in 0 : vector<2x8x8xf32>, vector<2x8x8xf32>, vector<2x8x8xf32>, vector<2x8x8xf32> -> vector<8x8x8xf32>
    %719 = vector.extract_strided_slice %698 {offsets = [0, 0], sizes = [16, 8], strides = [1, 1]} : vector<16x32xf32> to vector<16x8xf32>
    %720 = vector.shape_cast %719 : vector<16x8xf32> to vector<2x8x8xf32>
    %721 = vector.extract_strided_slice %698 {offsets = [0, 8], sizes = [16, 8], strides = [1, 1]} : vector<16x32xf32> to vector<16x8xf32>
    %722 = vector.shape_cast %721 : vector<16x8xf32> to vector<2x8x8xf32>
    %723 = vector.extract_strided_slice %698 {offsets = [0, 16], sizes = [16, 8], strides = [1, 1]} : vector<16x32xf32> to vector<16x8xf32>
    %724 = vector.shape_cast %723 : vector<16x8xf32> to vector<2x8x8xf32>
    %725 = vector.extract_strided_slice %698 {offsets = [0, 24], sizes = [16, 8], strides = [1, 1]} : vector<16x32xf32> to vector<16x8xf32>
    %726 = vector.shape_cast %725 : vector<16x8xf32> to vector<2x8x8xf32>
    %727 = tpu.concatenate %720, %722, %724, %726 in 0 : vector<2x8x8xf32>, vector<2x8x8xf32>, vector<2x8x8xf32>, vector<2x8x8xf32> -> vector<8x8x8xf32>
    "tpu.trace_start"() <{level = 10 : i32, message = "bqd,bkd->bqk"}> : () -> ()
    %cst_264 = arith.constant dense<0.000000e+00> : vector<8x8x8xf32>
    %728 = tpu.matmul %709, %718, %cst_264 {dimension_numbers = #tpu.dot_dimension_numbers<[2], [2], [1], [1], [0, 0, 0, 1, 1, 1], [0], [0]>} : vector<8x8x8xf32>, vector<8x8x8xf32>, vector<8x8x8xf32> -> vector<8x8x8xf32>
    "tpu.trace_stop"() : () -> ()
    %cst_265 = arith.constant dense<0xFF800000> : vector<8x8xf32>
    %729 = vector.multi_reduction <maximumf>, %728, %cst_265 [2] : vector<8x8x8xf32> to vector<8x8xf32>
    %730 = vector.shape_cast %729 : vector<8x8xf32> to vector<8x8x1xf32>
    %731 = vector.broadcast %730 : vector<8x8x1xf32> to vector<8x8x8xf32>
    %732 = arith.subf %728, %731 : vector<8x8x8xf32>
    %733 = math.exp %732 : vector<8x8x8xf32>
    %cst_266 = arith.constant dense<0.000000e+00> : vector<8x8xf32>
    %734 = vector.multi_reduction <add>, %733, %cst_266 [2] : vector<8x8x8xf32> to vector<8x8xf32>
    %735 = vector.shape_cast %734 : vector<8x8xf32> to vector<8x8x1xf32>
    %736 = tpu.reciprocal %735 {approx = true} : vector<8x8x1xf32> -> vector<8x8x1xf32>
    %737 = vector.broadcast %736 : vector<8x8x1xf32> to vector<8x8x8xf32>
    %738 = arith.mulf %733, %737 : vector<8x8x8xf32>
    "tpu.trace_start"() <{level = 10 : i32, message = "bqk,bkd->bqd"}> : () -> ()
    %cst_267 = arith.constant dense<0.000000e+00> : vector<8x8x8xf32>
    %739 = tpu.matmul %738, %727, %cst_267 {dimension_numbers = #tpu.dot_dimension_numbers<[2], [1], [1], [2], [0, 0, 0, 1, 1, 2], [0], [0]>} : vector<8x8x8xf32>, vector<8x8x8xf32>, vector<8x8x8xf32> -> vector<8x8x8xf32>
    "tpu.trace_stop"() : () -> ()
    %740 = vector.extract_strided_slice %739 {offsets = [0, 0, 0], sizes = [2, 8, 8], strides = [1, 1, 1]} : vector<8x8x8xf32> to vector<2x8x8xf32>
    %741 = vector.shape_cast %740 : vector<2x8x8xf32> to vector<16x8xf32>
    %742 = vector.extract_strided_slice %700 {offsets = [0, 0], sizes = [8, 32], strides = [1, 1]} : vector<32x32xf32> to vector<8x32xf32>
    %cst_268 = arith.constant dense<0.000000e+00> : vector<16x32xf32>
    %743 = tpu.matmul %741, %742, %cst_268 {dimension_numbers = #tpu.dot_dimension_numbers<[1], [0], [0], [1], [0, 0, 1, 1], [], []>} : vector<16x8xf32>, vector<8x32xf32>, vector<16x32xf32> -> vector<16x32xf32>
    %744 = vector.extract_strided_slice %739 {offsets = [2, 0, 0], sizes = [2, 8, 8], strides = [1, 1, 1]} : vector<8x8x8xf32> to vector<2x8x8xf32>
    %745 = vector.shape_cast %744 : vector<2x8x8xf32> to vector<16x8xf32>
    %746 = vector.extract_strided_slice %700 {offsets = [8, 0], sizes = [8, 32], strides = [1, 1]} : vector<32x32xf32> to vector<8x32xf32>
    %cst_269 = arith.constant dense<0.000000e+00> : vector<16x32xf32>
    %747 = tpu.matmul %745, %746, %cst_269 {dimension_numbers = #tpu.dot_dimension_numbers<[1], [0], [0], [1], [0, 0, 1, 1], [], []>} : vector<16x8xf32>, vector<8x32xf32>, vector<16x32xf32> -> vector<16x32xf32>
    %748 = arith.addf %743, %747 : vector<16x32xf32>
    %749 = vector.extract_strided_slice %739 {offsets = [4, 0, 0], sizes = [2, 8, 8], strides = [1, 1, 1]} : vector<8x8x8xf32> to vector<2x8x8xf32>
    %750 = vector.shape_cast %749 : vector<2x8x8xf32> to vector<16x8xf32>
    %751 = vector.extract_strided_slice %700 {offsets = [16, 0], sizes = [8, 32], strides = [1, 1]} : vector<32x32xf32> to vector<8x32xf32>
    %cst_270 = arith.constant dense<0.000000e+00> : vector<16x32xf32>
    %752 = tpu.matmul %750, %751, %cst_270 {dimension_numbers = #tpu.dot_dimension_numbers<[1], [0], [0], [1], [0, 0, 1, 1], [], []>} : vector<16x8xf32>, vector<8x32xf32>, vector<16x32xf32> -> vector<16x32xf32>
    %753 = arith.addf %748, %752 : vector<16x32xf32>
    %754 = vector.extract_strided_slice %739 {offsets = [6, 0, 0], sizes = [2, 8, 8], strides = [1, 1, 1]} : vector<8x8x8xf32> to vector<2x8x8xf32>
    %755 = vector.shape_cast %754 : vector<2x8x8xf32> to vector<16x8xf32>
    %756 = vector.extract_strided_slice %700 {offsets = [24, 0], sizes = [8, 32], strides = [1, 1]} : vector<32x32xf32> to vector<8x32xf32>
    %cst_271 = arith.constant dense<0.000000e+00> : vector<16x32xf32>
    %757 = tpu.matmul %755, %756, %cst_271 {dimension_numbers = #tpu.dot_dimension_numbers<[1], [0], [0], [1], [0, 0, 1, 1], [], []>} : vector<16x8xf32>, vector<8x32xf32>, vector<16x32xf32> -> vector<16x32xf32>
    %758 = arith.addf %753, %757 : vector<16x32xf32>
    %c1_272 = arith.constant 1 : index
    %c0_273 = arith.constant 0 : index
    %c0_274 = arith.constant 0 : index
    %759 = vector.load %arg24[%c1_272, %c0_273, %c0_274] : memref<2x1x32xf32, #tpu.memory_space<vmem>>, vector<1x1x32xf32>
    %760 = vector.shape_cast %759 : vector<1x1x32xf32> to vector<1x32xf32>
    %761 = vector.broadcast %760 : vector<1x32xf32> to vector<16x32xf32>
    %762 = arith.addf %758, %761 : vector<16x32xf32>
    %763 = arith.addf %682, %762 : vector<16x32xf32>
    %c1_275 = arith.constant 1 : index
    %c0_276 = arith.constant 0 : index
    %c0_277 = arith.constant 0 : index
    %764 = vector.load %arg31[%c1_275, %c0_276, %c0_277] : memref<2x1x32xf32, #tpu.memory_space<vmem>>, vector<1x1x32xf32>
    %765 = vector.shape_cast %764 : vector<1x1x32xf32> to vector<1x32xf32>
    %c1_278 = arith.constant 1 : index
    %c0_279 = arith.constant 0 : index
    %c0_280 = arith.constant 0 : index
    %766 = vector.load %arg32[%c1_278, %c0_279, %c0_280] : memref<2x1x32xf32, #tpu.memory_space<vmem>>, vector<1x1x32xf32>
    %767 = vector.shape_cast %766 : vector<1x1x32xf32> to vector<1x32xf32>
    %cst_281 = arith.constant dense<0.000000e+00> : vector<16xf32>
    %768 = vector.multi_reduction <add>, %763, %cst_281 [1] : vector<16x32xf32> to vector<16xf32>
    %769 = vector.shape_cast %768 : vector<16xf32> to vector<16x1xf32>
    %cst_282 = arith.constant 3.200000e+01 : f32
    %770 = vector.broadcast %cst_282 : f32 to vector<16x1xf32>
    %771 = arith.divf %769, %770 : vector<16x1xf32>
    %772 = vector.broadcast %771 : vector<16x1xf32> to vector<16x32xf32>
    %773 = arith.subf %763, %772 : vector<16x32xf32>
    %774 = arith.mulf %773, %773 : vector<16x32xf32>
    %cst_283 = arith.constant dense<0.000000e+00> : vector<16xf32>
    %775 = vector.multi_reduction <add>, %774, %cst_283 [1] : vector<16x32xf32> to vector<16xf32>
    %776 = vector.shape_cast %775 : vector<16xf32> to vector<16x1xf32>
    %cst_284 = arith.constant 3.200000e+01 : f32
    %777 = vector.broadcast %cst_284 : f32 to vector<16x1xf32>
    %778 = arith.divf %776, %777 : vector<16x1xf32>
    %779 = vector.broadcast %771 : vector<16x1xf32> to vector<16x32xf32>
    %780 = arith.subf %763, %779 : vector<16x32xf32>
    %cst_285 = arith.constant 9.99999974E-6 : f32
    %781 = vector.broadcast %cst_285 : f32 to vector<16x1xf32>
    %782 = arith.addf %778, %781 : vector<16x1xf32>
    %783 = math.rsqrt %782 : vector<16x1xf32>
    %784 = vector.broadcast %783 : vector<16x1xf32> to vector<16x32xf32>
    %785 = arith.mulf %780, %784 : vector<16x32xf32>
    %786 = vector.broadcast %765 : vector<1x32xf32> to vector<16x32xf32>
    %787 = arith.mulf %785, %786 : vector<16x32xf32>
    %788 = vector.broadcast %767 : vector<1x32xf32> to vector<16x32xf32>
    %789 = arith.addf %787, %788 : vector<16x32xf32>
    %c1_286 = arith.constant 1 : index
    %c0_287 = arith.constant 0 : index
    %c0_288 = arith.constant 0 : index
    %790 = vector.load %arg25[%c1_286, %c0_287, %c0_288] : memref<2x32x128xf32, #tpu.memory_space<vmem>>, vector<1x32x128xf32>
    %791 = vector.shape_cast %790 : vector<1x32x128xf32> to vector<32x128xf32>
    %cst_289 = arith.constant dense<0.000000e+00> : vector<16x128xf32>
    %792 = tpu.matmul %789, %791, %cst_289 {dimension_numbers = #tpu.dot_dimension_numbers<[1], [0], [0], [1], [0, 0, 1, 1], [], []>} : vector<16x32xf32>, vector<32x128xf32>, vector<16x128xf32> -> vector<16x128xf32>
    %c1_290 = arith.constant 1 : index
    %c0_291 = arith.constant 0 : index
    %c0_292 = arith.constant 0 : index
    %793 = vector.load %arg26[%c1_290, %c0_291, %c0_292] : memref<2x1x128xf32, #tpu.memory_space<vmem>>, vector<1x1x128xf32>
    %794 = vector.shape_cast %793 : vector<1x1x128xf32> to vector<1x128xf32>
    %795 = vector.broadcast %794 : vector<1x128xf32> to vector<16x128xf32>
    %796 = arith.addf %792, %795 : vector<16x128xf32>
    %cst_293 = arith.constant 0.000000e+00 : f32
    %797 = vector.broadcast %cst_293 : f32 to vector<16x128xf32>
    %798 = arith.maximumf %796, %797 : vector<16x128xf32>
    %c1_294 = arith.constant 1 : index
    %c0_295 = arith.constant 0 : index
    %c0_296 = arith.constant 0 : index
    %799 = vector.load %arg27[%c1_294, %c0_295, %c0_296] : memref<2x128x32xf32, #tpu.memory_space<vmem>>, vector<1x128x32xf32>
    %800 = vector.shape_cast %799 : vector<1x128x32xf32> to vector<128x32xf32>
    %cst_297 = arith.constant dense<0.000000e+00> : vector<16x32xf32>
    %801 = tpu.matmul %798, %800, %cst_297 {dimension_numbers = #tpu.dot_dimension_numbers<[1], [0], [0], [1], [0, 0, 1, 1], [], []>} : vector<16x128xf32>, vector<128x32xf32>, vector<16x32xf32> -> vector<16x32xf32>
    %c1_298 = arith.constant 1 : index
    %c0_299 = arith.constant 0 : index
    %c0_300 = arith.constant 0 : index
    %802 = vector.load %arg28[%c1_298, %c0_299, %c0_300] : memref<2x1x32xf32, #tpu.memory_space<vmem>>, vector<1x1x32xf32>
    %803 = vector.shape_cast %802 : vector<1x1x32xf32> to vector<1x32xf32>
    %804 = vector.broadcast %803 : vector<1x32xf32> to vector<16x32xf32>
    %805 = arith.addf %801, %804 : vector<16x32xf32>
    %806 = arith.addf %789, %805 : vector<16x32xf32>
    %c1_301 = arith.constant 1 : index
    %c0_302 = arith.constant 0 : index
    %c0_303 = arith.constant 0 : index
    %807 = vector.load %arg33[%c1_301, %c0_302, %c0_303] : memref<2x1x32xf32, #tpu.memory_space<vmem>>, vector<1x1x32xf32>
    %808 = vector.shape_cast %807 : vector<1x1x32xf32> to vector<1x32xf32>
    %c1_304 = arith.constant 1 : index
    %c0_305 = arith.constant 0 : index
    %c0_306 = arith.constant 0 : index
    %809 = vector.load %arg34[%c1_304, %c0_305, %c0_306] : memref<2x1x32xf32, #tpu.memory_space<vmem>>, vector<1x1x32xf32>
    %810 = vector.shape_cast %809 : vector<1x1x32xf32> to vector<1x32xf32>
    %cst_307 = arith.constant dense<0.000000e+00> : vector<16xf32>
    %811 = vector.multi_reduction <add>, %806, %cst_307 [1] : vector<16x32xf32> to vector<16xf32>
    %812 = vector.shape_cast %811 : vector<16xf32> to vector<16x1xf32>
    %cst_308 = arith.constant 3.200000e+01 : f32
    %813 = vector.broadcast %cst_308 : f32 to vector<16x1xf32>
    %814 = arith.divf %812, %813 : vector<16x1xf32>
    %815 = vector.broadcast %814 : vector<16x1xf32> to vector<16x32xf32>
    %816 = arith.subf %806, %815 : vector<16x32xf32>
    %817 = arith.mulf %816, %816 : vector<16x32xf32>
    %cst_309 = arith.constant dense<0.000000e+00> : vector<16xf32>
    %818 = vector.multi_reduction <add>, %817, %cst_309 [1] : vector<16x32xf32> to vector<16xf32>
    %819 = vector.shape_cast %818 : vector<16xf32> to vector<16x1xf32>
    %cst_310 = arith.constant 3.200000e+01 : f32
    %820 = vector.broadcast %cst_310 : f32 to vector<16x1xf32>
    %821 = arith.divf %819, %820 : vector<16x1xf32>
    %822 = vector.broadcast %814 : vector<16x1xf32> to vector<16x32xf32>
    %823 = arith.subf %806, %822 : vector<16x32xf32>
    %cst_311 = arith.constant 9.99999974E-6 : f32
    %824 = vector.broadcast %cst_311 : f32 to vector<16x1xf32>
    %825 = arith.addf %821, %824 : vector<16x1xf32>
    %826 = math.rsqrt %825 : vector<16x1xf32>
    %827 = vector.broadcast %826 : vector<16x1xf32> to vector<16x32xf32>
    %828 = arith.mulf %823, %827 : vector<16x32xf32>
    %829 = vector.broadcast %808 : vector<1x32xf32> to vector<16x32xf32>
    %830 = arith.mulf %828, %829 : vector<16x32xf32>
    %831 = vector.broadcast %810 : vector<1x32xf32> to vector<16x32xf32>
    %832 = arith.addf %830, %831 : vector<16x32xf32>
    %c0_312 = arith.constant 0 : index
    %c0_313 = arith.constant 0 : index
    %833 = vector.load %arg35[%c0_312, %c0_313] : memref<1x32xf32, #tpu.memory_space<vmem>>, vector<1x32xf32>
    %c0_314 = arith.constant 0 : index
    %c0_315 = arith.constant 0 : index
    %834 = vector.load %arg36[%c0_314, %c0_315] : memref<1x32xf32, #tpu.memory_space<vmem>>, vector<1x32xf32>
    %cst_316 = arith.constant dense<0.000000e+00> : vector<16xf32>
    %835 = vector.multi_reduction <add>, %832, %cst_316 [1] : vector<16x32xf32> to vector<16xf32>
    %836 = vector.shape_cast %835 : vector<16xf32> to vector<16x1xf32>
    %cst_317 = arith.constant 3.200000e+01 : f32
    %837 = vector.broadcast %cst_317 : f32 to vector<16x1xf32>
    %838 = arith.divf %836, %837 : vector<16x1xf32>
    %839 = vector.broadcast %838 : vector<16x1xf32> to vector<16x32xf32>
    %840 = arith.subf %832, %839 : vector<16x32xf32>
    %841 = arith.mulf %840, %840 : vector<16x32xf32>
    %cst_318 = arith.constant dense<0.000000e+00> : vector<16xf32>
    %842 = vector.multi_reduction <add>, %841, %cst_318 [1] : vector<16x32xf32> to vector<16xf32>
    %843 = vector.shape_cast %842 : vector<16xf32> to vector<16x1xf32>
    %cst_319 = arith.constant 3.200000e+01 : f32
    %844 = vector.broadcast %cst_319 : f32 to vector<16x1xf32>
    %845 = arith.divf %843, %844 : vector<16x1xf32>
    %846 = vector.broadcast %838 : vector<16x1xf32> to vector<16x32xf32>
    %847 = arith.subf %832, %846 : vector<16x32xf32>
    %cst_320 = arith.constant 9.99999974E-6 : f32
    %848 = vector.broadcast %cst_320 : f32 to vector<16x1xf32>
    %849 = arith.addf %845, %848 : vector<16x1xf32>
    %850 = math.rsqrt %849 : vector<16x1xf32>
    %851 = vector.broadcast %850 : vector<16x1xf32> to vector<16x32xf32>
    %852 = arith.mulf %847, %851 : vector<16x32xf32>
    %853 = vector.broadcast %833 : vector<1x32xf32> to vector<16x32xf32>
    %854 = arith.mulf %852, %853 : vector<16x32xf32>
    %855 = vector.broadcast %834 : vector<1x32xf32> to vector<16x32xf32>
    %856 = arith.addf %854, %855 : vector<16x32xf32>
    %c0_321 = arith.constant 0 : index
    %c0_322 = arith.constant 0 : index
    %857 = vector.load %arg37[%c0_321, %c0_322] : memref<32x128xf32, #tpu.memory_space<vmem>>, vector<32x128xf32>
    %cst_323 = arith.constant dense<0.000000e+00> : vector<16x128xf32>
    %858 = tpu.matmul %856, %857, %cst_323 {dimension_numbers = #tpu.dot_dimension_numbers<[1], [0], [0], [1], [0, 0, 1, 1], [], []>} : vector<16x32xf32>, vector<32x128xf32>, vector<16x128xf32> -> vector<16x128xf32>
    %c0_324 = arith.constant 0 : index
    %c0_325 = arith.constant 0 : index
    %859 = vector.load %arg38[%c0_324, %c0_325] : memref<1x128xf32, #tpu.memory_space<vmem>>, vector<1x128xf32>
    %860 = vector.broadcast %859 : vector<1x128xf32> to vector<16x128xf32>
    %861 = arith.addf %858, %860 : vector<16x128xf32>
    %c0_326 = arith.constant 0 : index
    %c0_327 = arith.constant 0 : index
    %862 = vector.load %arg39[%c0_326, %c0_327] : memref<16x128xf32, #tpu.memory_space<vmem>>, vector<16x128xf32>
    tpu.vector_store %arg39[%c0_326, %c0_327], %861 {strides = array<i32>} : memref<16x128xf32, #tpu.memory_space<vmem>>, vector<16x128xf32>,
    return
  }
}

</mosaic_0001>

<bundles_post_ra>
// kernel: transformer_forward.1
= control target key start
LH: loop header
LB: loop body
LE: loop exit
PB: predicated region body
PF: predicated region fallthrough
CT: control target
= control target key end

     0   :  { %s14378_s3 = smov 3   ;;  %vm272_vm0 = vcmask 261120   ;;  %s14379_s10 = smov 4   ;;  %v14380_v7 = vmov 0.0   ;;  %vm14383_vm1 = vmmov 0   ;;  %v168_v14 = vlaneseq  ;;  %s16119_s0 = inlined_call_operand.smem [shape: u32[40], index: -1, kind: input, shape index: {}] }
   0x1   :  { %s14434_s6 = sld [smem:[%s16119_s0 + %s14378_s3]]   ;;  %13217 = vmatprep.subr.mxu1 %v14380_v7  ;;  %s14381_s14 = smov 112   ;;  %13219 = vmatprep.mubr.msk.f32.mxu1 %vm14383_vm1, %v14380_v7  ;;  %vm374_vm3 = vcmask 64512   ;;  %v14386_v29 = vmov 1966171168  }
   0x2   :  { %s1_s9 = sld [smem:[%s16119_s0]]   ;;  %s14382_s15 = smov 120   ;;  %v14497_v17 = vshrl.u32 %v168_v14, 7  ;;  %v14499_v18 = vand.u32 127, %v168_v14  ;;  %v166_v30 = vunpack.c.l.s4 %v14386_v29 }
   0x3   :  { %s14454_s13 = sld [smem:[%s16119_s0 + %s14379_s10]]   ;;  %s14384_s16 = smov 104  }
   0x4   :  { %s14385_s17 = smov 96   ;;  %vm257_vm2 = vcmp.ge.s32.totalorder %v14497_v17, %v14499_v18  ;;  %s14387_s18 = smov 2   ;;  %v167_v31 = vunpack.c.0.s8 %v166_v30  ;;  %v215_v36 = vsub.s32 0, %v14497_v17 }
   0x5   :  { %s12407_s21 = sld [smem:[%s16119_s0 + %s14387_s18]]   ;;  %s14388_s22 = smov 64  }
   0x6   :  { %v170_v32 = vsub.s32 %v167_v31, %v14497_v17  ;;  %s14389_s23 = smov 5   ;;  %s14390_s27 = smov 6  }
   0x7   :  { %v264_v0 = vld [vmem:[%s14434_s6 + $0x18] sm:$0xff]  ;;  %v263_v1 = vld [vmem:[%s14434_s6 + $0x10] sm:$0xff]  ;;  %v262_v3 = vld [vmem:[%s14434_s6 + $0x8] sm:$0xff]  ;;  %s14657_s26 = sld [smem:[%s16119_s0 + %s14389_s23]]   ;;  %s14391_s1 = smov 7  }
   0x8   :  { %13206 = vmatprep.subr.mxu0 %v264_v0  ;;  %v14441_v2 = vld [vmem:[%s1_s9] sm:$0xff]  ;;  %v14447_v5 = vld [vmem:[%s1_s9 + $0x8] sm:$0xff]  ;;  %s14692_s30 = sld [smem:[%s16119_s0 + %s14390_s27]]   ;;  %s14392_s5 = smov 9  }
   0x9   :  { %13207 = vmatpush3.msra.mxu0 %v264_v0  ;;  %13214 = vmatprep.mubr.msk.f32.mxu0 %vm272_vm0, %v14441_v2  ;;  %v261_v4 = vld [vmem:[%s14434_s6] sm:$0xff]  ;;  %s14712_s4 = sld [smem:[%s16119_s0 + %s14391_s1]]   ;;  %s14393_s10 = smov 11  }
   0xa   :  { %13208 = vmatprep.subr.mxu0 %v263_v1  ;;  %v12445_v8 = vld [vmem:[%s14454_s13] ss:$0 sm:$0xff]  ;;  %s14721_s9 = sld [smem:[%s16119_s0 + %s14392_s5]]   ;;  %s14394_s19 = smov 12  }
   0xb   :  { %13209 = vmatpush3.msra.mxu0 %v263_v1  ;;  %v162_v33 = vld [vmem:[%s12407_s21] sm:$0xff]  ;;  %s14738_s18 = sld [smem:[%s16119_s0 + %s14393_s10]]   ;;  %s14395_s24 = smov 8  }
   0xc   :  { %13210 = vmatprep.subr.mxu0 %v262_v3  ;;  %v171_v34 = vrot.slane %v162_v33, %v170_v32  ;;  %v164_v49 = vcombine.high %v162_v33, %v162_v33  ;;  %s14743_s23 = sld [smem:[%s16119_s0 + %s14394_s19]]   ;;  %s14396_s29 = smov 10  }
   0xd   :  { %13211 = vmatpush3.msra.mxu0 %v262_v3  ;;  %s14759_s28 = sld [smem:[%s16119_s0 + %s14395_s24]]   ;;  %s14397_s5 = smov 13  }
   0xe   :  { %13212 = vmatprep.subr.mxu0 %v261_v4  ;;  %v187_v35 = vrot.slane %v171_v34, %v170_v32  ;;  %v179_v37 = vcombine.high %v171_v34, %v171_v34  ;;  %v178_v51 = vrot.slane %v164_v49, %v170_v32  ;;  %s14767_s3 = sld [smem:[%s16119_s0 + %s14396_s29]]   ;;  %s14410_s7 = smov 16  }
   0xf   :  { %13213 = vmatpush3.msra.mxu0 %v261_v4  ;;  %s14782_s10 = sld [smem:[%s16119_s0 + %s14397_s5]]   ;;  %s14412_s21 = smov 24  }
  0x10   :  { %13215 = vmatmul.mubr.msk.f32.vlgmr.msra.gmra.mxu0 %vm272_vm0, %v14447_v5  ;;  %13227 = vmatprep.subr.mxu0 %v14380_v7  ;;  %v14566_v38 = vrot.slane %v187_v35, %v215_v36  ;;  %v201_v39 = vrot.slane %v179_v37, %v170_v32  ;;  %v209_v50 = vcombine.high %v187_v35, %v187_v35  ;;  %s12421_s11 = sld [smem:[%s16119_s0 + %s14410_s7]]   ;;  %s14413_s27 = smov 25  }
  0x11   :  { %13229 = vmatprep.mubr.msk.f32.mxu0 %vm14383_vm1, %v14380_v7  ;;  %v180_v52 = vcombine.high %v178_v51, %v178_v51  ;;  %v194_v55 = vrot.slane %v178_v51, %v170_v32  ;;  %s15572_s1 = sld [smem:[%s16119_s0 + %s14413_s27]]  }
  0x12   :  { %v14571_v42 = vrot.slane %v201_v39, %v215_v36  ;;  %v14577_v53 = vrot.slane %v209_v50, %v215_v36  ;;  %v211_v54 = vcombine.high %v201_v39, %v201_v39 }
  0x13   :  { %v208_v57 = vrot.slane %v180_v52, %v170_v32  ;;  %v14582_v60 = vrot.slane %v194_v55, %v215_v36  ;;  %v210_v61 = vcombine.high %v194_v55, %v194_v55 }
  0x14   :  { %v14580_v59 = vrot.slane %v211_v54, %v215_v36 }
  0x15   :  { %v14585_v3 = vrot.slane %v208_v57, %v215_v36 }
  0xd0   :  { %v13216_v6 = vpop.f32.mrf.mxu0 }
  0xd1   :  { %v14469_v11 = vadd.f32 %v13216_v6, %v12445_v8 }
  0xd2   :  { %v345_v9 = vpop.f32.mrf.mxu0 }
  0xd3   :  { %v14459_v10 = vadd.f32 %v12445_v8, %v345_v9  ;;  %v14589_v8 = vrot.slane %v210_v61, %v215_v36  ;;  %v212_v9 = vcombine.high %v208_v57, %v208_v57 }
  0xd5   :  { %364 = vrot.lane.b32.xlu1 %v14459_v10, %s14381_s14  ;;  %360 = vrot.lane.b32.xlu0 %v14459_v10, %s14382_s15 }
  0xd9   :  { %366 = vrot.lane.b32.xlu1 %v14469_v11, %s14381_s14  ;;  %362 = vrot.lane.b32.xlu0 %v14469_v11, %s14382_s15 }
  0xdd   :  { %370 = vrot.lane.b32.xlu1 %v14469_v11, %s14384_s16  ;;  %368 = vrot.lane.b32.xlu0 %v14459_v10, %s14384_s16 }
  0xe1   :  { %449 = vrot.lane.b32.xlu1 %v14469_v11, %s14385_s17  ;;  %372 = vrot.lane.b32.xlu0 %v14459_v10, %s14385_s17 }
 0x147   :  { %v14483_v12 = vpop.permute.xlu1 %364  ;;  %v14485_v13 = vpop.permute.xlu0 %360 }
 0x148   :  { %525 = vrot.lane.b32.xlu0 %v14485_v13, %s14385_s17 }
 0x14b   :  { %v14489_v15 = vpop.permute.xlu1 %366  ;;  %v14491_v16 = vpop.permute.xlu0 %362 }
 0x14c   :  { %677 = vrot.lane.b32.xlu0 %v14483_v12, %s14385_s17  ;;  %601 = vrot.lane.b32.xlu1 %v14491_v16, %s14385_s17 }
 0x14f   :  { %v14503_v19 = vpop.permute.xlu0 %368  ;;  %v14509_v20 = vpop.permute.xlu1 %370 }
 0x150   :  { %753 = vrot.lane.b32.xlu1 %v14489_v15, %s14385_s17  ;;  %829 = vrot.lane.b32.xlu0 %v14503_v19, %s14385_s17 }
 0x153   :  { %v373_v21 = vpop.permute.xlu0 %372  ;;  %v450_v22 = vpop.permute.xlu1 %449 }
 0x154   :  { %905 = vrot.lane.b32.xlu1 %v14509_v20, %s14385_s17  ;;  %13218 = vmatpush3.xpose.msk.msra.mxu1 %vm374_vm3, %v373_v21 }
 0x155   :  { %13222 = vmatprep.subr.mxu1 %v14380_v7 }
 0x157   :  { %13220 = vmatmul.mubr.msk.f32.vlgmr.msra.gmra.mxu1 %vm374_vm3, %v14459_v10 }
 0x158   :  { %13223 = vmatpush3.xpose.msk.msra.mxu1 %vm374_vm3, %v450_v22  ;;  %13224 = vmatprep.mubr.msk.f32.mxu1 %vm14383_vm1, %v14380_v7 }
 0x159   :  { %13232 = vmatprep.subr.mxu1 %v14380_v7 }
 0x15b   :  { %13225 = vmatmul.mubr.msk.f32.vlgmr.msra.gmra.mxu1 %vm374_vm3, %v14469_v11 }
 0x15c   :  { %13234 = vmatprep.mubr.msk.f32.mxu1 %vm14383_vm1, %v14380_v7 }
 0x1ba   :  { %v526_v23 = vpop.permute.xlu0 %525 }
 0x1bb   :  { %13228 = vmatpush3.xpose.msk.msra.mxu0 %vm374_vm3, %v526_v23 }
 0x1bc   :  { %13237 = vmatprep.subr.mxu0 %v14380_v7 }
 0x1be   :  { %v602_v24 = vpop.permute.xlu1 %601  ;;  %13230 = vmatmul.mubr.msk.f32.vlgmr.msra.gmra.mxu0 %vm374_vm3, %v14485_v13  ;;  %v678_v25 = vpop.permute.xlu0 %677 }
 0x1bf   :  { %13233 = vmatpush3.xpose.msk.msra.mxu1 %vm374_vm3, %v602_v24  ;;  %13238 = vmatpush3.xpose.msk.msra.mxu0 %vm374_vm3, %v678_v25 }
 0x1c0   :  { %13239 = vmatprep.mubr.msk.f32.mxu0 %vm14383_vm1, %v14380_v7  ;;  %13242 = vmatprep.subr.mxu1 %v14380_v7 }
 0x1c1   :  { %13247 = vmatprep.subr.mxu0 %v14380_v7 }
 0x1c2   :  { %v754_v26 = vpop.permute.xlu1 %753  ;;  %13235 = vmatmul.mubr.msk.f32.vlgmr.msra.gmra.mxu1 %vm374_vm3, %v14491_v16  ;;  %13240 = vmatmul.mubr.msk.f32.vlgmr.msra.gmra.mxu0 %vm374_vm3, %v14483_v12  ;;  %v830_v27 = vpop.permute.xlu0 %829 }
 0x1c3   :  { %13243 = vmatpush3.xpose.msk.msra.mxu1 %vm374_vm3, %v754_v26  ;;  %13248 = vmatpush3.xpose.msk.msra.mxu0 %vm374_vm3, %v830_v27 }
 0x1c4   :  { %13244 = vmatprep.mubr.msk.f32.mxu1 %vm14383_vm1, %v14380_v7  ;;  %13249 = vmatprep.mubr.msk.f32.mxu0 %vm14383_vm1, %v14380_v7 }
 0x1c5   :  { %13252 = vmatprep.subr.mxu1 %v14380_v7  ;;  %13257 = vmatprep.subr.mxu0 %v14380_v7 }
 0x1c6   :  { %v906_v28 = vpop.permute.xlu1 %905  ;;  %13245 = vmatmul.mubr.msk.f32.vlgmr.msra.gmra.mxu1 %vm374_vm3, %v14489_v15  ;;  %13250 = vmatmul.mubr.msk.f32.vlgmr.msra.gmra.mxu0 %vm374_vm3, %v14503_v19 }
 0x1c7   :  { %13253 = vmatpush3.xpose.msk.msra.mxu1 %vm374_vm3, %v906_v28  ;;  %13254 = vmatprep.mubr.msk.f32.mxu1 %vm14383_vm1, %v14380_v7  ;;  %v14595_v28 = vrot.slane %v212_v9, %v215_v36 }
 0x1c8   :  { %13262 = vmatprep.subr.mxu1 %v14380_v7  ;;  %13259 = vmatprep.mubr.msk.f32.mxu0 %vm14383_vm1, %v14380_v7 }
 0x1ca   :  { %13255 = vmatmul.mubr.msk.f32.vlgmr.msra.gmra.mxu1 %vm374_vm3, %v14509_v20 }
 0x1cb   :  { %13264 = vmatprep.mubr.msk.f32.mxu1 %vm14383_vm1, %v14380_v7 }
 0x217   :  { %v445_v40 = vpop.f32.mrf.mxu1 }
 0x218   :  { %v14569_v41 = vadd.f32 %v445_v40, %v14566_v38 }
 0x219   :  { %v13221_v43 = vpop.f32.mrf.mxu1 }
 0x21a   :  { %v981_v44 = vsel %vm374_vm3, %v14569_v41, -inf }
 0x21b   :  { %982 = vmax.xlane.f32.xlu0 %v981_v44  ;;  %v521_v45 = vpop.f32.mrf.mxu1 }
 0x21c   :  { %v522_v46 = vadd.f32 %v521_v45, %v14571_v42 }
 0x21d   :  { %v13226_v47 = vpop.f32.mrf.mxu1 }
 0x21e   :  { %v984_v48 = vsel %vm374_vm3, %v522_v46, -inf }
 0x21f   :  { %985 = vmax.xlane.f32.xlu1 %v984_v48 }
 0x27e   :  { %v597_v56 = vpop.f32.mrf.mxu0 }
 0x27f   :  { %v598_v58 = vadd.f32 %v597_v56, %v14577_v53 }
 0x280   :  { %v13231_v62 = vpop.f32.mrf.mxu0 }
 0x281   :  { %v987_v63 = vsel %vm374_vm3, %v598_v58, -inf }
 0x282   :  { %v673_v0 = vpop.f32.mrf.mxu1  ;;  %988 = vmax.xlane.f32.xlu0 %v987_v63  ;;  %v749_v1 = vpop.f32.mrf.mxu0 }
 0x283   :  { %v674_v4 = vadd.f32 %v673_v0, %v14580_v59  ;;  %v750_v6 = vadd.f32 %v749_v1, %v14582_v60 }
 0x284   :  { %v13236_v14 = vpop.f32.mrf.mxu1  ;;  %v13241_v21 = vpop.f32.mrf.mxu0 }
 0x285   :  { %v990_v22 = vsel %vm374_vm3, %v674_v4, -inf  ;;  %v993_v23 = vsel %vm374_vm3, %v750_v6, -inf }
 0x286   :  { %v825_v24 = vpop.f32.mrf.mxu1  ;;  %991 = vmax.xlane.f32.xlu0 %v990_v22  ;;  %994 = vmax.xlane.f32.xlu1 %v993_v23  ;;  %v901_v25 = vpop.f32.mrf.mxu0 }
 0x287   :  { %v826_v26 = vadd.f32 %v825_v24, %v14585_v3  ;;  %v902_v27 = vadd.f32 %v901_v25, %v14589_v8 }
 0x288   :  { %v13246_v29 = vpop.f32.mrf.mxu1  ;;  %v13251_v30 = vpop.f32.mrf.mxu0 }
 0x289   :  { %v996_v31 = vsel %vm374_vm3, %v826_v26, -inf  ;;  %v999_v32 = vsel %vm374_vm3, %v902_v27, -inf }
 0x28a   :  { %v977_v33 = vpop.f32.mrf.mxu1  ;;  %997 = vmax.xlane.f32.xlu0 %v996_v31  ;;  %1000 = vmax.xlane.f32.xlu1 %v999_v32 }
 0x28b   :  { %v978_v34 = vadd.f32 %v977_v33, %v14595_v28 }
 0x28c   :  { %v13256_v35 = vpop.f32.mrf.mxu1 }
 0x28d   :  { %v1002_v37 = vsel %vm374_vm3, %v978_v34, -inf }
 0x28e   :  { %1003 = vmax.xlane.f32.xlu0 %v1002_v37 }
 0x29b   :  { %1069 = vrot.lane.b32.xlu1 %v14459_v10, %s14388_s22 }
 0x29f   :  { %1221 = vrot.lane.b32.xlu1 %v14485_v13, %s14388_s22 }
 0x2a3   :  { %1297 = vrot.lane.b32.xlu1 %v14491_v16, %s14388_s22 }
 0x2a4   :  { %1145 = vrot.lane.b32.xlu0 %v14469_v11, %s14388_s22  ;;  %v983_v40 = vpop.xlane.xlu0 %982 }
 0x2a5   :  { %v1005_v10 = vsub.f32 %v14569_v41, %v983_v40 }
 0x2a7   :  { %1449 = vrot.lane.b32.xlu1 %v14489_v15, %s14388_s22  ;;  %v1013_v44 = vmul.f32 1.442695, %v1005_v10 }
 0x2a8   :  { %1373 = vrot.lane.b32.xlu0 %v14483_v12, %s14388_s22  ;;  %v986_v36 = vpop.xlane.xlu1 %985 }
 0x2a9   :  { %v1006_v39 = vsub.f32 %v522_v46, %v986_v36 }
 0x2ab   :  { %v1015_v43 = vmul.f32 1.442695, %v1006_v39 }
 0x2ad   :  { %14138 = vpow2.f32 %v1015_v43 }
 0x2ae   :  { %14140 = vpow2.f32 %v1013_v44 }
 0x2ba   :  { %v14614_v13 = vpop.eup %14138 }
 0x2bb   :  { %v1032_v11 = vsel %vm374_vm3, %v14614_v13, 0.0  ;;  %v14618_v16 = vpop.eup %14140 }
 0x2bc   :  { %v1029_v12 = vsel %vm374_vm3, %v14618_v16, 0.0 }
 0x2c7   :  { %1033 = vadd.xlane.f32.xlu0 %v1032_v11 }
 0x2cb   :  { %1030 = vadd.xlane.f32.xlu1 %v1029_v12 }
 0x30b   :  { %v989_v15 = vpop.xlane.xlu0 %988 }
 0x30c   :  { %v1007_v45 = vsub.f32 %v598_v58, %v989_v15 }
 0x30e   :  { %v1017_v46 = vmul.f32 1.442695, %v1007_v45 }
 0x30f   :  { %v995_v41 = vpop.xlane.xlu1 %994  ;;  %v992_v47 = vpop.xlane.xlu0 %991 }
 0x310   :  { %14142 = vpow2.f32 %v1017_v46  ;;  %v1009_v48 = vsub.f32 %v750_v6, %v995_v41  ;;  %v1008_v49 = vsub.f32 %v674_v4, %v992_v47 }
 0x312   :  { %v1021_v50 = vmul.f32 1.442695, %v1009_v48  ;;  %v1019_v51 = vmul.f32 1.442695, %v1008_v49 }
 0x313   :  { %v1001_v52 = vpop.xlane.xlu1 %1000  ;;  %v998_v54 = vpop.xlane.xlu0 %997 }
 0x314   :  { %14144 = vpow2.f32 %v1021_v50  ;;  %v1011_v55 = vsub.f32 %v902_v27, %v1001_v52  ;;  %v1010_v56 = vsub.f32 %v826_v26, %v998_v54 }
 0x315   :  { %14146 = vpow2.f32 %v1019_v51  ;;  %v354_v51 = vld [vmem:[%s14657_s26] sm:$0xff] }
 0x316   :  { %v1025_v57 = vmul.f32 1.442695, %v1011_v55  ;;  %v1023_v61 = vmul.f32 1.442695, %v1010_v56  ;;  %v355_v56 = vld [vmem:[%s14657_s26 + $0x8] sm:$0xff] }
 0x317   :  { %v1070_v62 = vpop.permute.xlu1 %1069  ;;  %v1004_v63 = vpop.xlane.xlu0 %1003 }
 0x318   :  { %14148 = vpow2.f32 %v1025_v57  ;;  %v1012_v58 = vsub.f32 %v978_v34, %v1004_v63  ;;  %13258 = vmatpush3.msra.mxu0 %v1070_v62  ;;  %v356_v57 = vld [vmem:[%s14657_s26 + $0x10] sm:$0xff] }
 0x319   :  { %14150 = vpow2.f32 %v1023_v61  ;;  %13267 = vmatprep.subr.mxu0 %v14380_v7  ;;  %v357_v61 = vld [vmem:[%s14657_s26 + $0x18] sm:$0xff] }
 0x31a   :  { %v1027_v0 = vmul.f32 1.442695, %v1012_v58 }
 0x31b   :  { %v1146_v1 = vpop.permute.xlu0 %1145  ;;  %v1222_v30 = vpop.permute.xlu1 %1221 }
 0x31c   :  { %14152 = vpow2.f32 %v1027_v0  ;;  %13263 = vmatpush3.msra.mxu1 %v1146_v1 }
 0x31d   :  { %v14143_v4 = vpop.eup %14142  ;;  %13272 = vmatprep.subr.mxu1 %v14380_v7 }
 0x31e   :  { %v1035_v6 = vsel %vm374_vm3, %v14143_v4, 0.0 }
 0x31f   :  { %1036 = vadd.xlane.f32.xlu1 %v1035_v6  ;;  %v1298_v31 = vpop.permute.xlu1 %1297  ;;  %v1374_v32 = vpop.permute.xlu0 %1373 }
 0x321   :  { %v14145_v9 = vpop.eup %14144 }
 0x322   :  { %v14147_v14 = vpop.eup %14146  ;;  %v1041_v21 = vsel %vm374_vm3, %v14145_v9, 0.0 }
 0x323   :  { %1042 = vadd.xlane.f32.xlu1 %v1041_v21  ;;  %v1038_v22 = vsel %vm374_vm3, %v14147_v14, 0.0  ;;  %v1450_v33 = vpop.permute.xlu1 %1449 }
 0x324   :  { %1039 = vadd.xlane.f32.xlu0 %v1038_v22 }
 0x325   :  { %v14627_v23 = vpop.eup %14148 }
 0x326   :  { %v14629_v24 = vpop.eup %14150  ;;  %v1047_v25 = vsel %vm374_vm3, %v14627_v23, 0.0 }
 0x327   :  { %1048 = vadd.xlane.f32.xlu1 %v1047_v25  ;;  %v1044_v26 = vsel %vm374_vm3, %v14629_v24, 0.0 }
 0x328   :  { %1045 = vadd.xlane.f32.xlu0 %v1044_v26 }
 0x329   :  { %v14635_v27 = vpop.eup %14152 }
 0x32a   :  { %v1050_v29 = vsel %vm374_vm3, %v14635_v27, 0.0 }
 0x32c   :  { %1051 = vadd.xlane.f32.xlu0 %v1050_v29 }
 0x338   :  { %1601 = vrot.lane.b32.xlu1 %v14509_v20, %s14388_s22 }
 0x342   :  { %1525 = vrot.lane.b32.xlu0 %v14503_v19, %s14388_s22 }
 0x350   :  { %v1034_v34 = vpop.xlane.xlu0 %1033 }
 0x351   :  { %14154 = vrcp.f32 %v1034_v34 }
 0x354   :  { %v1031_v35 = vpop.xlane.xlu1 %1030 }
 0x355   :  { %14156 = vrcp.f32 %v1031_v35 }
 0x35e   :  { %v14155_v37 = vpop.eup %14154 }
 0x35f   :  { %v1062_v36 = vmul.f32 %v14155_v37, %v14614_v13 }
 0x361   :  { %13265 = vmatmul.mubr.msk.f32.vlgmr.msra.gmra.mxu1 %vm374_vm3, %v1062_v36 }
 0x362   :  { %v14157_v39 = vpop.eup %14156  ;;  %13273 = vmatpush3.msra.mxu1 %v1298_v31  ;;  %13274 = vmatprep.mubr.msk.f32.mxu1 %vm14383_vm1, %v14380_v7 }
 0x363   :  { %v1061_v19 = vmul.f32 %v14157_v39, %v14618_v16  ;;  %13282 = vmatprep.subr.mxu1 %v14380_v7 }
 0x365   :  { %13260 = vmatmul.mubr.msk.f32.vlgmr.msra.gmra.mxu0 %vm374_vm3, %v1061_v19  ;;  %v12480_v19 = vld [vmem:[%s14692_s30] ss:$0 sm:$0xff] }
 0x366   :  { %13268 = vmatpush3.msra.mxu0 %v1222_v30  ;;  %13269 = vmatprep.mubr.msk.f32.mxu0 %vm14383_vm1, %v14380_v7 }
 0x367   :  { %13277 = vmatprep.subr.mxu0 %v14380_v7 }
 0x3a8   :  { %v1037_v20 = vpop.xlane.xlu1 %1036 }
 0x3a9   :  { %14158 = vrcp.f32 %v1037_v20 }
 0x3ac   :  { %v1043_v40 = vpop.xlane.xlu1 %1042 }
 0x3ad   :  { %14160 = vrcp.f32 %v1043_v40  ;;  %v1040_v10 = vpop.xlane.xlu0 %1039 }
 0x3ae   :  { %14162 = vrcp.f32 %v1040_v10 }
 0x3b0   :  { %v1049_v43 = vpop.xlane.xlu1 %1048 }
 0x3b1   :  { %14164 = vrcp.f32 %v1049_v43  ;;  %v1046_v44 = vpop.xlane.xlu0 %1045 }
 0x3b2   :  { %14166 = vrcp.f32 %v1046_v44 }
 0x3b4   :  { %v1602_v52 = vpop.permute.xlu1 %1601 }
 0x3b5   :  { %v1052_v13 = vpop.xlane.xlu0 %1051 }
 0x3b6   :  { %v14159_v11 = vpop.eup %14158  ;;  %14168 = vrcp.f32 %v1052_v13 }
 0x3b7   :  { %v1063_v16 = vmul.f32 %v14159_v11, %v14143_v4 }
 0x3b9   :  { %13270 = vmatmul.mubr.msk.f32.vlgmr.msra.gmra.mxu0 %vm374_vm3, %v1063_v16  ;;  %v1526_v41 = vpop.permute.xlu0 %1525 }
 0x3ba   :  { %v14161_v12 = vpop.eup %14160  ;;  %13278 = vmatpush3.msra.mxu0 %v1374_v32  ;;  %13279 = vmatprep.mubr.msk.f32.mxu0 %vm14383_vm1, %v14380_v7 }
 0x3bb   :  { %v14163_v15 = vpop.eup %14162  ;;  %13287 = vmatprep.subr.mxu0 %v14380_v7  ;;  %v1065_v45 = vmul.f32 %v14161_v12, %v14145_v9 }
 0x3bc   :  { %v1064_v46 = vmul.f32 %v14163_v15, %v14147_v14 }
 0x3bd   :  { %13280 = vmatmul.mubr.msk.f32.vlgmr.msra.gmra.mxu0 %vm374_vm3, %v1065_v45 }
 0x3be   :  { %v14165_v47 = vpop.eup %14164  ;;  %13275 = vmatmul.mubr.msk.f32.vlgmr.msra.gmra.mxu1 %vm374_vm3, %v1064_v46  ;;  %13288 = vmatpush3.msra.mxu0 %v1526_v41 }
 0x3bf   :  { %v14167_v48 = vpop.eup %14166  ;;  %13283 = vmatpush3.msra.mxu1 %v1450_v33  ;;  %13284 = vmatprep.mubr.msk.f32.mxu1 %vm14383_vm1, %v14380_v7  ;;  %v1067_v49 = vmul.f32 %v14165_v47, %v14627_v23 }
 0x3c0   :  { %13289 = vmatprep.mubr.msk.f32.mxu0 %vm14383_vm1, %v14380_v7  ;;  %13292 = vmatprep.subr.mxu1 %v14380_v7  ;;  %v1066_v50 = vmul.f32 %v14167_v48, %v14629_v24 }
 0x3c1   :  { %13290 = vmatmul.mubr.msk.f32.vlgmr.msra.gmra.mxu0 %vm374_vm3, %v1067_v49  ;;  %13297 = vmatprep.subr.mxu0 %v355_v56 }
 0x3c2   :  { %13285 = vmatmul.mubr.msk.f32.vlgmr.msra.gmra.mxu1 %vm374_vm3, %v1066_v50  ;;  %13298 = vmatpush3.msra.mxu0 %v355_v56  ;;  %v2061_v56 = vld [vmem:[%s14712_s4] sm:$0xff] }
 0x3c3   :  { %v14169_v54 = vpop.eup %14168  ;;  %13293 = vmatpush3.msra.mxu1 %v1602_v52  ;;  %13294 = vmatprep.mubr.msk.f32.mxu1 %vm14383_vm1, %v14380_v7  ;;  %v2064_v52 = vld [vmem:[%s14712_s4 + $0x18] sm:$0xff] }
 0x3c4   :  { %v1068_v55 = vmul.f32 %v14169_v54, %v14635_v27  ;;  %13302 = vmatprep.subr.mxu1 %v354_v51  ;;  %13307 = vmatprep.subr.mxu0 %v356_v57  ;;  %v2063_v54 = vld [vmem:[%s14712_s4 + $0x10] sm:$0xff] }
 0x3c6   :  { %13295 = vmatmul.mubr.msk.f32.vlgmr.msra.gmra.mxu1 %vm374_vm3, %v1068_v55  ;;  %v2062_v55 = vld [vmem:[%s14712_s4 + $0x8] sm:$0xff] }
 0x3c7   :  { %13303 = vmatpush3.msra.mxu1 %v354_v51 }
 0x3c8   :  { %13312 = vmatprep.subr.mxu1 %v357_v61 }
 0x421   :  { %v1217_v62 = vpop.f32.mrf.mxu1 }
 0x423   :  { %v13266_v63 = vpop.f32.mrf.mxu1 }
 0x424   :  { %v2167_v63 = vld [vmem:[%s14721_s9 + $0x60] sm:$0xff] }
 0x425   :  { %v1141_v58 = vpop.f32.mrf.mxu0 }
 0x426   :  { %13304 = vmatprep.mubr.msk.f32.mxu1 %vm374_vm3, %v1141_v58  ;;  %v2166_v58 = vld [vmem:[%s14721_s9 + $0x58] sm:$0xff] }
 0x427   :  { %v13261_v0 = vpop.f32.mrf.mxu0  ;;  %13305 = vmatmul.mubr.msk.f32.vlgmr.msra.gmra.mxu1 %vm374_vm3, %v1217_v62  ;;  %v2168_v62 = vld [vmem:[%s14721_s9 + $0x68] sm:$0xff] }
 0x428   :  { %13313 = vmatpush3.msra.mxu1 %v357_v61  ;;  %v2169_v61 = vld [vmem:[%s14721_s9 + $0x70] sm:$0xff] }
 0x429   :  { %v2165_v0 = vld [vmem:[%s14721_s9 + $0x50] sm:$0xff] }
 0x479   :  { %v1293_v1 = vpop.f32.mrf.mxu0 }
 0x47a   :  { %13299 = vmatprep.mubr.msk.f32.mxu0 %vm374_vm3, %v1293_v1  ;;  %v2164_v1 = vld [vmem:[%s14721_s9 + $0x48] sm:$0xff] }
 0x47b   :  { %v13271_v4 = vpop.f32.mrf.mxu0 }
 0x47c   :  { %v2163_v4 = vld [vmem:[%s14721_s9 + $0x40] sm:$0xff] }
 0x47d   :  { %v1445_v6 = vpop.f32.mrf.mxu0 }
 0x47e   :  { %v1369_v9 = vpop.f32.mrf.mxu1 }
 0x47f   :  { %13300 = vmatmul.mubr.msk.f32.vlgmr.msra.gmra.mxu0 %vm374_vm3, %v1369_v9  ;;  %v13281_v14 = vpop.f32.mrf.mxu0  ;;  %v2161_v9 = vld [vmem:[%s14721_s9 + $0x30] sm:$0xff] }
 0x480   :  { %v13276_v21 = vpop.f32.mrf.mxu1  ;;  %13309 = vmatprep.mubr.msk.f32.mxu0 %vm374_vm3, %v1445_v6  ;;  %13308 = vmatpush3.msra.mxu0 %v356_v57  ;;  %v2170_v57 = vld [vmem:[%s14721_s9 + $0x78] sm:$0xff]  ;;  %v2160_v14 = vld [vmem:[%s14721_s9 + $0x28] sm:$0xff] }
 0x481   :  { %v1597_v22 = vpop.f32.mrf.mxu0  ;;  %13317 = vmatprep.subr.mxu0 %v2064_v52  ;;  %13328 = vmatprep.subr.mxu1 %v2170_v57  ;;  %v2162_v6 = vld [vmem:[%s14721_s9 + $0x38] sm:$0xff]  ;;  %v2159_v21 = vld [vmem:[%s14721_s9 + $0x20] sm:$0xff] }
 0x482   :  { %v1521_v23 = vpop.f32.mrf.mxu1  ;;  %13314 = vmatprep.mubr.msk.f32.mxu1 %vm374_vm3, %v1597_v22 }
 0x483   :  { %13310 = vmatmul.mubr.msk.f32.vlgmr.msra.gmra.mxu0 %vm374_vm3, %v1521_v23  ;;  %v13291_v24 = vpop.f32.mrf.mxu0 }
 0x484   :  { %v13286_v25 = vpop.f32.mrf.mxu1  ;;  %13318 = vmatpush3.msra.mxu0 %v2064_v52 }
 0x485   :  { %13319 = vmatprep.subr.mxu0 %v2063_v54 }
 0x486   :  { %v1673_v26 = vpop.f32.mrf.mxu1  ;;  %13320 = vmatpush3.msra.mxu0 %v2063_v54 }
 0x487   :  { %13315 = vmatmul.mubr.msk.f32.vlgmr.msra.gmra.mxu1 %vm374_vm3, %v1673_v26  ;;  %13321 = vmatprep.subr.mxu0 %v2062_v55 }
 0x488   :  { %v13296_v27 = vpop.f32.mrf.mxu1  ;;  %13322 = vmatpush3.msra.mxu0 %v2062_v55  ;;  %13329 = vmatpush3.msra.mxu1 %v2170_v57 }
 0x489   :  { %13323 = vmatprep.subr.mxu0 %v2061_v56  ;;  %13330 = vmatprep.subr.mxu1 %v2169_v61 }
 0x48a   :  { %13324 = vmatpush3.msra.mxu0 %v2061_v56  ;;  %13331 = vmatpush3.msra.mxu1 %v2169_v61 }
 0x48b   :  { %13332 = vmatprep.subr.mxu1 %v2168_v62 }
 0x48c   :  { %13333 = vmatpush3.msra.mxu1 %v2168_v62 }
 0x48d   :  { %13334 = vmatprep.subr.mxu1 %v2167_v63 }
 0x48e   :  { %13335 = vmatpush3.msra.mxu1 %v2167_v63 }
 0x48f   :  { %13336 = vmatprep.subr.mxu1 %v2166_v58 }
 0x490   :  { %13337 = vmatpush3.msra.mxu1 %v2166_v58 }
 0x491   :  { %13338 = vmatprep.subr.mxu1 %v2165_v0 }
 0x492   :  { %13339 = vmatpush3.msra.mxu1 %v2165_v0  ;;  %v12492_v0 = vld [vmem:[%s14434_s6 + $0x38] sm:$0xff] }
 0x493   :  { %13340 = vmatprep.subr.mxu1 %v2164_v1  ;;  %13363 = vmatprep.subr.mxu0 %v12492_v0 }
 0x494   :  { %13341 = vmatpush3.msra.mxu1 %v2164_v1  ;;  %v12491_v1 = vld [vmem:[%s14434_s6 + $0x30] sm:$0xff] }
 0x495   :  { %13342 = vmatprep.subr.mxu1 %v2163_v4 }
 0x496   :  { %13343 = vmatpush3.msra.mxu1 %v2163_v4  ;;  %v12490_v4 = vld [vmem:[%s14434_s6 + $0x28] sm:$0xff] }
 0x497   :  { %13344 = vmatprep.subr.mxu1 %v2162_v6 }
 0x498   :  { %13345 = vmatpush3.msra.mxu1 %v2162_v6  ;;  %v12489_v6 = vld [vmem:[%s14434_s6 + $0x20] sm:$0xff]  ;;  %s14398_s6 = smov 14  }
 0x499   :  { %13346 = vmatprep.subr.mxu1 %v2161_v9  ;;  %s14787_s19 = sld [smem:[%s16119_s0 + %s14398_s6]]  }
 0x49a   :  { %13347 = vmatpush3.msra.mxu1 %v2161_v9 }
 0x49b   :  { %13348 = vmatprep.subr.mxu1 %v2160_v14 }
 0x49c   :  { %13349 = vmatpush3.msra.mxu1 %v2160_v14 }
 0x49d   :  { %13350 = vmatprep.subr.mxu1 %v2159_v21 }
 0x49e   :  { %13351 = vmatpush3.msra.mxu1 %v2159_v21 }
 0x4e7   :  { %v13306_v30 = vpop.f32.mrf.mxu1 }
 0x4e9   :  { %v1830_v34 = vpop.f32.mrf.mxu1 }
 0x53f   :  { %v13301_v29 = vpop.f32.mrf.mxu0 }
 0x540   :  { %v1836_v33 = vadd.f32 %v13306_v30, %v13301_v29  ;;  %v12481_v30 = vld [vmem:[%s14738_s18] ss:$0 sm:$0xff] }
 0x541   :  { %v1749_v31 = vpop.f32.mrf.mxu0 }
 0x542   :  { %v1831_v37 = vadd.f32 %v1830_v34, %v1749_v31 }
 0x543   :  { %v13311_v32 = vpop.f32.mrf.mxu0 }
 0x544   :  { %v1921_v36 = vadd.f32 %v13311_v32, %v1836_v33  ;;  %v12482_v32 = vld [vmem:[%s14743_s23] ss:$0 sm:$0xff] }
 0x545   :  { %v1911_v35 = vpop.f32.mrf.mxu0 }
 0x546   :  { %v1920_v20 = vadd.f32 %v1911_v35, %v1831_v37 }
 0x547   :  { %v13316_v39 = vpop.f32.mrf.mxu1 }
 0x548   :  { %v2004_v40 = vadd.f32 %v13316_v39, %v1921_v36 }
 0x549   :  { %v1994_v10 = vpop.f32.mrf.mxu1 }
 0x54a   :  { %v2013_v43 = vadd.f32 %v12480_v19, %v2004_v40  ;;  %v2003_v44 = vadd.f32 %v1994_v10, %v1920_v20  ;;  %v2157_v20 = vld [vmem:[%s14721_s9 + $0x10] sm:$0xff]  ;;  %v2156_v40 = vld [vmem:[%s14721_s9 + $0x8] sm:$0xff]  ;;  %v2155_v10 = vld [vmem:[%s14721_s9] sm:$0xff] }
 0x54c   :  { %v2012_v13 = vadd.f32 %v12480_v19, %v2003_v44  ;;  %v2015_v11 = vadd.f32 %v2013_v43, %v14447_v5  ;;  %v2158_v19 = vld [vmem:[%s14721_s9 + $0x18] sm:$0xff]  ;;  %v12483_v43 = vld [vmem:[%s14759_s28] ss:$0 sm:$0xff] }
 0x54d   :  { %13352 = vmatprep.subr.mxu1 %v2158_v19 }
 0x54e   :  { %v2021_v16 = vsel %vm272_vm0, %v2015_v11, 0.0  ;;  %v2014_v12 = vadd.f32 %v2012_v13, %v14441_v2  ;;  %13353 = vmatpush3.msra.mxu1 %v2158_v19 }
 0x54f   :  { %2022 = vadd.xlane.f32.xlu1 %v2021_v16  ;;  %13354 = vmatprep.subr.mxu1 %v2157_v20 }
 0x550   :  { %v2018_v15 = vsel %vm272_vm0, %v2014_v12, 0.0  ;;  %13355 = vmatpush3.msra.mxu1 %v2157_v20 }
 0x551   :  { %2019 = vadd.xlane.f32.xlu0 %v2018_v15  ;;  %13356 = vmatprep.subr.mxu1 %v2156_v40 }
 0x552   :  { %13357 = vmatpush3.msra.mxu1 %v2156_v40 }
 0x553   :  { %13358 = vmatprep.subr.mxu1 %v2155_v10 }
 0x554   :  { %13359 = vmatpush3.msra.mxu1 %v2155_v10 }
 0x555   :  { %13399 = vmatprep.subr.mxu1 %v14380_v7 }
 0x5d8   :  { %v2023_v45 = vpop.xlane.xlu1 %2022 }
 0x5d9   :  { %v2026_v46 = vmul.f32 0.03125, %v2023_v45  ;;  %v12486_v45 = vld [vmem:[%s14767_s3] ss:$0 sm:$0xff] }
 0x5da   :  { %v2020_v41 = vpop.xlane.xlu0 %2019 }
 0x5db   :  { %v2025_v47 = vmul.f32 0.03125, %v2020_v41  ;;  %v14699_v48 = vsub.f32 %v2015_v11, %v2026_v46 }
 0x5dd   :  { %v14701_v49 = vsub.f32 %v2014_v12, %v2025_v47  ;;  %v2030_v2 = vmul.f32 %v14699_v48, %v14699_v48 }
 0x5df   :  { %v2029_v50 = vmul.f32 %v14701_v49, %v14701_v49  ;;  %v2034_v51 = vsel %vm272_vm0, %v2030_v2, 0.0 }
 0x5e1   :  { %v2031_v5 = vsel %vm272_vm0, %v2029_v50, 0.0 }
 0x5e2   :  { %2032 = vadd.xlane.f32.xlu0 %v2031_v5 }
 0x5e6   :  { %2035 = vadd.xlane.f32.xlu0 %v2034_v51 }
 0x66b   :  { %v2033_v22 = vpop.xlane.xlu0 %2032 }
 0x66c   :  { %v2037_v23 = vmul.f32 0.03125, %v2033_v22 }
 0x66e   :  { %v2039_v24 = vadd.f32 1e-05, %v2037_v23 }
 0x66f   :  { %v2036_v25 = vpop.xlane.xlu0 %2035 }
 0x670   :  { %14170 = vrsqrt.f32 %v2039_v24  ;;  %v2038_v26 = vmul.f32 0.03125, %v2036_v25 }
 0x672   :  { %v2040_v27 = vadd.f32 1e-05, %v2038_v26  ;;  %v12487_v26 = vld [vmem:[%s14782_s10] ss:$0 sm:$0xff] }
 0x674   :  { %14172 = vrsqrt.f32 %v2040_v27 }
 0x67d   :  { %v14171_v29 = vpop.eup %14170 }
 0x67e   :  { %v2043_v31 = vmul.f32 %v14171_v29, %v14701_v49 }
 0x680   :  { %v2051_v33 = vmul.f32 %v12481_v30, %v2043_v31 }
 0x681   :  { %v14173_v34 = vpop.eup %14172 }
 0x682   :  { %v2044_v35 = vmul.f32 %v14173_v34, %v14699_v48  ;;  %v2059_v37 = vadd.f32 %v12482_v32, %v2051_v33 }
 0x684   :  { %v2052_v36 = vmul.f32 %v12481_v30, %v2044_v35  ;;  %13325 = vmatprep.mubr.msk.f32.mxu0 %vm272_vm0, %v2059_v37 }
 0x686   :  { %v2060_v39 = vadd.f32 %v12482_v32, %v2052_v36  ;;  %v12488_v32 = vld [vmem:[%s14787_s19] ss:$0 sm:$0xff] }
 0x688   :  { %13326 = vmatmul.mubr.msk.f32.vlgmr.msra.gmra.mxu0 %vm272_vm0, %v2060_v39 }
 0x689   :  { %13364 = vmatpush3.msra.mxu0 %v12492_v0 }
 0x68a   :  { %13365 = vmatprep.subr.mxu0 %v12491_v1 }
 0x68b   :  { %13366 = vmatpush3.msra.mxu0 %v12491_v1 }
 0x68c   :  { %13367 = vmatprep.subr.mxu0 %v12490_v4 }
 0x68d   :  { %13368 = vmatpush3.msra.mxu0 %v12490_v4 }
 0x68e   :  { %13369 = vmatprep.subr.mxu0 %v12489_v6 }
 0x68f   :  { %13370 = vmatpush3.msra.mxu0 %v12489_v6 }
 0x690   :  { %13374 = vmatprep.subr.mxu0 %v14380_v7 }
 0x748   :  { %v13327_v44 = vpop.f32.mrf.mxu0 }
 0x749   :  { %v2150_v13 = vadd.f32 %v13327_v44, %v12483_v43 }
 0x74a   :  { %v2144_v11 = vpop.f32.mrf.mxu0 }
 0x74b   :  { %v2145_v16 = vadd.f32 %v12483_v43, %v2144_v11  ;;  %v2154_v15 = vmax.f32 %v2150_v13, 0.0 }
 0x74d   :  { %v2153_v12 = vmax.f32 %v2145_v16, 0.0 }
 0x74f   :  { %13360 = vmatprep.mubr.f32.mxu1 %v2153_v12 }
 0x750   :  { %13361 = vmatmul.mubr.f32.vlgmr.msra.gmra.mxu1 %v2154_v15 }
 0x751   :  { %13401 = vmatprep.mubr.msk.f32.mxu1 %vm14383_vm1, %v14380_v7 }
 0x810   :  { %v13362_v46 = vpop.f32.mrf.mxu1 }
 0x811   :  { %v2250_v41 = vadd.f32 %v13362_v46, %v12486_v45 }
 0x812   :  { %v2244_v47 = vpop.f32.mrf.mxu1 }
 0x813   :  { %v2245_v48 = vadd.f32 %v12486_v45, %v2244_v47  ;;  %v2254_v49 = vadd.f32 %v2250_v41, %v2060_v39 }
 0x815   :  { %v2260_v50 = vsel %vm272_vm0, %v2254_v49, 0.0  ;;  %v2253_v5 = vadd.f32 %v2245_v48, %v2059_v37  ;;  %v12494_v37 = vld [vmem:[%s14454_s13 + $0x1] ss:$0 sm:$0xff]  ;;  %s14399_s13 = smov 17  }
 0x816   :  { %2261 = vadd.xlane.f32.xlu0 %v2260_v50  ;;  %s15008_s20 = sld [smem:[%s16119_s0 + %s14399_s13]]  }
 0x817   :  { %v2257_v2 = vsel %vm272_vm0, %v2253_v5, 0.0 }
 0x818   :  { %2258 = vadd.xlane.f32.xlu1 %v2257_v2 }
 0x89f   :  { %v2262_v51 = vpop.xlane.xlu0 %2261 }
 0x8a0   :  { %v2264_v52 = vmul.f32 0.03125, %v2262_v51 }
 0x8a1   :  { %v2259_v54 = vpop.xlane.xlu1 %2258 }
 0x8a2   :  { %v2266_v55 = vsub.f32 %v2254_v49, %v2264_v52  ;;  %v2263_v56 = vmul.f32 0.03125, %v2259_v54 }
 0x8a4   :  { %v2265_v57 = vsub.f32 %v2253_v5, %v2263_v56  ;;  %v2268_v61 = vmul.f32 %v2266_v55, %v2266_v55 }
 0x8a6   :  { %v2272_v62 = vsel %vm272_vm0, %v2268_v61, 0.0  ;;  %v2267_v63 = vmul.f32 %v2265_v57, %v2265_v57 }
 0x8a7   :  { %2273 = vadd.xlane.f32.xlu0 %v2272_v62 }
 0x8a8   :  { %v2269_v58 = vsel %vm272_vm0, %v2267_v63, 0.0 }
 0x8a9   :  { %2270 = vadd.xlane.f32.xlu1 %v2269_v58 }
 0x930   :  { %v2274_v9 = vpop.xlane.xlu0 %2273 }
 0x931   :  { %v2276_v14 = vmul.f32 0.03125, %v2274_v9 }
 0x932   :  { %v2271_v21 = vpop.xlane.xlu1 %2270 }
 0x933   :  { %v2278_v22 = vadd.f32 1e-05, %v2276_v14  ;;  %v2275_v23 = vmul.f32 0.03125, %v2271_v21 }
 0x935   :  { %14174 = vrsqrt.f32 %v2278_v22  ;;  %v2277_v24 = vadd.f32 1e-05, %v2275_v23 }
 0x937   :  { %14176 = vrsqrt.f32 %v2277_v24 }
 0x942   :  { %v14175_v25 = vpop.eup %14174 }
 0x943   :  { %v2282_v27 = vmul.f32 %v14175_v25, %v2266_v55 }
 0x944   :  { %v14177_v29 = vpop.eup %14176 }
 0x945   :  { %v2281_v30 = vmul.f32 %v14177_v29, %v2265_v57  ;;  %v2290_v31 = vmul.f32 %v12487_v26, %v2282_v27 }
 0x947   :  { %v2289_v33 = vmul.f32 %v12487_v26, %v2281_v30  ;;  %v14793_v35 = vadd.f32 %v12488_v32, %v2290_v31 }
 0x949   :  { %v14791_v34 = vadd.f32 %v12488_v32, %v2289_v33 }
 0x94b   :  { %13371 = vmatprep.mubr.msk.f32.mxu0 %vm272_vm0, %v14791_v34 }
 0x94c   :  { %13372 = vmatmul.mubr.msk.f32.vlgmr.msra.gmra.mxu0 %vm272_vm0, %v14793_v35 }
 0x94d   :  { %13376 = vmatprep.mubr.msk.f32.mxu0 %vm14383_vm1, %v14380_v7 }
 0xa0c   :  { %v13373_v36 = vpop.f32.mrf.mxu0 }
 0xa0d   :  { %v14802_v39 = vadd.f32 %v13373_v36, %v12494_v37 }
 0xa0e   :  { %v2384_v19 = vpop.f32.mrf.mxu0 }
 0xa0f   :  { %v14804_v20 = vadd.f32 %v12494_v37, %v2384_v19  ;;  %2402 = vrot.lane.b32.xlu0 %v14802_v39, %s14382_s15 }
 0xa11   :  { %2400 = vrot.lane.b32.xlu1 %v14804_v20, %s14382_s15 }
 0xa13   :  { %2408 = vrot.lane.b32.xlu0 %v14804_v20, %s14384_s16 }
 0xa15   :  { %2404 = vrot.lane.b32.xlu1 %v14804_v20, %s14381_s14 }
 0xa17   :  { %2412 = vrot.lane.b32.xlu0 %v14804_v20, %s14385_s17 }
 0xa19   :  { %2406 = vrot.lane.b32.xlu1 %v14802_v39, %s14381_s14 }
 0xa1d   :  { %2410 = vrot.lane.b32.xlu1 %v14802_v39, %s14384_s16 }
 0xa21   :  { %2488 = vrot.lane.b32.xlu1 %v14802_v39, %s14385_s17 }
 0xa81   :  { %v14822_v40 = vpop.permute.xlu0 %2402 }
 0xa82   :  { %2640 = vrot.lane.b32.xlu1 %v14822_v40, %s14385_s17 }
 0xa83   :  { %v2401_v10 = vpop.permute.xlu1 %2400 }
 0xa84   :  { %2564 = vrot.lane.b32.xlu0 %v2401_v10, %s14385_s17 }
 0xa85   :  { %v14827_v43 = vpop.permute.xlu0 %2408 }
 0xa87   :  { %v14829_v44 = vpop.permute.xlu1 %2404 }
 0xa88   :  { %2716 = vrot.lane.b32.xlu0 %v14829_v44, %s14385_s17 }
 0xa89   :  { %v2413_v13 = vpop.permute.xlu0 %2412 }
 0xa8a   :  { %13375 = vmatpush3.xpose.msk.msra.mxu0 %vm374_vm3, %v2413_v13 }
 0xa8b   :  { %v14834_v11 = vpop.permute.xlu1 %2406  ;;  %13379 = vmatprep.subr.mxu0 %v14380_v7 }
 0xa8c   :  { %2868 = vrot.lane.b32.xlu0 %v14827_v43, %s14385_s17  ;;  %2792 = vrot.lane.b32.xlu1 %v14834_v11, %s14385_s17 }
 0xa8d   :  { %13377 = vmatmul.mubr.msk.f32.vlgmr.msra.gmra.mxu0 %vm374_vm3, %v14804_v20 }
 0xa8e   :  { %13381 = vmatprep.mubr.msk.f32.mxu0 %vm14383_vm1, %v14380_v7 }
 0xa8f   :  { %v14845_v16 = vpop.permute.xlu1 %2410 }
 0xa90   :  { %2944 = vrot.lane.b32.xlu1 %v14845_v16, %s14385_s17 }
 0xa93   :  { %v2489_v12 = vpop.permute.xlu1 %2488 }
 0xa94   :  { %13380 = vmatpush3.xpose.msk.msra.mxu0 %vm374_vm3, %v2489_v12 }
 0xa95   :  { %13384 = vmatprep.subr.mxu0 %v14380_v7 }
 0xa97   :  { %13382 = vmatmul.mubr.msk.f32.vlgmr.msra.gmra.mxu0 %vm374_vm3, %v14802_v39 }
 0xa98   :  { %13386 = vmatprep.mubr.msk.f32.mxu0 %vm14383_vm1, %v14380_v7 }
 0xaf4   :  { %v2641_v45 = vpop.permute.xlu1 %2640 }
 0xaf6   :  { %v2565_v15 = vpop.permute.xlu0 %2564 }
 0xaf7   :  { %13385 = vmatpush3.xpose.msk.msra.mxu0 %vm374_vm3, %v2565_v15 }
 0xaf8   :  { %13389 = vmatprep.subr.mxu0 %v14380_v7 }
 0xafa   :  { %13387 = vmatmul.mubr.msk.f32.vlgmr.msra.gmra.mxu0 %vm374_vm3, %v2401_v10  ;;  %v2717_v46 = vpop.permute.xlu0 %2716 }
 0xafb   :  { %13390 = vmatpush3.xpose.msk.msra.mxu0 %vm374_vm3, %v2641_v45  ;;  %13391 = vmatprep.mubr.msk.f32.mxu0 %vm14383_vm1, %v14380_v7 }
 0xafc   :  { %13394 = vmatprep.subr.mxu0 %v14380_v7 }
 0xafe   :  { %13392 = vmatmul.mubr.msk.f32.vlgmr.msra.gmra.mxu0 %vm374_vm3, %v14822_v40  ;;  %v2793_v41 = vpop.permute.xlu1 %2792  ;;  %v2869_v47 = vpop.permute.xlu0 %2868 }
 0xaff   :  { %13395 = vmatpush3.xpose.msk.msra.mxu0 %vm374_vm3, %v2717_v46  ;;  %13400 = vmatpush3.xpose.msk.msra.mxu1 %vm374_vm3, %v2793_v41 }
 0xb00   :  { %13396 = vmatprep.mubr.msk.f32.mxu0 %vm14383_vm1, %v14380_v7  ;;  %13404 = vmatprep.subr.mxu0 %v14380_v7 }
 0xb01   :  { %13409 = vmatprep.subr.mxu1 %v14380_v7 }
 0xb02   :  { %13397 = vmatmul.mubr.msk.f32.vlgmr.msra.gmra.mxu0 %vm374_vm3, %v14829_v44  ;;  %13402 = vmatmul.mubr.msk.f32.vlgmr.msra.gmra.mxu1 %vm374_vm3, %v14834_v11  ;;  %v2945_v48 = vpop.permute.xlu1 %2944 }
 0xb03   :  { %13405 = vmatpush3.xpose.msk.msra.mxu0 %vm374_vm3, %v2869_v47  ;;  %13410 = vmatpush3.xpose.msk.msra.mxu1 %vm374_vm3, %v2945_v48 }
 0xb04   :  { %13406 = vmatprep.mubr.msk.f32.mxu0 %vm14383_vm1, %v14380_v7  ;;  %13411 = vmatprep.mubr.msk.f32.mxu1 %vm14383_vm1, %v14380_v7 }
 0xb05   :  { %13414 = vmatprep.subr.mxu0 %v14380_v7  ;;  %13419 = vmatprep.subr.mxu1 %v14380_v7 }
 0xb06   :  { %13407 = vmatmul.mubr.msk.f32.vlgmr.msra.gmra.mxu0 %vm374_vm3, %v14827_v43  ;;  %13412 = vmatmul.mubr.msk.f32.vlgmr.msra.gmra.mxu1 %vm374_vm3, %v14845_v16 }
 0xb07   :  { %13416 = vmatprep.mubr.msk.f32.mxu0 %vm14383_vm1, %v14380_v7  ;;  %13421 = vmatprep.mubr.msk.f32.mxu1 %vm14383_vm1, %v14380_v7 }
 0xb4d   :  { %v2484_v49 = vpop.f32.mrf.mxu0 }
 0xb4e   :  { %v2485_v50 = vadd.f32 %v2484_v49, %v14566_v38 }
 0xb4f   :  { %v13378_v5 = vpop.f32.mrf.mxu0 }
 0xb50   :  { %v3020_v2 = vsel %vm374_vm3, %v2485_v50, -inf }
 0xb51   :  { %3021 = vmax.xlane.f32.xlu0 %v3020_v2 }
 0xb57   :  { %v2560_v51 = vpop.f32.mrf.mxu0 }
 0xb58   :  { %v2561_v52 = vadd.f32 %v2560_v51, %v14571_v42 }
 0xb59   :  { %v13383_v54 = vpop.f32.mrf.mxu0 }
 0xb5a   :  { %v3023_v55 = vsel %vm374_vm3, %v2561_v52, -inf }
 0xb5b   :  { %3024 = vmax.xlane.f32.xlu1 %v3023_v55 }
 0xb6c   :  { %3108 = vrot.lane.b32.xlu1 %v14804_v20, %s14388_s22 }
 0xb70   :  { %3260 = vrot.lane.b32.xlu1 %v2401_v10, %s14388_s22 }
 0xbba   :  { %v2636_v56 = vpop.f32.mrf.mxu0 }
 0xbbb   :  { %v2637_v57 = vadd.f32 %v2636_v56, %v14577_v53 }
 0xbbc   :  { %v13388_v38 = vpop.f32.mrf.mxu0 }
 0xbbd   :  { %v3026_v61 = vsel %vm374_vm3, %v2637_v57, -inf }
 0xbbe   :  { %3027 = vmax.xlane.f32.xlu0 %v3026_v61  ;;  %v2712_v62 = vpop.f32.mrf.mxu0 }
 0xbbf   :  { %v2713_v63 = vadd.f32 %v2712_v62, %v14580_v59 }
 0xbc0   :  { %v13393_v42 = vpop.f32.mrf.mxu0 }
 0xbc1   :  { %v3029_v58 = vsel %vm374_vm3, %v2713_v63, -inf }
 0xbc2   :  { %3030 = vmax.xlane.f32.xlu0 %v3029_v58  ;;  %v2788_v0 = vpop.f32.mrf.mxu0  ;;  %v2864_v1 = vpop.f32.mrf.mxu1 }
 0xbc3   :  { %v14902_v4 = vadd.f32 %v2788_v0, %v14582_v60  ;;  %v2865_v6 = vadd.f32 %v2864_v1, %v14585_v3 }
 0xbc4   :  { %v13398_v9 = vpop.f32.mrf.mxu0  ;;  %v13403_v53 = vpop.f32.mrf.mxu1 }
 0xbc5   :  { %v3032_v14 = vsel %vm374_vm3, %v14902_v4, -inf  ;;  %v3035_v21 = vsel %vm374_vm3, %v2865_v6, -inf }
 0xbc6   :  { %3033 = vmax.xlane.f32.xlu1 %v3032_v14  ;;  %v2940_v59 = vpop.f32.mrf.mxu0  ;;  %3036 = vmax.xlane.f32.xlu0 %v3035_v21  ;;  %v3016_v22 = vpop.f32.mrf.mxu1 }
 0xbc7   :  { %v14909_v23 = vadd.f32 %v2940_v59, %v14589_v8  ;;  %v3017_v24 = vadd.f32 %v3016_v22, %v14595_v28 }
 0xbc8   :  { %v13408_v60 = vpop.f32.mrf.mxu0  ;;  %v13413_v25 = vpop.f32.mrf.mxu1 }
 0xbc9   :  { %v3038_v3 = vsel %vm374_vm3, %v14909_v23, -inf  ;;  %v3041_v26 = vsel %vm374_vm3, %v3017_v24, -inf }
 0xbca   :  { %3039 = vmax.xlane.f32.xlu1 %v3038_v3  ;;  %3042 = vmax.xlane.f32.xlu0 %v3041_v26 }
 0xbda   :  { %v3022_v27 = vpop.xlane.xlu0 %3021 }
 0xbdb   :  { %3336 = vrot.lane.b32.xlu1 %v14822_v40, %s14388_s22  ;;  %v3044_v29 = vsub.f32 %v2485_v50, %v3022_v27 }
 0xbdd   :  { %v3052_v31 = vmul.f32 1.442695, %v3044_v29 }
 0xbdf   :  { %14178 = vpow2.f32 %v3052_v31 }
 0xbe0   :  { %3184 = vrot.lane.b32.xlu0 %v14802_v39, %s14388_s22 }
 0xbe4   :  { %v3025_v8 = vpop.xlane.xlu1 %3024 }
 0xbe5   :  { %v3045_v30 = vsub.f32 %v2561_v52, %v3025_v8 }
 0xbe7   :  { %v3054_v32 = vmul.f32 1.442695, %v3045_v30 }
 0xbe8   :  { %v3109_v28 = vpop.permute.xlu1 %3108 }
 0xbe9   :  { %13415 = vmatpush3.msra.mxu0 %v3109_v28  ;;  %14180 = vpow2.f32 %v3054_v32  ;;  %v12497_v32 = vld [vmem:[%s14657_s26 + $0x20] sm:$0xff] }
 0xbea   :  { %13424 = vmatprep.subr.mxu0 %v14380_v7 }
 0xbec   :  { %v14920_v33 = vpop.eup %14178 }
 0xbed   :  { %v3068_v36 = vsel %vm374_vm3, %v14920_v33, 0.0 }
 0xbf6   :  { %v14181_v37 = vpop.eup %14180 }
 0xbf7   :  { %v3071_v39 = vsel %vm374_vm3, %v14181_v37, 0.0 }
 0xbff   :  { %3069 = vadd.xlane.f32.xlu1 %v3068_v36  ;;  %3072 = vadd.xlane.f32.xlu0 %v3071_v39 }
 0xc47   :  { %v3028_v19 = vpop.xlane.xlu0 %3027 }
 0xc48   :  { %v3046_v20 = vsub.f32 %v2637_v57, %v3028_v19  ;;  %v3261_v57 = vpop.permute.xlu1 %3260 }
 0xc4a   :  { %v3056_v40 = vmul.f32 1.442695, %v3046_v20 }
 0xc4b   :  { %v3031_v10 = vpop.xlane.xlu0 %3030 }
 0xc4c   :  { %14182 = vpow2.f32 %v3056_v40  ;;  %v3047_v15 = vsub.f32 %v2713_v63, %v3031_v10  ;;  %v12498_v10 = vld [vmem:[%s14657_s26 + $0x28] sm:$0xff] }
 0xc4e   :  { %v3058_v47 = vmul.f32 1.442695, %v3047_v15 }
 0xc4f   :  { %v3037_v13 = vpop.xlane.xlu0 %3036  ;;  %v3034_v38 = vpop.xlane.xlu1 %3033 }
 0xc50   :  { %v3049_v12 = vsub.f32 %v2865_v6, %v3037_v13  ;;  %v3048_v61 = vsub.f32 %v14902_v4, %v3034_v38 }
 0xc52   :  { %v3062_v45 = vmul.f32 1.442695, %v3049_v12  ;;  %v3060_v63 = vmul.f32 1.442695, %v3048_v61 }
 0xc53   :  { %v3043_v46 = vpop.xlane.xlu0 %3042  ;;  %v3040_v62 = vpop.xlane.xlu1 %3039 }
 0xc54   :  { %14184 = vpow2.f32 %v3062_v45  ;;  %v3051_v41 = vsub.f32 %v3017_v24, %v3043_v46  ;;  %v3050_v42 = vsub.f32 %v14909_v23, %v3040_v62  ;;  %v12499_v46 = vld [vmem:[%s14657_s26 + $0x30] sm:$0xff] }
 0xc56   :  { %v3066_v48 = vmul.f32 1.442695, %v3051_v41  ;;  %v3064_v58 = vmul.f32 1.442695, %v3050_v42  ;;  %v12500_v41 = vld [vmem:[%s14657_s26 + $0x38] sm:$0xff] }
 0xc57   :  { %v3185_v49 = vpop.permute.xlu0 %3184  ;;  %v3337_v0 = vpop.permute.xlu1 %3336 }
 0xc58   :  { %14186 = vpow2.f32 %v3066_v48  ;;  %13420 = vmatpush3.msra.mxu1 %v3185_v49 }
 0xc59   :  { %v14183_v50 = vpop.eup %14182  ;;  %13429 = vmatprep.subr.mxu1 %v14380_v7  ;;  %14188 = vpow2.f32 %v3058_v47 }
 0xc5a   :  { %v3074_v5 = vsel %vm374_vm3, %v14183_v50, 0.0  ;;  %14190 = vpow2.f32 %v3060_v63 }
 0xc5b   :  { %3075 = vadd.xlane.f32.xlu1 %v3074_v5  ;;  %14192 = vpow2.f32 %v3064_v58 }
 0xc61   :  { %v14927_v2 = vpop.eup %14184 }
 0xc62   :  { %v3083_v51 = vsel %vm374_vm3, %v14927_v2, 0.0 }
 0xc63   :  { %3084 = vadd.xlane.f32.xlu0 %v3083_v51 }
 0xc65   :  { %v14931_v52 = vpop.eup %14186 }
 0xc66   :  { %v3089_v54 = vsel %vm374_vm3, %v14931_v52, 0.0  ;;  %v14189_v55 = vpop.eup %14188 }
 0xc67   :  { %3090 = vadd.xlane.f32.xlu0 %v3089_v54  ;;  %v3077_v56 = vsel %vm374_vm3, %v14189_v55, 0.0  ;;  %v14191_v6 = vpop.eup %14190 }
 0xc68   :  { %v3080_v4 = vsel %vm374_vm3, %v14191_v6, 0.0  ;;  %v14193_v9 = vpop.eup %14192 }
 0xc69   :  { %v3086_v53 = vsel %vm374_vm3, %v14193_v9, 0.0 }
 0xc6b   :  { %3078 = vadd.xlane.f32.xlu0 %v3077_v56 }
 0xc6c   :  { %3488 = vrot.lane.b32.xlu1 %v14834_v11, %s14388_s22 }
 0xc81   :  { %3412 = vrot.lane.b32.xlu0 %v14829_v44, %s14388_s22 }
 0xc85   :  { %3564 = vrot.lane.b32.xlu0 %v14827_v43, %s14388_s22 }
 0xc88   :  { %v3073_v1 = vpop.xlane.xlu0 %3072  ;;  %v3070_v11 = vpop.xlane.xlu1 %3069 }
 0xc89   :  { %14194 = vrcp.f32 %v3073_v1 }
 0xc8a   :  { %14196 = vrcp.f32 %v3070_v11 }
 0xc90   :  { %3081 = vadd.xlane.f32.xlu1 %v3080_v4  ;;  %v12534_v4 = vld [vmem:[%s14692_s30 + $0x1] ss:$0 sm:$0xff] }
 0xc94   :  { %3087 = vadd.xlane.f32.xlu1 %v3086_v53 }
 0xc96   :  { %v14195_v14 = vpop.eup %14194 }
 0xc97   :  { %v14197_v21 = vpop.eup %14196  ;;  %v3101_v44 = vmul.f32 %v14195_v14, %v14181_v37 }
 0xc98   :  { %v3100_v59 = vmul.f32 %v14197_v21, %v14920_v33 }
 0xc99   :  { %13422 = vmatmul.mubr.msk.f32.vlgmr.msra.gmra.mxu1 %vm374_vm3, %v3101_v44 }
 0xc9a   :  { %13417 = vmatmul.mubr.msk.f32.vlgmr.msra.gmra.mxu0 %vm374_vm3, %v3100_v59  ;;  %13430 = vmatpush3.msra.mxu1 %v3337_v0 }
 0xc9b   :  { %13425 = vmatpush3.msra.mxu0 %v3261_v57  ;;  %13426 = vmatprep.mubr.msk.f32.mxu0 %vm14383_vm1, %v14380_v7 }
 0xc9c   :  { %13434 = vmatprep.subr.mxu0 %v14380_v7  ;;  %13431 = vmatprep.mubr.msk.f32.mxu1 %vm14383_vm1, %v14380_v7 }
 0xc9d   :  { %13439 = vmatprep.subr.mxu1 %v14380_v7 }
 0xca5   :  { %3640 = vrot.lane.b32.xlu1 %v14845_v16, %s14388_s22 }
 0xce4   :  { %v3076_v43 = vpop.xlane.xlu1 %3075 }
 0xce5   :  { %14198 = vrcp.f32 %v3076_v43 }
 0xce8   :  { %v3489_v8 = vpop.permute.xlu1 %3488 }
 0xcec   :  { %v3085_v22 = vpop.xlane.xlu0 %3084 }
 0xcf0   :  { %v3091_v23 = vpop.xlane.xlu0 %3090 }
 0xcf2   :  { %v14199_v24 = vpop.eup %14198 }
 0xcf3   :  { %v3102_v60 = vmul.f32 %v14199_v24, %v14183_v50 }
 0xcf4   :  { %v3079_v25 = vpop.xlane.xlu0 %3078 }
 0xcf5   :  { %14200 = vrcp.f32 %v3079_v25  ;;  %13427 = vmatmul.mubr.msk.f32.vlgmr.msra.gmra.mxu0 %vm374_vm3, %v3102_v60 }
 0xcf6   :  { %13436 = vmatprep.mubr.msk.f32.mxu0 %vm14383_vm1, %v14380_v7  ;;  %14202 = vrcp.f32 %v3085_v22 }
 0xcf7   :  { %14204 = vrcp.f32 %v3091_v23 }
 0xcf8   :  { %v3413_v3 = vpop.permute.xlu0 %3412 }
 0xcf9   :  { %13435 = vmatpush3.msra.mxu0 %v3413_v3 }
 0xcfa   :  { %13444 = vmatprep.subr.mxu0 %v14380_v7 }
 0xcfc   :  { %v3565_v19 = vpop.permute.xlu0 %3564 }
 0xd02   :  { %v14201_v26 = vpop.eup %14200 }
 0xd03   :  { %v3103_v16 = vmul.f32 %v14201_v26, %v14189_v55  ;;  %v14203_v27 = vpop.eup %14202 }
 0xd04   :  { %v3105_v29 = vmul.f32 %v14203_v27, %v14927_v2  ;;  %v14205_v31 = vpop.eup %14204 }
 0xd05   :  { %13432 = vmatmul.mubr.msk.f32.vlgmr.msra.gmra.mxu1 %vm374_vm3, %v3103_v16  ;;  %v3107_v37 = vmul.f32 %v14205_v31, %v14931_v52  ;;  %v12540_v31 = vld [vmem:[%s14712_s4 + $0x28] sm:$0xff] }
 0xd06   :  { %13440 = vmatpush3.msra.mxu1 %v3489_v8  ;;  %13441 = vmatprep.mubr.msk.f32.mxu1 %vm14383_vm1, %v14380_v7 }
 0xd07   :  { %13449 = vmatprep.subr.mxu1 %v14380_v7 }
 0xd09   :  { %13442 = vmatmul.mubr.msk.f32.vlgmr.msra.gmra.mxu1 %vm374_vm3, %v3105_v29 }
 0xd0a   :  { %13451 = vmatprep.mubr.msk.f32.mxu1 %vm14383_vm1, %v14380_v7 }
 0xd19   :  { %v3082_v30 = vpop.xlane.xlu1 %3081 }
 0xd1a   :  { %14206 = vrcp.f32 %v3082_v30  ;;  %v12542_v30 = vld [vmem:[%s14712_s4 + $0x38] sm:$0xff] }
 0xd1d   :  { %v3088_v28 = vpop.xlane.xlu1 %3087 }
 0xd1e   :  { %14208 = vrcp.f32 %v3088_v28  ;;  %v12541_v28 = vld [vmem:[%s14712_s4 + $0x30] sm:$0xff] }
 0xd21   :  { %v3641_v33 = vpop.permute.xlu1 %3640 }
 0xd22   :  { %13450 = vmatpush3.msra.mxu1 %v3641_v33  ;;  %v4395_v33 = vld [vmem:[%s15008_s20 + $0x18] sm:$0xff] }
 0xd23   :  { %13452 = vmatmul.mubr.msk.f32.vlgmr.msra.gmra.mxu1 %vm374_vm3, %v3107_v37  ;;  %13459 = vmatprep.subr.mxu1 %v12497_v32  ;;  %v12562_v37 = vld [vmem:[%s14721_s9 + $0xf8] sm:$0xff] }
 0xd24   :  { %13460 = vmatpush3.msra.mxu1 %v12497_v32  ;;  %v12539_v32 = vld [vmem:[%s14712_s4 + $0x20] sm:$0xff]  ;;  %s14400_s4 = smov 1  }
 0xd25   :  { %13469 = vmatprep.subr.mxu1 %v12500_v41  ;;  %s12406_s25 = sld [smem:[%s16119_s0 + %s14400_s4]]   ;;  %s14407_s4 = smov 29  }
 0xd27   :  { %v14207_v36 = vpop.eup %14206 }
 0xd28   :  { %v3104_v39 = vmul.f32 %v14207_v36, %v14191_v6  ;;  %v12561_v36 = vld [vmem:[%s14721_s9 + $0xf0] sm:$0xff] }
 0xd2a   :  { %13437 = vmatmul.mubr.msk.f32.vlgmr.msra.gmra.mxu0 %vm374_vm3, %v3104_v39  ;;  %v12560_v39 = vld [vmem:[%s14721_s9 + $0xe8] sm:$0xff] }
 0xd2b   :  { %v14209_v20 = vpop.eup %14208  ;;  %13445 = vmatpush3.msra.mxu0 %v3565_v19  ;;  %13446 = vmatprep.mubr.msk.f32.mxu0 %vm14383_vm1, %v14380_v7  ;;  %v12559_v19 = vld [vmem:[%s14721_s9 + $0xe0] sm:$0xff] }
 0xd2c   :  { %v3106_v40 = vmul.f32 %v14209_v20, %v14193_v9  ;;  %13454 = vmatprep.subr.mxu0 %v12498_v10  ;;  %v12558_v20 = vld [vmem:[%s14721_s9 + $0xd8] sm:$0xff] }
 0xd2e   :  { %13447 = vmatmul.mubr.msk.f32.vlgmr.msra.gmra.mxu0 %vm374_vm3, %v3106_v40  ;;  %v12557_v40 = vld [vmem:[%s14721_s9 + $0xd0] sm:$0xff] }
 0xd2f   :  { %13455 = vmatpush3.msra.mxu0 %v12498_v10  ;;  %v12556_v10 = vld [vmem:[%s14721_s9 + $0xc8] sm:$0xff] }
 0xd30   :  { %13464 = vmatprep.subr.mxu0 %v12499_v46 }
 0xd59   :  { %v3256_v13 = vpop.f32.mrf.mxu1 }
 0xd5a   :  { %v3180_v12 = vpop.f32.mrf.mxu0 }
 0xd5b   :  { %13461 = vmatprep.mubr.msk.f32.mxu1 %vm374_vm3, %v3180_v12  ;;  %v13423_v15 = vpop.f32.mrf.mxu1  ;;  %v12554_v12 = vld [vmem:[%s14721_s9 + $0xb8] sm:$0xff] }
 0xd5c   :  { %v13418_v45 = vpop.f32.mrf.mxu0  ;;  %13462 = vmatmul.mubr.msk.f32.vlgmr.msra.gmra.mxu1 %vm374_vm3, %v3256_v13  ;;  %v12555_v13 = vld [vmem:[%s14721_s9 + $0xc0] sm:$0xff]  ;;  %v12553_v15 = vld [vmem:[%s14721_s9 + $0xb0] sm:$0xff] }
 0xd5d   :  { %13470 = vmatpush3.msra.mxu1 %v12500_v41  ;;  %v12552_v45 = vld [vmem:[%s14721_s9 + $0xa8] sm:$0xff] }
 0xd5e   :  { %13485 = vmatprep.subr.mxu1 %v12562_v37 }
 0xdb5   :  { %v3332_v47 = vpop.f32.mrf.mxu0 }
 0xdb6   :  { %13456 = vmatprep.mubr.msk.f32.mxu0 %vm374_vm3, %v3332_v47 }
 0xdb7   :  { %v13428_v48 = vpop.f32.mrf.mxu0 }
 0xdc5   :  { %v3408_v49 = vpop.f32.mrf.mxu1 }
 0xdc6   :  { %13457 = vmatmul.mubr.msk.f32.vlgmr.msra.gmra.mxu0 %vm374_vm3, %v3408_v49 }
 0xdc7   :  { %v13433_v50 = vpop.f32.mrf.mxu1  ;;  %13465 = vmatpush3.msra.mxu0 %v12499_v46  ;;  %v12551_v46 = vld [vmem:[%s14721_s9 + $0xa0] sm:$0xff] }
 0xdc8   :  { %13474 = vmatprep.subr.mxu0 %v12542_v30 }
 0xdc9   :  { %v3560_v5 = vpop.f32.mrf.mxu1 }
 0xdcb   :  { %v13443_v2 = vpop.f32.mrf.mxu1 }
 0xde3   :  { %v3712_v51 = vpop.f32.mrf.mxu1 }
 0xde5   :  { %v13453_v52 = vpop.f32.mrf.mxu1 }
 0xdea   :  { %v3484_v54 = vpop.f32.mrf.mxu0 }
 0xdeb   :  { %13466 = vmatprep.mubr.msk.f32.mxu0 %vm374_vm3, %v3484_v54  ;;  %v12538_v54 = vld [vmem:[%s14743_s23 + $0x1] ss:$0 sm:$0xff]  ;;  %s15552_s23 = sld [smem:[%s16119_s0 + %s14412_s21]]   ;;  %s14416_s21 = smov 32  }
 0xdec   :  { %v13438_v55 = vpop.f32.mrf.mxu0  ;;  %13467 = vmatmul.mubr.msk.f32.vlgmr.msra.gmra.mxu0 %vm374_vm3, %v3560_v5  ;;  %s15603_s27 = sld [smem:[%s16119_s0 + %s14416_s21]]   ;;  %s14419_s21 = smov 33  }
 0xded   :  { %13475 = vmatpush3.msra.mxu0 %v12542_v30 }
 0xdee   :  { %v3636_v56 = vpop.f32.mrf.mxu0  ;;  %13476 = vmatprep.subr.mxu0 %v12541_v28 }
 0xdef   :  { %13471 = vmatprep.mubr.msk.f32.mxu1 %vm374_vm3, %v3636_v56  ;;  %13477 = vmatpush3.msra.mxu0 %v12541_v28 }
 0xdf0   :  { %v13448_v57 = vpop.f32.mrf.mxu0  ;;  %13472 = vmatmul.mubr.msk.f32.vlgmr.msra.gmra.mxu1 %vm374_vm3, %v3712_v51  ;;  %13478 = vmatprep.subr.mxu0 %v12540_v31  ;;  %v12537_v51 = vld [vmem:[%s14738_s18 + $0x1] ss:$0 sm:$0xff]  ;;  %s14401_s18 = smov 18  }
 0xdf1   :  { %13479 = vmatpush3.msra.mxu0 %v12540_v31  ;;  %13486 = vmatpush3.msra.mxu1 %v12562_v37  ;;  %s15061_s29 = sld [smem:[%s16119_s0 + %s14401_s18]]   ;;  %s14408_s18 = smov 15  }
 0xdf2   :  { %13480 = vmatprep.subr.mxu0 %v12539_v32  ;;  %13487 = vmatprep.subr.mxu1 %v12561_v36 }
 0xdf3   :  { %13481 = vmatpush3.msra.mxu0 %v12539_v32  ;;  %13488 = vmatpush3.msra.mxu1 %v12561_v36 }
 0xdf4   :  { %13520 = vmatprep.subr.mxu0 %v4395_v33  ;;  %13489 = vmatprep.subr.mxu1 %v12560_v39 }
 0xdf5   :  { %13490 = vmatpush3.msra.mxu1 %v12560_v39  ;;  %v14402_v39 = vmov -1e+30  }
 0xdf6   :  { %13491 = vmatprep.subr.mxu1 %v12559_v19 }
 0xdf7   :  { %13492 = vmatpush3.msra.mxu1 %v12559_v19  ;;  %v15158_v19 = vsel %vm257_vm2, 0.0, %v14402_v39 }
 0xdf8   :  { %13493 = vmatprep.subr.mxu1 %v12558_v20 }
 0xdf9   :  { %13494 = vmatpush3.msra.mxu1 %v12558_v20 }
 0xdfa   :  { %13495 = vmatprep.subr.mxu1 %v12557_v40 }
 0xdfb   :  { %13496 = vmatpush3.msra.mxu1 %v12557_v40 }
 0xdfc   :  { %13497 = vmatprep.subr.mxu1 %v12556_v10 }
 0xdfd   :  { %13498 = vmatpush3.msra.mxu1 %v12556_v10 }
 0xdfe   :  { %13499 = vmatprep.subr.mxu1 %v12555_v13 }
 0xdff   :  { %13500 = vmatpush3.msra.mxu1 %v12555_v13 }
 0xe00   :  { %13501 = vmatprep.subr.mxu1 %v12554_v12 }
 0xe01   :  { %13502 = vmatpush3.msra.mxu1 %v12554_v12 }
 0xe02   :  { %13503 = vmatprep.subr.mxu1 %v12553_v15 }
 0xe03   :  { %13504 = vmatpush3.msra.mxu1 %v12553_v15 }
 0xe04   :  { %13505 = vmatprep.subr.mxu1 %v12552_v45 }
 0xe05   :  { %13506 = vmatpush3.msra.mxu1 %v12552_v45 }
 0xe06   :  { %13507 = vmatprep.subr.mxu1 %v12551_v46 }
 0xe07   :  { %13508 = vmatpush3.msra.mxu1 %v12551_v46 }
 0xe1c   :  { %v13463_v61 = vpop.f32.mrf.mxu1 }
 0xe1e   :  { %v3869_v58 = vpop.f32.mrf.mxu1 }
 0xe86   :  { %v13458_v38 = vpop.f32.mrf.mxu0 }
 0xe87   :  { %v3875_v42 = vadd.f32 %v13463_v61, %v13458_v38 }
 0xe88   :  { %v3788_v62 = vpop.f32.mrf.mxu0 }
 0xe89   :  { %v3870_v1 = vadd.f32 %v3869_v58, %v3788_v62  ;;  %v4393_v58 = vld [vmem:[%s15008_s20 + $0x8] sm:$0xff] }
 0xeac   :  { %v13468_v63 = vpop.f32.mrf.mxu0 }
 0xead   :  { %v3960_v11 = vadd.f32 %v13468_v63, %v3875_v42  ;;  %v15037_v63 = vld [vmem:[%s12406_s25] sm:$0xff]  ;;  %v4394_v42 = vld [vmem:[%s15008_s20 + $0x10] sm:$0xff] }
 0xeae   :  { %v3950_v0 = vpop.f32.mrf.mxu0 }
 0xeaf   :  { %v3959_v9 = vadd.f32 %v3950_v0, %v3870_v1  ;;  %v4392_v0 = vld [vmem:[%s15008_s20] sm:$0xff]  ;;  %v15046_v1 = vld [vmem:[%s12406_s25 + $0x8] sm:$0xff]  ;;  %s15347_s25 = sld [smem:[%s16119_s0 + %s14407_s4]]  }
 0xeb0   :  { %v13473_v6 = vpop.f32.mrf.mxu1 }
 0xeb1   :  { %v4043_v53 = vadd.f32 %v13473_v6, %v3960_v11  ;;  %v12550_v11 = vld [vmem:[%s14721_s9 + $0x98] sm:$0xff]  ;;  %v12549_v6 = vld [vmem:[%s14721_s9 + $0x90] sm:$0xff] }
 0xeb2   :  { %v4033_v14 = vpop.f32.mrf.mxu1  ;;  %13509 = vmatprep.subr.mxu1 %v12550_v11 }
 0xeb3   :  { %v4053_v21 = vadd.f32 %v12534_v4, %v4043_v53  ;;  %v4042_v44 = vadd.f32 %v4033_v14, %v3959_v9  ;;  %13510 = vmatpush3.msra.mxu1 %v12550_v11  ;;  %v12547_v9 = vld [vmem:[%s14721_s9 + $0x80] sm:$0xff] }
 0xeb4   :  { %13511 = vmatprep.subr.mxu1 %v12549_v6  ;;  %v12544_v53 = vld [vmem:[%s14759_s28 + $0x1] ss:$0 sm:$0xff]  ;;  %s14409_s28 = smov 30  }
 0xeb5   :  { %v4052_v59 = vadd.f32 %v12534_v4, %v4042_v44  ;;  %v4055_v43 = vadd.f32 %v4053_v21, %v14793_v35  ;;  %13512 = vmatpush3.msra.mxu1 %v12549_v6  ;;  %v12548_v4 = vld [vmem:[%s14721_s9 + $0x88] sm:$0xff]  ;;  %s14403_s9 = smov 19   ;;  %s15355_s5 = sld [smem:[%s16119_s0 + %s14409_s28]]  }
 0xeb6   :  { %13513 = vmatprep.subr.mxu1 %v12548_v4  ;;  %s15266_s2 = sld [smem:[%s16119_s0 + %s14403_s9]]  }
 0xeb7   :  { %v4063_v22 = vsel %vm272_vm0, %v4055_v43, 0.0  ;;  %v4054_v23 = vadd.f32 %v4052_v59, %v14791_v34  ;;  %13514 = vmatpush3.msra.mxu1 %v12548_v4  ;;  %s12420_s9 = sld [smem:[%s16119_s0 + %s14408_s18]]  }
 0xeb8   :  { %4064 = vadd.xlane.f32.xlu1 %v4063_v22  ;;  %13515 = vmatprep.subr.mxu1 %v12547_v9 }
 0xeb9   :  { %v4060_v24 = vsel %vm272_vm0, %v4054_v23, 0.0  ;;  %13516 = vmatpush3.msra.mxu1 %v12547_v9 }
 0xeba   :  { %4061 = vadd.xlane.f32.xlu0 %v4060_v24  ;;  %13556 = vmatprep.subr.mxu1 %v14380_v7 }
 0xf41   :  { %v4065_v60 = vpop.xlane.xlu1 %4064 }
 0xf42   :  { %v4067_v25 = vmul.f32 0.03125, %v4065_v60 }
 0xf43   :  { %v4062_v3 = vpop.xlane.xlu0 %4061 }
 0xf44   :  { %v4066_v26 = vmul.f32 0.03125, %v4062_v3  ;;  %v14992_v16 = vsub.f32 %v4055_v43, %v4067_v25 }
 0xf46   :  { %v14994_v27 = vsub.f32 %v4054_v23, %v4066_v26  ;;  %v4071_v8 = vmul.f32 %v14992_v16, %v14992_v16  ;;  %v12571_v23 = vld [vmem:[%s15061_s29] ss:$0 sm:$0xff] }
 0xf48   :  { %v4070_v35 = vmul.f32 %v14994_v27, %v14994_v27  ;;  %v4075_v29 = vsel %vm272_vm0, %v4071_v8, 0.0 }
 0xf4a   :  { %v4072_v34 = vsel %vm272_vm0, %v4070_v35, 0.0 }
 0xf4b   :  { %4073 = vadd.xlane.f32.xlu0 %v4072_v34 }
 0xf4f   :  { %4076 = vadd.xlane.f32.xlu0 %v4075_v29 }
 0xfd4   :  { %v4074_v41 = vpop.xlane.xlu0 %4073 }
 0xfd5   :  { %v4078_v47 = vmul.f32 0.03125, %v4074_v41 }
 0xfd7   :  { %v4080_v48 = vadd.f32 1e-05, %v4078_v47 }
 0xfd8   :  { %v4077_v49 = vpop.xlane.xlu0 %4076 }
 0xfd9   :  { %14210 = vrsqrt.f32 %v4080_v48  ;;  %v4079_v50 = vmul.f32 0.03125, %v4077_v49 }
 0xfdb   :  { %v4081_v5 = vadd.f32 1e-05, %v4079_v50 }
 0xfdd   :  { %14212 = vrsqrt.f32 %v4081_v5 }
 0xfe6   :  { %v14211_v2 = vpop.eup %14210 }
 0xfe7   :  { %v4084_v52 = vmul.f32 %v14211_v2, %v14994_v27 }
 0xfe9   :  { %v4092_v55 = vmul.f32 %v12537_v51, %v4084_v52 }
 0xfea   :  { %v14213_v56 = vpop.eup %14212 }
 0xfeb   :  { %v4085_v57 = vmul.f32 %v14213_v56, %v14992_v16  ;;  %v15031_v38 = vadd.f32 %v12538_v54, %v4092_v55 }
 0xfed   :  { %v4093_v61 = vmul.f32 %v12537_v51, %v4085_v57  ;;  %13482 = vmatprep.mubr.msk.f32.mxu0 %vm272_vm0, %v15031_v38 }
 0xfef   :  { %v15035_v62 = vadd.f32 %v12538_v54, %v4093_v61 }
 0xff1   :  { %13483 = vmatmul.mubr.msk.f32.vlgmr.msra.gmra.mxu0 %vm272_vm0, %v15035_v62 }
 0xff2   :  { %13521 = vmatpush3.msra.mxu0 %v4395_v33  ;;  %13528 = vmatprep.mubr.msk.f32.mxu0 %vm272_vm0, %v15037_v63 }
 0xff3   :  { %13522 = vmatprep.subr.mxu0 %v4394_v42 }
 0xff4   :  { %13523 = vmatpush3.msra.mxu0 %v4394_v42 }
 0xff5   :  { %13524 = vmatprep.subr.mxu0 %v4393_v58 }
 0xff6   :  { %13525 = vmatpush3.msra.mxu0 %v4393_v58 }
 0xff7   :  { %13526 = vmatprep.subr.mxu0 %v4392_v0 }
 0xff8   :  { %13527 = vmatpush3.msra.mxu0 %v4392_v0 }
 0xff9   :  { %13529 = vmatmul.mubr.msk.f32.vlgmr.msra.gmra.mxu0 %vm272_vm0, %v15046_v1  ;;  %13531 = vmatprep.subr.mxu0 %v14380_v7 }
 0xffa   :  { %13533 = vmatprep.mubr.msk.f32.mxu0 %vm14383_vm1, %v14380_v7 }
0x10b1   :  { %v13484_v14 = vpop.f32.mrf.mxu0 }
0x10b2   :  { %v4193_v21 = vadd.f32 %v13484_v14, %v12544_v53 }
0x10b3   :  { %v4187_v44 = vpop.f32.mrf.mxu0 }
0x10b4   :  { %v4188_v59 = vadd.f32 %v12544_v53, %v4187_v44  ;;  %v4197_v22 = vmax.f32 %v4193_v21, 0.0 }
0x10b6   :  { %v4196_v43 = vmax.f32 %v4188_v59, 0.0 }
0x10b8   :  { %13517 = vmatprep.mubr.f32.mxu1 %v4196_v43 }
0x10b9   :  { %v13530_v24 = vpop.f32.mrf.mxu0  ;;  %13518 = vmatmul.mubr.f32.vlgmr.msra.gmra.mxu1 %v4197_v22 }
0x10ba   :  { %v15065_v60 = vadd.f32 %v13530_v24, %v12571_v23  ;;  %13558 = vmatprep.mubr.msk.f32.mxu1 %vm14383_vm1, %v14380_v7 }
0x10bb   :  { %v4475_v25 = vpop.f32.mrf.mxu0 }
0x10bc   :  { %v15069_v3 = vadd.f32 %v12571_v23, %v4475_v25  ;;  %4492 = vrot.lane.b32.xlu0 %v15065_v60, %s14382_s15 }
0x10be   :  { %4490 = vrot.lane.b32.xlu1 %v15069_v3, %s14382_s15 }
0x10c0   :  { %4498 = vrot.lane.b32.xlu0 %v15069_v3, %s14384_s16 }
0x10c2   :  { %4494 = vrot.lane.b32.xlu1 %v15069_v3, %s14381_s14 }
0x10c4   :  { %4502 = vrot.lane.b32.xlu0 %v15069_v3, %s14385_s17 }
0x10c6   :  { %4496 = vrot.lane.b32.xlu1 %v15065_v60, %s14381_s14 }
0x10ca   :  { %4500 = vrot.lane.b32.xlu1 %v15065_v60, %s14384_s16 }
0x10ce   :  { %4578 = vrot.lane.b32.xlu1 %v15065_v60, %s14385_s17 }
0x112e   :  { %v15087_v26 = vpop.permute.xlu0 %4492 }
0x112f   :  { %4730 = vrot.lane.b32.xlu1 %v15087_v26, %s14385_s17 }
0x1130   :  { %v4491_v16 = vpop.permute.xlu1 %4490 }
0x1131   :  { %4654 = vrot.lane.b32.xlu0 %v4491_v16, %s14385_s17 }
0x1132   :  { %v15092_v27 = vpop.permute.xlu0 %4498 }
0x1134   :  { %v15094_v35 = vpop.permute.xlu1 %4494 }
0x1135   :  { %4806 = vrot.lane.b32.xlu0 %v15094_v35, %s14385_s17 }
0x1136   :  { %v4503_v34 = vpop.permute.xlu0 %4502 }
0x1137   :  { %13532 = vmatpush3.xpose.msk.msra.mxu0 %vm374_vm3, %v4503_v34 }
0x1138   :  { %v15099_v8 = vpop.permute.xlu1 %4496  ;;  %13536 = vmatprep.subr.mxu0 %v14380_v7 }
0x1139   :  { %4958 = vrot.lane.b32.xlu0 %v15092_v27, %s14385_s17  ;;  %4882 = vrot.lane.b32.xlu1 %v15099_v8, %s14385_s17 }
0x113a   :  { %13534 = vmatmul.mubr.msk.f32.vlgmr.msra.gmra.mxu0 %vm374_vm3, %v15069_v3 }
0x113b   :  { %13538 = vmatprep.mubr.msk.f32.mxu0 %vm14383_vm1, %v14380_v7 }
0x113c   :  { %v15110_v29 = vpop.permute.xlu1 %4500 }
0x113d   :  { %5034 = vrot.lane.b32.xlu1 %v15110_v29, %s14385_s17 }
0x1140   :  { %v4579_v30 = vpop.permute.xlu1 %4578 }
0x1141   :  { %13537 = vmatpush3.xpose.msk.msra.mxu0 %vm374_vm3, %v4579_v30 }
0x1142   :  { %13541 = vmatprep.subr.mxu0 %v14380_v7 }
0x1144   :  { %13539 = vmatmul.mubr.msk.f32.vlgmr.msra.gmra.mxu0 %vm374_vm3, %v15065_v60 }
0x1145   :  { %13543 = vmatprep.mubr.msk.f32.mxu0 %vm14383_vm1, %v14380_v7 }
0x1179   :  { %v15168_v41 = vpop.f32.mrf.mxu1 }
0x117b   :  { %v15172_v5 = vpop.f32.mrf.mxu1 }
0x11a1   :  { %v4731_v31 = vpop.permute.xlu1 %4730 }
0x11a3   :  { %v4655_v28 = vpop.permute.xlu0 %4654 }
0x11a4   :  { %13542 = vmatpush3.xpose.msk.msra.mxu0 %vm374_vm3, %v4655_v28 }
0x11a5   :  { %13546 = vmatprep.subr.mxu0 %v14380_v7 }
0x11a7   :  { %13544 = vmatmul.mubr.msk.f32.vlgmr.msra.gmra.mxu0 %vm374_vm3, %v4491_v16  ;;  %v4807_v32 = vpop.permute.xlu0 %4806 }
0x11a8   :  { %13547 = vmatpush3.xpose.msk.msra.mxu0 %vm374_vm3, %v4731_v31  ;;  %13548 = vmatprep.mubr.msk.f32.mxu0 %vm14383_vm1, %v14380_v7 }
0x11a9   :  { %13551 = vmatprep.subr.mxu0 %v14380_v7 }
0x11ab   :  { %13549 = vmatmul.mubr.msk.f32.vlgmr.msra.gmra.mxu0 %vm374_vm3, %v15087_v26  ;;  %v4883_v33 = vpop.permute.xlu1 %4882  ;;  %v4959_v37 = vpop.permute.xlu0 %4958 }
0x11ac   :  { %13552 = vmatpush3.xpose.msk.msra.mxu0 %vm374_vm3, %v4807_v32  ;;  %13557 = vmatpush3.xpose.msk.msra.mxu1 %vm374_vm3, %v4883_v33 }
0x11ad   :  { %13553 = vmatprep.mubr.msk.f32.mxu0 %vm14383_vm1, %v14380_v7  ;;  %13561 = vmatprep.subr.mxu0 %v14380_v7 }
0x11ae   :  { %13566 = vmatprep.subr.mxu1 %v14380_v7 }
0x11af   :  { %13554 = vmatmul.mubr.msk.f32.vlgmr.msra.gmra.mxu0 %vm374_vm3, %v15094_v35  ;;  %v5035_v36 = vpop.permute.xlu1 %5034  ;;  %13559 = vmatmul.mubr.msk.f32.vlgmr.msra.gmra.mxu1 %vm374_vm3, %v15099_v8 }
0x11b0   :  { %13562 = vmatpush3.xpose.msk.msra.mxu0 %vm374_vm3, %v4959_v37  ;;  %13567 = vmatpush3.xpose.msk.msra.mxu1 %vm374_vm3, %v5035_v36 }
0x11b1   :  { %13563 = vmatprep.mubr.msk.f32.mxu0 %vm14383_vm1, %v14380_v7  ;;  %13568 = vmatprep.mubr.msk.f32.mxu1 %vm14383_vm1, %v14380_v7 }
0x11b2   :  { %13571 = vmatprep.subr.mxu0 %v14380_v7  ;;  %13576 = vmatprep.subr.mxu1 %v14380_v7 }
0x11b3   :  { %13564 = vmatmul.mubr.msk.f32.vlgmr.msra.gmra.mxu0 %vm374_vm3, %v15092_v27  ;;  %13569 = vmatmul.mubr.msk.f32.vlgmr.msra.gmra.mxu1 %vm374_vm3, %v15110_v29 }
0x11b4   :  { %13573 = vmatprep.mubr.msk.f32.mxu0 %vm14383_vm1, %v14380_v7  ;;  %13578 = vmatprep.mubr.msk.f32.mxu1 %vm14383_vm1, %v14380_v7 }
0x11fa   :  { %v4574_v20 = vpop.f32.mrf.mxu0 }
0x11fb   :  { %v4575_v40 = vadd.f32 %v4574_v20, %v15158_v19 }
0x11fc   :  { %v13535_v10 = vpop.f32.mrf.mxu0 }
0x11fd   :  { %v5110_v13 = vsel %vm374_vm3, %v4575_v40, -inf }
0x11fe   :  { %5111 = vmax.xlane.f32.xlu0 %v5110_v13 }
0x1204   :  { %v4650_v12 = vpop.f32.mrf.mxu0 }
0x1205   :  { %v4651_v15 = vadd.f32 %v4650_v12, %v15158_v19 }
0x1206   :  { %v13540_v45 = vpop.f32.mrf.mxu0 }
0x1207   :  { %v5113_v46 = vsel %vm374_vm3, %v4651_v15, -inf }
0x1208   :  { %5114 = vmax.xlane.f32.xlu1 %v5113_v46 }
0x1219   :  { %5198 = vrot.lane.b32.xlu1 %v15069_v3, %s14388_s22 }
0x121d   :  { %5350 = vrot.lane.b32.xlu1 %v4491_v16, %s14388_s22 }
0x1267   :  { %v4726_v17 = vpop.f32.mrf.mxu0 }
0x1268   :  { %v4727_v18 = vadd.f32 %v4726_v17, %v15158_v19 }
0x1269   :  { %v13545_v47 = vpop.f32.mrf.mxu0 }
0x126a   :  { %v5116_v48 = vsel %vm374_vm3, %v4727_v18, -inf }
0x126b   :  { %5117 = vmax.xlane.f32.xlu0 %v5116_v48  ;;  %v4802_v49 = vpop.f32.mrf.mxu0 }
0x126c   :  { %v4803_v50 = vadd.f32 %v4802_v49, %v15158_v19 }
0x126d   :  { %v13550_v2 = vpop.f32.mrf.mxu0 }
0x126e   :  { %v5119_v51 = vsel %vm374_vm3, %v4803_v50, -inf }
0x126f   :  { %5120 = vmax.xlane.f32.xlu0 %v5119_v51  ;;  %v4878_v52 = vpop.f32.mrf.mxu0  ;;  %v4954_v54 = vpop.f32.mrf.mxu1 }
0x1270   :  { %v15176_v55 = vadd.f32 %v4878_v52, %v15158_v19  ;;  %v4955_v56 = vadd.f32 %v4954_v54, %v15158_v19 }
0x1271   :  { %v13555_v57 = vpop.f32.mrf.mxu0  ;;  %v13560_v61 = vpop.f32.mrf.mxu1 }
0x1272   :  { %v5122_v42 = vsel %vm374_vm3, %v15176_v55, -inf  ;;  %v5125_v58 = vsel %vm374_vm3, %v4955_v56, -inf }
0x1273   :  { %5123 = vmax.xlane.f32.xlu1 %v5122_v42  ;;  %v5030_v0 = vpop.f32.mrf.mxu0  ;;  %5126 = vmax.xlane.f32.xlu0 %v5125_v58  ;;  %v5106_v11 = vpop.f32.mrf.mxu1 }
0x1274   :  { %v15183_v6 = vadd.f32 %v5030_v0, %v15158_v19  ;;  %v5107_v4 = vadd.f32 %v5106_v11, %v15158_v19 }
0x1275   :  { %v13565_v9 = vpop.f32.mrf.mxu0  ;;  %v13570_v53 = vpop.f32.mrf.mxu1 }
0x1276   :  { %v5128_v14 = vsel %vm374_vm3, %v15183_v6, -inf  ;;  %v5131_v21 = vsel %vm374_vm3, %v5107_v4, -inf }
0x1277   :  { %5129 = vmax.xlane.f32.xlu1 %v5128_v14  ;;  %5132 = vmax.xlane.f32.xlu0 %v5131_v21 }
0x1287   :  { %v5112_v44 = vpop.xlane.xlu0 %5111 }
0x1288   :  { %5426 = vrot.lane.b32.xlu1 %v15087_v26, %s14388_s22  ;;  %v5134_v43 = vsub.f32 %v4575_v40, %v5112_v44 }
0x128a   :  { %v5142_v24 = vmul.f32 1.442695, %v5134_v43 }
0x128c   :  { %14214 = vpow2.f32 %v5142_v24 }
0x128d   :  { %5274 = vrot.lane.b32.xlu0 %v15065_v60, %s14388_s22 }
0x1291   :  { %v5115_v59 = vpop.xlane.xlu1 %5114 }
0x1292   :  { %v5135_v22 = vsub.f32 %v4651_v15, %v5115_v59 }
0x1294   :  { %v5144_v25 = vmul.f32 1.442695, %v5135_v22 }
0x1295   :  { %v5199_v23 = vpop.permute.xlu1 %5198 }
0x1296   :  { %13572 = vmatpush3.msra.mxu0 %v5199_v23  ;;  %14216 = vpow2.f32 %v5144_v25 }
0x1297   :  { %13581 = vmatprep.subr.mxu0 %v14380_v7 }
0x1299   :  { %v14215_v3 = vpop.eup %14214  ;;  %v5351_v49 = vpop.permute.xlu1 %5350 }
0x129a   :  { %v5158_v34 = vsel %vm374_vm3, %v14215_v3, 0.0 }
0x12a3   :  { %v14217_v16 = vpop.eup %14216 }
0x12a4   :  { %v5161_v26 = vsel %vm374_vm3, %v14217_v16, 0.0 }
0x12ac   :  { %5159 = vadd.xlane.f32.xlu1 %v5158_v34  ;;  %5162 = vadd.xlane.f32.xlu0 %v5161_v26 }
0x12f4   :  { %v5118_v60 = vpop.xlane.xlu0 %5117 }
0x12f5   :  { %v5136_v30 = vsub.f32 %v4727_v18, %v5118_v60 }
0x12f7   :  { %v5146_v28 = vmul.f32 1.442695, %v5136_v30  ;;  %v4484_v30 = vld [vmem:[%s15266_s2] sm:$0xff] }
0x12f8   :  { %v5121_v31 = vpop.xlane.xlu0 %5120 }
0x12f9   :  { %14218 = vpow2.f32 %v5146_v28  ;;  %v5137_v36 = vsub.f32 %v4803_v50, %v5121_v31 }
0x12fb   :  { %v5148_v10 = vmul.f32 1.442695, %v5137_v36 }
0x12fc   :  { %v5127_v32 = vpop.xlane.xlu0 %5126  ;;  %v5124_v50 = vpop.xlane.xlu1 %5123 }
0x12fd   :  { %v5139_v33 = vsub.f32 %v4955_v56, %v5127_v32  ;;  %v5138_v2 = vsub.f32 %v15176_v55, %v5124_v50 }
0x12ff   :  { %v5152_v37 = vmul.f32 1.442695, %v5139_v33  ;;  %v5150_v52 = vmul.f32 1.442695, %v5138_v2 }
0x1300   :  { %v5133_v39 = vpop.xlane.xlu0 %5132  ;;  %v5130_v51 = vpop.xlane.xlu1 %5129 }
0x1301   :  { %v5141_v20 = vsub.f32 %v5107_v4, %v5133_v39  ;;  %14220 = vpow2.f32 %v5152_v37  ;;  %v5140_v54 = vsub.f32 %v15183_v6, %v5130_v51  ;;  %v12564_v4 = vld [vmem:[%s14767_s3 + $0x1] ss:$0 sm:$0xff]  ;;  %v4486_v51 = vld [vmem:[%s15266_s2 + $0x10] sm:$0xff]  ;;  %s14404_s3 = smov 20  }
0x1302   :  { %v4290_v9 = vadd.f32 %v12564_v4, %v15172_v5  ;;  %v4295_v21 = vadd.f32 %v15168_v41, %v12564_v4  ;;  %s15301_s8 = sld [smem:[%s16119_s0 + %s14404_s3]]   ;;  %s14414_s3 = smov 27  }
0x1303   :  { %v5156_v40 = vmul.f32 1.442695, %v5141_v20  ;;  %v5154_v56 = vmul.f32 1.442695, %v5140_v54  ;;  %s15581_s6 = sld [smem:[%s16119_s0 + %s14414_s3]]  }
0x1304   :  { %v5275_v13 = vpop.permute.xlu0 %5274  ;;  %v5427_v57 = vpop.permute.xlu1 %5426  ;;  %v4298_v53 = vadd.f32 %v4290_v9, %v15031_v38  ;;  %v15245_v44 = vadd.f32 %v4295_v21, %v15035_v62 }
0x1305   :  { %13577 = vmatpush3.msra.mxu1 %v5275_v13  ;;  %14222 = vpow2.f32 %v5156_v40 }
0x1306   :  { %v15196_v12 = vpop.eup %14218  ;;  %13586 = vmatprep.subr.mxu1 %v14380_v7  ;;  %14224 = vpow2.f32 %v5148_v10  ;;  %v4304_v14 = vsel %vm272_vm0, %v4298_v53, 0.0  ;;  %v4307_v5 = vsel %vm272_vm0, %v15245_v44, 0.0 }
0x1307   :  { %v5164_v15 = vsel %vm374_vm3, %v15196_v12, 0.0  ;;  %14226 = vpow2.f32 %v5150_v52  ;;  %v4487_v52 = vld [vmem:[%s15266_s2 + $0x18] sm:$0xff] }
0x1308   :  { %5165 = vadd.xlane.f32.xlu1 %v5164_v15  ;;  %14228 = vpow2.f32 %v5154_v56  ;;  %v4485_v15 = vld [vmem:[%s15266_s2 + $0x8] sm:$0xff] }
0x130e   :  { %v15201_v45 = vpop.eup %14220 }
0x130f   :  { %v5173_v46 = vsel %vm374_vm3, %v15201_v45, 0.0 }
0x1310   :  { %5174 = vadd.xlane.f32.xlu0 %v5173_v46 }
0x1312   :  { %v15205_v17 = vpop.eup %14222 }
0x1313   :  { %v5179_v18 = vsel %vm374_vm3, %v15205_v17, 0.0  ;;  %v15209_v47 = vpop.eup %14224 }
0x1314   :  { %5180 = vadd.xlane.f32.xlu0 %v5179_v18  ;;  %v5167_v48 = vsel %vm374_vm3, %v15209_v47, 0.0  ;;  %v15221_v55 = vpop.eup %14226 }
0x1315   :  { %v5170_v42 = vsel %vm374_vm3, %v15221_v55, 0.0  ;;  %v15225_v58 = vpop.eup %14228 }
0x1318   :  { %5168 = vadd.xlane.f32.xlu0 %v5167_v48 }
0x1319   :  { %5578 = vrot.lane.b32.xlu1 %v15099_v8, %s14388_s22 }
0x132e   :  { %5502 = vrot.lane.b32.xlu0 %v15094_v35, %s14388_s22  ;;  %v5176_v35 = vsel %vm374_vm3, %v15225_v58, 0.0 }
0x1332   :  { %5654 = vrot.lane.b32.xlu0 %v15092_v27, %s14388_s22 }
0x1335   :  { %v5160_v61 = vpop.xlane.xlu1 %5159  ;;  %v5163_v8 = vpop.xlane.xlu0 %5162 }
0x1336   :  { %14230 = vrcp.f32 %v5160_v61 }
0x1337   :  { %14232 = vrcp.f32 %v5163_v8 }
0x133d   :  { %5171 = vadd.xlane.f32.xlu1 %v5170_v42 }
0x1341   :  { %5177 = vadd.xlane.f32.xlu1 %v5176_v35 }
0x1343   :  { %v14231_v0 = vpop.eup %14230 }
0x1344   :  { %v14233_v11 = vpop.eup %14232  ;;  %v5190_v27 = vmul.f32 %v14231_v0, %v14215_v3 }
0x1345   :  { %v5191_v6 = vmul.f32 %v14233_v11, %v14217_v16 }
0x1346   :  { %13574 = vmatmul.mubr.msk.f32.vlgmr.msra.gmra.mxu0 %vm374_vm3, %v5190_v27 }
0x1347   :  { %13579 = vmatmul.mubr.msk.f32.vlgmr.msra.gmra.mxu1 %vm374_vm3, %v5191_v6  ;;  %13582 = vmatpush3.msra.mxu0 %v5351_v49 }
0x1348   :  { %13587 = vmatpush3.msra.mxu1 %v5427_v57  ;;  %13583 = vmatprep.mubr.msk.f32.mxu0 %vm14383_vm1, %v14380_v7 }
0x1349   :  { %13591 = vmatprep.subr.mxu0 %v14380_v7  ;;  %13588 = vmatprep.mubr.msk.f32.mxu1 %vm14383_vm1, %v14380_v7 }
0x134a   :  { %13596 = vmatprep.subr.mxu1 %v14380_v7 }
0x1351   :  { %4305 = vadd.xlane.f32.xlu0 %v4304_v14 }
0x1352   :  { %5730 = vrot.lane.b32.xlu1 %v15110_v29, %s14388_s22 }
0x1376   :  { %4308 = vadd.xlane.f32.xlu1 %v4307_v5 }
0x1391   :  { %v5166_v59 = vpop.xlane.xlu1 %5165 }
0x1392   :  { %14234 = vrcp.f32 %v5166_v59 }
0x1395   :  { %v5579_v3 = vpop.permute.xlu1 %5578 }
0x1399   :  { %v5175_v43 = vpop.xlane.xlu0 %5174 }
0x139d   :  { %v5181_v22 = vpop.xlane.xlu0 %5180 }
0x139f   :  { %v14235_v38 = vpop.eup %14234 }
0x13a0   :  { %v5192_v23 = vmul.f32 %v14235_v38, %v15196_v12 }
0x13a1   :  { %v5169_v24 = vpop.xlane.xlu0 %5168 }
0x13a2   :  { %13584 = vmatmul.mubr.msk.f32.vlgmr.msra.gmra.mxu0 %vm374_vm3, %v5192_v23  ;;  %14236 = vrcp.f32 %v5169_v24 }
0x13a3   :  { %13593 = vmatprep.mubr.msk.f32.mxu0 %vm14383_vm1, %v14380_v7  ;;  %14238 = vrcp.f32 %v5175_v43 }
0x13a4   :  { %14240 = vrcp.f32 %v5181_v22 }
0x13a5   :  { %v5503_v62 = vpop.permute.xlu0 %5502 }
0x13a6   :  { %13592 = vmatpush3.msra.mxu0 %v5503_v62 }
0x13a7   :  { %13601 = vmatprep.subr.mxu0 %v14380_v7 }
0x13a9   :  { %v5655_v37 = vpop.permute.xlu0 %5654 }
0x13af   :  { %v14237_v29 = vpop.eup %14236 }
0x13b0   :  { %v5193_v41 = vmul.f32 %v14237_v29, %v15209_v47  ;;  %v14239_v25 = vpop.eup %14238 }
0x13b1   :  { %v5195_v16 = vmul.f32 %v14239_v25, %v15201_v45  ;;  %v14241_v60 = vpop.eup %14240 }
0x13b2   :  { %13589 = vmatmul.mubr.msk.f32.vlgmr.msra.gmra.mxu1 %vm374_vm3, %v5193_v41  ;;  %v5197_v31 = vmul.f32 %v14241_v60, %v15205_v17 }
0x13b3   :  { %13597 = vmatpush3.msra.mxu1 %v5579_v3  ;;  %13598 = vmatprep.mubr.msk.f32.mxu1 %vm14383_vm1, %v14380_v7 }
0x13b4   :  { %13606 = vmatprep.subr.mxu1 %v14380_v7 }
0x13b6   :  { %13599 = vmatmul.mubr.msk.f32.vlgmr.msra.gmra.mxu1 %vm374_vm3, %v5195_v16  ;;  %v12606_v16 = vld [vmem:[%s15301_s8] ss:$0 sm:$0xff] }
0x13b7   :  { %13608 = vmatprep.mubr.msk.f32.mxu1 %vm14383_vm1, %v14380_v7 }
0x13c6   :  { %v5172_v34 = vpop.xlane.xlu1 %5171 }
0x13c7   :  { %14242 = vrcp.f32 %v5172_v34 }
0x13ca   :  { %v5178_v26 = vpop.xlane.xlu1 %5177 }
0x13cb   :  { %14244 = vrcp.f32 %v5178_v26 }
0x13ce   :  { %v5731_v28 = vpop.permute.xlu1 %5730 }
0x13cf   :  { %13607 = vmatpush3.msra.mxu1 %v5731_v28  ;;  %v12567_v28 = vld [vmem:[%s14782_s10 + $0x1] ss:$0 sm:$0xff]  ;;  %s14405_s10 = smov 21  }
0x13d0   :  { %13609 = vmatmul.mubr.msk.f32.vlgmr.msra.gmra.mxu1 %vm374_vm3, %v5197_v31  ;;  %13616 = vmatprep.subr.mxu1 %v4484_v30  ;;  %s15316_s12 = sld [smem:[%s16119_s0 + %s14405_s10]]   ;;  %s14418_s10 = smov 28  }
0x13d1   :  { %13617 = vmatpush3.msra.mxu1 %v4484_v30  ;;  %s15627_s13 = sld [smem:[%s16119_s0 + %s14418_s10]]  }
0x13d2   :  { %13626 = vmatprep.subr.mxu1 %v4487_v52 }
0x13d4   :  { %v14243_v32 = vpop.eup %14242 }
0x13d5   :  { %v5194_v33 = vmul.f32 %v14243_v32, %v15221_v55 }
0x13d7   :  { %13594 = vmatmul.mubr.msk.f32.vlgmr.msra.gmra.mxu0 %vm374_vm3, %v5194_v33 }
0x13d8   :  { %v14245_v36 = vpop.eup %14244  ;;  %13602 = vmatpush3.msra.mxu0 %v5655_v37  ;;  %13603 = vmatprep.mubr.msk.f32.mxu0 %vm14383_vm1, %v14380_v7 }
0x13d9   :  { %v5196_v39 = vmul.f32 %v14245_v36, %v15225_v58  ;;  %13611 = vmatprep.subr.mxu0 %v4485_v15 }
0x13da   :  { %v4306_v20 = vpop.xlane.xlu0 %4305 }
0x13db   :  { %13604 = vmatmul.mubr.msk.f32.vlgmr.msra.gmra.mxu0 %vm374_vm3, %v5196_v39  ;;  %v4310_v40 = vmul.f32 0.03125, %v4306_v20  ;;  %v12568_v20 = vld [vmem:[%s14787_s19 + $0x1] ss:$0 sm:$0xff]  ;;  %s14406_s19 = smov 22  }
0x13dc   :  { %13612 = vmatpush3.msra.mxu0 %v4485_v15  ;;  %s15337_s30 = sld [smem:[%s16119_s0 + %s14406_s19]]   ;;  %s14411_s19 = smov 23  }
0x13dd   :  { %v15277_v10 = vsub.f32 %v4298_v53, %v4310_v40  ;;  %13621 = vmatprep.subr.mxu0 %v4486_v51  ;;  %s15516_s4 = sld [smem:[%s16119_s0 + %s14411_s19]]  }
0x13df   :  { %v4314_v13 = vmul.f32 %v15277_v10, %v15277_v10 }
0x13e1   :  { %v4316_v12 = vsel %vm272_vm0, %v4314_v13, 0.0 }
0x13e2   :  { %4317 = vadd.xlane.f32.xlu0 %v4316_v12 }
0x13ff   :  { %v4309_v45 = vpop.xlane.xlu1 %4308 }
0x1400   :  { %v4311_v46 = vmul.f32 0.03125, %v4309_v45 }
0x1402   :  { %v4313_v17 = vsub.f32 %v15245_v44, %v4311_v46 }
0x1404   :  { %v4315_v18 = vmul.f32 %v4313_v17, %v4313_v17 }
0x1406   :  { %v5270_v47 = vpop.f32.mrf.mxu0  ;;  %v4319_v48 = vsel %vm272_vm0, %v4315_v18, 0.0  ;;  %v6189_v18 = vld [vmem:[%s15316_s12] sm:$0xff] }
0x1407   :  { %v5346_v49 = vpop.f32.mrf.mxu1  ;;  %13618 = vmatprep.mubr.msk.f32.mxu1 %vm374_vm3, %v5270_v47  ;;  %4320 = vadd.xlane.f32.xlu0 %v4319_v48 }
0x1408   :  { %v13575_v50 = vpop.f32.mrf.mxu0  ;;  %13619 = vmatmul.mubr.msk.f32.vlgmr.msra.gmra.mxu1 %vm374_vm3, %v5346_v49 }
0x1409   :  { %v13580_v2 = vpop.f32.mrf.mxu1  ;;  %13627 = vmatpush3.msra.mxu1 %v4487_v52 }
0x140a   :  { %13658 = vmatprep.subr.mxu1 %v14380_v7 }
0x1462   :  { %v5422_v54 = vpop.f32.mrf.mxu0 }
0x1463   :  { %13613 = vmatprep.mubr.msk.f32.mxu0 %vm374_vm3, %v5422_v54 }
0x1464   :  { %v13585_v56 = vpop.f32.mrf.mxu0 }
0x146b   :  { %v4318_v6 = vpop.xlane.xlu0 %4317 }
0x146c   :  { %v4322_v53 = vmul.f32 0.03125, %v4318_v6 }
0x146e   :  { %v4324_v21 = vadd.f32 1e-05, %v4322_v53 }
0x1472   :  { %v5498_v57 = vpop.f32.mrf.mxu1 }
0x1473   :  { %13614 = vmatmul.mubr.msk.f32.vlgmr.msra.gmra.mxu0 %vm374_vm3, %v5498_v57 }
0x1474   :  { %v13590_v61 = vpop.f32.mrf.mxu1  ;;  %13622 = vmatpush3.msra.mxu0 %v4486_v51 }
0x1476   :  { %v5650_v8 = vpop.f32.mrf.mxu1 }
0x1478   :  { %v13600_v55 = vpop.f32.mrf.mxu1 }
0x1490   :  { %v5802_v42 = vpop.f32.mrf.mxu1  ;;  %v4321_v4 = vpop.xlane.xlu0 %4320 }
0x1491   :  { %v4323_v9 = vmul.f32 0.03125, %v4321_v4  ;;  %v15340_v4 = vld [vmem:[%s15337_s30] ss:$0 sm:$0xff] }
0x1492   :  { %v13610_v58 = vpop.f32.mrf.mxu1 }
0x1493   :  { %v4325_v14 = vadd.f32 1e-05, %v4323_v9 }
0x1495   :  { %14246 = vrsqrt.f32 %v4325_v14 }
0x1496   :  { %14248 = vrsqrt.f32 %v4324_v21 }
0x1497   :  { %v5574_v35 = vpop.f32.mrf.mxu0 }
0x1498   :  { %13623 = vmatprep.mubr.msk.f32.mxu0 %vm374_vm3, %v5574_v35 }
0x1499   :  { %v13595_v0 = vpop.f32.mrf.mxu0  ;;  %13624 = vmatmul.mubr.msk.f32.vlgmr.msra.gmra.mxu0 %vm374_vm3, %v5650_v8 }
0x149b   :  { %v5726_v11 = vpop.f32.mrf.mxu0 }
0x149c   :  { %13628 = vmatprep.mubr.msk.f32.mxu1 %vm374_vm3, %v5726_v11 }
0x149d   :  { %v13605_v27 = vpop.f32.mrf.mxu0  ;;  %13629 = vmatmul.mubr.msk.f32.vlgmr.msra.gmra.mxu1 %vm374_vm3, %v5802_v42 }
0x149e   :  { %13660 = vmatprep.mubr.msk.f32.mxu1 %vm14383_vm1, %v14380_v7 }
0x14a2   :  { %v14247_v43 = vpop.eup %14246 }
0x14a3   :  { %v14249_v23 = vpop.eup %14248  ;;  %v4329_v25 = vmul.f32 %v14247_v43, %v4313_v17  ;;  %v6190_v17 = vld [vmem:[%s15316_s12 + $0x8] sm:$0xff] }
0x14a4   :  { %v4328_v60 = vmul.f32 %v14249_v23, %v15277_v10 }
0x14a5   :  { %v4337_v33 = vmul.f32 %v12567_v28, %v4329_v25 }
0x14a6   :  { %v4336_v39 = vmul.f32 %v12567_v28, %v4328_v60 }
0x14a7   :  { %v4345_v12 = vadd.f32 %v12568_v20, %v4337_v33 }
0x14a8   :  { %v4344_v45 = vadd.f32 %v12568_v20, %v4336_v39  ;;  %v12570_v20 = vld [vmem:[%s12421_s11] ss:$0 sm:$0xff]  ;;  %s14415_s11 = smov 31  }
0x14a9   :  { %v4351_v10 = vsel %vm272_vm0, %v4345_v12, 0.0  ;;  %s15598_s26 = sld [smem:[%s16119_s0 + %s14415_s11]]  }
0x14aa   :  { %v4348_v46 = vsel %vm272_vm0, %v4344_v45, 0.0 }
0x14c8   :  { %v13620_v5 = vpop.f32.mrf.mxu1 }
0x14ca   :  { %v5959_v24 = vpop.f32.mrf.mxu1 }
0x1533   :  { %v13615_v44 = vpop.f32.mrf.mxu0 }
0x1534   :  { %v5965_v38 = vadd.f32 %v13620_v5, %v13615_v44 }
0x1535   :  { %v5878_v59 = vpop.f32.mrf.mxu0 }
0x1536   :  { %v5960_v29 = vadd.f32 %v5959_v24, %v5878_v59 }
0x1559   :  { %v13625_v22 = vpop.f32.mrf.mxu0 }
0x155a   :  { %v6050_v41 = vadd.f32 %v13625_v22, %v5965_v38 }
0x155b   :  { %v6040_v62 = vpop.f32.mrf.mxu0 }
0x155c   :  { %v6049_v34 = vadd.f32 %v6040_v62, %v5960_v29 }
0x155d   :  { %v13630_v3 = vpop.f32.mrf.mxu1 }
0x155e   :  { %v6133_v26 = vadd.f32 %v13630_v3, %v6050_v41  ;;  %v12607_v3 = vld [vmem:[%s15347_s25] ss:$0 sm:$0xff] }
0x155f   :  { %v6123_v30 = vpop.f32.mrf.mxu1 }
0x1560   :  { %v6142_v31 = vadd.f32 %v12606_v16, %v6133_v26  ;;  %v6132_v32 = vadd.f32 %v6123_v30, %v6049_v34  ;;  %v12569_v30 = vld [vmem:[%s12420_s9] ss:$0 sm:$0xff]  ;;  %s14417_s9 = smov 26  }
0x1561   :  { %s15619_s7 = sld [smem:[%s16119_s0 + %s14417_s9]]  }
0x1562   :  { %v6141_v37 = vadd.f32 %v12606_v16, %v6132_v32  ;;  %v6144_v36 = vadd.f32 %v6142_v31, %v15046_v1  ;;  %v6191_v1 = vld [vmem:[%s15316_s12 + $0x10] sm:$0xff]  ;;  %v12608_v31 = vld [vmem:[%s15355_s5] ss:$0 sm:$0xff]  ;;  %s15642_s9 = sld [smem:[%s16119_s0 + %s14419_s21]]  }
0x1564   :  { %v6150_v40 = vsel %vm272_vm0, %v6144_v36, 0.0  ;;  %v6143_v13 = vadd.f32 %v6141_v37, %v15037_v63  ;;  %v6192_v63 = vld [vmem:[%s15316_s12 + $0x18] sm:$0xff] }
0x1565   :  { %6151 = vadd.xlane.f32.xlu0 %v6150_v40  ;;  %13631 = vmatprep.subr.mxu0 %v6192_v63 }
0x1566   :  { %v6147_v15 = vsel %vm272_vm0, %v6143_v13, 0.0  ;;  %13632 = vmatpush3.msra.mxu0 %v6192_v63 }
0x1567   :  { %6148 = vadd.xlane.f32.xlu1 %v6147_v15  ;;  %13633 = vmatprep.subr.mxu0 %v6191_v1 }
0x1568   :  { %13634 = vmatpush3.msra.mxu0 %v6191_v1 }
0x1569   :  { %4352 = vadd.xlane.f32.xlu0 %v4351_v10  ;;  %13635 = vmatprep.subr.mxu0 %v6190_v17 }
0x156a   :  { %13636 = vmatpush3.msra.mxu0 %v6190_v17 }
0x156b   :  { %4349 = vadd.xlane.f32.xlu1 %v4348_v46  ;;  %13637 = vmatprep.subr.mxu0 %v6189_v18 }
0x156c   :  { %13638 = vmatpush3.msra.mxu0 %v6189_v18 }
0x15ee   :  { %v6152_v47 = vpop.xlane.xlu0 %6151 }
0x15ef   :  { %v6154_v48 = vmul.f32 0.03125, %v6152_v47 }
0x15f0   :  { %v6149_v49 = vpop.xlane.xlu1 %6148 }
0x15f1   :  { %v6156_v50 = vsub.f32 %v6144_v36, %v6154_v48  ;;  %v6153_v51 = vmul.f32 0.03125, %v6149_v49 }
0x15f2   :  { %v4353_v2 = vpop.xlane.xlu0 %4352 }
0x15f3   :  { %v4355_v52 = vmul.f32 0.03125, %v4353_v2  ;;  %v6158_v54 = vmul.f32 %v6156_v50, %v6156_v50  ;;  %v6155_v55 = vsub.f32 %v6143_v13, %v6153_v51 }
0x15f4   :  { %v4350_v56 = vpop.xlane.xlu1 %4349 }
0x15f5   :  { %v15322_v57 = vsub.f32 %v4345_v12, %v4355_v52  ;;  %v4354_v61 = vmul.f32 0.03125, %v4350_v56  ;;  %v6162_v8 = vsel %vm272_vm0, %v6158_v54, 0.0  ;;  %v6157_v27 = vmul.f32 %v6155_v55, %v6155_v55 }
0x15f6   :  { %6163 = vadd.xlane.f32.xlu0 %v6162_v8 }
0x15f7   :  { %v4356_v42 = vsub.f32 %v4344_v45, %v4354_v61  ;;  %v4359_v58 = vmul.f32 %v15322_v57, %v15322_v57  ;;  %v6159_v6 = vsel %vm272_vm0, %v6157_v27, 0.0 }
0x15f9   :  { %v4363_v35 = vsel %vm272_vm0, %v4359_v58, 0.0  ;;  %v4358_v0 = vmul.f32 %v4356_v42, %v4356_v42 }
0x15fa   :  { %4364 = vadd.xlane.f32.xlu0 %v4363_v35 }
0x15fb   :  { %v4360_v11 = vsel %vm272_vm0, %v4358_v0, 0.0 }
0x15fc   :  { %4361 = vadd.xlane.f32.xlu1 %v4360_v11 }
0x1600   :  { %6160 = vadd.xlane.f32.xlu1 %v6159_v6 }
0x1610   :  { %6289 = vrot.lane.b32.xlu0 %v6191_v1, %s14385_s17 }
0x1611   :  { %6291 = vrot.lane.b32.xlu1 %v6192_v63, %s14385_s17 }
0x1614   :  { %6297 = vrot.lane.b32.xlu0 %v15340_v4, %s14385_s17 }
0x1615   :  { %6287 = vrot.lane.b32.xlu1 %v6190_v17, %s14385_s17 }
0x1619   :  { %6285 = vrot.lane.b32.xlu1 %v6189_v18, %s14385_s17 }
0x167f   :  { %v6164_v9 = vpop.xlane.xlu0 %6163 }
0x1680   :  { %v6166_v53 = vmul.f32 0.03125, %v6164_v9 }
0x1682   :  { %v6168_v14 = vadd.f32 1e-05, %v6166_v53 }
0x1683   :  { %v4365_v44 = vpop.xlane.xlu0 %4364 }
0x1684   :  { %14250 = vrsqrt.f32 %v6168_v14  ;;  %v4367_v43 = vmul.f32 0.03125, %v4365_v44 }
0x1685   :  { %v4362_v21 = vpop.xlane.xlu1 %4361 }
0x1686   :  { %v4366_v5 = vmul.f32 0.03125, %v4362_v21  ;;  %v4369_v24 = vadd.f32 1e-05, %v4367_v43 }
0x1687   :  { %v6290_v13 = vpop.permute.xlu0 %6289 }
0x1688   :  { %v4368_v59 = vadd.f32 1e-05, %v4366_v5 }
0x1689   :  { %v6161_v22 = vpop.xlane.xlu1 %6160 }
0x168a   :  { %14252 = vrsqrt.f32 %v4368_v59  ;;  %v6165_v38 = vmul.f32 0.03125, %v6161_v22 }
0x168b   :  { %v6298_v18 = vpop.permute.xlu0 %6297 }
0x168c   :  { %v6167_v23 = vadd.f32 1e-05, %v6165_v38 }
0x168d   :  { %v6292_v62 = vpop.permute.xlu1 %6291 }
0x168e   :  { %14254 = vrsqrt.f32 %v6167_v23  ;;  %13642 = vmatprep.subr.mxu0 %v6292_v62 }
0x168f   :  { %14256 = vrsqrt.f32 %v4369_v24 }
0x1691   :  { %v14251_v29 = vpop.eup %14250  ;;  %v6288_v36 = vpop.permute.xlu1 %6287 }
0x1692   :  { %v6172_v25 = vmul.f32 %v14251_v29, %v6156_v50 }
0x1694   :  { %v6180_v60 = vmul.f32 %v12607_v3, %v6172_v25 }
0x1695   :  { %v6286_v45 = vpop.permute.xlu1 %6285 }
0x1696   :  { %v15364_v39 = vadd.f32 %v12608_v31, %v6180_v60 }
0x1697   :  { %v14253_v41 = vpop.eup %14252 }
0x1698   :  { %v4372_v16 = vmul.f32 %v14253_v41, %v4356_v42 }
0x169a   :  { %v4380_v33 = vmul.f32 %v12569_v30, %v4372_v16 }
0x169b   :  { %v14255_v34 = vpop.eup %14254 }
0x169c   :  { %v6171_v26 = vmul.f32 %v14255_v34, %v6155_v55  ;;  %v14257_v28 = vpop.eup %14256  ;;  %v15369_v12 = vadd.f32 %v12570_v20, %v4380_v33 }
0x169d   :  { %v4373_v40 = vmul.f32 %v14257_v28, %v15322_v57 }
0x169e   :  { %v6179_v32 = vmul.f32 %v12607_v3, %v6171_v26 }
0x169f   :  { %v4381_v15 = vmul.f32 %v12569_v30, %v4373_v40 }
0x16a0   :  { %v15362_v37 = vadd.f32 %v12608_v31, %v6179_v32 }
0x16a1   :  { %v15375_v10 = vadd.f32 %v12570_v20, %v4381_v15 }
0x16a2   :  { %13639 = vmatprep.mubr.msk.f32.mxu0 %vm272_vm0, %v15362_v37 }
0x16a3   :  { %13640 = vmatmul.mubr.msk.f32.vlgmr.msra.gmra.mxu0 %vm272_vm0, %v15364_v39 }
0x16a4   :  { %13643 = vmatpush3.msra.mxu0 %v6292_v62  ;;  %13650 = vmatprep.mubr.msk.f32.mxu0 %vm272_vm0, %v15369_v12 }
0x16a5   :  { %13644 = vmatprep.subr.mxu0 %v6290_v13 }
0x16a6   :  { %13645 = vmatpush3.msra.mxu0 %v6290_v13 }
0x16a7   :  { %13646 = vmatprep.subr.mxu0 %v6288_v36 }
0x16a8   :  { %13647 = vmatpush3.msra.mxu0 %v6288_v36 }
0x16a9   :  { %13648 = vmatprep.subr.mxu0 %v6286_v45 }
0x16aa   :  { %13649 = vmatpush3.msra.mxu0 %v6286_v45 }
0x16ab   :  { %13651 = vmatmul.mubr.msk.f32.vlgmr.msra.gmra.mxu0 %vm272_vm0, %v15375_v10  ;;  %13653 = vmatprep.subr.mxu0 %v14380_v7 }
0x16ac   :  { %13655 = vmatprep.mubr.msk.f32.mxu0 %vm14383_vm1, %v14380_v7 }
0x1763   :  { %v13641_v46 = vpop.f32.mrf.mxu0 }
0x1764   :  { %v6278_v63 = vadd.f32 %v13641_v46, %v15340_v4 }
0x1765   :  { %v6272_v1 = vpop.f32.mrf.mxu0 }
0x1766   :  { %v6273_v17 = vadd.f32 %v15340_v4, %v6272_v1  ;;  %6389 = vrot.lane.b32.xlu0 %v6278_v63, %s14382_s15 }
0x1768   :  { %6387 = vrot.lane.b32.xlu1 %v6273_v17, %s14382_s15 }
0x176a   :  { %6393 = vrot.lane.b32.xlu0 %v6278_v63, %s14381_s14 }
0x176b   :  { %v13652_v47 = vpop.f32.mrf.mxu0 }
0x176c   :  { %v15387_v48 = vadd.f32 %v13652_v47, %v6298_v18  ;;  %6391 = vrot.lane.b32.xlu1 %v6273_v17, %s14381_s14 }
0x176d   :  { %v6372_v49 = vpop.f32.mrf.mxu0 }
0x176e   :  { %v15390_v50 = vadd.f32 %v6372_v49, %v6298_v18  ;;  %13659 = vmatpush3.xpose.msk.msra.mxu1 %vm374_vm3, %v15387_v48  ;;  %6403 = vrot.lane.b32.xlu0 %v15387_v48, %s14382_s15 }
0x176f   :  { %13668 = vmatprep.subr.mxu1 %v14380_v7 }
0x1770   :  { %13654 = vmatpush3.xpose.msk.msra.mxu0 %vm374_vm3, %v15390_v50  ;;  %6401 = vrot.lane.b32.xlu1 %v15390_v50, %s14382_s15 }
0x1771   :  { %13661 = vmatmul.mubr.msk.f32.vlgmr.msra.gmra.mxu1 %vm374_vm3, %v6278_v63  ;;  %13663 = vmatprep.subr.mxu0 %v14380_v7 }
0x1772   :  { %6407 = vrot.lane.b32.xlu0 %v15387_v48, %s14381_s14  ;;  %13670 = vmatprep.mubr.msk.f32.mxu1 %vm14383_vm1, %v14380_v7 }
0x1773   :  { %13656 = vmatmul.mubr.msk.f32.vlgmr.msra.gmra.mxu0 %vm374_vm3, %v6273_v17 }
0x1774   :  { %6405 = vrot.lane.b32.xlu1 %v15390_v50, %s14381_s14  ;;  %13665 = vmatprep.mubr.msk.f32.mxu0 %vm14383_vm1, %v14380_v7 }
0x1776   :  { %6411 = vrot.lane.b32.xlu0 %v15387_v48, %s14384_s16 }
0x1778   :  { %6409 = vrot.lane.b32.xlu1 %v15390_v50, %s14384_s16 }
0x177a   :  { %6397 = vrot.lane.b32.xlu0 %v6278_v63, %s14384_s16 }
0x177c   :  { %6395 = vrot.lane.b32.xlu1 %v6273_v17, %s14384_s16 }
0x17d8   :  { %v6390_v2 = vpop.permute.xlu0 %6389 }
0x17da   :  { %v6388_v51 = vpop.permute.xlu1 %6387 }
0x17dc   :  { %v6394_v52 = vpop.permute.xlu0 %6393 }
0x17de   :  { %v6392_v54 = vpop.permute.xlu1 %6391 }
0x17e0   :  { %v15418_v56 = vpop.permute.xlu0 %6403 }
0x17e1   :  { %13669 = vmatpush3.xpose.msk.msra.mxu1 %vm374_vm3, %v15418_v56 }
0x17e2   :  { %v6402_v57 = vpop.permute.xlu1 %6401  ;;  %13678 = vmatprep.subr.mxu1 %v14380_v7 }
0x17e3   :  { %13664 = vmatpush3.xpose.msk.msra.mxu0 %vm374_vm3, %v6402_v57 }
0x17e4   :  { %13671 = vmatmul.mubr.msk.f32.vlgmr.msra.gmra.mxu1 %vm374_vm3, %v6390_v2  ;;  %v6408_v61 = vpop.permute.xlu0 %6407  ;;  %13673 = vmatprep.subr.mxu0 %v14380_v7 }
0x17e5   :  { %13679 = vmatpush3.xpose.msk.msra.mxu1 %vm374_vm3, %v6408_v61  ;;  %13680 = vmatprep.mubr.msk.f32.mxu1 %vm14383_vm1, %v14380_v7 }
0x17e6   :  { %v6406_v8 = vpop.permute.xlu1 %6405  ;;  %13666 = vmatmul.mubr.msk.f32.vlgmr.msra.gmra.mxu0 %vm374_vm3, %v6388_v51  ;;  %13688 = vmatprep.subr.mxu1 %v14380_v7 }
0x17e7   :  { %13674 = vmatpush3.xpose.msk.msra.mxu0 %vm374_vm3, %v6406_v8  ;;  %13675 = vmatprep.mubr.msk.f32.mxu0 %vm14383_vm1, %v14380_v7 }
0x17e8   :  { %13681 = vmatmul.mubr.msk.f32.vlgmr.msra.gmra.mxu1 %vm374_vm3, %v6394_v52  ;;  %v15435_v55 = vpop.permute.xlu0 %6411  ;;  %13683 = vmatprep.subr.mxu0 %v14380_v7 }
0x17e9   :  { %13689 = vmatpush3.xpose.msk.msra.mxu1 %vm374_vm3, %v15435_v55  ;;  %13690 = vmatprep.mubr.msk.f32.mxu1 %vm14383_vm1, %v14380_v7 }
0x17ea   :  { %v15442_v42 = vpop.permute.xlu1 %6409  ;;  %13676 = vmatmul.mubr.msk.f32.vlgmr.msra.gmra.mxu0 %vm374_vm3, %v6392_v54  ;;  %13698 = vmatprep.subr.mxu1 %v14380_v7 }
0x17eb   :  { %13684 = vmatpush3.xpose.msk.msra.mxu0 %vm374_vm3, %v15442_v42  ;;  %13685 = vmatprep.mubr.msk.f32.mxu0 %vm14383_vm1, %v14380_v7 }
0x17ec   :  { %v6398_v58 = vpop.permute.xlu0 %6397  ;;  %13693 = vmatprep.subr.mxu0 %v14380_v7 }
0x17ed   :  { %13691 = vmatmul.mubr.msk.f32.vlgmr.msra.gmra.mxu1 %vm374_vm3, %v6398_v58 }
0x17ee   :  { %v6396_v35 = vpop.permute.xlu1 %6395  ;;  %13700 = vmatprep.mubr.msk.f32.mxu1 %vm14383_vm1, %v14380_v7 }
0x17ef   :  { %13686 = vmatmul.mubr.msk.f32.vlgmr.msra.gmra.mxu0 %vm374_vm3, %v6396_v35 }
0x17f0   :  { %13695 = vmatprep.mubr.msk.f32.mxu0 %vm14383_vm1, %v14380_v7 }
0x1831   :  { %v6557_v0 = vpop.f32.mrf.mxu1 }
0x1832   :  { %v7008_v11 = vsel %vm374_vm3, %v6557_v0, -inf }
0x1833   :  { %7009 = vmax.xlane.f32.xlu0 %v7008_v11  ;;  %v6483_v27 = vpop.f32.mrf.mxu0  ;;  %v13662_v6 = vpop.f32.mrf.mxu1 }
0x1834   :  { %v7005_v4 = vsel %vm374_vm3, %v6483_v27, -inf }
0x1835   :  { %7006 = vmax.xlane.f32.xlu1 %v7005_v4  ;;  %v13657_v9 = vpop.f32.mrf.mxu0 }
0x18a4   :  { %v6705_v53 = vpop.f32.mrf.mxu1 }
0x18a5   :  { %v7014_v14 = vsel %vm374_vm3, %v6705_v53, -inf }
0x18a6   :  { %v6631_v21 = vpop.f32.mrf.mxu0  ;;  %7015 = vmax.xlane.f32.xlu1 %v7014_v14  ;;  %v13672_v44 = vpop.f32.mrf.mxu1 }
0x18a7   :  { %v7011_v5 = vsel %vm374_vm3, %v6631_v21, -inf }
0x18a8   :  { %7012 = vmax.xlane.f32.xlu0 %v7011_v5  ;;  %v13667_v59 = vpop.f32.mrf.mxu0  ;;  %v6853_v43 = vpop.f32.mrf.mxu1 }
0x18a9   :  { %v7020_v22 = vsel %vm374_vm3, %v6853_v43, -inf }
0x18aa   :  { %v6779_v38 = vpop.f32.mrf.mxu0  ;;  %7021 = vmax.xlane.f32.xlu1 %v7020_v22  ;;  %v13682_v23 = vpop.f32.mrf.mxu1 }
0x18ab   :  { %v7017_v24 = vsel %vm374_vm3, %v6779_v38, -inf }
0x18ac   :  { %7018 = vmax.xlane.f32.xlu0 %v7017_v24  ;;  %v13677_v62 = vpop.f32.mrf.mxu0 }
0x18ad   :  { %v7001_v29 = vpop.f32.mrf.mxu1 }
0x18ae   :  { %v7026_v41 = vsel %vm374_vm3, %v7001_v29, -inf }
0x18af   :  { %v6927_v25 = vpop.f32.mrf.mxu0  ;;  %7027 = vmax.xlane.f32.xlu1 %v7026_v41  ;;  %v13692_v3 = vpop.f32.mrf.mxu1 }
0x18b0   :  { %v7023_v16 = vsel %vm374_vm3, %v6927_v25, -inf }
0x18b1   :  { %7024 = vmax.xlane.f32.xlu0 %v7023_v16  ;;  %v13687_v34 = vpop.f32.mrf.mxu0 }
0x18bc   :  { %v7010_v26 = vpop.xlane.xlu0 %7009 }
0x18bd   :  { %v7030_v30 = vsub.f32 %v6557_v0, %v7010_v26 }
0x18be   :  { %v7007_v60 = vpop.xlane.xlu1 %7006 }
0x18bf   :  { %v7029_v28 = vsub.f32 %v6483_v27, %v7007_v60  ;;  %v7039_v31 = vmul.f32 1.442695, %v7030_v30 }
0x18c0   :  { %7169 = vrot.lane.b32.xlu1 %v15387_v48, %s14385_s17 }
0x18c1   :  { %v7037_v32 = vmul.f32 1.442695, %v7029_v28  ;;  %14258 = vpow2.f32 %v7039_v31 }
0x18c3   :  { %14260 = vpow2.f32 %v7037_v32 }
0x18c4   :  { %7245 = vrot.lane.b32.xlu1 %v6402_v57, %s14385_s17 }
0x18c7   :  { %7093 = vrot.lane.b32.xlu0 %v15390_v50, %s14385_s17 }
0x18c8   :  { %7397 = vrot.lane.b32.xlu1 %v6406_v8, %s14385_s17 }
0x18cb   :  { %7321 = vrot.lane.b32.xlu0 %v15418_v56, %s14385_s17 }
0x18ce   :  { %v15474_v33 = vpop.eup %14258 }
0x18cf   :  { %7473 = vrot.lane.b32.xlu0 %v6408_v61, %s14385_s17  ;;  %v7056_v20 = vsel %vm374_vm3, %v15474_v33, 0.0 }
0x18d0   :  { %v15476_v36 = vpop.eup %14260 }
0x18d1   :  { %v7053_v40 = vsel %vm374_vm3, %v15476_v36, 0.0 }
0x18ec   :  { %7057 = vadd.xlane.f32.xlu1 %v7056_v20 }
0x18ee   :  { %7054 = vadd.xlane.f32.xlu0 %v7053_v40 }
0x192f   :  { %v7016_v13 = vpop.xlane.xlu1 %7015 }
0x1930   :  { %v7032_v15 = vsub.f32 %v6705_v53, %v7016_v13 }
0x1931   :  { %v7013_v45 = vpop.xlane.xlu0 %7012 }
0x1932   :  { %v7043_v46 = vmul.f32 1.442695, %v7032_v15  ;;  %v7031_v63 = vsub.f32 %v6631_v21, %v7013_v45 }
0x1933   :  { %v7022_v1 = vpop.xlane.xlu1 %7021 }
0x1934   :  { %14262 = vpow2.f32 %v7043_v46  ;;  %v7041_v17 = vmul.f32 1.442695, %v7031_v63  ;;  %v7034_v18 = vsub.f32 %v6853_v43, %v7022_v1  ;;  %v6382_v1 = vld [vmem:[%s15516_s4 + $0x8] sm:$0xff] }
0x1935   :  { %v7019_v47 = vpop.xlane.xlu0 %7018 }
0x1936   :  { %14264 = vpow2.f32 %v7041_v17  ;;  %v7047_v48 = vmul.f32 1.442695, %v7034_v18  ;;  %v7033_v49 = vsub.f32 %v6779_v38, %v7019_v47  ;;  %v6383_v17 = vld [vmem:[%s15516_s4 + $0x10] sm:$0xff]  ;;  %v6384_v18 = vld [vmem:[%s15516_s4 + $0x18] sm:$0xff] }
0x1938   :  { %14266 = vpow2.f32 %v7047_v48  ;;  %v7045_v50 = vmul.f32 1.442695, %v7033_v49  ;;  %v7028_v2 = vpop.xlane.xlu1 %7027 }
0x1939   :  { %v7036_v51 = vsub.f32 %v7001_v29, %v7028_v2 }
0x193a   :  { %14268 = vpow2.f32 %v7045_v50  ;;  %v7025_v52 = vpop.xlane.xlu0 %7024 }
0x193b   :  { %v7051_v54 = vmul.f32 1.442695, %v7036_v51  ;;  %v7035_v56 = vsub.f32 %v6927_v25, %v7025_v52 }
0x193c   :  { %v7170_v57 = vpop.permute.xlu1 %7169 }
0x193d   :  { %14270 = vpow2.f32 %v7051_v54  ;;  %v7049_v61 = vmul.f32 1.442695, %v7035_v56  ;;  %13699 = vmatpush3.msra.mxu1 %v7170_v57 }
0x193e   :  { %v7094_v8 = vpop.permute.xlu0 %7093  ;;  %13708 = vmatprep.subr.mxu1 %v14380_v7 }
0x193f   :  { %14272 = vpow2.f32 %v7049_v61  ;;  %13694 = vmatpush3.msra.mxu0 %v7094_v8 }
0x1940   :  { %13703 = vmatprep.subr.mxu0 %v14380_v7  ;;  %v7246_v5 = vpop.permute.xlu1 %7245 }
0x1941   :  { %v14263_v58 = vpop.eup %14262 }
0x1942   :  { %v7062_v35 = vsel %vm374_vm3, %v14263_v58, 0.0  ;;  %v7322_v59 = vpop.permute.xlu0 %7321 }
0x1943   :  { %v14265_v0 = vpop.eup %14264  ;;  %7063 = vadd.xlane.f32.xlu1 %v7062_v35 }
0x1944   :  { %v7059_v11 = vsel %vm374_vm3, %v14265_v0, 0.0  ;;  %v7398_v43 = vpop.permute.xlu1 %7397 }
0x1945   :  { %v14267_v27 = vpop.eup %14266  ;;  %7060 = vadd.xlane.f32.xlu0 %v7059_v11 }
0x1946   :  { %v7068_v6 = vsel %vm374_vm3, %v14267_v27, 0.0  ;;  %v7474_v22 = vpop.permute.xlu0 %7473 }
0x1947   :  { %v15487_v4 = vpop.eup %14268  ;;  %7069 = vadd.xlane.f32.xlu1 %v7068_v6 }
0x1948   :  { %v7065_v9 = vsel %vm374_vm3, %v15487_v4, 0.0 }
0x1949   :  { %7066 = vadd.xlane.f32.xlu0 %v7065_v9 }
0x194a   :  { %v15491_v53 = vpop.eup %14270 }
0x194b   :  { %v7074_v14 = vsel %vm374_vm3, %v15491_v53, 0.0 }
0x194c   :  { %v15495_v21 = vpop.eup %14272  ;;  %7075 = vadd.xlane.f32.xlu1 %v7074_v14 }
0x194d   :  { %v7071_v44 = vsel %vm374_vm3, %v15495_v21, 0.0 }
0x194e   :  { %7072 = vadd.xlane.f32.xlu0 %v7071_v44 }
0x195d   :  { %7549 = vrot.lane.b32.xlu1 %v15442_v42, %s14385_s17 }
0x1964   :  { %7625 = vrot.lane.b32.xlu0 %v15435_v55, %s14385_s17 }
0x1975   :  { %v7058_v38 = vpop.xlane.xlu1 %7057 }
0x1976   :  { %14274 = vrcp.f32 %v7058_v38 }
0x1977   :  { %v7055_v23 = vpop.xlane.xlu0 %7054 }
0x1978   :  { %14276 = vrcp.f32 %v7055_v23 }
0x1983   :  { %v14275_v24 = vpop.eup %14274 }
0x1984   :  { %v7086_v62 = vmul.f32 %v14275_v24, %v15474_v33 }
0x1985   :  { %v14277_v29 = vpop.eup %14276 }
0x1986   :  { %13701 = vmatmul.mubr.msk.f32.vlgmr.msra.gmra.mxu1 %vm374_vm3, %v7086_v62  ;;  %v7085_v41 = vmul.f32 %v14277_v29, %v15476_v36  ;;  %v6381_v36 = vld [vmem:[%s15516_s4] sm:$0xff] }
0x1987   :  { %13709 = vmatpush3.msra.mxu1 %v7322_v59  ;;  %13710 = vmatprep.mubr.msk.f32.mxu1 %vm14383_vm1, %v14380_v7 }
0x1988   :  { %13696 = vmatmul.mubr.msk.f32.vlgmr.msra.gmra.mxu0 %vm374_vm3, %v7085_v41  ;;  %13718 = vmatprep.subr.mxu1 %v14380_v7 }
0x1989   :  { %13704 = vmatpush3.msra.mxu0 %v7246_v5  ;;  %13705 = vmatprep.mubr.msk.f32.mxu0 %vm14383_vm1, %v14380_v7 }
0x198a   :  { %13713 = vmatprep.subr.mxu0 %v14380_v7 }
0x19cc   :  { %v7064_v55 = vpop.xlane.xlu1 %7063 }
0x19cd   :  { %14278 = vrcp.f32 %v7064_v55 }
0x19ce   :  { %v7061_v42 = vpop.xlane.xlu0 %7060 }
0x19cf   :  { %14280 = vrcp.f32 %v7061_v42 }
0x19d0   :  { %v7070_v25 = vpop.xlane.xlu1 %7069 }
0x19d1   :  { %14282 = vrcp.f32 %v7070_v25 }
0x19d2   :  { %v7067_v3 = vpop.xlane.xlu0 %7066 }
0x19d3   :  { %14284 = vrcp.f32 %v7067_v3 }
0x19d5   :  { %v7076_v16 = vpop.xlane.xlu1 %7075 }
0x19d6   :  { %14286 = vrcp.f32 %v7076_v16 }
0x19d7   :  { %v7073_v34 = vpop.xlane.xlu0 %7072 }
0x19d8   :  { %14288 = vrcp.f32 %v7073_v34 }
0x19d9   :  { %v7550_v15 = vpop.permute.xlu1 %7549 }
0x19da   :  { %v14279_v26 = vpop.eup %14278 }
0x19db   :  { %v7088_v60 = vmul.f32 %v14279_v26, %v14263_v58  ;;  %v7626_v20 = vpop.permute.xlu0 %7625 }
0x19dc   :  { %v14281_v30 = vpop.eup %14280 }
0x19dd   :  { %13711 = vmatmul.mubr.msk.f32.vlgmr.msra.gmra.mxu1 %vm374_vm3, %v7088_v60  ;;  %v7087_v28 = vmul.f32 %v14281_v30, %v14265_v0 }
0x19de   :  { %v14283_v31 = vpop.eup %14282  ;;  %13719 = vmatpush3.msra.mxu1 %v7474_v22  ;;  %13720 = vmatprep.mubr.msk.f32.mxu1 %vm14383_vm1, %v14380_v7 }
0x19df   :  { %13706 = vmatmul.mubr.msk.f32.vlgmr.msra.gmra.mxu0 %vm374_vm3, %v7087_v28  ;;  %13728 = vmatprep.subr.mxu1 %v14380_v7  ;;  %v7090_v32 = vmul.f32 %v14283_v31, %v14267_v27 }
0x19e0   :  { %v14285_v33 = vpop.eup %14284  ;;  %13714 = vmatpush3.msra.mxu0 %v7398_v43  ;;  %13715 = vmatprep.mubr.msk.f32.mxu0 %vm14383_vm1, %v14380_v7  ;;  %v12646_v43 = vld [vmem:[%s15552_s23] ss:$0 sm:$0xff] }
0x19e1   :  { %13721 = vmatmul.mubr.msk.f32.vlgmr.msra.gmra.mxu1 %vm374_vm3, %v7090_v32  ;;  %13723 = vmatprep.subr.mxu0 %v14380_v7  ;;  %v7089_v40 = vmul.f32 %v14285_v33, %v15487_v4  ;;  %v8087_v32 = vld [vmem:[%s15572_s1 + $0x18] sm:$0xff]  ;;  %v8086_v33 = vld [vmem:[%s15572_s1 + $0x10] sm:$0xff] }
0x19e2   :  { %13729 = vmatpush3.msra.mxu1 %v7626_v20  ;;  %13730 = vmatprep.mubr.msk.f32.mxu1 %vm14383_vm1, %v14380_v7  ;;  %v8084_v20 = vld [vmem:[%s15572_s1] sm:$0xff] }
0x19e3   :  { %v14287_v13 = vpop.eup %14286  ;;  %13716 = vmatmul.mubr.msk.f32.vlgmr.msra.gmra.mxu0 %vm374_vm3, %v7089_v40  ;;  %13738 = vmatprep.subr.mxu1 %v6381_v36  ;;  %v8193_v40 = vld [vmem:[%s15581_s6 + $0x78] sm:$0xff] }
0x19e4   :  { %13724 = vmatpush3.msra.mxu0 %v7550_v15  ;;  %v7092_v45 = vmul.f32 %v14287_v13, %v15491_v53  ;;  %13725 = vmatprep.mubr.msk.f32.mxu0 %vm14383_vm1, %v14380_v7  ;;  %v8192_v13 = vld [vmem:[%s15581_s6 + $0x70] sm:$0xff]  ;;  %v8191_v15 = vld [vmem:[%s15581_s6 + $0x68] sm:$0xff] }
0x19e5   :  { %v14289_v46 = vpop.eup %14288  ;;  %13733 = vmatprep.subr.mxu0 %v6382_v1 }
0x19e6   :  { %13731 = vmatmul.mubr.msk.f32.vlgmr.msra.gmra.mxu1 %vm374_vm3, %v7092_v45  ;;  %v7091_v63 = vmul.f32 %v14289_v46, %v15495_v21  ;;  %v8190_v45 = vld [vmem:[%s15581_s6 + $0x60] sm:$0xff]  ;;  %v8189_v46 = vld [vmem:[%s15581_s6 + $0x58] sm:$0xff] }
0x19e7   :  { %13739 = vmatpush3.msra.mxu1 %v6381_v36  ;;  %v8085_v36 = vld [vmem:[%s15572_s1 + $0x8] sm:$0xff] }
0x19e8   :  { %13726 = vmatmul.mubr.msk.f32.vlgmr.msra.gmra.mxu0 %vm374_vm3, %v7091_v63  ;;  %13748 = vmatprep.subr.mxu1 %v6384_v18  ;;  %v8188_v63 = vld [vmem:[%s15581_s6 + $0x50] sm:$0xff] }
0x19e9   :  { %13734 = vmatpush3.msra.mxu0 %v6382_v1  ;;  %v8187_v1 = vld [vmem:[%s15581_s6 + $0x48] sm:$0xff] }
0x19ea   :  { %13743 = vmatprep.subr.mxu0 %v6383_v17 }
0x1a46   :  { %v7241_v47 = vpop.f32.mrf.mxu1 }
0x1a48   :  { %v7165_v48 = vpop.f32.mrf.mxu0  ;;  %v13702_v49 = vpop.f32.mrf.mxu1 }
0x1a49   :  { %13740 = vmatprep.mubr.msk.f32.mxu1 %vm374_vm3, %v7165_v48  ;;  %v8183_v48 = vld [vmem:[%s15581_s6 + $0x28] sm:$0xff]  ;;  %v8182_v49 = vld [vmem:[%s15581_s6 + $0x20] sm:$0xff] }
0x1a4a   :  { %v13697_v50 = vpop.f32.mrf.mxu0  ;;  %13741 = vmatmul.mubr.msk.f32.vlgmr.msra.gmra.mxu1 %vm374_vm3, %v7241_v47  ;;  %v8184_v47 = vld [vmem:[%s15581_s6 + $0x30] sm:$0xff] }
0x1a4b   :  { %13749 = vmatpush3.msra.mxu1 %v6384_v18  ;;  %v8185_v18 = vld [vmem:[%s15581_s6 + $0x38] sm:$0xff] }
0x1a4c   :  { %13764 = vmatprep.subr.mxu1 %v8193_v40 }
0x1a9d   :  { %v7393_v2 = vpop.f32.mrf.mxu1 }
0x1a9f   :  { %v7317_v51 = vpop.f32.mrf.mxu0  ;;  %v13712_v52 = vpop.f32.mrf.mxu1 }
0x1aa0   :  { %13735 = vmatprep.mubr.msk.f32.mxu0 %vm374_vm3, %v7317_v51 }
0x1aa1   :  { %v13707_v54 = vpop.f32.mrf.mxu0  ;;  %v7545_v56 = vpop.f32.mrf.mxu1  ;;  %13736 = vmatmul.mubr.msk.f32.vlgmr.msra.gmra.mxu0 %vm374_vm3, %v7393_v2 }
0x1aa2   :  { %13744 = vmatpush3.msra.mxu0 %v6383_v17  ;;  %v8186_v17 = vld [vmem:[%s15581_s6 + $0x40] sm:$0xff] }
0x1aa3   :  { %v7469_v57 = vpop.f32.mrf.mxu0  ;;  %v13722_v61 = vpop.f32.mrf.mxu1  ;;  %13753 = vmatprep.subr.mxu0 %v8087_v32 }
0x1aa4   :  { %13745 = vmatprep.mubr.msk.f32.mxu0 %vm374_vm3, %v7469_v57  ;;  %v12647_v61 = vld [vmem:[%s15598_s26] ss:$0 sm:$0xff] }
0x1aa5   :  { %v13717_v8 = vpop.f32.mrf.mxu0  ;;  %13746 = vmatmul.mubr.msk.f32.vlgmr.msra.gmra.mxu0 %vm374_vm3, %v7545_v56 }
0x1aa6   :  { %v7697_v58 = vpop.f32.mrf.mxu1  ;;  %13754 = vmatpush3.msra.mxu0 %v8087_v32 }
0x1aa7   :  { %13755 = vmatprep.subr.mxu0 %v8086_v33 }
0x1aa8   :  { %v7621_v35 = vpop.f32.mrf.mxu0  ;;  %v13732_v0 = vpop.f32.mrf.mxu1  ;;  %13756 = vmatpush3.msra.mxu0 %v8086_v33 }
0x1aa9   :  { %13750 = vmatprep.mubr.msk.f32.mxu1 %vm374_vm3, %v7621_v35  ;;  %13757 = vmatprep.subr.mxu0 %v8085_v36 }
0x1aaa   :  { %v13727_v11 = vpop.f32.mrf.mxu0  ;;  %13751 = vmatmul.mubr.msk.f32.vlgmr.msra.gmra.mxu1 %vm374_vm3, %v7697_v58  ;;  %13758 = vmatpush3.msra.mxu0 %v8085_v36  ;;  %v12658_v36 = vld [vmem:[%s15008_s20 + $0x38] sm:$0xff] }
0x1aab   :  { %13759 = vmatprep.subr.mxu0 %v8084_v20  ;;  %13765 = vmatpush3.msra.mxu1 %v8193_v40  ;;  %v12648_v11 = vld [vmem:[%s15603_s27] ss:$0 sm:$0xff]  ;;  %v12656_v40 = vld [vmem:[%s15008_s20 + $0x28] sm:$0xff] }
0x1aac   :  { %13760 = vmatpush3.msra.mxu0 %v8084_v20  ;;  %13766 = vmatprep.subr.mxu1 %v8192_v13  ;;  %v12657_v20 = vld [vmem:[%s15008_s20 + $0x30] sm:$0xff] }
0x1aad   :  { %13767 = vmatpush3.msra.mxu1 %v8192_v13  ;;  %13799 = vmatprep.subr.mxu0 %v12658_v36  ;;  %v12655_v13 = vld [vmem:[%s15008_s20 + $0x20] sm:$0xff]  ;;  %s14420_s20 = smov 34  }
0x1aae   :  { %13768 = vmatprep.subr.mxu1 %v8191_v15  ;;  %s15647_s10 = sld [smem:[%s16119_s0 + %s14420_s20]]  }
0x1aaf   :  { %13769 = vmatpush3.msra.mxu1 %v8191_v15 }
0x1ab0   :  { %13770 = vmatprep.subr.mxu1 %v8190_v45 }
0x1ab1   :  { %13771 = vmatpush3.msra.mxu1 %v8190_v45 }
0x1ab2   :  { %13772 = vmatprep.subr.mxu1 %v8189_v46 }
0x1ab3   :  { %13773 = vmatpush3.msra.mxu1 %v8189_v46 }
0x1ab4   :  { %13774 = vmatprep.subr.mxu1 %v8188_v63 }
0x1ab5   :  { %13775 = vmatpush3.msra.mxu1 %v8188_v63 }
0x1ab6   :  { %13776 = vmatprep.subr.mxu1 %v8187_v1 }
0x1ab7   :  { %13777 = vmatpush3.msra.mxu1 %v8187_v1 }
0x1ab8   :  { %13778 = vmatprep.subr.mxu1 %v8186_v17 }
0x1ab9   :  { %13779 = vmatpush3.msra.mxu1 %v8186_v17 }
0x1aba   :  { %13780 = vmatprep.subr.mxu1 %v8185_v18 }
0x1abb   :  { %13781 = vmatpush3.msra.mxu1 %v8185_v18 }
0x1abc   :  { %13782 = vmatprep.subr.mxu1 %v8184_v47 }
0x1abd   :  { %13783 = vmatpush3.msra.mxu1 %v8184_v47  ;;  %v12653_v47 = vld [vmem:[%s15642_s9] ss:$0 sm:$0xff] }
0x1abe   :  { %13784 = vmatprep.subr.mxu1 %v8183_v48 }
0x1abf   :  { %13785 = vmatpush3.msra.mxu1 %v8183_v48 }
0x1ac0   :  { %13786 = vmatprep.subr.mxu1 %v8182_v49 }
0x1ac1   :  { %13787 = vmatpush3.msra.mxu1 %v8182_v49 }
0x1b0a   :  { %v13742_v4 = vpop.f32.mrf.mxu1 }
0x1b0c   :  { %v7854_v14 = vpop.f32.mrf.mxu1 }
0x1b61   :  { %v13737_v27 = vpop.f32.mrf.mxu0 }
0x1b62   :  { %v7860_v53 = vadd.f32 %v13742_v4, %v13737_v27 }
0x1b63   :  { %v7773_v6 = vpop.f32.mrf.mxu0 }
0x1b64   :  { %v7855_v44 = vadd.f32 %v7854_v14, %v7773_v6  ;;  %v8179_v14 = vld [vmem:[%s15581_s6 + $0x8] sm:$0xff] }
0x1b65   :  { %v13747_v9 = vpop.f32.mrf.mxu0 }
0x1b66   :  { %v7945_v5 = vadd.f32 %v13747_v9, %v7860_v53  ;;  %v8181_v9 = vld [vmem:[%s15581_s6 + $0x18] sm:$0xff]  ;;  %v8180_v53 = vld [vmem:[%s15581_s6 + $0x10] sm:$0xff] }
0x1b67   :  { %v7935_v21 = vpop.f32.mrf.mxu0  ;;  %13788 = vmatprep.subr.mxu1 %v8181_v9 }
0x1b68   :  { %v7944_v22 = vadd.f32 %v7935_v21, %v7855_v44  ;;  %13789 = vmatpush3.msra.mxu1 %v8181_v9  ;;  %v8178_v21 = vld [vmem:[%s15581_s6] sm:$0xff] }
0x1b69   :  { %13790 = vmatprep.subr.mxu1 %v8180_v53  ;;  %v12649_v44 = vld [vmem:[%s15619_s7] ss:$0 sm:$0xff] }
0x1b6a   :  { %v13752_v59 = vpop.f32.mrf.mxu1  ;;  %13791 = vmatpush3.msra.mxu1 %v8180_v53 }
0x1b6b   :  { %v8028_v38 = vadd.f32 %v13752_v59, %v7945_v5  ;;  %13792 = vmatprep.subr.mxu1 %v8179_v14 }
0x1b6c   :  { %v8018_v23 = vpop.f32.mrf.mxu1  ;;  %13793 = vmatpush3.msra.mxu1 %v8179_v14 }
0x1b6d   :  { %v8037_v24 = vadd.f32 %v12646_v43, %v8028_v38  ;;  %v8027_v62 = vadd.f32 %v8018_v23, %v7944_v22  ;;  %13794 = vmatprep.subr.mxu1 %v8178_v21 }
0x1b6e   :  { %13795 = vmatpush3.msra.mxu1 %v8178_v21 }
0x1b6f   :  { %v8036_v29 = vadd.f32 %v12646_v43, %v8027_v62  ;;  %v8039_v41 = vadd.f32 %v8037_v24, %v15364_v39  ;;  %13835 = vmatprep.subr.mxu1 %v14380_v7  ;;  %v12652_v24 = vld [vmem:[%s15627_s13] ss:$0 sm:$0xff] }
0x1b71   :  { %v8045_v55 = vsel %vm272_vm0, %v8039_v41, 0.0  ;;  %v8038_v42 = vadd.f32 %v8036_v29, %v15362_v37 }
0x1b72   :  { %8046 = vadd.xlane.f32.xlu0 %v8045_v55 }
0x1b73   :  { %v8042_v25 = vsel %vm272_vm0, %v8038_v42, 0.0 }
0x1b74   :  { %8043 = vadd.xlane.f32.xlu1 %v8042_v25 }
0x1bfb   :  { %v8047_v3 = vpop.xlane.xlu0 %8046 }
0x1bfc   :  { %v8049_v16 = vmul.f32 0.03125, %v8047_v3 }
0x1bfd   :  { %v8044_v34 = vpop.xlane.xlu1 %8043 }
0x1bfe   :  { %v15559_v26 = vsub.f32 %v8039_v41, %v8049_v16  ;;  %v8048_v60 = vmul.f32 0.03125, %v8044_v34 }
0x1c00   :  { %v15561_v30 = vsub.f32 %v8038_v42, %v8048_v60  ;;  %v8053_v28 = vmul.f32 %v15559_v26, %v15559_v26 }
0x1c02   :  { %v8057_v39 = vsel %vm272_vm0, %v8053_v28, 0.0  ;;  %v8052_v37 = vmul.f32 %v15561_v30, %v15561_v30 }
0x1c03   :  { %8058 = vadd.xlane.f32.xlu1 %v8057_v39 }
0x1c04   :  { %v8054_v31 = vsel %vm272_vm0, %v8052_v37, 0.0 }
0x1c05   :  { %8055 = vadd.xlane.f32.xlu0 %v8054_v31 }
0x1c8c   :  { %v8059_v50 = vpop.xlane.xlu1 %8058 }
0x1c8d   :  { %v8061_v2 = vmul.f32 0.03125, %v8059_v50 }
0x1c8e   :  { %v8056_v51 = vpop.xlane.xlu0 %8055 }
0x1c8f   :  { %v8063_v52 = vadd.f32 1e-05, %v8061_v2  ;;  %v8060_v54 = vmul.f32 0.03125, %v8056_v51  ;;  %v12654_v51 = vld [vmem:[%s15647_s10] ss:$0 sm:$0xff] }
0x1c91   :  { %14290 = vrsqrt.f32 %v8063_v52  ;;  %v8062_v56 = vadd.f32 1e-05, %v8060_v54 }
0x1c93   :  { %14292 = vrsqrt.f32 %v8062_v56 }
0x1c9e   :  { %v14291_v57 = vpop.eup %14290 }
0x1c9f   :  { %v8067_v8 = vmul.f32 %v14291_v57, %v15559_v26  ;;  %v12660_v57 = vld [vmem:[%s15061_s29 + $0x1] ss:$0 sm:$0xff] }
0x1ca0   :  { %v14293_v58 = vpop.eup %14292 }
0x1ca1   :  { %v8066_v35 = vmul.f32 %v14293_v58, %v15561_v30  ;;  %v8075_v0 = vmul.f32 %v12647_v61, %v8067_v8 }
0x1ca3   :  { %v8074_v27 = vmul.f32 %v12647_v61, %v8066_v35  ;;  %v8083_v4 = vadd.f32 %v12648_v11, %v8075_v0 }
0x1ca5   :  { %v8082_v6 = vadd.f32 %v12648_v11, %v8074_v27 }
0x1ca7   :  { %13761 = vmatprep.mubr.msk.f32.mxu0 %vm272_vm0, %v8082_v6 }
0x1ca8   :  { %13762 = vmatmul.mubr.msk.f32.vlgmr.msra.gmra.mxu0 %vm272_vm0, %v8083_v4 }
0x1ca9   :  { %13800 = vmatpush3.msra.mxu0 %v12658_v36 }
0x1caa   :  { %13801 = vmatprep.subr.mxu0 %v12657_v20 }
0x1cab   :  { %13802 = vmatpush3.msra.mxu0 %v12657_v20 }
0x1cac   :  { %13803 = vmatprep.subr.mxu0 %v12656_v40 }
0x1cad   :  { %13804 = vmatpush3.msra.mxu0 %v12656_v40 }
0x1cae   :  { %13805 = vmatprep.subr.mxu0 %v12655_v13 }
0x1caf   :  { %13806 = vmatpush3.msra.mxu0 %v12655_v13 }
0x1cb0   :  { %13810 = vmatprep.subr.mxu0 %v14380_v7 }
0x1d68   :  { %v13763_v5 = vpop.f32.mrf.mxu0 }
0x1d69   :  { %v8173_v59 = vadd.f32 %v13763_v5, %v12649_v44 }
0x1d6a   :  { %v8167_v43 = vpop.f32.mrf.mxu0 }
0x1d6b   :  { %v8168_v22 = vadd.f32 %v12649_v44, %v8167_v43  ;;  %v8177_v23 = vmax.f32 %v8173_v59, 0.0 }
0x1d6d   :  { %v8176_v38 = vmax.f32 %v8168_v22, 0.0 }
0x1d6f   :  { %13796 = vmatprep.mubr.f32.mxu1 %v8176_v38 }
0x1d70   :  { %13797 = vmatmul.mubr.f32.vlgmr.msra.gmra.mxu1 %v8177_v23 }
0x1d71   :  { %13837 = vmatprep.mubr.msk.f32.mxu1 %vm14383_vm1, %v14380_v7 }
0x1e30   :  { %v13798_v62 = vpop.f32.mrf.mxu1 }
0x1e31   :  { %v8273_v29 = vadd.f32 %v13798_v62, %v12652_v24 }
0x1e32   :  { %v8267_v41 = vpop.f32.mrf.mxu1 }
0x1e33   :  { %v8277_v55 = vadd.f32 %v8273_v29, %v8083_v4  ;;  %v8268_v42 = vadd.f32 %v12652_v24, %v8267_v41 }
0x1e35   :  { %v8276_v25 = vadd.f32 %v8268_v42, %v8082_v6  ;;  %v8283_v3 = vsel %vm272_vm0, %v8277_v55, 0.0 }
0x1e36   :  { %8284 = vadd.xlane.f32.xlu1 %v8283_v3 }
0x1e37   :  { %v8280_v16 = vsel %vm272_vm0, %v8276_v25, 0.0 }
0x1e38   :  { %8281 = vadd.xlane.f32.xlu0 %v8280_v16 }
0x1ebf   :  { %v8285_v34 = vpop.xlane.xlu1 %8284 }
0x1ec0   :  { %v8287_v26 = vmul.f32 0.03125, %v8285_v34 }
0x1ec1   :  { %v8282_v60 = vpop.xlane.xlu0 %8281 }
0x1ec2   :  { %v8289_v30 = vsub.f32 %v8277_v55, %v8287_v26  ;;  %v8286_v28 = vmul.f32 0.03125, %v8282_v60 }
0x1ec4   :  { %v8288_v39 = vsub.f32 %v8276_v25, %v8286_v28  ;;  %v8291_v37 = vmul.f32 %v8289_v30, %v8289_v30 }
0x1ec6   :  { %v8295_v31 = vsel %vm272_vm0, %v8291_v37, 0.0  ;;  %v8290_v32 = vmul.f32 %v8288_v39, %v8288_v39 }
0x1ec7   :  { %8296 = vadd.xlane.f32.xlu1 %v8295_v31 }
0x1ec8   :  { %v8292_v33 = vsel %vm272_vm0, %v8290_v32, 0.0 }
0x1ec9   :  { %8293 = vadd.xlane.f32.xlu0 %v8292_v33 }
0x1f50   :  { %v8297_v15 = vpop.xlane.xlu1 %8296 }
0x1f51   :  { %v8299_v45 = vmul.f32 0.03125, %v8297_v15 }
0x1f52   :  { %v8294_v46 = vpop.xlane.xlu0 %8293 }
0x1f53   :  { %v8301_v63 = vadd.f32 1e-05, %v8299_v45  ;;  %v8298_v1 = vmul.f32 0.03125, %v8294_v46 }
0x1f55   :  { %14294 = vrsqrt.f32 %v8301_v63  ;;  %v8300_v17 = vadd.f32 1e-05, %v8298_v1 }
0x1f57   :  { %14296 = vrsqrt.f32 %v8300_v17 }
0x1f62   :  { %v14295_v18 = vpop.eup %14294 }
0x1f63   :  { %v8305_v48 = vmul.f32 %v14295_v18, %v8289_v30 }
0x1f64   :  { %v14297_v49 = vpop.eup %14296 }
0x1f65   :  { %v8304_v50 = vmul.f32 %v14297_v49, %v8288_v39  ;;  %v8313_v2 = vmul.f32 %v12653_v47, %v8305_v48 }
0x1f67   :  { %v8312_v52 = vmul.f32 %v12653_v47, %v8304_v50  ;;  %v15653_v56 = vadd.f32 %v12654_v51, %v8313_v2 }
0x1f69   :  { %v15651_v54 = vadd.f32 %v12654_v51, %v8312_v52 }
0x1f6b   :  { %13807 = vmatprep.mubr.msk.f32.mxu0 %vm272_vm0, %v15651_v54 }
0x1f6c   :  { %13808 = vmatmul.mubr.msk.f32.vlgmr.msra.gmra.mxu0 %vm272_vm0, %v15653_v56 }
0x1f6d   :  { %13812 = vmatprep.mubr.msk.f32.mxu0 %vm14383_vm1, %v14380_v7 }
0x202c   :  { %v13809_v61 = vpop.f32.mrf.mxu0 }
0x202d   :  { %v15662_v8 = vadd.f32 %v13809_v61, %v12660_v57 }
0x202e   :  { %v8407_v58 = vpop.f32.mrf.mxu0 }
0x202f   :  { %v15664_v35 = vadd.f32 %v12660_v57, %v8407_v58  ;;  %8425 = vrot.lane.b32.xlu1 %v15662_v8, %s14382_s15 }
0x2031   :  { %8423 = vrot.lane.b32.xlu0 %v15664_v35, %s14382_s15 }
0x2033   :  { %8427 = vrot.lane.b32.xlu1 %v15664_v35, %s14381_s14 }
0x2035   :  { %8429 = vrot.lane.b32.xlu0 %v15662_v8, %s14381_s14 }
0x2037   :  { %8431 = vrot.lane.b32.xlu1 %v15664_v35, %s14384_s16 }
0x2039   :  { %8433 = vrot.lane.b32.xlu0 %v15662_v8, %s14384_s16 }
0x203b   :  { %8435 = vrot.lane.b32.xlu1 %v15664_v35, %s14385_s17 }
0x203d   :  { %8511 = vrot.lane.b32.xlu0 %v15662_v8, %s14385_s17 }
0x20a1   :  { %v15682_v0 = vpop.permute.xlu1 %8425 }
0x20a2   :  { %8663 = vrot.lane.b32.xlu0 %v15682_v0, %s14385_s17 }
0x20a3   :  { %v15686_v11 = vpop.permute.xlu0 %8423 }
0x20a4   :  { %8587 = vrot.lane.b32.xlu1 %v15686_v11, %s14385_s17 }
0x20a5   :  { %v15690_v27 = vpop.permute.xlu1 %8427 }
0x20a7   :  { %v15692_v6 = vpop.permute.xlu0 %8429 }
0x20a8   :  { %8739 = vrot.lane.b32.xlu1 %v15690_v27, %s14385_s17  ;;  %8815 = vrot.lane.b32.xlu0 %v15692_v6, %s14385_s17 }
0x20a9   :  { %v15698_v4 = vpop.permute.xlu1 %8431 }
0x20ab   :  { %v15700_v9 = vpop.permute.xlu0 %8433 }
0x20ac   :  { %8891 = vrot.lane.b32.xlu1 %v15698_v4, %s14385_s17  ;;  %8967 = vrot.lane.b32.xlu0 %v15700_v9, %s14385_s17 }
0x20ad   :  { %v8436_v53 = vpop.permute.xlu1 %8435 }
0x20ae   :  { %13811 = vmatpush3.xpose.msk.msra.mxu0 %vm374_vm3, %v8436_v53 }
0x20af   :  { %13815 = vmatprep.subr.mxu0 %v14380_v7  ;;  %v8512_v14 = vpop.permute.xlu0 %8511 }
0x20b1   :  { %13813 = vmatmul.mubr.msk.f32.vlgmr.msra.gmra.mxu0 %vm374_vm3, %v15664_v35 }
0x20b2   :  { %13816 = vmatpush3.xpose.msk.msra.mxu0 %vm374_vm3, %v8512_v14  ;;  %13817 = vmatprep.mubr.msk.f32.mxu0 %vm14383_vm1, %v14380_v7 }
0x20b3   :  { %13820 = vmatprep.subr.mxu0 %v14380_v7 }
0x20b5   :  { %13818 = vmatmul.mubr.msk.f32.vlgmr.msra.gmra.mxu0 %vm374_vm3, %v15662_v8 }
0x20b6   :  { %13822 = vmatprep.mubr.msk.f32.mxu0 %vm14383_vm1, %v14380_v7 }
0x2114   :  { %v8664_v21 = vpop.permute.xlu0 %8663 }
0x2116   :  { %v8588_v44 = vpop.permute.xlu1 %8587 }
0x2117   :  { %13821 = vmatpush3.xpose.msk.msra.mxu0 %vm374_vm3, %v8588_v44 }
0x2118   :  { %13825 = vmatprep.subr.mxu0 %v14380_v7 }
0x211a   :  { %13823 = vmatmul.mubr.msk.f32.vlgmr.msra.gmra.mxu0 %vm374_vm3, %v15686_v11  ;;  %v8816_v5 = vpop.permute.xlu0 %8815  ;;  %v8740_v59 = vpop.permute.xlu1 %8739 }
0x211b   :  { %13826 = vmatpush3.xpose.msk.msra.mxu0 %vm374_vm3, %v8664_v21  ;;  %13836 = vmatpush3.xpose.msk.msra.mxu1 %vm374_vm3, %v8816_v5 }
0x211c   :  { %13827 = vmatprep.mubr.msk.f32.mxu0 %vm14383_vm1, %v14380_v7  ;;  %13830 = vmatprep.subr.mxu0 %v14380_v7 }
0x211d   :  { %13845 = vmatprep.subr.mxu1 %v14380_v7 }
0x211e   :  { %13828 = vmatmul.mubr.msk.f32.vlgmr.msra.gmra.mxu0 %vm374_vm3, %v15682_v0  ;;  %13838 = vmatmul.mubr.msk.f32.vlgmr.msra.gmra.mxu1 %vm374_vm3, %v15692_v6  ;;  %v8968_v43 = vpop.permute.xlu0 %8967  ;;  %v8892_v22 = vpop.permute.xlu1 %8891 }
0x211f   :  { %13831 = vmatpush3.xpose.msk.msra.mxu0 %vm374_vm3, %v8740_v59  ;;  %13846 = vmatpush3.xpose.msk.msra.mxu1 %vm374_vm3, %v8968_v43 }
0x2120   :  { %13832 = vmatprep.mubr.msk.f32.mxu0 %vm14383_vm1, %v14380_v7  ;;  %13847 = vmatprep.mubr.msk.f32.mxu1 %vm14383_vm1, %v14380_v7 }
0x2121   :  { %13840 = vmatprep.subr.mxu0 %v14380_v7  ;;  %13855 = vmatprep.subr.mxu1 %v14380_v7 }
0x2122   :  { %13833 = vmatmul.mubr.msk.f32.vlgmr.msra.gmra.mxu0 %vm374_vm3, %v15690_v27  ;;  %13848 = vmatmul.mubr.msk.f32.vlgmr.msra.gmra.mxu1 %vm374_vm3, %v15700_v9 }
0x2123   :  { %13841 = vmatpush3.xpose.msk.msra.mxu0 %vm374_vm3, %v8892_v22  ;;  %13842 = vmatprep.mubr.msk.f32.mxu0 %vm14383_vm1, %v14380_v7 }
0x2124   :  { %13850 = vmatprep.subr.mxu0 %v14380_v7  ;;  %13857 = vmatprep.mubr.msk.f32.mxu1 %vm14383_vm1, %v14380_v7 }
0x2126   :  { %13843 = vmatmul.mubr.msk.f32.vlgmr.msra.gmra.mxu0 %vm374_vm3, %v15698_v4 }
0x2127   :  { %13852 = vmatprep.mubr.msk.f32.mxu0 %vm14383_vm1, %v14380_v7 }
0x2171   :  { %v8507_v38 = vpop.f32.mrf.mxu0 }
0x2172   :  { %v8508_v23 = vadd.f32 %v8507_v38, %v15158_v19 }
0x2173   :  { %v13814_v24 = vpop.f32.mrf.mxu0 }
0x2174   :  { %v9043_v62 = vsel %vm374_vm3, %v8508_v23, -inf }
0x2175   :  { %9044 = vmax.xlane.f32.xlu1 %v9043_v62  ;;  %v8583_v29 = vpop.f32.mrf.mxu0 }
0x2176   :  { %v8584_v41 = vadd.f32 %v8583_v29, %v15158_v19 }
0x2177   :  { %v13819_v55 = vpop.f32.mrf.mxu0 }
0x2178   :  { %v9046_v42 = vsel %vm374_vm3, %v8584_v41, -inf }
0x2179   :  { %9047 = vmax.xlane.f32.xlu0 %v9046_v42 }
0x21da   :  { %v8659_v25 = vpop.f32.mrf.mxu0 }
0x21db   :  { %v8660_v3 = vadd.f32 %v8659_v25, %v15158_v19 }
0x21dc   :  { %v13824_v16 = vpop.f32.mrf.mxu0 }
0x21dd   :  { %v9049_v34 = vsel %vm374_vm3, %v8660_v3, -inf }
0x21de   :  { %9050 = vmax.xlane.f32.xlu0 %v9049_v34  ;;  %v8735_v26 = vpop.f32.mrf.mxu0  ;;  %v8887_v60 = vpop.f32.mrf.mxu1 }
0x21df   :  { %v8736_v30 = vadd.f32 %v8735_v26, %v15158_v19  ;;  %v8888_v37 = vadd.f32 %v8887_v60, %v15158_v19 }
0x21e0   :  { %v13829_v28 = vpop.f32.mrf.mxu0  ;;  %v13839_v39 = vpop.f32.mrf.mxu1 }
0x21e1   :  { %v9052_v31 = vsel %vm374_vm3, %v8736_v30, -inf  ;;  %v9058_v45 = vsel %vm374_vm3, %v8888_v37, -inf }
0x21e2   :  { %9053 = vmax.xlane.f32.xlu1 %v9052_v31  ;;  %v8811_v32 = vpop.f32.mrf.mxu0  ;;  %v9039_v33 = vpop.f32.mrf.mxu1 }
0x21e3   :  { %v8812_v36 = vadd.f32 %v8811_v32, %v15158_v19  ;;  %v9040_v13 = vadd.f32 %v9039_v33, %v15158_v19 }
0x21e4   :  { %v13834_v20 = vpop.f32.mrf.mxu0  ;;  %v13849_v40 = vpop.f32.mrf.mxu1 }
0x21e5   :  { %v9055_v15 = vsel %vm374_vm3, %v8812_v36, -inf  ;;  %v9064_v18 = vsel %vm374_vm3, %v9040_v13, -inf }
0x21e6   :  { %9056 = vmax.xlane.f32.xlu0 %v9055_v15  ;;  %v8963_v46 = vpop.f32.mrf.mxu0  ;;  %9059 = vmax.xlane.f32.xlu1 %v9058_v45 }
0x21e7   :  { %v8964_v63 = vadd.f32 %v8963_v46, %v15158_v19 }
0x21e8   :  { %v13844_v1 = vpop.f32.mrf.mxu0 }
0x21e9   :  { %v9061_v17 = vsel %vm374_vm3, %v8964_v63, -inf }
0x21ea   :  { %9062 = vmax.xlane.f32.xlu0 %v9061_v17  ;;  %9065 = vmax.xlane.f32.xlu1 %v9064_v18 }
0x21fb   :  { %9207 = vrot.lane.b32.xlu1 %v15662_v8, %s14388_s22 }
0x21fe   :  { %v9045_v19 = vpop.xlane.xlu1 %9044 }
0x21ff   :  { %9283 = vrot.lane.b32.xlu1 %v15686_v11, %s14388_s22  ;;  %v9067_v48 = vsub.f32 %v8508_v23, %v9045_v19 }
0x2200   :  { %9131 = vrot.lane.b32.xlu0 %v15664_v35, %s14388_s22 }
0x2201   :  { %v9075_v50 = vmul.f32 1.442695, %v9067_v48 }
0x2202   :  { %v9048_v47 = vpop.xlane.xlu0 %9047 }
0x2203   :  { %9435 = vrot.lane.b32.xlu1 %v15690_v27, %s14388_s22  ;;  %v9068_v49 = vsub.f32 %v8584_v41, %v9048_v47  ;;  %14298 = vpow2.f32 %v9075_v50 }
0x2204   :  { %9359 = vrot.lane.b32.xlu0 %v15682_v0, %s14388_s22 }
0x2205   :  { %v9077_v2 = vmul.f32 1.442695, %v9068_v49 }
0x2207   :  { %14300 = vpow2.f32 %v9077_v2 }
0x2208   :  { %9511 = vrot.lane.b32.xlu0 %v15692_v6, %s14388_s22 }
0x2210   :  { %v15782_v51 = vpop.eup %14298 }
0x2211   :  { %v9091_v57 = vsel %vm374_vm3, %v15782_v51, 0.0 }
0x2214   :  { %v15784_v52 = vpop.eup %14300 }
0x2215   :  { %v9094_v61 = vsel %vm374_vm3, %v15784_v52, 0.0 }
0x2227   :  { %9092 = vadd.xlane.f32.xlu0 %v9091_v57  ;;  %9095 = vadd.xlane.f32.xlu1 %v9094_v61 }
0x2267   :  { %v9051_v8 = vpop.xlane.xlu0 %9050 }
0x2268   :  { %v9069_v58 = vsub.f32 %v8660_v3, %v9051_v8 }
0x226a   :  { %v9079_v35 = vmul.f32 1.442695, %v9069_v58  ;;  %v12663_v58 = vld [vmem:[%s15266_s2 + $0x20] sm:$0xff] }
0x226b   :  { %v9054_v0 = vpop.xlane.xlu1 %9053 }
0x226c   :  { %14302 = vpow2.f32 %v9079_v35  ;;  %v9070_v14 = vsub.f32 %v8736_v30, %v9054_v0 }
0x226e   :  { %v9081_v38 = vmul.f32 1.442695, %v9070_v14 }
0x226f   :  { %v9060_v11 = vpop.xlane.xlu1 %9059  ;;  %v9057_v27 = vpop.xlane.xlu0 %9056 }
0x2270   :  { %v9072_v6 = vsub.f32 %v8888_v37, %v9060_v11  ;;  %v9071_v53 = vsub.f32 %v8812_v36, %v9057_v27  ;;  %v12664_v11 = vld [vmem:[%s15266_s2 + $0x28] sm:$0xff]  ;;  %v12665_v27 = vld [vmem:[%s15266_s2 + $0x30] sm:$0xff] }
0x2272   :  { %v9085_v21 = vmul.f32 1.442695, %v9072_v6  ;;  %v9083_v44 = vmul.f32 1.442695, %v9071_v53  ;;  %v12666_v6 = vld [vmem:[%s15266_s2 + $0x38] sm:$0xff] }
0x2273   :  { %v9066_v5 = vpop.xlane.xlu1 %9065  ;;  %v9063_v59 = vpop.xlane.xlu0 %9062 }
0x2274   :  { %14304 = vpow2.f32 %v9085_v21  ;;  %v9074_v43 = vsub.f32 %v9040_v13, %v9066_v5  ;;  %v9073_v22 = vsub.f32 %v8964_v63, %v9063_v59 }
0x2275   :  { %14306 = vpow2.f32 %v9083_v44 }
0x2276   :  { %v9089_v23 = vmul.f32 1.442695, %v9074_v43  ;;  %v9087_v24 = vmul.f32 1.442695, %v9073_v22 }
0x2277   :  { %v9208_v62 = vpop.permute.xlu1 %9207  ;;  %v9132_v29 = vpop.permute.xlu0 %9131 }
0x2278   :  { %14308 = vpow2.f32 %v9089_v23  ;;  %13851 = vmatpush3.msra.mxu0 %v9132_v29  ;;  %13856 = vmatpush3.msra.mxu1 %v9208_v62 }
0x2279   :  { %v14303_v41 = vpop.eup %14302  ;;  %14310 = vpow2.f32 %v9087_v24  ;;  %13860 = vmatprep.subr.mxu0 %v14380_v7  ;;  %13865 = vmatprep.subr.mxu1 %v14380_v7 }
0x227a   :  { %14312 = vpow2.f32 %v9081_v38  ;;  %v9097_v55 = vsel %vm374_vm3, %v14303_v41, 0.0 }
0x227b   :  { %9098 = vadd.xlane.f32.xlu0 %v9097_v55  ;;  %v9284_v37 = vpop.permute.xlu1 %9283  ;;  %v9360_v31 = vpop.permute.xlu0 %9359 }
0x227f   :  { %v9436_v32 = vpop.permute.xlu1 %9435  ;;  %v9512_v33 = vpop.permute.xlu0 %9511 }
0x2281   :  { %v15793_v42 = vpop.eup %14304 }
0x2282   :  { %v14307_v25 = vpop.eup %14306  ;;  %v9106_v3 = vsel %vm374_vm3, %v15793_v42, 0.0 }
0x2283   :  { %9107 = vadd.xlane.f32.xlu1 %v9106_v3  ;;  %v9103_v16 = vsel %vm374_vm3, %v14307_v25, 0.0 }
0x2284   :  { %9104 = vadd.xlane.f32.xlu0 %v9103_v16 }
0x2285   :  { %v15798_v34 = vpop.eup %14308 }
0x2286   :  { %v14311_v26 = vpop.eup %14310  ;;  %v9112_v60 = vsel %vm374_vm3, %v15798_v34, 0.0 }
0x2287   :  { %v14313_v30 = vpop.eup %14312  ;;  %9113 = vadd.xlane.f32.xlu1 %v9112_v60  ;;  %v9109_v28 = vsel %vm374_vm3, %v14311_v26, 0.0 }
0x2288   :  { %9110 = vadd.xlane.f32.xlu0 %v9109_v28  ;;  %v9100_v39 = vsel %vm374_vm3, %v14313_v30, 0.0 }
0x228b   :  { %9101 = vadd.xlane.f32.xlu1 %v9100_v39 }
0x229c   :  { %9587 = vrot.lane.b32.xlu1 %v15698_v4, %s14388_s22 }
0x229e   :  { %9663 = vrot.lane.b32.xlu0 %v15700_v9, %s14388_s22  ;;  %s14422_s22 = smov 35  }
0x22b0   :  { %v9096_v36 = vpop.xlane.xlu1 %9095  ;;  %v9093_v20 = vpop.xlane.xlu0 %9092 }
0x22b1   :  { %14314 = vrcp.f32 %v9096_v36 }
0x22b2   :  { %14316 = vrcp.f32 %v9093_v20 }
0x22be   :  { %v14315_v40 = vpop.eup %14314 }
0x22bf   :  { %v14317_v13 = vpop.eup %14316  ;;  %v9124_v15 = vmul.f32 %v14315_v40, %v15784_v52 }
0x22c0   :  { %v9123_v45 = vmul.f32 %v14317_v13, %v15782_v51 }
0x22c1   :  { %13858 = vmatmul.mubr.msk.f32.vlgmr.msra.gmra.mxu1 %vm374_vm3, %v9124_v15 }
0x22c2   :  { %13853 = vmatmul.mubr.msk.f32.vlgmr.msra.gmra.mxu0 %vm374_vm3, %v9123_v45  ;;  %13866 = vmatpush3.msra.mxu1 %v9360_v31  ;;  %v12700_v31 = vld [vmem:[%s15301_s8 + $0x1] ss:$0 sm:$0xff]  ;;  %s12440_s8 = sld [smem:[%s16119_s0 + %s14422_s22]]  }
0x22c3   :  { %13861 = vmatpush3.msra.mxu0 %v9284_v37  ;;  %13862 = vmatprep.mubr.msk.f32.mxu0 %vm14383_vm1, %v14380_v7 }
0x22c4   :  { %13870 = vmatprep.subr.mxu0 %v14380_v7  ;;  %13867 = vmatprep.mubr.msk.f32.mxu1 %vm14383_vm1, %v14380_v7 }
0x22c5   :  { %13875 = vmatprep.subr.mxu1 %v14380_v7 }
0x2304   :  { %v9099_v4 = vpop.xlane.xlu0 %9098 }
0x2305   :  { %14318 = vrcp.f32 %v9099_v4 }
0x230c   :  { %v9108_v9 = vpop.xlane.xlu1 %9107 }
0x230d   :  { %v9105_v46 = vpop.xlane.xlu0 %9104 }
0x230e   :  { %14320 = vrcp.f32 %v9105_v46  ;;  %v12707_v46 = vld [vmem:[%s15316_s12 + $0x30] sm:$0xff] }
0x2310   :  { %v9114_v63 = vpop.xlane.xlu1 %9113 }
0x2311   :  { %v9111_v1 = vpop.xlane.xlu0 %9110 }
0x2312   :  { %v14319_v17 = vpop.eup %14318  ;;  %14322 = vrcp.f32 %v9111_v1  ;;  %v12705_v1 = vld [vmem:[%s15316_s12 + $0x20] sm:$0xff] }
0x2313   :  { %v9125_v18 = vmul.f32 %v14319_v17, %v14303_v41 }
0x2314   :  { %v9102_v19 = vpop.xlane.xlu1 %9101 }
0x2315   :  { %14324 = vrcp.f32 %v9102_v19  ;;  %13863 = vmatmul.mubr.msk.f32.vlgmr.msra.gmra.mxu0 %vm374_vm3, %v9125_v18  ;;  %v9664_v35 = vpop.permute.xlu0 %9663 }
0x2316   :  { %13871 = vmatpush3.msra.mxu0 %v9436_v32  ;;  %13872 = vmatprep.mubr.msk.f32.mxu0 %vm14383_vm1, %v14380_v7  ;;  %14326 = vrcp.f32 %v9108_v9  ;;  %v12708_v9 = vld [vmem:[%s15316_s12 + $0x38] sm:$0xff] }
0x2317   :  { %13880 = vmatprep.subr.mxu0 %v14380_v7  ;;  %14328 = vrcp.f32 %v9114_v63  ;;  %v12706_v63 = vld [vmem:[%s15316_s12 + $0x28] sm:$0xff]  ;;  %s14423_s12 = smov 36  }
0x2318   :  { %v9588_v49 = vpop.permute.xlu1 %9587 }
0x231b   :  { %v14321_v47 = vpop.eup %14320 }
0x231c   :  { %v9127_v48 = vmul.f32 %v14321_v47, %v14307_v25 }
0x231e   :  { %13873 = vmatmul.mubr.msk.f32.vlgmr.msra.gmra.mxu0 %vm374_vm3, %v9127_v48 }
0x231f   :  { %v14323_v50 = vpop.eup %14322  ;;  %13881 = vmatpush3.msra.mxu0 %v9588_v49  ;;  %13882 = vmatprep.mubr.msk.f32.mxu0 %vm14383_vm1, %v14380_v7 }
0x2320   :  { %v9129_v2 = vmul.f32 %v14323_v50, %v14311_v26  ;;  %13890 = vmatprep.subr.mxu0 %v12664_v11 }
0x2322   :  { %v14325_v51 = vpop.eup %14324  ;;  %13883 = vmatmul.mubr.msk.f32.vlgmr.msra.gmra.mxu0 %vm374_vm3, %v9129_v2 }
0x2323   :  { %v9126_v52 = vmul.f32 %v14325_v51, %v14313_v30  ;;  %v14327_v57 = vpop.eup %14326  ;;  %13891 = vmatpush3.msra.mxu0 %v12664_v11  ;;  %v12710_v51 = vld [vmem:[%s15337_s30 + $0x1] ss:$0 sm:$0xff] }
0x2324   :  { %v9128_v61 = vmul.f32 %v14327_v57, %v15793_v42  ;;  %v14329_v8 = vpop.eup %14328  ;;  %13900 = vmatprep.subr.mxu0 %v12665_v27 }
0x2325   :  { %13868 = vmatmul.mubr.msk.f32.vlgmr.msra.gmra.mxu1 %vm374_vm3, %v9126_v52  ;;  %v9130_v0 = vmul.f32 %v14329_v8, %v15798_v34 }
0x2326   :  { %13876 = vmatpush3.msra.mxu1 %v9512_v33  ;;  %13877 = vmatprep.mubr.msk.f32.mxu1 %vm14383_vm1, %v14380_v7 }
0x2327   :  { %13885 = vmatprep.subr.mxu1 %v14380_v7 }
0x2329   :  { %13878 = vmatmul.mubr.msk.f32.vlgmr.msra.gmra.mxu1 %vm374_vm3, %v9128_v61 }
0x232a   :  { %13886 = vmatpush3.msra.mxu1 %v9664_v35  ;;  %13887 = vmatprep.mubr.msk.f32.mxu1 %vm14383_vm1, %v14380_v7 }
0x232b   :  { %13895 = vmatprep.subr.mxu1 %v12663_v58 }
0x232d   :  { %13888 = vmatmul.mubr.msk.f32.vlgmr.msra.gmra.mxu1 %vm374_vm3, %v9130_v0 }
0x232e   :  { %13896 = vmatpush3.msra.mxu1 %v12663_v58 }
0x232f   :  { %13905 = vmatprep.subr.mxu1 %v12666_v6 }
0x2381   :  { %v9279_v53 = vpop.f32.mrf.mxu1 }
0x2382   :  { %v9203_v14 = vpop.f32.mrf.mxu0 }
0x2383   :  { %13897 = vmatprep.mubr.msk.f32.mxu1 %vm374_vm3, %v9203_v14  ;;  %v13859_v21 = vpop.f32.mrf.mxu1  ;;  %v12703_v14 = vld [vmem:[%s15347_s25 + $0x1] ss:$0 sm:$0xff] }
0x2384   :  { %v13854_v44 = vpop.f32.mrf.mxu0  ;;  %13898 = vmatmul.mubr.msk.f32.vlgmr.msra.gmra.mxu1 %vm374_vm3, %v9279_v53 }
0x2385   :  { %13906 = vmatpush3.msra.mxu1 %v12666_v6 }
0x23d5   :  { %v9355_v5 = vpop.f32.mrf.mxu0 }
0x23d6   :  { %13892 = vmatprep.mubr.msk.f32.mxu0 %vm374_vm3, %v9355_v5 }
0x23d7   :  { %v13864_v59 = vpop.f32.mrf.mxu0 }
0x23de   :  { %v9507_v43 = vpop.f32.mrf.mxu0 }
0x23e0   :  { %v13874_v22 = vpop.f32.mrf.mxu0 }
0x23e2   :  { %v9659_v38 = vpop.f32.mrf.mxu0 }
0x23e3   :  { %13907 = vmatprep.mubr.msk.f32.mxu1 %vm374_vm3, %v9659_v38 }
0x23e4   :  { %v13884_v23 = vpop.f32.mrf.mxu0 }
0x23e5   :  { %v9431_v24 = vpop.f32.mrf.mxu1 }
0x23e6   :  { %13893 = vmatmul.mubr.msk.f32.vlgmr.msra.gmra.mxu0 %vm374_vm3, %v9431_v24 }
0x23e7   :  { %v13869_v62 = vpop.f32.mrf.mxu1  ;;  %13902 = vmatprep.mubr.msk.f32.mxu0 %vm374_vm3, %v9507_v43  ;;  %13901 = vmatpush3.msra.mxu0 %v12665_v27  ;;  %v12704_v43 = vld [vmem:[%s15355_s5 + $0x1] ss:$0 sm:$0xff]  ;;  %s12441_s5 = sld [smem:[%s16119_s0 + %s14423_s12]]  }
0x23e8   :  { %13910 = vmatprep.subr.mxu0 %v12708_v9 }
0x23e9   :  { %v9583_v29 = vpop.f32.mrf.mxu1 }
0x23ea   :  { %13903 = vmatmul.mubr.msk.f32.vlgmr.msra.gmra.mxu0 %vm374_vm3, %v9583_v29 }
0x23eb   :  { %v13879_v41 = vpop.f32.mrf.mxu1  ;;  %13911 = vmatpush3.msra.mxu0 %v12708_v9 }
0x23ec   :  { %13912 = vmatprep.subr.mxu0 %v12707_v46 }
0x23ed   :  { %v9735_v55 = vpop.f32.mrf.mxu1  ;;  %13913 = vmatpush3.msra.mxu0 %v12707_v46 }
0x23ee   :  { %13908 = vmatmul.mubr.msk.f32.vlgmr.msra.gmra.mxu1 %vm374_vm3, %v9735_v55  ;;  %13914 = vmatprep.subr.mxu0 %v12706_v63 }
0x23ef   :  { %v13889_v42 = vpop.f32.mrf.mxu1  ;;  %13929 = vmatprep.mubr.msk.f32.mxu1 %vm272_vm0, %v15369_v12  ;;  %13915 = vmatpush3.msra.mxu0 %v12706_v63 }
0x23f0   :  { %13916 = vmatprep.subr.mxu0 %v12705_v1 }
0x23f1   :  { %13917 = vmatpush3.msra.mxu0 %v12705_v1 }
0x23f2   :  { %13932 = vmatprep.subr.mxu0 %v14380_v7 }
0x2444   :  { %v13899_v3 = vpop.f32.mrf.mxu1 }
0x2446   :  { %v9892_v60 = vpop.f32.mrf.mxu1 }
0x24a6   :  { %v13894_v25 = vpop.f32.mrf.mxu0 }
0x24a7   :  { %v9898_v26 = vadd.f32 %v13899_v3, %v13894_v25 }
0x24a8   :  { %v9811_v16 = vpop.f32.mrf.mxu0 }
0x24a9   :  { %v9893_v28 = vadd.f32 %v9892_v60, %v9811_v16 }
0x24aa   :  { %v13904_v34 = vpop.f32.mrf.mxu0 }
0x24ab   :  { %v9983_v39 = vadd.f32 %v13904_v34, %v9898_v26 }
0x24ac   :  { %v9973_v30 = vpop.f32.mrf.mxu0 }
0x24ad   :  { %v9982_v32 = vadd.f32 %v9973_v30, %v9893_v28 }
0x24ae   :  { %v13909_v37 = vpop.f32.mrf.mxu1 }
0x24af   :  { %v10066_v33 = vadd.f32 %v13909_v37, %v9983_v39 }
0x24b0   :  { %v10056_v36 = vpop.f32.mrf.mxu1 }
0x24b1   :  { %v10076_v20 = vadd.f32 %v12700_v31, %v10066_v33  ;;  %v10065_v40 = vadd.f32 %v10056_v36, %v9982_v32 }
0x24b3   :  { %v10075_v12 = vadd.f32 %v12700_v31, %v10065_v40  ;;  %v10078_v13 = vadd.f32 %v10076_v20, %v15653_v56 }
0x24b5   :  { %v10086_v15 = vsel %vm272_vm0, %v10078_v13, 0.0  ;;  %v10077_v45 = vadd.f32 %v10075_v12, %v15651_v54 }
0x24b6   :  { %10087 = vadd.xlane.f32.xlu0 %v10086_v15 }
0x24b7   :  { %v10083_v4 = vsel %vm272_vm0, %v10077_v45, 0.0 }
0x24b8   :  { %10084 = vadd.xlane.f32.xlu1 %v10083_v4 }
0x253f   :  { %v10088_v56 = vpop.xlane.xlu0 %10087 }
0x2540   :  { %v10090_v54 = vmul.f32 0.03125, %v10088_v56 }
0x2541   :  { %v10085_v17 = vpop.xlane.xlu1 %10084 }
0x2542   :  { %v10092_v18 = vsub.f32 %v10078_v13, %v10090_v54  ;;  %v10089_v19 = vmul.f32 0.03125, %v10085_v17 }
0x2544   :  { %v10091_v47 = vsub.f32 %v10077_v45, %v10089_v19  ;;  %v10094_v48 = vmul.f32 %v10092_v18, %v10092_v18 }
0x2546   :  { %v10098_v49 = vsel %vm272_vm0, %v10094_v48, 0.0  ;;  %v10093_v50 = vmul.f32 %v10091_v47, %v10091_v47 }
0x2547   :  { %10099 = vadd.xlane.f32.xlu1 %v10098_v49 }
0x2548   :  { %v10095_v2 = vsel %vm272_vm0, %v10093_v50, 0.0 }
0x2549   :  { %10096 = vadd.xlane.f32.xlu0 %v10095_v2 }
0x2558   :  { %10227 = vrot.lane.b32.xlu1 %v12707_v46, %s14385_s17 }
0x255c   :  { %10225 = vrot.lane.b32.xlu1 %v12706_v63, %s14385_s17 }
0x255f   :  { %10229 = vrot.lane.b32.xlu0 %v12708_v9, %s14385_s17 }
0x2560   :  { %10235 = vrot.lane.b32.xlu1 %v12710_v51, %s14385_s17 }
0x2563   :  { %10223 = vrot.lane.b32.xlu0 %v12705_v1, %s14385_s17 }
0x25d0   :  { %v10100_v52 = vpop.xlane.xlu1 %10099 }
0x25d1   :  { %v10102_v57 = vmul.f32 0.03125, %v10100_v52 }
0x25d2   :  { %v10097_v61 = vpop.xlane.xlu0 %10096 }
0x25d3   :  { %v10104_v8 = vadd.f32 1e-05, %v10102_v57  ;;  %v10101_v58 = vmul.f32 0.03125, %v10097_v61 }
0x25d4   :  { %v10228_v35 = vpop.permute.xlu1 %10227 }
0x25d5   :  { %14330 = vrsqrt.f32 %v10104_v8  ;;  %v10103_v0 = vadd.f32 1e-05, %v10101_v58 }
0x25d6   :  { %v10230_v11 = vpop.permute.xlu0 %10229 }
0x25d7   :  { %14332 = vrsqrt.f32 %v10103_v0  ;;  %13921 = vmatprep.subr.mxu1 %v10230_v11 }
0x25d8   :  { %13922 = vmatpush3.msra.mxu1 %v10230_v11  ;;  %v10226_v27 = vpop.permute.xlu1 %10225 }
0x25d9   :  { %13923 = vmatprep.subr.mxu1 %v10228_v35 }
0x25da   :  { %13924 = vmatpush3.msra.mxu1 %v10228_v35  ;;  %v10224_v6 = vpop.permute.xlu0 %10223 }
0x25db   :  { %13925 = vmatprep.subr.mxu1 %v10226_v27 }
0x25dc   :  { %13926 = vmatpush3.msra.mxu1 %v10226_v27 }
0x25dd   :  { %13927 = vmatprep.subr.mxu1 %v10224_v6 }
0x25de   :  { %13928 = vmatpush3.msra.mxu1 %v10224_v6 }
0x25df   :  { %13930 = vmatmul.mubr.msk.f32.vlgmr.msra.gmra.mxu1 %vm272_vm0, %v15375_v10  ;;  %13937 = vmatprep.subr.mxu1 %v14380_v7  ;;  %v10236_v10 = vpop.permute.xlu1 %10235 }
0x25e0   :  { %13939 = vmatprep.mubr.msk.f32.mxu1 %vm14383_vm1, %v14380_v7 }
0x25e2   :  { %v14331_v53 = vpop.eup %14330 }
0x25e3   :  { %v10108_v21 = vmul.f32 %v14331_v53, %v10092_v18 }
0x25e4   :  { %v14333_v44 = vpop.eup %14332 }
0x25e5   :  { %v10107_v5 = vmul.f32 %v14333_v44, %v10091_v47  ;;  %v10116_v59 = vmul.f32 %v12703_v14, %v10108_v21 }
0x25e7   :  { %v10115_v22 = vmul.f32 %v12703_v14, %v10107_v5  ;;  %v15877_v23 = vadd.f32 %v12704_v43, %v10116_v59 }
0x25e9   :  { %v15875_v38 = vadd.f32 %v12704_v43, %v10115_v22 }
0x25eb   :  { %13918 = vmatprep.mubr.msk.f32.mxu0 %vm272_vm0, %v15875_v38 }
0x25ec   :  { %13919 = vmatmul.mubr.msk.f32.vlgmr.msra.gmra.mxu0 %vm272_vm0, %v15877_v23 }
0x25ed   :  { %13934 = vmatprep.mubr.msk.f32.mxu0 %vm14383_vm1, %v14380_v7 }
0x269f   :  { %v13931_v24 = vpop.f32.mrf.mxu1 }
0x26a0   :  { %v15885_v62 = vadd.f32 %v13931_v24, %v10236_v10 }
0x26a1   :  { %v10304_v29 = vpop.f32.mrf.mxu1 }
0x26a2   :  { %v15887_v41 = vadd.f32 %v10304_v29, %v10236_v10  ;;  %10336 = vrot.lane.b32.xlu1 %v15885_v62, %s14382_s15  ;;  %13938 = vmatpush3.xpose.msk.msra.mxu1 %vm374_vm3, %v15885_v62 }
0x26a3   :  { %13947 = vmatprep.subr.mxu1 %v14380_v7 }
0x26a4   :  { %10334 = vrot.lane.b32.xlu0 %v15887_v41, %s14382_s15  ;;  %13933 = vmatpush3.xpose.msk.msra.mxu0 %vm374_vm3, %v15887_v41 }
0x26a5   :  { %13942 = vmatprep.subr.mxu0 %v14380_v7 }
0x26a6   :  { %10340 = vrot.lane.b32.xlu1 %v15885_v62, %s14381_s14 }
0x26a8   :  { %10338 = vrot.lane.b32.xlu0 %v15887_v41, %s14381_s14 }
0x26aa   :  { %10344 = vrot.lane.b32.xlu1 %v15885_v62, %s14384_s16 }
0x26ac   :  { %v13920_v55 = vpop.f32.mrf.mxu0  ;;  %10342 = vrot.lane.b32.xlu0 %v15887_v41, %s14384_s16 }
0x26ad   :  { %v10216_v42 = vadd.f32 %v13920_v55, %v12710_v51 }
0x26ae   :  { %v10210_v25 = vpop.f32.mrf.mxu0 }
0x26af   :  { %v10211_v3 = vadd.f32 %v12710_v51, %v10210_v25  ;;  %10322 = vrot.lane.b32.xlu1 %v10216_v42, %s14382_s15  ;;  %13940 = vmatmul.mubr.msk.f32.vlgmr.msra.gmra.mxu1 %vm374_vm3, %v10216_v42 }
0x26b0   :  { %13949 = vmatprep.mubr.msk.f32.mxu1 %vm14383_vm1, %v14380_v7 }
0x26b1   :  { %10320 = vrot.lane.b32.xlu0 %v10211_v3, %s14382_s15  ;;  %13935 = vmatmul.mubr.msk.f32.vlgmr.msra.gmra.mxu0 %vm374_vm3, %v10211_v3 }
0x26b2   :  { %13944 = vmatprep.mubr.msk.f32.mxu0 %vm14383_vm1, %v14380_v7 }
0x26b3   :  { %10326 = vrot.lane.b32.xlu1 %v10216_v42, %s14381_s14 }
0x26b5   :  { %10324 = vrot.lane.b32.xlu0 %v10211_v3, %s14381_s14  ;;  %s14421_s14 = smov 37  }
0x26b7   :  { %10330 = vrot.lane.b32.xlu1 %v10216_v42, %s14384_s16 }
0x26b9   :  { %10328 = vrot.lane.b32.xlu0 %v10211_v3, %s14384_s16 }
0x2714   :  { %v15919_v16 = vpop.permute.xlu1 %10336 }
0x2715   :  { %13948 = vmatpush3.xpose.msk.msra.mxu1 %vm374_vm3, %v15919_v16 }
0x2716   :  { %v15923_v34 = vpop.permute.xlu0 %10334  ;;  %13957 = vmatprep.subr.mxu1 %v14380_v7 }
0x2717   :  { %13943 = vmatpush3.xpose.msk.msra.mxu0 %vm374_vm3, %v15923_v34 }
0x2718   :  { %v15928_v26 = vpop.permute.xlu1 %10340  ;;  %13952 = vmatprep.subr.mxu0 %v14380_v7 }
0x271a   :  { %v15931_v60 = vpop.permute.xlu0 %10338 }
0x271c   :  { %v15933_v30 = vpop.permute.xlu1 %10344 }
0x271e   :  { %v15935_v28 = vpop.permute.xlu0 %10342 }
0x2721   :  { %v10323_v39 = vpop.permute.xlu1 %10322 }
0x2722   :  { %13950 = vmatmul.mubr.msk.f32.vlgmr.msra.gmra.mxu1 %vm374_vm3, %v10323_v39 }
0x2723   :  { %13958 = vmatpush3.xpose.msk.msra.mxu1 %vm374_vm3, %v15928_v26  ;;  %v10321_v37 = vpop.permute.xlu0 %10320  ;;  %13959 = vmatprep.mubr.msk.f32.mxu1 %vm14383_vm1, %v14380_v7 }
0x2724   :  { %13945 = vmatmul.mubr.msk.f32.vlgmr.msra.gmra.mxu0 %vm374_vm3, %v10321_v37  ;;  %13967 = vmatprep.subr.mxu1 %v14380_v7 }
0x2725   :  { %13953 = vmatpush3.xpose.msk.msra.mxu0 %vm374_vm3, %v15931_v60  ;;  %v10327_v31 = vpop.permute.xlu1 %10326  ;;  %13954 = vmatprep.mubr.msk.f32.mxu0 %vm14383_vm1, %v14380_v7 }
0x2726   :  { %13960 = vmatmul.mubr.msk.f32.vlgmr.msra.gmra.mxu1 %vm374_vm3, %v10327_v31  ;;  %13962 = vmatprep.subr.mxu0 %v14380_v7 }
0x2727   :  { %13968 = vmatpush3.xpose.msk.msra.mxu1 %vm374_vm3, %v15933_v30  ;;  %v10325_v32 = vpop.permute.xlu0 %10324  ;;  %13969 = vmatprep.mubr.msk.f32.mxu1 %vm14383_vm1, %v14380_v7 }
0x2728   :  { %13955 = vmatmul.mubr.msk.f32.vlgmr.msra.gmra.mxu0 %vm374_vm3, %v10325_v32  ;;  %13977 = vmatprep.subr.mxu1 %v14380_v7 }
0x2729   :  { %13963 = vmatpush3.xpose.msk.msra.mxu0 %vm374_vm3, %v15935_v28  ;;  %v10331_v33 = vpop.permute.xlu1 %10330  ;;  %13964 = vmatprep.mubr.msk.f32.mxu0 %vm14383_vm1, %v14380_v7 }
0x272a   :  { %13970 = vmatmul.mubr.msk.f32.vlgmr.msra.gmra.mxu1 %vm374_vm3, %v10331_v33  ;;  %13972 = vmatprep.subr.mxu0 %v14380_v7 }
0x272b   :  { %v10329_v36 = vpop.permute.xlu0 %10328  ;;  %13979 = vmatprep.mubr.msk.f32.mxu1 %vm14383_vm1, %v14380_v7 }
0x272c   :  { %13965 = vmatmul.mubr.msk.f32.vlgmr.msra.gmra.mxu0 %vm374_vm3, %v10329_v36 }
0x272d   :  { %13974 = vmatprep.mubr.msk.f32.mxu0 %vm14383_vm1, %v14380_v7 }
0x276f   :  { %v10490_v20 = vpop.f32.mrf.mxu1 }
0x2770   :  { %v10941_v40 = vsel %vm374_vm3, %v10490_v20, -inf }
0x2771   :  { %10942 = vmax.xlane.f32.xlu1 %v10941_v40  ;;  %v10416_v12 = vpop.f32.mrf.mxu0  ;;  %v13941_v13 = vpop.f32.mrf.mxu1 }
0x2772   :  { %v10938_v15 = vsel %vm374_vm3, %v10416_v12, -inf }
0x2773   :  { %10939 = vmax.xlane.f32.xlu0 %v10938_v15  ;;  %v13936_v45 = vpop.f32.mrf.mxu0 }
0x27e2   :  { %v10638_v4 = vpop.f32.mrf.mxu1 }
0x27e3   :  { %v10947_v18 = vsel %vm374_vm3, %v10638_v4, -inf }
0x27e4   :  { %v10564_v9 = vpop.f32.mrf.mxu0  ;;  %v13951_v46 = vpop.f32.mrf.mxu1 }
0x27e5   :  { %v10944_v63 = vsel %vm374_vm3, %v10564_v9, -inf }
0x27e6   :  { %v10786_v1 = vpop.f32.mrf.mxu1  ;;  %10945 = vmax.xlane.f32.xlu0 %v10944_v63  ;;  %v13946_v56 = vpop.f32.mrf.mxu0 }
0x27e7   :  { %v10953_v2 = vsel %vm374_vm3, %v10786_v1, -inf }
0x27e8   :  { %v10712_v54 = vpop.f32.mrf.mxu0  ;;  %v13961_v17 = vpop.f32.mrf.mxu1 }
0x27e9   :  { %v10950_v19 = vsel %vm374_vm3, %v10712_v54, -inf }
0x27ea   :  { %v10934_v47 = vpop.f32.mrf.mxu1  ;;  %10948 = vmax.xlane.f32.xlu0 %v10947_v18  ;;  %10951 = vmax.xlane.f32.xlu1 %v10950_v19  ;;  %v13956_v48 = vpop.f32.mrf.mxu0 }
0x27eb   :  { %v10959_v57 = vsel %vm374_vm3, %v10934_v47, -inf }
0x27ec   :  { %v10860_v49 = vpop.f32.mrf.mxu0  ;;  %v13971_v50 = vpop.f32.mrf.mxu1 }
0x27ed   :  { %v10956_v51 = vsel %vm374_vm3, %v10860_v49, -inf }
0x27ee   :  { %10954 = vmax.xlane.f32.xlu0 %v10953_v2  ;;  %10957 = vmax.xlane.f32.xlu1 %v10956_v51  ;;  %v13966_v52 = vpop.f32.mrf.mxu0 }
0x27f2   :  { %10960 = vmax.xlane.f32.xlu0 %v10959_v57 }
0x27fa   :  { %v10943_v61 = vpop.xlane.xlu1 %10942 }
0x27fb   :  { %v10963_v8 = vsub.f32 %v10490_v20, %v10943_v61 }
0x27fc   :  { %v10940_v58 = vpop.xlane.xlu0 %10939 }
0x27fd   :  { %v10972_v35 = vmul.f32 1.442695, %v10963_v8  ;;  %v10962_v0 = vsub.f32 %v10416_v12, %v10940_v58 }
0x27ff   :  { %11026 = vrot.lane.b32.xlu1 %v15887_v41, %s14385_s17  ;;  %14334 = vpow2.f32 %v10972_v35  ;;  %v10970_v11 = vmul.f32 1.442695, %v10962_v0 }
0x2801   :  { %14336 = vpow2.f32 %v10970_v11 }
0x2803   :  { %11178 = vrot.lane.b32.xlu1 %v15923_v34, %s14385_s17 }
0x2807   :  { %11254 = vrot.lane.b32.xlu1 %v15919_v16, %s14385_s17 }
0x2808   :  { %11102 = vrot.lane.b32.xlu0 %v15885_v62, %s14385_s17 }
0x280b   :  { %11406 = vrot.lane.b32.xlu1 %v15928_v26, %s14385_s17 }
0x280c   :  { %11330 = vrot.lane.b32.xlu0 %v15931_v60, %s14385_s17  ;;  %v15987_v27 = vpop.eup %14334 }
0x280d   :  { %v10989_v6 = vsel %vm374_vm3, %v15987_v27, 0.0 }
0x280e   :  { %v15991_v53 = vpop.eup %14336 }
0x280f   :  { %v10986_v14 = vsel %vm374_vm3, %v15991_v53, 0.0 }
0x282b   :  { %10990 = vadd.xlane.f32.xlu0 %v10989_v6 }
0x282f   :  { %10987 = vadd.xlane.f32.xlu1 %v10986_v14 }
0x286f   :  { %v10946_v21 = vpop.xlane.xlu0 %10945 }
0x2870   :  { %v10964_v44 = vsub.f32 %v10564_v9, %v10946_v21 }
0x2872   :  { %v10974_v5 = vmul.f32 1.442695, %v10964_v44 }
0x2873   :  { %v10949_v59 = vpop.xlane.xlu0 %10948  ;;  %v10952_v43 = vpop.xlane.xlu1 %10951 }
0x2874   :  { %14338 = vpow2.f32 %v10974_v5  ;;  %v10965_v22 = vsub.f32 %v10638_v4, %v10949_v59  ;;  %v10966_v10 = vsub.f32 %v10712_v54, %v10952_v43  ;;  %v12716_v5 = vld [vmem:[%s15516_s4 + $0x28] sm:$0xff]  ;;  %v12717_v59 = vld [vmem:[%s15516_s4 + $0x30] sm:$0xff]  ;;  %v12718_v43 = vld [vmem:[%s15516_s4 + $0x38] sm:$0xff] }
0x2876   :  { %v10976_v24 = vmul.f32 1.442695, %v10965_v22  ;;  %v10978_v62 = vmul.f32 1.442695, %v10966_v10 }
0x2877   :  { %v10955_v29 = vpop.xlane.xlu0 %10954  ;;  %v10958_v41 = vpop.xlane.xlu1 %10957 }
0x2878   :  { %14340 = vpow2.f32 %v10976_v24  ;;  %v10967_v55 = vsub.f32 %v10786_v1, %v10955_v29  ;;  %v10968_v42 = vsub.f32 %v10860_v49, %v10958_v41 }
0x2879   :  { %14342 = vpow2.f32 %v10978_v62 }
0x287a   :  { %v10980_v25 = vmul.f32 1.442695, %v10967_v55  ;;  %v10982_v3 = vmul.f32 1.442695, %v10968_v42 }
0x287b   :  { %v10961_v16 = vpop.xlane.xlu0 %10960  ;;  %v11027_v34 = vpop.permute.xlu1 %11026 }
0x287c   :  { %14344 = vpow2.f32 %v10980_v25  ;;  %v10969_v26 = vsub.f32 %v10934_v47, %v10961_v16  ;;  %13973 = vmatpush3.msra.mxu0 %v11027_v34 }
0x287d   :  { %14346 = vpow2.f32 %v10982_v3  ;;  %13982 = vmatprep.subr.mxu0 %v14380_v7 }
0x287e   :  { %v10984_v60 = vmul.f32 1.442695, %v10969_v26 }
0x287f   :  { %v11103_v39 = vpop.permute.xlu0 %11102  ;;  %v11179_v9 = vpop.permute.xlu1 %11178 }
0x2880   :  { %14348 = vpow2.f32 %v10984_v60  ;;  %13978 = vmatpush3.msra.mxu1 %v11103_v39 }
0x2881   :  { %v14339_v37 = vpop.eup %14338  ;;  %13987 = vmatprep.subr.mxu1 %v14380_v7 }
0x2882   :  { %v10992_v31 = vsel %vm374_vm3, %v14339_v37, 0.0 }
0x2883   :  { %10993 = vadd.xlane.f32.xlu1 %v10992_v31  ;;  %v11255_v46 = vpop.permute.xlu1 %11254  ;;  %v11331_v63 = vpop.permute.xlu0 %11330 }
0x2885   :  { %v14341_v32 = vpop.eup %14340 }
0x2886   :  { %v14343_v33 = vpop.eup %14342  ;;  %v10995_v36 = vsel %vm374_vm3, %v14341_v32, 0.0 }
0x2887   :  { %10996 = vadd.xlane.f32.xlu0 %v10995_v36  ;;  %v10998_v20 = vsel %vm374_vm3, %v14343_v33, 0.0  ;;  %v11407_v1 = vpop.permute.xlu1 %11406 }
0x2888   :  { %10999 = vadd.xlane.f32.xlu1 %v10998_v20 }
0x2889   :  { %v14345_v40 = vpop.eup %14344 }
0x288a   :  { %v14347_v12 = vpop.eup %14346  ;;  %v11001_v13 = vsel %vm374_vm3, %v14345_v40, 0.0 }
0x288b   :  { %11002 = vadd.xlane.f32.xlu0 %v11001_v13  ;;  %v11004_v15 = vsel %vm374_vm3, %v14347_v12, 0.0 }
0x288c   :  { %11005 = vadd.xlane.f32.xlu1 %v11004_v15 }
0x288d   :  { %v16002_v45 = vpop.eup %14348 }
0x288e   :  { %v11007_v4 = vsel %vm374_vm3, %v16002_v45, 0.0 }
0x288f   :  { %11008 = vadd.xlane.f32.xlu0 %v11007_v4 }
0x289d   :  { %11558 = vrot.lane.b32.xlu1 %v15933_v30, %s14385_s17 }
0x28a5   :  { %11482 = vrot.lane.b32.xlu0 %v15935_v28, %s14385_s17  ;;  %s12442_s17 = sld [smem:[%s16119_s0 + %s14421_s14]]  }
0x28b4   :  { %v10991_v56 = vpop.xlane.xlu0 %10990 }
0x28b5   :  { %14350 = vrcp.f32 %v10991_v56 }
0x28b8   :  { %v10988_v54 = vpop.xlane.xlu1 %10987 }
0x28b9   :  { %14352 = vrcp.f32 %v10988_v54 }
0x28c2   :  { %v14351_v17 = vpop.eup %14350 }
0x28c3   :  { %v11019_v18 = vmul.f32 %v14351_v17, %v15987_v27 }
0x28c5   :  { %13980 = vmatmul.mubr.msk.f32.vlgmr.msra.gmra.mxu1 %vm374_vm3, %v11019_v18 }
0x28c6   :  { %v14353_v19 = vpop.eup %14352  ;;  %13988 = vmatpush3.msra.mxu1 %v11255_v46  ;;  %13989 = vmatprep.mubr.msk.f32.mxu1 %vm14383_vm1, %v14380_v7 }
0x28c7   :  { %v11018_v30 = vmul.f32 %v14353_v19, %v15991_v53  ;;  %13997 = vmatprep.subr.mxu1 %v14380_v7  ;;  %v12715_v53 = vld [vmem:[%s15516_s4 + $0x20] sm:$0xff]  ;;  %s14424_s4 = smov 38  }
0x28c9   :  { %13975 = vmatmul.mubr.msk.f32.vlgmr.msra.gmra.mxu0 %vm374_vm3, %v11018_v30 }
0x28ca   :  { %13983 = vmatpush3.msra.mxu0 %v11179_v9  ;;  %13984 = vmatprep.mubr.msk.f32.mxu0 %vm14383_vm1, %v14380_v7 }
0x28cb   :  { %13992 = vmatprep.subr.mxu0 %v14380_v7 }
0x290c   :  { %v10994_v28 = vpop.xlane.xlu1 %10993 }
0x290d   :  { %14354 = vrcp.f32 %v10994_v28 }
0x2910   :  { %v10997_v47 = vpop.xlane.xlu0 %10996 }
0x2911   :  { %14356 = vrcp.f32 %v10997_v47  ;;  %v11000_v48 = vpop.xlane.xlu1 %10999 }
0x2912   :  { %14358 = vrcp.f32 %v11000_v48 }
0x2914   :  { %v11003_v49 = vpop.xlane.xlu0 %11002 }
0x2915   :  { %14360 = vrcp.f32 %v11003_v49  ;;  %v11006_v50 = vpop.xlane.xlu1 %11005 }
0x2916   :  { %14362 = vrcp.f32 %v11006_v50 }
0x2918   :  { %v11009_v2 = vpop.xlane.xlu0 %11008 }
0x2919   :  { %14364 = vrcp.f32 %v11009_v2  ;;  %v11559_v14 = vpop.permute.xlu1 %11558 }
0x291a   :  { %v14355_v51 = vpop.eup %14354 }
0x291b   :  { %v11020_v52 = vmul.f32 %v14355_v51, %v14339_v37 }
0x291c   :  { %v11483_v0 = vpop.permute.xlu0 %11482 }
0x291d   :  { %13985 = vmatmul.mubr.msk.f32.vlgmr.msra.gmra.mxu0 %vm374_vm3, %v11020_v52  ;;  %v12760_v52 = vld [vmem:[%s15572_s1 + $0x38] sm:$0xff] }
0x291e   :  { %v14357_v57 = vpop.eup %14356  ;;  %13993 = vmatpush3.msra.mxu0 %v11331_v63  ;;  %13994 = vmatprep.mubr.msk.f32.mxu0 %vm14383_vm1, %v14380_v7 }
0x291f   :  { %v14359_v61 = vpop.eup %14358  ;;  %14002 = vmatprep.subr.mxu0 %v14380_v7  ;;  %v11021_v8 = vmul.f32 %v14357_v57, %v14341_v32  ;;  %v12759_v57 = vld [vmem:[%s15572_s1 + $0x30] sm:$0xff] }
0x2920   :  { %v11022_v58 = vmul.f32 %v14359_v61, %v14343_v33  ;;  %v12758_v61 = vld [vmem:[%s15572_s1 + $0x28] sm:$0xff] }
0x2921   :  { %13990 = vmatmul.mubr.msk.f32.vlgmr.msra.gmra.mxu1 %vm374_vm3, %v11021_v8  ;;  %v12757_v8 = vld [vmem:[%s15572_s1 + $0x20] sm:$0xff] }
0x2922   :  { %v14361_v35 = vpop.eup %14360  ;;  %13995 = vmatmul.mubr.msk.f32.vlgmr.msra.gmra.mxu0 %vm374_vm3, %v11022_v58  ;;  %13998 = vmatpush3.msra.mxu1 %v11407_v1  ;;  %v12780_v58 = vld [vmem:[%s15581_s6 + $0xf8] sm:$0xff] }
0x2923   :  { %v14363_v11 = vpop.eup %14362  ;;  %14003 = vmatpush3.msra.mxu0 %v11483_v0  ;;  %13999 = vmatprep.mubr.msk.f32.mxu1 %vm14383_vm1, %v14380_v7  ;;  %v11023_v27 = vmul.f32 %v14361_v35, %v14345_v40  ;;  %v12779_v35 = vld [vmem:[%s15581_s6 + $0xf0] sm:$0xff]  ;;  %v12778_v0 = vld [vmem:[%s15581_s6 + $0xe8] sm:$0xff] }
0x2924   :  { %v11024_v6 = vmul.f32 %v14363_v11, %v14347_v12  ;;  %14004 = vmatprep.mubr.msk.f32.mxu0 %vm14383_vm1, %v14380_v7  ;;  %14007 = vmatprep.subr.mxu1 %v14380_v7  ;;  %v12777_v11 = vld [vmem:[%s15581_s6 + $0xe0] sm:$0xff] }
0x2925   :  { %14000 = vmatmul.mubr.msk.f32.vlgmr.msra.gmra.mxu1 %vm374_vm3, %v11023_v27  ;;  %14012 = vmatprep.subr.mxu0 %v12716_v5  ;;  %v12776_v27 = vld [vmem:[%s15581_s6 + $0xd8] sm:$0xff] }
0x2926   :  { %v14365_v21 = vpop.eup %14364  ;;  %14005 = vmatmul.mubr.msk.f32.vlgmr.msra.gmra.mxu0 %vm374_vm3, %v11024_v6  ;;  %14008 = vmatpush3.msra.mxu1 %v11559_v14  ;;  %v12775_v6 = vld [vmem:[%s15581_s6 + $0xd0] sm:$0xff]  ;;  %v12773_v14 = vld [vmem:[%s15581_s6 + $0xc0] sm:$0xff] }
0x2927   :  { %v11025_v44 = vmul.f32 %v14365_v21, %v16002_v45  ;;  %14009 = vmatprep.mubr.msk.f32.mxu1 %vm14383_vm1, %v14380_v7  ;;  %14017 = vmatprep.subr.mxu1 %v12715_v53  ;;  %v12752_v45 = vld [vmem:[%s15552_s23 + $0x1] ss:$0 sm:$0xff]  ;;  %v12772_v21 = vld [vmem:[%s15581_s6 + $0xb8] sm:$0xff] }
0x2928   :  { %14013 = vmatpush3.msra.mxu0 %v12716_v5  ;;  %v12770_v5 = vld [vmem:[%s15581_s6 + $0xa8] sm:$0xff] }
0x2929   :  { %14010 = vmatmul.mubr.msk.f32.vlgmr.msra.gmra.mxu1 %vm374_vm3, %v11025_v44  ;;  %14022 = vmatprep.subr.mxu0 %v12717_v59  ;;  %v12771_v44 = vld [vmem:[%s15581_s6 + $0xb0] sm:$0xff] }
0x292a   :  { %14018 = vmatpush3.msra.mxu1 %v12715_v53  ;;  %v12774_v53 = vld [vmem:[%s15581_s6 + $0xc8] sm:$0xff] }
0x292b   :  { %14027 = vmatprep.subr.mxu1 %v12718_v43 }
0x2985   :  { %v11174_v22 = vpop.f32.mrf.mxu1 }
0x2987   :  { %v13981_v10 = vpop.f32.mrf.mxu1 }
0x2989   :  { %v11098_v24 = vpop.f32.mrf.mxu0 }
0x298a   :  { %14019 = vmatprep.mubr.msk.f32.mxu1 %vm374_vm3, %v11098_v24 }
0x298b   :  { %v13976_v62 = vpop.f32.mrf.mxu0  ;;  %14020 = vmatmul.mubr.msk.f32.vlgmr.msra.gmra.mxu1 %vm374_vm3, %v11174_v22 }
0x298c   :  { %14028 = vmatpush3.msra.mxu1 %v12718_v43 }
0x298d   :  { %14043 = vmatprep.subr.mxu1 %v12780_v58 }
0x29dd   :  { %v11250_v7 = vpop.f32.mrf.mxu0 }
0x29de   :  { %14014 = vmatprep.mubr.msk.f32.mxu0 %vm374_vm3, %v11250_v7 }
0x29df   :  { %v13986_v29 = vpop.f32.mrf.mxu0 }
0x29e1   :  { %v11326_v41 = vpop.f32.mrf.mxu1 }
0x29e2   :  { %v11402_v55 = vpop.f32.mrf.mxu0  ;;  %14015 = vmatmul.mubr.msk.f32.vlgmr.msra.gmra.mxu0 %vm374_vm3, %v11326_v41  ;;  %v12755_v41 = vld [vmem:[%s15598_s26 + $0x1] ss:$0 sm:$0xff]  ;;  %s14425_s26 = smov 39  }
0x29e3   :  { %v13991_v42 = vpop.f32.mrf.mxu1  ;;  %14024 = vmatprep.mubr.msk.f32.mxu0 %vm374_vm3, %v11402_v55  ;;  %14023 = vmatpush3.msra.mxu0 %v12717_v59  ;;  %v12769_v59 = vld [vmem:[%s15581_s6 + $0xa0] sm:$0xff]  ;;  %s12444_s11 = sld [smem:[%s16119_s0 + %s14425_s26]]  }
0x29e4   :  { %v13996_v25 = vpop.f32.mrf.mxu0  ;;  %14032 = vmatprep.subr.mxu0 %v12760_v52  ;;  %v12756_v42 = vld [vmem:[%s15603_s27 + $0x1] ss:$0 sm:$0xff] }
0x29e5   :  { %v11478_v3 = vpop.f32.mrf.mxu1 }
0x29e6   :  { %v11554_v16 = vpop.f32.mrf.mxu0  ;;  %14025 = vmatmul.mubr.msk.f32.vlgmr.msra.gmra.mxu0 %vm374_vm3, %v11478_v3 }
0x29e7   :  { %14029 = vmatprep.mubr.msk.f32.mxu1 %vm374_vm3, %v11554_v16  ;;  %v14001_v34 = vpop.f32.mrf.mxu1  ;;  %14033 = vmatpush3.msra.mxu0 %v12760_v52 }
0x29e8   :  { %v14006_v26 = vpop.f32.mrf.mxu0  ;;  %14034 = vmatprep.subr.mxu0 %v12759_v57 }
0x29e9   :  { %v11630_v60 = vpop.f32.mrf.mxu1  ;;  %14035 = vmatpush3.msra.mxu0 %v12759_v57 }
0x29ea   :  { %14030 = vmatmul.mubr.msk.f32.vlgmr.msra.gmra.mxu1 %vm374_vm3, %v11630_v60  ;;  %14036 = vmatprep.subr.mxu0 %v12758_v61 }
0x29eb   :  { %v14011_v39 = vpop.f32.mrf.mxu1  ;;  %14037 = vmatpush3.msra.mxu0 %v12758_v61  ;;  %14044 = vmatpush3.msra.mxu1 %v12780_v58 }
0x29ec   :  { %14038 = vmatprep.subr.mxu0 %v12757_v8  ;;  %14045 = vmatprep.subr.mxu1 %v12779_v35  ;;  %v12768_v39 = vld [vmem:[%s15581_s6 + $0x98] sm:$0xff] }
0x29ed   :  { %14039 = vmatpush3.msra.mxu0 %v12757_v8  ;;  %14046 = vmatpush3.msra.mxu1 %v12779_v35  ;;  %v12785_v35 = vld [vmem:[%s15642_s9 + $0x1] ss:$0 sm:$0xff] }
0x29ee   :  { %14047 = vmatprep.subr.mxu1 %v12778_v0 }
0x29ef   :  { %14048 = vmatpush3.msra.mxu1 %v12778_v0 }
0x29f0   :  { %14049 = vmatprep.subr.mxu1 %v12777_v11 }
0x29f1   :  { %14050 = vmatpush3.msra.mxu1 %v12777_v11 }
0x29f2   :  { %14051 = vmatprep.subr.mxu1 %v12776_v27 }
0x29f3   :  { %14052 = vmatpush3.msra.mxu1 %v12776_v27  ;;  %v12786_v27 = vld [vmem:[%s15647_s10 + $0x1] ss:$0 sm:$0xff] }
0x29f4   :  { %14053 = vmatprep.subr.mxu1 %v12775_v6 }
0x29f5   :  { %14054 = vmatpush3.msra.mxu1 %v12775_v6 }
0x29f6   :  { %14055 = vmatprep.subr.mxu1 %v12774_v53 }
0x29f7   :  { %14056 = vmatpush3.msra.mxu1 %v12774_v53 }
0x29f8   :  { %14057 = vmatprep.subr.mxu1 %v12773_v14 }
0x29f9   :  { %14058 = vmatpush3.msra.mxu1 %v12773_v14 }
0x29fa   :  { %14059 = vmatprep.subr.mxu1 %v12772_v21 }
0x29fb   :  { %14060 = vmatpush3.msra.mxu1 %v12772_v21 }
0x29fc   :  { %14061 = vmatprep.subr.mxu1 %v12771_v44 }
0x29fd   :  { %14062 = vmatpush3.msra.mxu1 %v12771_v44 }
0x29fe   :  { %14063 = vmatprep.subr.mxu1 %v12770_v5 }
0x29ff   :  { %14064 = vmatpush3.msra.mxu1 %v12770_v5 }
0x2a00   :  { %14065 = vmatprep.subr.mxu1 %v12769_v59 }
0x2a01   :  { %14066 = vmatpush3.msra.mxu1 %v12769_v59 }
0x2a02   :  { %14067 = vmatprep.subr.mxu1 %v12768_v39 }
0x2a03   :  { %14068 = vmatpush3.msra.mxu1 %v12768_v39 }
0x2a4b   :  { %v14021_v31 = vpop.f32.mrf.mxu1 }
0x2a4d   :  { %v11787_v20 = vpop.f32.mrf.mxu1 }
0x2aa2   :  { %v14016_v37 = vpop.f32.mrf.mxu0 }
0x2aa3   :  { %v11793_v36 = vadd.f32 %v14021_v31, %v14016_v37  ;;  %v12767_v37 = vld [vmem:[%s15581_s6 + $0x90] sm:$0xff]  ;;  %v12766_v31 = vld [vmem:[%s15581_s6 + $0x88] sm:$0xff] }
0x2aa4   :  { %v11706_v32 = vpop.f32.mrf.mxu0  ;;  %14069 = vmatprep.subr.mxu1 %v12767_v37 }
0x2aa5   :  { %v11788_v12 = vadd.f32 %v11787_v20, %v11706_v32  ;;  %14070 = vmatpush3.msra.mxu1 %v12767_v37  ;;  %v12765_v32 = vld [vmem:[%s15581_s6 + $0x80] sm:$0xff]  ;;  %s12443_s6 = sld [smem:[%s16119_s0 + %s14424_s4]]  }
0x2aa6   :  { %v14026_v33 = vpop.f32.mrf.mxu0  ;;  %14071 = vmatprep.subr.mxu1 %v12766_v31 }
0x2aa7   :  { %v11878_v13 = vadd.f32 %v14026_v33, %v11793_v36  ;;  %14072 = vmatpush3.msra.mxu1 %v12766_v31  ;;  %v12762_v33 = vld [vmem:[%s15619_s7 + $0x1] ss:$0 sm:$0xff] }
0x2aa8   :  { %v11868_v40 = vpop.f32.mrf.mxu0  ;;  %14073 = vmatprep.subr.mxu1 %v12765_v32 }
0x2aa9   :  { %v11877_v4 = vadd.f32 %v11868_v40, %v11788_v12  ;;  %14074 = vmatpush3.msra.mxu1 %v12765_v32 }
0x2aaa   :  { %v14031_v15 = vpop.f32.mrf.mxu1 }
0x2aab   :  { %v11961_v9 = vadd.f32 %v14031_v15, %v11878_v13 }
0x2aac   :  { %v11951_v46 = vpop.f32.mrf.mxu1 }
0x2aad   :  { %v11971_v63 = vadd.f32 %v12752_v45, %v11961_v9  ;;  %v11960_v1 = vadd.f32 %v11951_v46, %v11877_v4 }
0x2aaf   :  { %v11970_v56 = vadd.f32 %v12752_v45, %v11960_v1  ;;  %v11973_v54 = vadd.f32 %v11971_v63, %v15877_v23  ;;  %v12782_v45 = vld [vmem:[%s15627_s13 + $0x1] ss:$0 sm:$0xff] }
0x2ab1   :  { %v11981_v17 = vsel %vm272_vm0, %v11973_v54, 0.0  ;;  %v11972_v18 = vadd.f32 %v11970_v56, %v15875_v38 }
0x2ab2   :  { %11982 = vadd.xlane.f32.xlu1 %v11981_v17 }
0x2ab3   :  { %v11978_v19 = vsel %vm272_vm0, %v11972_v18, 0.0 }
0x2ab4   :  { %11979 = vadd.xlane.f32.xlu0 %v11978_v19 }
0x2b3b   :  { %v11983_v30 = vpop.xlane.xlu1 %11982 }
0x2b3c   :  { %v11985_v28 = vmul.f32 0.03125, %v11983_v30 }
0x2b3d   :  { %v11980_v47 = vpop.xlane.xlu0 %11979 }
0x2b3e   :  { %v11984_v48 = vmul.f32 0.03125, %v11980_v47  ;;  %v16054_v49 = vsub.f32 %v11973_v54, %v11985_v28 }
0x2b40   :  { %v16056_v50 = vsub.f32 %v11972_v18, %v11984_v48  ;;  %v11989_v2 = vmul.f32 %v16054_v49, %v16054_v49 }
0x2b42   :  { %v11988_v23 = vmul.f32 %v16056_v50, %v16056_v50  ;;  %v11993_v51 = vsel %vm272_vm0, %v11989_v2, 0.0 }
0x2b44   :  { %v11990_v38 = vsel %vm272_vm0, %v11988_v23, 0.0 }
0x2b45   :  { %11991 = vadd.xlane.f32.xlu0 %v11990_v38 }
0x2b49   :  { %11994 = vadd.xlane.f32.xlu0 %v11993_v51 }
0x2bce   :  { %v11992_v43 = vpop.xlane.xlu0 %11991 }
0x2bcf   :  { %v11996_v22 = vmul.f32 0.03125, %v11992_v43 }
0x2bd1   :  { %v11998_v10 = vadd.f32 1e-05, %v11996_v22 }
0x2bd2   :  { %v11995_v24 = vpop.xlane.xlu0 %11994 }
0x2bd3   :  { %14366 = vrsqrt.f32 %v11998_v10  ;;  %v11997_v62 = vmul.f32 0.03125, %v11995_v24 }
0x2bd5   :  { %v11999_v7 = vadd.f32 1e-05, %v11997_v62 }
0x2bd7   :  { %14368 = vrsqrt.f32 %v11999_v7 }
0x2be0   :  { %v14367_v29 = vpop.eup %14366 }
0x2be1   :  { %v12002_v55 = vmul.f32 %v14367_v29, %v16056_v50 }
0x2be3   :  { %v12010_v25 = vmul.f32 %v12755_v41, %v12002_v55 }
0x2be4   :  { %v14369_v3 = vpop.eup %14368 }
0x2be5   :  { %v12003_v16 = vmul.f32 %v14369_v3, %v16054_v49  ;;  %v12018_v34 = vadd.f32 %v12756_v42, %v12010_v25  ;;  %v12311_v25 = vld [vmem:[%s12442_s17 + $0x18] sm:$0xff]  ;;  %v12310_v3 = vld [vmem:[%s12442_s17 + $0x10] sm:$0xff] }
0x2be6   :  { %14078 = vmatprep.subr.mxu0 %v12311_v25 }
0x2be7   :  { %v12011_v26 = vmul.f32 %v12755_v41, %v12003_v16  ;;  %14040 = vmatprep.mubr.msk.f32.mxu0 %vm272_vm0, %v12018_v34  ;;  %v12309_v16 = vld [vmem:[%s12442_s17 + $0x8] sm:$0xff] }
0x2be9   :  { %v12019_v60 = vadd.f32 %v12756_v42, %v12011_v26 }
0x2beb   :  { %14041 = vmatmul.mubr.msk.f32.vlgmr.msra.gmra.mxu0 %vm272_vm0, %v12019_v60 }
0x2bec   :  { %14079 = vmatpush3.msra.mxu0 %v12311_v25 }
0x2bed   :  { %14080 = vmatprep.subr.mxu0 %v12310_v3 }
0x2bee   :  { %14081 = vmatpush3.msra.mxu0 %v12310_v3 }
0x2bef   :  { %14082 = vmatprep.subr.mxu0 %v12309_v16 }
0x2bf0   :  { %14083 = vmatpush3.msra.mxu0 %v12309_v16 }
0x2cab   :  { %v14042_v36 = vpop.f32.mrf.mxu0 }
0x2cac   :  { %v12111_v20 = vadd.f32 %v14042_v36, %v12762_v33  ;;  %v12787_v36 = vld [vmem:[%s12440_s8] ss:$0 sm:$0xff] }
0x2cad   :  { %v12105_v40 = vpop.f32.mrf.mxu0 }
0x2cae   :  { %v12106_v12 = vadd.f32 %v12762_v33, %v12105_v40  ;;  %v12115_v15 = vmax.f32 %v12111_v20, 0.0 }
0x2cb0   :  { %v12114_v13 = vmax.f32 %v12106_v12, 0.0 }
0x2cb2   :  { %14075 = vmatprep.mubr.f32.mxu1 %v12114_v13 }
0x2cb3   :  { %14076 = vmatmul.mubr.f32.vlgmr.msra.gmra.mxu1 %v12115_v15  ;;  %v12788_v15 = vld [vmem:[%s12441_s5] ss:$0 sm:$0xff] }
0x2d73   :  { %v14077_v4 = vpop.f32.mrf.mxu1 }
0x2d74   :  { %v12213_v9 = vadd.f32 %v14077_v4, %v12782_v45 }
0x2d75   :  { %v12207_v46 = vpop.f32.mrf.mxu1 }
0x2d76   :  { %v12217_v63 = vadd.f32 %v12213_v9, %v12019_v60  ;;  %v12208_v1 = vadd.f32 %v12782_v45, %v12207_v46  ;;  %v12789_v46 = vld [vmem:[%s12443_s6] ss:$0 sm:$0xff] }
0x2d78   :  { %v12216_v56 = vadd.f32 %v12208_v1, %v12018_v34  ;;  %v12225_v54 = vsel %vm272_vm0, %v12217_v63, 0.0  ;;  %v12308_v34 = vld [vmem:[%s12442_s17] sm:$0xff] }
0x2d79   :  { %12226 = vadd.xlane.f32.xlu0 %v12225_v54  ;;  %14084 = vmatprep.subr.mxu0 %v12308_v34 }
0x2d7a   :  { %v12222_v17 = vsel %vm272_vm0, %v12216_v56, 0.0  ;;  %14085 = vmatpush3.msra.mxu0 %v12308_v34 }
0x2d7b   :  { %12223 = vadd.xlane.f32.xlu1 %v12222_v17 }
0x2e02   :  { %v12227_v18 = vpop.xlane.xlu0 %12226 }
0x2e03   :  { %v12229_v19 = vmul.f32 0.03125, %v12227_v18 }
0x2e04   :  { %v12224_v30 = vpop.xlane.xlu1 %12223 }
0x2e05   :  { %v12231_v28 = vsub.f32 %v12217_v63, %v12229_v19  ;;  %v12228_v47 = vmul.f32 0.03125, %v12224_v30 }
0x2e07   :  { %v12230_v48 = vsub.f32 %v12216_v56, %v12228_v47  ;;  %v12233_v49 = vmul.f32 %v12231_v28, %v12231_v28 }
0x2e09   :  { %v12237_v50 = vsel %vm272_vm0, %v12233_v49, 0.0  ;;  %v12232_v23 = vmul.f32 %v12230_v48, %v12230_v48 }
0x2e0a   :  { %12238 = vadd.xlane.f32.xlu0 %v12237_v50 }
0x2e0b   :  { %v12234_v38 = vsel %vm272_vm0, %v12232_v23, 0.0 }
0x2e0c   :  { %12235 = vadd.xlane.f32.xlu1 %v12234_v38 }
0x2e93   :  { %v12239_v2 = vpop.xlane.xlu0 %12238 }
0x2e94   :  { %v12241_v51 = vmul.f32 0.03125, %v12239_v2 }
0x2e95   :  { %v12236_v52 = vpop.xlane.xlu1 %12235 }
0x2e96   :  { %v12243_v57 = vadd.f32 1e-05, %v12241_v51  ;;  %v12240_v61 = vmul.f32 0.03125, %v12236_v52 }
0x2e98   :  { %14370 = vrsqrt.f32 %v12243_v57  ;;  %v12242_v8 = vadd.f32 1e-05, %v12240_v61 }
0x2e9a   :  { %14372 = vrsqrt.f32 %v12242_v8 }
0x2ea5   :  { %v14371_v58 = vpop.eup %14370 }
0x2ea6   :  { %v12247_v0 = vmul.f32 %v14371_v58, %v12231_v28 }
0x2ea7   :  { %v14373_v11 = vpop.eup %14372 }
0x2ea8   :  { %v12255_v6 = vmul.f32 %v12785_v35, %v12247_v0  ;;  %v12246_v53 = vmul.f32 %v14373_v11, %v12230_v48 }
0x2eaa   :  { %v12263_v14 = vadd.f32 %v12786_v27, %v12255_v6  ;;  %v12254_v21 = vmul.f32 %v12785_v35, %v12246_v53 }
0x2eac   :  { %v12269_v44 = vsel %vm272_vm0, %v12263_v14, 0.0  ;;  %v12262_v5 = vadd.f32 %v12786_v27, %v12254_v21 }
0x2ead   :  { %12270 = vadd.xlane.f32.xlu0 %v12269_v44 }
0x2eae   :  { %v12266_v59 = vsel %vm272_vm0, %v12262_v5, 0.0 }
0x2eaf   :  { %12267 = vadd.xlane.f32.xlu1 %v12266_v59 }
0x2f36   :  { %v12271_v43 = vpop.xlane.xlu0 %12270 }
0x2f37   :  { %v12273_v22 = vmul.f32 0.03125, %v12271_v43 }
0x2f38   :  { %v12268_v10 = vpop.xlane.xlu1 %12267 }
0x2f39   :  { %v12275_v24 = vsub.f32 %v12263_v14, %v12273_v22  ;;  %v12272_v62 = vmul.f32 0.03125, %v12268_v10 }
0x2f3b   :  { %v12274_v7 = vsub.f32 %v12262_v5, %v12272_v62  ;;  %v12277_v29 = vmul.f32 %v12275_v24, %v12275_v24 }
0x2f3d   :  { %v12281_v41 = vsel %vm272_vm0, %v12277_v29, 0.0  ;;  %v12276_v55 = vmul.f32 %v12274_v7, %v12274_v7 }
0x2f3e   :  { %12282 = vadd.xlane.f32.xlu0 %v12281_v41 }
0x2f3f   :  { %v12278_v42 = vsel %vm272_vm0, %v12276_v55, 0.0 }
0x2f40   :  { %12279 = vadd.xlane.f32.xlu1 %v12278_v42 }
0x2fc7   :  { %v12283_v26 = vpop.xlane.xlu0 %12282 }
0x2fc8   :  { %v12285_v60 = vmul.f32 0.03125, %v12283_v26 }
0x2fc9   :  { %v12280_v39 = vpop.xlane.xlu1 %12279 }
0x2fca   :  { %v12287_v37 = vadd.f32 1e-05, %v12285_v60  ;;  %v12284_v31 = vmul.f32 0.03125, %v12280_v39 }
0x2fcc   :  { %14374 = vrsqrt.f32 %v12287_v37  ;;  %v12286_v32 = vadd.f32 1e-05, %v12284_v31 }
0x2fce   :  { %14376 = vrsqrt.f32 %v12286_v32 }
0x2fd9   :  { %v14375_v33 = vpop.eup %14374 }
0x2fda   :  { %v12291_v20 = vmul.f32 %v14375_v33, %v12275_v24 }
0x2fdb   :  { %v14377_v40 = vpop.eup %14376 }
0x2fdc   :  { %v12290_v12 = vmul.f32 %v14377_v40, %v12274_v7  ;;  %v12299_v13 = vmul.f32 %v12787_v36, %v12291_v20 }
0x2fde   :  { %v12298_v45 = vmul.f32 %v12787_v36, %v12290_v12  ;;  %v12307_v9 = vadd.f32 %v12788_v15, %v12299_v13 }
0x2fe0   :  { %v12306_v4 = vadd.f32 %v12788_v15, %v12298_v45 }
0x2fe2   :  { %14086 = vmatprep.mubr.msk.f32.mxu0 %vm272_vm0, %v12306_v4 }
0x2fe3   :  { %14087 = vmatmul.mubr.msk.f32.vlgmr.msra.gmra.mxu0 %vm272_vm0, %v12307_v9 }
0x30a3   :  { %v14088_v63 = vpop.f32.mrf.mxu0 }
0x30a4   :  { %v12397_v1 = vadd.f32 %v14088_v63, %v12789_v46 }
0x30a5   :  { %v12391_v56 = vpop.f32.mrf.mxu0 }
0x30a6   :  { %12401 = vst [vmem:[%s12444_s11 + $0x8] sm:$0xff] %v12397_v1  ;;  %v12392_v54 = vadd.f32 %v12789_v46, %v12391_v56 }
0x30a8   :  { %12400 = vst [vmem:[%s12444_s11] sm:$0xff] %v12392_v54 }

</bundles_post_ra>
